<compile_context>
chip_gen: v7x
topology: tpu7x:2x2x1
jax: 0.10.0
libtpu: 0.0.40
codegen_flags: <defaults>
</compile_context>

<pallas_src>
import jax
import jax.numpy as jnp
from jax import lax
from jax.experimental import pallas as pl
from jax.experimental.pallas import tpu as pltpu

# ---------------- configuration (small test sizes) ----------------
B = 2            # batch
H = W = 16       # spatial
N = H * W        # 256 tokens
D = 32           # in_dim
DS = 32          # slot_dim
CC = 8           # color_dim
K = 4            # num_slots
KM1 = K - 1
ITERS = 4
EPS = 1e-8
MOM = 0.5        # pos momentum
CAM = 5          # camera_dim (unused: camera_modulation=False)
LN_EPS = 1e-5    # torch LayerNorm default eps
SCALE = DS ** -0.5
D4 = 4 * D       # fused projection width  (=128, lane-dense)
DS4 = 4 * DS     # fused k/v lane width    (=128, lane-dense)
SMALL_ROWS = 8   # packed small-output rows (K slots + KM1 positions, padded)


# ---------------- helpers ----------------
def build_grid(h, w):
    # TODO(synk): build_grid is not shown in the reference file; we use the
    # common slot-attention convention: 2-channel grid in (-1, 1).
    x = jnp.linspace(-1.0 + 1.0 / w, 1.0 - 1.0 / w, w, dtype=jnp.float32)
    y = jnp.linspace(-1.0 + 1.0 / h, 1.0 - 1.0 / h, h, dtype=jnp.float32)
    yy, xx = jnp.meshgrid(y, x, indexing="ij")
    return jnp.stack([xx, yy], axis=-1)[None]          # (1, h, w, 2)


def _erf(x):
    # Abramowitz & Stegun 7.1.26 (|err| <= 1.5e-7): matches torch's exact GELU
    # to float32 precision while using only exp (avoids relying on an erf
    # lowering inside Mosaic).
    a1, a2, a3, a4, a5 = 0.254829592, -0.284496736, 1.421413741, -1.453152027, 1.061405429
    p = 0.3275911
    s = jnp.where(x >= 0.0, 1.0, -1.0)
    ax = jnp.abs(x)
    t = 1.0 / (1.0 + p * ax)
    poly = ((((a5 * t + a4) * t + a3) * t + a2) * t + a1) * t
    return s * (1.0 - poly * jnp.exp(-ax * ax))


def _gelu(x):
    # exact (erf-based) GELU, as in torch nn.GELU()
    return 0.5 * x * (1.0 + _erf(x * 0.7071067811865476))


# ---------------- the single fused Pallas kernel ----------------
def fused_kernel(feat_ref, fc_ref, lnf_ref, lnc_ref, wkv4_ref, wge4_ref, bgb4_ref,
                 wblk_ref, wgm_ref, grid2_ref, wqf_ref, wqb_ref, ln8_ref,
                 mlpw_ref, mlpb_ref, sfg0_ref, sbg0_ref, pos0_ref, apw_ref, apb_ref,
                 attn_ref, small_ref):
    f32 = jnp.float32

    # ---------- prologue: iteration-invariant N-sized tensors ----------
    x = feat_ref[0]                                            # (N, D)
    lnf = lnf_ref[...]
    mu = jnp.mean(x, axis=-1, keepdims=True)
    var = jnp.mean((x - mu) ** 2, axis=-1, keepdims=True)
    xn = (x - mu) * lax.rsqrt(var + LN_EPS) * lnf[0:1, :] + lnf[1:2, :]

    # [k_fg | v_fg | k_bg_in | v_bg_in]  (N, 128), one lane-dense MXU push
    proj = jnp.dot(xn, wkv4_ref[...], preferred_element_type=f32)
    # grid embedding replicated over the 4 lane blocks  (N, 128)
    ge4 = jnp.dot(grid2_ref[...], wge4_ref[...],
                  preferred_element_type=f32) + bgb4_ref[...]
    # [kE | vE | k_bg | v_bg]  (N, 128) via block-diag(MLP_fg,MLP_fg,MLP_bg,MLP_bg)
    kvkv = jnp.dot(proj + ge4, wblk_ref[...], preferred_element_type=f32)

    # normalized color features (used only at the last iteration)
    fc = fc_ref[0]                                             # (N, CC)
    lnc = lnc_ref[...]
    cmu = jnp.mean(fc, axis=-1, keepdims=True)
    cvar = jnp.mean((fc - cmu) ** 2, axis=-1, keepdims=True)
    fcn = (fc - cmu) * lax.rsqrt(cvar + LN_EPS) * lnc[0:1, :] + lnc[1:2, :]

    grid2 = grid2_ref[...]                                     # (N, 2)
    wgm = wgm_ref[...]                                         # (2, DS) = Wg_eff @ Wmlp_fg
    ln8 = ln8_ref[...]                                         # (8, DS) packed LN params
    mlpw = mlpw_ref[...]                                       # (4*DS, DS) packed MLP weights
    mlpb = mlpb_ref[...]                                       # (4, DS)   packed MLP biases
    wqf = wqf_ref[...]
    wqb = wqb_ref[...]

    z1 = jnp.zeros((1, DS), f32)
    zf = jnp.zeros((KM1, DS), f32)

    def ln_rows(v, g, b):
        m = jnp.mean(v, axis=-1, keepdims=True)
        s = jnp.mean((v - m) ** 2, axis=-1, keepdims=True)
        return (v - m) * lax.rsqrt(s + LN_EPS) * g + b

    # slot state carried in registers across the (statically unrolled) iterations
    slot_fg = sfg0_ref[...]                                    # (KM1, DS)
    slot_bg = sbg0_ref[...]                                    # (1, DS)
    pos = pos0_ref[...]                                        # (KM1, 2)

    # TODO(synk): remove_duplicate branch (data-dependent slot pruning) and
    # depth_scale_pred branch are disabled by default and not implemented here.
    for it in range(ITERS):
        last = (it == ITERS - 1)

        # q projections (AdaLN degenerates to LayerNorm: camera_modulation=False)
        q_fg = jnp.dot(ln_rows(slot_fg, ln8[0:1], ln8[1:2]), wqf,
                       preferred_element_type=f32)             # (KM1, DS)
        q_bg = jnp.dot(ln_rows(slot_bg, ln8[2:3], ln8[3:4]), wqb,
                       preferred_element_type=f32)             # (1, DS)

        # per-slot grid-embedding delta pushed through MLP_fg (linearity hoist):
        # k_i = kE + d_i, v_i = vE + d_i with d_i = -pos_i @ (Wg_eff @ Wmlp_fg)
        dmat = -jnp.dot(pos, wgm, preferred_element_type=f32)  # (KM1, DS)

        # attention logits: one (K, 128) @ (N, 128)^T matmul (bg + fg together)
        q_pad = jnp.concatenate([
            jnp.concatenate([z1, z1, q_bg, z1], axis=1),       # bg row -> k_bg lanes
            jnp.concatenate([q_fg, zf, zf, zf], axis=1),       # fg rows -> kE lanes
        ], axis=0)                                             # (K, 128)
        core = lax.dot_general(q_pad, kvkv, (((1,), (1,)), ((), ())),
                               preferred_element_type=f32)     # (K, N)
        corr = jnp.sum(q_fg * dmat, axis=-1, keepdims=True)    # (KM1, 1)  q_i . d_i
        corr = jnp.concatenate([jnp.zeros((1, 1), f32), corr], axis=0)
        logits = (core + corr) * SCALE                         # (K, N)

        # softmax over slots + eps (matches reference ordering)
        m = jnp.max(logits, axis=0, keepdims=True)
        e = jnp.exp(logits - m)
        attn = e / jnp.sum(e, axis=0, keepdims=True) + EPS     # (K, N)

        attn_fg = attn[1:, :]
        attn_bg = attn[0:1, :]
        wfg = attn_fg / jnp.sum(attn_fg, axis=-1, keepdims=True)   # (KM1, N)
        wbg = attn_bg / jnp.sum(attn_bg, axis=-1, keepdims=True)   # (1, N)
        a_all = jnp.concatenate([wbg, wfg], axis=0)                # (K, N)

        # position update (momentum)
        posupd = jnp.dot(wfg, grid2, preferred_element_type=f32)   # (KM1, 2)
        pos = posupd * (1.0 - MOM) + pos * MOM

        if not last:
            # ALL slot updates in one (K, N) @ (N, 128) matmul
            av = jnp.dot(a_all, kvkv, preferred_element_type=f32)  # (K, 128)
            upd_fg = av[1:, DS:2 * DS] + dmat                      # wfg @ vE + d_i
            upd_bg = av[0:1, 3 * DS:4 * DS]                        # wbg @ v_bg
            slot_fg = slot_fg + upd_fg
            slot_bg = slot_bg + upd_bg
            # slot MLPs (tiny (K, DS) work, kept in-kernel to avoid extra launches)
            h_bg = ln_rows(slot_bg, ln8[6:7], ln8[7:8])
            h_bg = jnp.dot(_gelu(jnp.dot(h_bg, mlpw[2 * DS:3 * DS],
                                         preferred_element_type=f32) + mlpb[2:3]),
                           mlpw[3 * DS:4 * DS], preferred_element_type=f32) + mlpb[3:4]
            slot_bg = slot_bg + h_bg
            h_fg = ln_rows(slot_fg, ln8[4:5], ln8[5:6])
            h_fg = jnp.dot(_gelu(jnp.dot(h_fg, mlpw[0:DS],
                                         preferred_element_type=f32) + mlpb[0:1]),
                           mlpw[DS:2 * DS], preferred_element_type=f32) + mlpb[1:2]
            slot_fg = slot_fg + h_fg
        else:
            # learnable position bias (zero-init weights in torch) + clamp
            pos_bias = jnp.tanh(jnp.dot(wfg, apw_ref[...],
                                        preferred_element_type=f32) + apb_ref[...])
            pos = jnp.clip(pos + pos_bias * 0.1, -1.0, 1.0)
            # color slots: row 0 = bg, rows 1.. = fg, in one matmul
            colors = jnp.dot(a_all, fcn, preferred_element_type=f32)   # (K, CC)

            # ----- outputs (attn lane-dense; tiny outputs packed into (8,128)) -----
            attn_ref[0] = attn
            small_ref[0] = jnp.zeros((SMALL_ROWS, 128), f32)
            small_ref[0, 0:K, 0:DS] = jnp.concatenate([slot_bg, slot_fg], axis=0)
            small_ref[0, 0:K, DS:DS + CC] = colors
            small_ref[0, K:K + KM1, 0:2] = pos


def _rep2(shape):
    # broadcast (batch-invariant) 2-D parameter block
    return pl.BlockSpec(shape, lambda b: (0, 0))


fused_call = pl.pallas_call(
    fused_kernel,
    out_shape=(
        jax.ShapeDtypeStruct((B, K, N), jnp.float32),          # attn (softmax + eps)
        jax.ShapeDtypeStruct((B, SMALL_ROWS, 128), jnp.float32),  # packed slots / fg_position
    ),
    grid_spec=pltpu.PrefetchScalarGridSpec(
        num_scalar_prefetch=0,
        grid=(B,),
        in_specs=[
            pl.BlockSpec((1, N, D), lambda b: (b, 0, 0)),      # feat
            pl.BlockSpec((1, N, CC), lambda b: (b, 0, 0)),     # feat_color
            _rep2((2, D)),          # norm_feat gamma/beta
            _rep2((2, CC)),         # norm_feat_color gamma/beta
            _rep2((D, D4)),         # [Wk_fg|Wv_fg|Wk_bg|Wv_bg]
            _rep2((2, D4)),         # Wg_eff tiled x4
            _rep2((1, D4)),         # grid_embed bias tiled x4
            _rep2((D4, DS4)),       # blkdiag(Wmlp_fg,Wmlp_fg,Wmlp_bg,Wmlp_bg)
            _rep2((2, DS)),         # Wg_eff @ Wmlp_fg
            _rep2((N, 2)),          # grid2
            _rep2((DS, DS)),        # W q_fg
            _rep2((DS, DS)),        # W q_bg
            _rep2((8, DS)),         # packed slot LayerNorm params
            _rep2((4 * DS, DS)),    # packed slot-MLP weights
            _rep2((4, DS)),         # packed slot-MLP biases
            _rep2((KM1, DS)),       # slots_init_fg
            _rep2((1, DS)),         # slots_init_bg
            _rep2((KM1, 2)),        # fg_position init
            _rep2((N, 2)),          # attn_to_pos_bias W
            _rep2((1, 2)),          # attn_to_pos_bias b
        ],
        out_specs=[
            pl.BlockSpec((1, K, N), lambda b: (b, 0, 0)),
            pl.BlockSpec((1, SMALL_ROWS, 128), lambda b: (b, 0, 0)),
        ],
    ),
    compiler_params=pltpu.CompilerParams(dimension_semantics=("parallel",)),
)


# ---------------- parameters (deterministic, synthetic) ----------------
def init_params(key):
    keys = jax.random.split(key, 20)
    s = 0.1
    p = {}
    p["fg_position"] = jax.random.uniform(keys[0], (1, KM1, 2)) * 1.5 - 0.75
    p["slots_init_fg"] = jax.random.normal(keys[1], (1, KM1, DS))
    p["slots_init_bg"] = jax.random.normal(keys[2], (1, 1, DS))
    # EncoderPosEmbedding weights (stored (in, out); y = x @ W + b)
    p["w_grid"] = jax.random.normal(keys[3], (4, D)) * s
    p["b_grid"] = jax.random.normal(keys[4], (D,)) * s
    p["w_k_fg"] = jax.random.normal(keys[5], (D, D)) * s
    p["w_v_fg"] = jax.random.normal(keys[6], (D, D)) * s
    p["w_k_bg"] = jax.random.normal(keys[7], (D, D)) * s
    p["w_v_bg"] = jax.random.normal(keys[8], (D, D)) * s
    p["w_mlp_fg"] = jax.random.normal(keys[9], (D, DS)) * s
    p["w_mlp_bg"] = jax.random.normal(keys[10], (D, DS)) * s
    # q projections (no bias)
    p["w_q_fg"] = jax.random.normal(keys[11], (DS, DS)) * s
    p["w_q_bg"] = jax.random.normal(keys[12], (DS, DS)) * s
    # LayerNorms (torch default init)
    p["norm_feat_g"], p["norm_feat_b"] = jnp.ones((D,)), jnp.zeros((D,))
    p["norm_color_g"], p["norm_color_b"] = jnp.ones((CC,)), jnp.zeros((CC,))
    p["ln_qfg_g"], p["ln_qfg_b"] = jnp.ones((DS,)), jnp.zeros((DS,))
    p["ln_qbg_g"], p["ln_qbg_b"] = jnp.ones((DS,)), jnp.zeros((DS,))
    p["ln_mfg_g"], p["ln_mfg_b"] = jnp.ones((DS,)), jnp.zeros((DS,))
    p["ln_mbg_g"], p["ln_mbg_b"] = jnp.ones((DS,)), jnp.zeros((DS,))
    # slot MLPs
    p["mlp_fg_w1"] = jax.random.normal(keys[13], (DS, DS)) * s
    p["mlp_fg_b1"] = jnp.zeros((DS,))
    p["mlp_fg_w2"] = jax.random.normal(keys[14], (DS, DS)) * s
    p["mlp_fg_b2"] = jnp.zeros((DS,))
    p["mlp_bg_w1"] = jax.random.normal(keys[15], (DS, DS)) * s
    p["mlp_bg_b1"] = jnp.zeros((DS,))
    p["mlp_bg_w2"] = jax.random.normal(keys[16], (DS, DS)) * s
    p["mlp_bg_b2"] = jnp.zeros((DS,))
    # attn_to_pos_bias is zero-initialised in the torch module
    p["attn_pos_w"] = jnp.zeros((N, 2))
    p["attn_pos_b"] = jnp.zeros((2,))
    return jax.tree_util.tree_map(lambda a: a.astype(jnp.float32), p)


# ---------------- forward (param prep + one kernel call) ----------------
def slot_attention_forward(params, feat, camera_modulation, feat_color):
    # camera_modulation accepted but unused (module built with camera_modulation=False,
    # so every AdaLN degenerates to plain LayerNorm).
    del camera_modulation
    Bb, Hh, Ww, _ = feat.shape
    Nn = Hh * Ww
    assert (Bb, Nn) == (B, N)
    feat_flat = feat.reshape(Bb, Nn, D)
    grid2 = build_grid(Hh, Ww).reshape(Nn, 2)

    # ---- tiny one-time parameter packing (plain XLA, outside the hot path) ----
    wg, bgr = params["w_grid"], params["b_grid"]
    wg_eff2 = wg[0:2] - wg[2:4]                               # folds the [g, -g] concat
    wge4 = jnp.concatenate([wg_eff2] * 4, axis=1)             # (2, 4D)
    bgb4 = jnp.concatenate([bgr[None]] * 4, axis=1)           # (1, 4D)
    wkv4 = jnp.concatenate([params["w_k_fg"], params["w_v_fg"],
                            params["w_k_bg"], params["w_v_bg"]], axis=1)   # (D, 4D)
    wmf, wmb = params["w_mlp_fg"], params["w_mlp_bg"]
    Z = jnp.zeros((D, DS), jnp.float32)
    wblock = jnp.concatenate([
        jnp.concatenate([wmf, Z, Z, Z], axis=1),
        jnp.concatenate([Z, wmf, Z, Z], axis=1),
        jnp.concatenate([Z, Z, wmb, Z], axis=1),
        jnp.concatenate([Z, Z, Z, wmb], axis=1)], axis=0)     # (4D, 4DS)
    wgm = wg_eff2 @ wmf                                       # (2, DS)
    lnf = jnp.stack([params["norm_feat_g"], params["norm_feat_b"]])
    lnc = jnp.stack([params["norm_color_g"], params["norm_color_b"]])
    ln8 = jnp.stack([params["ln_qfg_g"], params["ln_qfg_b"],
                     params["ln_qbg_g"], params["ln_qbg_b"],
                     params["ln_mfg_g"], params["ln_mfg_b"],
                     params["ln_mbg_g"], params["ln_mbg_b"]])
    mlpw = jnp.concatenate([params["mlp_fg_w1"], params["mlp_fg_w2"],
                            params["mlp_bg_w1"], params["mlp_bg_w2"]], axis=0)
    mlpb = jnp.stack([params["mlp_fg_b1"], params["mlp_fg_b2"],
                      params["mlp_bg_b1"], params["mlp_bg_b2"]])
    sfg0 = params["slots_init_fg"][0]
    sbg0 = params["slots_init_bg"][0]
    pos0 = params["fg_position"][0]
    apw = params["attn_pos_w"]
    apb = params["attn_pos_b"][None]

    has_color = feat_color is not None
    fc_flat = (feat_color.reshape(Bb, Nn, CC) if has_color
               else jnp.zeros((Bb, Nn, CC), jnp.float32))

    attn, small = fused_call(
        feat_flat, fc_flat, lnf, lnc, wkv4, wge4, bgb4, wblock, wgm, grid2,
        params["w_q_fg"], params["w_q_bg"], ln8, mlpw, mlpb,
        sfg0, sbg0, pos0, apw, apb)

    slot_width = DS + CC if has_color else DS
    slots = small[:, 0:K, 0:slot_width]
    fg_position = small[:, K:K + KM1, 0:2]
    fg_depth_scale = jnp.ones((Bb, KM1, 1), jnp.float32)      # depth_scale_pred=False
    return slots, attn, fg_position, fg_depth_scale


# ---------------- main ----------------
if __name__ == "__main__":
    key = jax.random.PRNGKey(0)
    kp, kf, kc, kcam = jax.random.split(key, 4)
    params = init_params(kp)
    feat = jax.random.normal(kf, (B, H, W, D), jnp.float32)
    feat_color = jax.random.normal(kc, (B, H, W, CC), jnp.float32)
    cam = jax.random.normal(kcam, (B, CAM), jnp.float32)   # unused (no camera modulation)

    slots, attn, fg_pos, fg_depth_scale = slot_attention_forward(params, feat, cam, feat_color)
    (slots, attn, fg_pos, fg_depth_scale) = jax.block_until_ready(
        (slots, attn, fg_pos, fg_depth_scale))

    assert slots.shape == (B, K, DS + CC), slots.shape
    assert attn.shape == (B, K, N), attn.shape
    assert fg_pos.shape == (B, KM1, 2), fg_pos.shape
    assert fg_depth_scale.shape == (B, KM1, 1), fg_depth_scale.shape
    assert bool(jnp.all(jnp.isfinite(slots))) and bool(jnp.all(jnp.isfinite(attn)))
    assert bool(jnp.all(jnp.abs(fg_pos) <= 1.0 + 1e-6))
    # attention over slots (pre-eps) sums to ~1
    assert bool(jnp.allclose(jnp.sum(attn, axis=1), 1.0 + K * EPS, atol=1e-4))
    print("KERNEL_OK")
</pallas_src>

<mosaic_0001>
module attributes {stable_mosaic.version = 11 : i64} {
  func.func @fused_kernel(%arg0: i32, %arg1: memref<1x256x32xf32, #tpu.memory_space<vmem>>, %arg2: memref<1x256x8xf32, #tpu.memory_space<vmem>>, %arg3: memref<2x32xf32, #tpu.memory_space<vmem>>, %arg4: memref<2x8xf32, #tpu.memory_space<vmem>>, %arg5: memref<32x128xf32, #tpu.memory_space<vmem>>, %arg6: memref<2x128xf32, #tpu.memory_space<vmem>>, %arg7: memref<1x128xf32, #tpu.memory_space<vmem>>, %arg8: memref<128x128xf32, #tpu.memory_space<vmem>>, %arg9: memref<2x32xf32, #tpu.memory_space<vmem>>, %arg10: memref<256x2xf32, #tpu.memory_space<vmem>>, %arg11: memref<32x32xf32, #tpu.memory_space<vmem>>, %arg12: memref<32x32xf32, #tpu.memory_space<vmem>>, %arg13: memref<8x32xf32, #tpu.memory_space<vmem>>, %arg14: memref<128x32xf32, #tpu.memory_space<vmem>>, %arg15: memref<4x32xf32, #tpu.memory_space<vmem>>, %arg16: memref<3x32xf32, #tpu.memory_space<vmem>>, %arg17: memref<1x32xf32, #tpu.memory_space<vmem>>, %arg18: memref<3x2xf32, #tpu.memory_space<vmem>>, %arg19: memref<256x2xf32, #tpu.memory_space<vmem>>, %arg20: memref<1x2xf32, #tpu.memory_space<vmem>>, %arg21: memref<1x4x256xf32, #tpu.memory_space<vmem>>, %arg22: memref<1x8x128xf32, #tpu.memory_space<vmem>>) attributes {dimension_semantics = [#tpu.dimension_semantics<parallel>], iteration_bounds = array<i64: 2>, scalar_prefetch = 0 : i64, scratch_operands = 0 : i64, tpu.core_type = #tpu.core_type<tc>, window_params = [{transform_indices = @transform_0, window_bounds = array<i64: 1, 256, 32>}, {transform_indices = @transform_1, window_bounds = array<i64: 1, 256, 8>}, {pipeline_mode = #tpu.pipeline_mode<synchronous>, transform_indices = @transform_2, window_bounds = array<i64: 2, 32>}, {pipeline_mode = #tpu.pipeline_mode<synchronous>, transform_indices = @transform_3, window_bounds = array<i64: 2, 8>}, {pipeline_mode = #tpu.pipeline_mode<synchronous>, transform_indices = @transform_4, window_bounds = array<i64: 32, 128>}, {pipeline_mode = #tpu.pipeline_mode<synchronous>, transform_indices = @transform_5, window_bounds = array<i64: 2, 128>}, {pipeline_mode = #tpu.pipeline_mode<synchronous>, transform_indices = @transform_6, window_bounds = array<i64: 1, 128>}, {pipeline_mode = #tpu.pipeline_mode<synchronous>, transform_indices = @transform_7, window_bounds = array<i64: 128, 128>}, {pipeline_mode = #tpu.pipeline_mode<synchronous>, transform_indices = @transform_8, window_bounds = array<i64: 2, 32>}, {pipeline_mode = #tpu.pipeline_mode<synchronous>, transform_indices = @transform_9, window_bounds = array<i64: 256, 2>}, {pipeline_mode = #tpu.pipeline_mode<synchronous>, transform_indices = @transform_10, window_bounds = array<i64: 32, 32>}, {pipeline_mode = #tpu.pipeline_mode<synchronous>, transform_indices = @transform_11, window_bounds = array<i64: 32, 32>}, {pipeline_mode = #tpu.pipeline_mode<synchronous>, transform_indices = @transform_12, window_bounds = array<i64: 8, 32>}, {pipeline_mode = #tpu.pipeline_mode<synchronous>, transform_indices = @transform_13, window_bounds = array<i64: 128, 32>}, {pipeline_mode = #tpu.pipeline_mode<synchronous>, transform_indices = @transform_14, window_bounds = array<i64: 4, 32>}, {pipeline_mode = #tpu.pipeline_mode<synchronous>, transform_indices = @transform_15, window_bounds = array<i64: 3, 32>}, {pipeline_mode = #tpu.pipeline_mode<synchronous>, transform_indices = @transform_16, window_bounds = array<i64: 1, 32>}, {pipeline_mode = #tpu.pipeline_mode<synchronous>, transform_indices = @transform_17, window_bounds = array<i64: 3, 2>}, {pipeline_mode = #tpu.pipeline_mode<synchronous>, transform_indices = @transform_18, window_bounds = array<i64: 256, 2>}, {pipeline_mode = #tpu.pipeline_mode<synchronous>, transform_indices = @transform_19, window_bounds = array<i64: 1, 2>}, {transform_indices = @transform_20, window_bounds = array<i64: 1, 4, 256>}, {transform_indices = @transform_21, window_bounds = array<i64: 1, 8, 128>}]} {
    %c0 = arith.constant 0 : index
    %c0_0 = arith.constant 0 : index
    %c0_1 = arith.constant 0 : index
    %0 = vector.load %arg1[%c0, %c0_0, %c0_1] : memref<1x256x32xf32, #tpu.memory_space<vmem>>, vector<1x256x32xf32>
    %1 = vector.shape_cast %0 : vector<1x256x32xf32> to vector<256x32xf32>
    %c0_2 = arith.constant 0 : index
    %c0_3 = arith.constant 0 : index
    %2 = vector.load %arg3[%c0_2, %c0_3] : memref<2x32xf32, #tpu.memory_space<vmem>>, vector<2x32xf32>
    %cst = arith.constant dense<0.000000e+00> : vector<256xf32>
    %3 = vector.multi_reduction <add>, %1, %cst [1] : vector<256x32xf32> to vector<256xf32>
    %4 = vector.shape_cast %3 : vector<256xf32> to vector<256x1xf32>
    %cst_4 = arith.constant 3.200000e+01 : f32
    %5 = vector.broadcast %cst_4 : f32 to vector<256x1xf32>
    %6 = arith.divf %4, %5 : vector<256x1xf32>
    %7 = vector.broadcast %6 : vector<256x1xf32> to vector<256x32xf32>
    %8 = arith.subf %1, %7 : vector<256x32xf32>
    %9 = arith.mulf %8, %8 : vector<256x32xf32>
    %cst_5 = arith.constant dense<0.000000e+00> : vector<256xf32>
    %10 = vector.multi_reduction <add>, %9, %cst_5 [1] : vector<256x32xf32> to vector<256xf32>
    %11 = vector.shape_cast %10 : vector<256xf32> to vector<256x1xf32>
    %cst_6 = arith.constant 3.200000e+01 : f32
    %12 = vector.broadcast %cst_6 : f32 to vector<256x1xf32>
    %13 = arith.divf %11, %12 : vector<256x1xf32>
    %14 = vector.broadcast %6 : vector<256x1xf32> to vector<256x32xf32>
    %15 = arith.subf %1, %14 : vector<256x32xf32>
    %cst_7 = arith.constant 9.99999974E-6 : f32
    %16 = vector.broadcast %cst_7 : f32 to vector<256x1xf32>
    %17 = arith.addf %13, %16 : vector<256x1xf32>
    %18 = math.rsqrt %17 : vector<256x1xf32>
    %19 = vector.broadcast %18 : vector<256x1xf32> to vector<256x32xf32>
    %20 = arith.mulf %15, %19 : vector<256x32xf32>
    %21 = vector.extract_strided_slice %2 {offsets = [0, 0], sizes = [1, 32], strides = [1, 1]} : vector<2x32xf32> to vector<1x32xf32>
    %22 = vector.broadcast %21 : vector<1x32xf32> to vector<256x32xf32>
    %23 = arith.mulf %20, %22 : vector<256x32xf32>
    %24 = vector.extract_strided_slice %2 {offsets = [1, 0], sizes = [1, 32], strides = [1, 1]} : vector<2x32xf32> to vector<1x32xf32>
    %25 = vector.broadcast %24 : vector<1x32xf32> to vector<256x32xf32>
    %26 = arith.addf %23, %25 : vector<256x32xf32>
    %c0_8 = arith.constant 0 : index
    %c0_9 = arith.constant 0 : index
    %27 = vector.load %arg5[%c0_8, %c0_9] : memref<32x128xf32, #tpu.memory_space<vmem>>, vector<32x128xf32>
    %cst_10 = arith.constant dense<0.000000e+00> : vector<256x128xf32>
    %28 = tpu.matmul %26, %27, %cst_10 {dimension_numbers = #tpu.dot_dimension_numbers<[1], [0], [0], [1], [0, 0, 1, 1], [], []>} : vector<256x32xf32>, vector<32x128xf32>, vector<256x128xf32> -> vector<256x128xf32>
    %c0_11 = arith.constant 0 : index
    %c0_12 = arith.constant 0 : index
    %29 = vector.load %arg10[%c0_11, %c0_12] : memref<256x2xf32, #tpu.memory_space<vmem>>, vector<256x2xf32>
    %c0_13 = arith.constant 0 : index
    %c0_14 = arith.constant 0 : index
    %30 = vector.load %arg6[%c0_13, %c0_14] : memref<2x128xf32, #tpu.memory_space<vmem>>, vector<2x128xf32>
    %cst_15 = arith.constant dense<0.000000e+00> : vector<256x128xf32>
    %31 = tpu.matmul %29, %30, %cst_15 {dimension_numbers = #tpu.dot_dimension_numbers<[1], [0], [0], [1], [0, 0, 1, 1], [], []>} : vector<256x2xf32>, vector<2x128xf32>, vector<256x128xf32> -> vector<256x128xf32>
    %c0_16 = arith.constant 0 : index
    %c0_17 = arith.constant 0 : index
    %32 = vector.load %arg7[%c0_16, %c0_17] : memref<1x128xf32, #tpu.memory_space<vmem>>, vector<1x128xf32>
    %33 = vector.broadcast %32 : vector<1x128xf32> to vector<256x128xf32>
    %34 = arith.addf %31, %33 : vector<256x128xf32>
    %35 = arith.addf %28, %34 : vector<256x128xf32>
    %c0_18 = arith.constant 0 : index
    %c0_19 = arith.constant 0 : index
    %36 = vector.load %arg8[%c0_18, %c0_19] : memref<128x128xf32, #tpu.memory_space<vmem>>, vector<128x128xf32>
    %cst_20 = arith.constant dense<0.000000e+00> : vector<256x128xf32>
    %37 = tpu.matmul %35, %36, %cst_20 {dimension_numbers = #tpu.dot_dimension_numbers<[1], [0], [0], [1], [0, 0, 1, 1], [], []>} : vector<256x128xf32>, vector<128x128xf32>, vector<256x128xf32> -> vector<256x128xf32>
    %c0_21 = arith.constant 0 : index
    %c0_22 = arith.constant 0 : index
    %c0_23 = arith.constant 0 : index
    %38 = vector.load %arg2[%c0_21, %c0_22, %c0_23] : memref<1x256x8xf32, #tpu.memory_space<vmem>>, vector<1x256x8xf32>
    %39 = vector.shape_cast %38 : vector<1x256x8xf32> to vector<256x8xf32>
    %c0_24 = arith.constant 0 : index
    %c0_25 = arith.constant 0 : index
    %40 = vector.load %arg4[%c0_24, %c0_25] : memref<2x8xf32, #tpu.memory_space<vmem>>, vector<2x8xf32>
    %cst_26 = arith.constant dense<0.000000e+00> : vector<256xf32>
    %41 = vector.multi_reduction <add>, %39, %cst_26 [1] : vector<256x8xf32> to vector<256xf32>
    %42 = vector.shape_cast %41 : vector<256xf32> to vector<256x1xf32>
    %cst_27 = arith.constant 8.000000e+00 : f32
    %43 = vector.broadcast %cst_27 : f32 to vector<256x1xf32>
    %44 = arith.divf %42, %43 : vector<256x1xf32>
    %45 = vector.broadcast %44 : vector<256x1xf32> to vector<256x8xf32>
    %46 = arith.subf %39, %45 : vector<256x8xf32>
    %47 = arith.mulf %46, %46 : vector<256x8xf32>
    %cst_28 = arith.constant dense<0.000000e+00> : vector<256xf32>
    %48 = vector.multi_reduction <add>, %47, %cst_28 [1] : vector<256x8xf32> to vector<256xf32>
    %49 = vector.shape_cast %48 : vector<256xf32> to vector<256x1xf32>
    %cst_29 = arith.constant 8.000000e+00 : f32
    %50 = vector.broadcast %cst_29 : f32 to vector<256x1xf32>
    %51 = arith.divf %49, %50 : vector<256x1xf32>
    %52 = vector.broadcast %44 : vector<256x1xf32> to vector<256x8xf32>
    %53 = arith.subf %39, %52 : vector<256x8xf32>
    %cst_30 = arith.constant 9.99999974E-6 : f32
    %54 = vector.broadcast %cst_30 : f32 to vector<256x1xf32>
    %55 = arith.addf %51, %54 : vector<256x1xf32>
    %56 = math.rsqrt %55 : vector<256x1xf32>
    %57 = vector.broadcast %56 : vector<256x1xf32> to vector<256x8xf32>
    %58 = arith.mulf %53, %57 : vector<256x8xf32>
    %59 = vector.extract_strided_slice %40 {offsets = [0, 0], sizes = [1, 8], strides = [1, 1]} : vector<2x8xf32> to vector<1x8xf32>
    %60 = vector.broadcast %59 : vector<1x8xf32> to vector<256x8xf32>
    %61 = arith.mulf %58, %60 : vector<256x8xf32>
    %62 = vector.extract_strided_slice %40 {offsets = [1, 0], sizes = [1, 8], strides = [1, 1]} : vector<2x8xf32> to vector<1x8xf32>
    %63 = vector.broadcast %62 : vector<1x8xf32> to vector<256x8xf32>
    %64 = arith.addf %61, %63 : vector<256x8xf32>
    %c0_31 = arith.constant 0 : index
    %c0_32 = arith.constant 0 : index
    %65 = vector.load %arg10[%c0_31, %c0_32] : memref<256x2xf32, #tpu.memory_space<vmem>>, vector<256x2xf32>
    %c0_33 = arith.constant 0 : index
    %c0_34 = arith.constant 0 : index
    %66 = vector.load %arg9[%c0_33, %c0_34] : memref<2x32xf32, #tpu.memory_space<vmem>>, vector<2x32xf32>
    %c0_35 = arith.constant 0 : index
    %c0_36 = arith.constant 0 : index
    %67 = vector.load %arg13[%c0_35, %c0_36] : memref<8x32xf32, #tpu.memory_space<vmem>>, vector<8x32xf32>
    %c0_37 = arith.constant 0 : index
    %c0_38 = arith.constant 0 : index
    %68 = vector.load %arg14[%c0_37, %c0_38] : memref<128x32xf32, #tpu.memory_space<vmem>>, vector<128x32xf32>
    %c0_39 = arith.constant 0 : index
    %c0_40 = arith.constant 0 : index
    %69 = vector.load %arg15[%c0_39, %c0_40] : memref<4x32xf32, #tpu.memory_space<vmem>>, vector<4x32xf32>
    %c0_41 = arith.constant 0 : index
    %c0_42 = arith.constant 0 : index
    %70 = vector.load %arg11[%c0_41, %c0_42] : memref<32x32xf32, #tpu.memory_space<vmem>>, vector<32x32xf32>
    %c0_43 = arith.constant 0 : index
    %c0_44 = arith.constant 0 : index
    %71 = vector.load %arg12[%c0_43, %c0_44] : memref<32x32xf32, #tpu.memory_space<vmem>>, vector<32x32xf32>
    %cst_45 = arith.constant 0.000000e+00 : f32
    %72 = vector.broadcast %cst_45 : f32 to vector<1x32xf32>
    %cst_46 = arith.constant 0.000000e+00 : f32
    %73 = vector.broadcast %cst_46 : f32 to vector<3x32xf32>
    %c0_47 = arith.constant 0 : index
    %c0_48 = arith.constant 0 : index
    %74 = vector.load %arg16[%c0_47, %c0_48] : memref<3x32xf32, #tpu.memory_space<vmem>>, vector<3x32xf32>
    %c0_49 = arith.constant 0 : index
    %c0_50 = arith.constant 0 : index
    %75 = vector.load %arg17[%c0_49, %c0_50] : memref<1x32xf32, #tpu.memory_space<vmem>>, vector<1x32xf32>
    %c0_51 = arith.constant 0 : index
    %c0_52 = arith.constant 0 : index
    %76 = vector.load %arg18[%c0_51, %c0_52] : memref<3x2xf32, #tpu.memory_space<vmem>>, vector<3x2xf32>
    %77 = vector.extract_strided_slice %67 {offsets = [0, 0], sizes = [1, 32], strides = [1, 1]} : vector<8x32xf32> to vector<1x32xf32>
    %78 = vector.extract_strided_slice %67 {offsets = [1, 0], sizes = [1, 32], strides = [1, 1]} : vector<8x32xf32> to vector<1x32xf32>
    %cst_53 = arith.constant dense<0.000000e+00> : vector<3xf32>
    %79 = vector.multi_reduction <add>, %74, %cst_53 [1] : vector<3x32xf32> to vector<3xf32>
    %80 = vector.shape_cast %79 : vector<3xf32> to vector<3x1xf32>
    %cst_54 = arith.constant 3.200000e+01 : f32
    %81 = vector.broadcast %cst_54 : f32 to vector<3x1xf32>
    %82 = arith.divf %80, %81 : vector<3x1xf32>
    %83 = vector.broadcast %82 : vector<3x1xf32> to vector<3x32xf32>
    %84 = arith.subf %74, %83 : vector<3x32xf32>
    %85 = arith.mulf %84, %84 : vector<3x32xf32>
    %cst_55 = arith.constant dense<0.000000e+00> : vector<3xf32>
    %86 = vector.multi_reduction <add>, %85, %cst_55 [1] : vector<3x32xf32> to vector<3xf32>
    %87 = vector.shape_cast %86 : vector<3xf32> to vector<3x1xf32>
    %cst_56 = arith.constant 3.200000e+01 : f32
    %88 = vector.broadcast %cst_56 : f32 to vector<3x1xf32>
    %89 = arith.divf %87, %88 : vector<3x1xf32>
    %90 = vector.broadcast %82 : vector<3x1xf32> to vector<3x32xf32>
    %91 = arith.subf %74, %90 : vector<3x32xf32>
    %cst_57 = arith.constant 9.99999974E-6 : f32
    %92 = vector.broadcast %cst_57 : f32 to vector<3x1xf32>
    %93 = arith.addf %89, %92 : vector<3x1xf32>
    %94 = math.rsqrt %93 : vector<3x1xf32>
    %95 = vector.broadcast %94 : vector<3x1xf32> to vector<3x32xf32>
    %96 = arith.mulf %91, %95 : vector<3x32xf32>
    %97 = vector.broadcast %77 : vector<1x32xf32> to vector<3x32xf32>
    %98 = arith.mulf %96, %97 : vector<3x32xf32>
    %99 = vector.broadcast %78 : vector<1x32xf32> to vector<3x32xf32>
    %100 = arith.addf %98, %99 : vector<3x32xf32>
    %cst_58 = arith.constant dense<0.000000e+00> : vector<3x32xf32>
    %101 = tpu.matmul %100, %70, %cst_58 {dimension_numbers = #tpu.dot_dimension_numbers<[1], [0], [0], [1], [0, 0, 1, 1], [], []>} : vector<3x32xf32>, vector<32x32xf32>, vector<3x32xf32> -> vector<3x32xf32>
    %102 = vector.extract_strided_slice %67 {offsets = [2, 0], sizes = [1, 32], strides = [1, 1]} : vector<8x32xf32> to vector<1x32xf32>
    %103 = vector.extract_strided_slice %67 {offsets = [3, 0], sizes = [1, 32], strides = [1, 1]} : vector<8x32xf32> to vector<1x32xf32>
    %cst_59 = arith.constant dense<0.000000e+00> : vector<1xf32>
    %104 = vector.multi_reduction <add>, %75, %cst_59 [1] : vector<1x32xf32> to vector<1xf32>
    %105 = vector.shape_cast %104 : vector<1xf32> to vector<1x1xf32>
    %cst_60 = arith.constant 3.200000e+01 : f32
    %106 = vector.broadcast %cst_60 : f32 to vector<1x1xf32>
    %107 = arith.divf %105, %106 : vector<1x1xf32>
    %108 = vector.broadcast %107 : vector<1x1xf32> to vector<1x32xf32>
    %109 = arith.subf %75, %108 : vector<1x32xf32>
    %110 = arith.mulf %109, %109 : vector<1x32xf32>
    %cst_61 = arith.constant dense<0.000000e+00> : vector<1xf32>
    %111 = vector.multi_reduction <add>, %110, %cst_61 [1] : vector<1x32xf32> to vector<1xf32>
    %112 = vector.shape_cast %111 : vector<1xf32> to vector<1x1xf32>
    %cst_62 = arith.constant 3.200000e+01 : f32
    %113 = vector.broadcast %cst_62 : f32 to vector<1x1xf32>
    %114 = arith.divf %112, %113 : vector<1x1xf32>
    %115 = vector.broadcast %107 : vector<1x1xf32> to vector<1x32xf32>
    %116 = arith.subf %75, %115 : vector<1x32xf32>
    %cst_63 = arith.constant 9.99999974E-6 : f32
    %117 = vector.broadcast %cst_63 : f32 to vector<1x1xf32>
    %118 = arith.addf %114, %117 : vector<1x1xf32>
    %119 = math.rsqrt %118 : vector<1x1xf32>
    %120 = vector.broadcast %119 : vector<1x1xf32> to vector<1x32xf32>
    %121 = arith.mulf %116, %120 : vector<1x32xf32>
    %122 = arith.mulf %121, %102 : vector<1x32xf32>
    %123 = arith.addf %122, %103 : vector<1x32xf32>
    %cst_64 = arith.constant dense<0.000000e+00> : vector<1x32xf32>
    %124 = tpu.matmul %123, %71, %cst_64 {dimension_numbers = #tpu.dot_dimension_numbers<[1], [0], [0], [1], [0, 0, 1, 1], [], []>} : vector<1x32xf32>, vector<32x32xf32>, vector<1x32xf32> -> vector<1x32xf32>
    %cst_65 = arith.constant dense<0.000000e+00> : vector<3x32xf32>
    %125 = tpu.matmul %76, %66, %cst_65 {dimension_numbers = #tpu.dot_dimension_numbers<[1], [0], [0], [1], [0, 0, 1, 1], [], []>} : vector<3x2xf32>, vector<2x32xf32>, vector<3x32xf32> -> vector<3x32xf32>
    %cst_66 = arith.constant 0.000000e+00 : f32
    %126 = vector.broadcast %cst_66 : f32 to vector<3x32xf32>
    %127 = arith.subf %126, %125 : vector<3x32xf32>
    %128 = tpu.concatenate %72, %72, %124, %72 in 1 : vector<1x32xf32>, vector<1x32xf32>, vector<1x32xf32>, vector<1x32xf32> -> vector<1x128xf32>
    %129 = tpu.concatenate %101, %73, %73, %73 in 1 : vector<3x32xf32>, vector<3x32xf32>, vector<3x32xf32>, vector<3x32xf32> -> vector<3x128xf32>
    %130 = tpu.concatenate %128, %129 in 0 : vector<1x128xf32>, vector<3x128xf32> -> vector<4x128xf32>
    %cst_67 = arith.constant dense<0.000000e+00> : vector<4x256xf32>
    %131 = tpu.matmul %130, %37, %cst_67 {dimension_numbers = #tpu.dot_dimension_numbers<[1], [1], [0], [0], [0, 0, 1, 0], [], []>} : vector<4x128xf32>, vector<256x128xf32>, vector<4x256xf32> -> vector<4x256xf32>
    %132 = arith.mulf %101, %127 : vector<3x32xf32>
    %cst_68 = arith.constant dense<0.000000e+00> : vector<3xf32>
    %133 = vector.multi_reduction <add>, %132, %cst_68 [1] : vector<3x32xf32> to vector<3xf32>
    %134 = vector.shape_cast %133 : vector<3xf32> to vector<3x1xf32>
    %cst_69 = arith.constant 0.000000e+00 : f32
    %135 = vector.broadcast %cst_69 : f32 to vector<1x1xf32>
    %136 = tpu.concatenate %135, %134 in 0 : vector<1x1xf32>, vector<3x1xf32> -> vector<4x1xf32>
    %137 = vector.broadcast %136 : vector<4x1xf32> to vector<4x256xf32>
    %138 = arith.addf %131, %137 : vector<4x256xf32>
    %cst_70 = arith.constant 0.176776692 : f32
    %139 = vector.broadcast %cst_70 : f32 to vector<4x256xf32>
    %140 = arith.mulf %138, %139 : vector<4x256xf32>
    %cst_71 = arith.constant dense<0xFF800000> : vector<256xf32>
    %141 = vector.multi_reduction <maximumf>, %140, %cst_71 [0] : vector<4x256xf32> to vector<256xf32>
    %142 = vector.shape_cast %141 : vector<256xf32> to vector<1x256xf32>
    %143 = vector.broadcast %142 : vector<1x256xf32> to vector<4x256xf32>
    %144 = arith.subf %140, %143 : vector<4x256xf32>
    %145 = math.exp %144 : vector<4x256xf32>
    %cst_72 = arith.constant dense<0.000000e+00> : vector<256xf32>
    %146 = vector.multi_reduction <add>, %145, %cst_72 [0] : vector<4x256xf32> to vector<256xf32>
    %147 = vector.shape_cast %146 : vector<256xf32> to vector<1x256xf32>
    %148 = vector.broadcast %147 : vector<1x256xf32> to vector<4x256xf32>
    %149 = arith.divf %145, %148 : vector<4x256xf32>
    %cst_73 = arith.constant 9.99999993E-9 : f32
    %150 = vector.broadcast %cst_73 : f32 to vector<4x256xf32>
    %151 = arith.addf %149, %150 : vector<4x256xf32>
    %152 = vector.extract_strided_slice %151 {offsets = [1, 0], sizes = [3, 256], strides = [1, 1]} : vector<4x256xf32> to vector<3x256xf32>
    %153 = vector.extract_strided_slice %151 {offsets = [0, 0], sizes = [1, 256], strides = [1, 1]} : vector<4x256xf32> to vector<1x256xf32>
    %cst_74 = arith.constant dense<0.000000e+00> : vector<3xf32>
    %154 = vector.multi_reduction <add>, %152, %cst_74 [1] : vector<3x256xf32> to vector<3xf32>
    %155 = vector.shape_cast %154 : vector<3xf32> to vector<3x1xf32>
    %156 = vector.broadcast %155 : vector<3x1xf32> to vector<3x256xf32>
    %157 = arith.divf %152, %156 : vector<3x256xf32>
    %cst_75 = arith.constant dense<0.000000e+00> : vector<1xf32>
    %158 = vector.multi_reduction <add>, %153, %cst_75 [1] : vector<1x256xf32> to vector<1xf32>
    %159 = vector.shape_cast %158 : vector<1xf32> to vector<1x1xf32>
    %160 = vector.broadcast %159 : vector<1x1xf32> to vector<1x256xf32>
    %161 = arith.divf %153, %160 : vector<1x256xf32>
    %162 = tpu.concatenate %161, %157 in 0 : vector<1x256xf32>, vector<3x256xf32> -> vector<4x256xf32>
    %cst_76 = arith.constant dense<0.000000e+00> : vector<3x2xf32>
    %163 = tpu.matmul %157, %65, %cst_76 {dimension_numbers = #tpu.dot_dimension_numbers<[1], [0], [0], [1], [0, 0, 1, 1], [], []>} : vector<3x256xf32>, vector<256x2xf32>, vector<3x2xf32> -> vector<3x2xf32>
    %cst_77 = arith.constant 5.000000e-01 : f32
    %164 = vector.broadcast %cst_77 : f32 to vector<3x2xf32>
    %165 = arith.mulf %163, %164 : vector<3x2xf32>
    %cst_78 = arith.constant 5.000000e-01 : f32
    %166 = vector.broadcast %cst_78 : f32 to vector<3x2xf32>
    %167 = arith.mulf %76, %166 : vector<3x2xf32>
    %168 = arith.addf %165, %167 : vector<3x2xf32>
    %cst_79 = arith.constant dense<0.000000e+00> : vector<4x128xf32>
    %169 = tpu.matmul %162, %37, %cst_79 {dimension_numbers = #tpu.dot_dimension_numbers<[1], [0], [0], [1], [0, 0, 1, 1], [], []>} : vector<4x256xf32>, vector<256x128xf32>, vector<4x128xf32> -> vector<4x128xf32>
    %170 = vector.extract_strided_slice %169 {offsets = [1, 32], sizes = [3, 32], strides = [1, 1]} : vector<4x128xf32> to vector<3x32xf32>
    %171 = arith.addf %170, %127 : vector<3x32xf32>
    %172 = vector.extract_strided_slice %169 {offsets = [0, 96], sizes = [1, 32], strides = [1, 1]} : vector<4x128xf32> to vector<1x32xf32>
    %173 = arith.addf %74, %171 : vector<3x32xf32>
    %174 = arith.addf %75, %172 : vector<1x32xf32>
    %175 = vector.extract_strided_slice %67 {offsets = [6, 0], sizes = [1, 32], strides = [1, 1]} : vector<8x32xf32> to vector<1x32xf32>
    %176 = vector.extract_strided_slice %67 {offsets = [7, 0], sizes = [1, 32], strides = [1, 1]} : vector<8x32xf32> to vector<1x32xf32>
    %cst_80 = arith.constant dense<0.000000e+00> : vector<1xf32>
    %177 = vector.multi_reduction <add>, %174, %cst_80 [1] : vector<1x32xf32> to vector<1xf32>
    %178 = vector.shape_cast %177 : vector<1xf32> to vector<1x1xf32>
    %cst_81 = arith.constant 3.200000e+01 : f32
    %179 = vector.broadcast %cst_81 : f32 to vector<1x1xf32>
    %180 = arith.divf %178, %179 : vector<1x1xf32>
    %181 = vector.broadcast %180 : vector<1x1xf32> to vector<1x32xf32>
    %182 = arith.subf %174, %181 : vector<1x32xf32>
    %183 = arith.mulf %182, %182 : vector<1x32xf32>
    %cst_82 = arith.constant dense<0.000000e+00> : vector<1xf32>
    %184 = vector.multi_reduction <add>, %183, %cst_82 [1] : vector<1x32xf32> to vector<1xf32>
    %185 = vector.shape_cast %184 : vector<1xf32> to vector<1x1xf32>
    %cst_83 = arith.constant 3.200000e+01 : f32
    %186 = vector.broadcast %cst_83 : f32 to vector<1x1xf32>
    %187 = arith.divf %185, %186 : vector<1x1xf32>
    %188 = vector.broadcast %180 : vector<1x1xf32> to vector<1x32xf32>
    %189 = arith.subf %174, %188 : vector<1x32xf32>
    %cst_84 = arith.constant 9.99999974E-6 : f32
    %190 = vector.broadcast %cst_84 : f32 to vector<1x1xf32>
    %191 = arith.addf %187, %190 : vector<1x1xf32>
    %192 = math.rsqrt %191 : vector<1x1xf32>
    %193 = vector.broadcast %192 : vector<1x1xf32> to vector<1x32xf32>
    %194 = arith.mulf %189, %193 : vector<1x32xf32>
    %195 = arith.mulf %194, %175 : vector<1x32xf32>
    %196 = arith.addf %195, %176 : vector<1x32xf32>
    %197 = vector.extract_strided_slice %68 {offsets = [64, 0], sizes = [32, 32], strides = [1, 1]} : vector<128x32xf32> to vector<32x32xf32>
    %cst_85 = arith.constant dense<0.000000e+00> : vector<1x32xf32>
    %198 = tpu.matmul %196, %197, %cst_85 {dimension_numbers = #tpu.dot_dimension_numbers<[1], [0], [0], [1], [0, 0, 1, 1], [], []>} : vector<1x32xf32>, vector<32x32xf32>, vector<1x32xf32> -> vector<1x32xf32>
    %199 = vector.extract_strided_slice %69 {offsets = [2, 0], sizes = [1, 32], strides = [1, 1]} : vector<4x32xf32> to vector<1x32xf32>
    %200 = arith.addf %198, %199 : vector<1x32xf32>
    %cst_86 = arith.constant 5.000000e-01 : f32
    %201 = vector.broadcast %cst_86 : f32 to vector<1x32xf32>
    %202 = arith.mulf %201, %200 : vector<1x32xf32>
    %cst_87 = arith.constant 0.707106769 : f32
    %203 = vector.broadcast %cst_87 : f32 to vector<1x32xf32>
    %204 = arith.mulf %200, %203 : vector<1x32xf32>
    %cst_88 = arith.constant 0.000000e+00 : f32
    %205 = vector.broadcast %cst_88 : f32 to vector<1x32xf32>
    %206 = arith.cmpf oge, %204, %205 : vector<1x32xf32>
    %cst_89 = arith.constant 1.000000e+00 : f32
    %cst_90 = arith.constant -1.000000e+00 : f32
    %207 = vector.broadcast %cst_89 : f32 to vector<1x32xf32>
    %208 = vector.broadcast %cst_90 : f32 to vector<1x32xf32>
    %209 = arith.select %206, %207, %208 : vector<1x32xi1>, vector<1x32xf32>
    %210 = math.absf %204 : vector<1x32xf32>
    %cst_91 = arith.constant 0.327591091 : f32
    %211 = vector.broadcast %cst_91 : f32 to vector<1x32xf32>
    %212 = arith.mulf %211, %210 : vector<1x32xf32>
    %cst_92 = arith.constant 1.000000e+00 : f32
    %213 = vector.broadcast %cst_92 : f32 to vector<1x32xf32>
    %214 = arith.addf %213, %212 : vector<1x32xf32>
    %cst_93 = arith.constant 1.000000e+00 : f32
    %215 = vector.broadcast %cst_93 : f32 to vector<1x32xf32>
    %216 = arith.divf %215, %214 : vector<1x32xf32>
    %cst_94 = arith.constant 1.06140542 : f32
    %217 = vector.broadcast %cst_94 : f32 to vector<1x32xf32>
    %218 = arith.mulf %217, %216 : vector<1x32xf32>
    %cst_95 = arith.constant -1.45315206 : f32
    %219 = vector.broadcast %cst_95 : f32 to vector<1x32xf32>
    %220 = arith.addf %218, %219 : vector<1x32xf32>
    %221 = arith.mulf %220, %216 : vector<1x32xf32>
    %cst_96 = arith.constant 1.42141378 : f32
    %222 = vector.broadcast %cst_96 : f32 to vector<1x32xf32>
    %223 = arith.addf %221, %222 : vector<1x32xf32>
    %224 = arith.mulf %223, %216 : vector<1x32xf32>
    %cst_97 = arith.constant -0.284496725 : f32
    %225 = vector.broadcast %cst_97 : f32 to vector<1x32xf32>
    %226 = arith.addf %224, %225 : vector<1x32xf32>
    %227 = arith.mulf %226, %216 : vector<1x32xf32>
    %cst_98 = arith.constant 0.254829586 : f32
    %228 = vector.broadcast %cst_98 : f32 to vector<1x32xf32>
    %229 = arith.addf %227, %228 : vector<1x32xf32>
    %230 = arith.mulf %229, %216 : vector<1x32xf32>
    %cst_99 = arith.constant 0.000000e+00 : f32
    %231 = vector.broadcast %cst_99 : f32 to vector<1x32xf32>
    %232 = arith.subf %231, %210 : vector<1x32xf32>
    %233 = arith.mulf %232, %210 : vector<1x32xf32>
    %234 = math.exp %233 : vector<1x32xf32>
    %235 = arith.mulf %230, %234 : vector<1x32xf32>
    %cst_100 = arith.constant 1.000000e+00 : f32
    %236 = vector.broadcast %cst_100 : f32 to vector<1x32xf32>
    %237 = arith.subf %236, %235 : vector<1x32xf32>
    %238 = arith.mulf %209, %237 : vector<1x32xf32>
    %cst_101 = arith.constant 1.000000e+00 : f32
    %239 = vector.broadcast %cst_101 : f32 to vector<1x32xf32>
    %240 = arith.addf %239, %238 : vector<1x32xf32>
    %241 = arith.mulf %202, %240 : vector<1x32xf32>
    %242 = vector.extract_strided_slice %68 {offsets = [96, 0], sizes = [32, 32], strides = [1, 1]} : vector<128x32xf32> to vector<32x32xf32>
    %cst_102 = arith.constant dense<0.000000e+00> : vector<1x32xf32>
    %243 = tpu.matmul %241, %242, %cst_102 {dimension_numbers = #tpu.dot_dimension_numbers<[1], [0], [0], [1], [0, 0, 1, 1], [], []>} : vector<1x32xf32>, vector<32x32xf32>, vector<1x32xf32> -> vector<1x32xf32>
    %244 = vector.extract_strided_slice %69 {offsets = [3, 0], sizes = [1, 32], strides = [1, 1]} : vector<4x32xf32> to vector<1x32xf32>
    %245 = arith.addf %243, %244 : vector<1x32xf32>
    %246 = arith.addf %174, %245 : vector<1x32xf32>
    %247 = vector.extract_strided_slice %67 {offsets = [4, 0], sizes = [1, 32], strides = [1, 1]} : vector<8x32xf32> to vector<1x32xf32>
    %248 = vector.extract_strided_slice %67 {offsets = [5, 0], sizes = [1, 32], strides = [1, 1]} : vector<8x32xf32> to vector<1x32xf32>
    %cst_103 = arith.constant dense<0.000000e+00> : vector<3xf32>
    %249 = vector.multi_reduction <add>, %173, %cst_103 [1] : vector<3x32xf32> to vector<3xf32>
    %250 = vector.shape_cast %249 : vector<3xf32> to vector<3x1xf32>
    %cst_104 = arith.constant 3.200000e+01 : f32
    %251 = vector.broadcast %cst_104 : f32 to vector<3x1xf32>
    %252 = arith.divf %250, %251 : vector<3x1xf32>
    %253 = vector.broadcast %252 : vector<3x1xf32> to vector<3x32xf32>
    %254 = arith.subf %173, %253 : vector<3x32xf32>
    %255 = arith.mulf %254, %254 : vector<3x32xf32>
    %cst_105 = arith.constant dense<0.000000e+00> : vector<3xf32>
    %256 = vector.multi_reduction <add>, %255, %cst_105 [1] : vector<3x32xf32> to vector<3xf32>
    %257 = vector.shape_cast %256 : vector<3xf32> to vector<3x1xf32>
    %cst_106 = arith.constant 3.200000e+01 : f32
    %258 = vector.broadcast %cst_106 : f32 to vector<3x1xf32>
    %259 = arith.divf %257, %258 : vector<3x1xf32>
    %260 = vector.broadcast %252 : vector<3x1xf32> to vector<3x32xf32>
    %261 = arith.subf %173, %260 : vector<3x32xf32>
    %cst_107 = arith.constant 9.99999974E-6 : f32
    %262 = vector.broadcast %cst_107 : f32 to vector<3x1xf32>
    %263 = arith.addf %259, %262 : vector<3x1xf32>
    %264 = math.rsqrt %263 : vector<3x1xf32>
    %265 = vector.broadcast %264 : vector<3x1xf32> to vector<3x32xf32>
    %266 = arith.mulf %261, %265 : vector<3x32xf32>
    %267 = vector.broadcast %247 : vector<1x32xf32> to vector<3x32xf32>
    %268 = arith.mulf %266, %267 : vector<3x32xf32>
    %269 = vector.broadcast %248 : vector<1x32xf32> to vector<3x32xf32>
    %270 = arith.addf %268, %269 : vector<3x32xf32>
    %271 = vector.extract_strided_slice %68 {offsets = [0, 0], sizes = [32, 32], strides = [1, 1]} : vector<128x32xf32> to vector<32x32xf32>
    %cst_108 = arith.constant dense<0.000000e+00> : vector<3x32xf32>
    %272 = tpu.matmul %270, %271, %cst_108 {dimension_numbers = #tpu.dot_dimension_numbers<[1], [0], [0], [1], [0, 0, 1, 1], [], []>} : vector<3x32xf32>, vector<32x32xf32>, vector<3x32xf32> -> vector<3x32xf32>
    %273 = vector.extract_strided_slice %69 {offsets = [0, 0], sizes = [1, 32], strides = [1, 1]} : vector<4x32xf32> to vector<1x32xf32>
    %274 = vector.broadcast %273 : vector<1x32xf32> to vector<3x32xf32>
    %275 = arith.addf %272, %274 : vector<3x32xf32>
    %cst_109 = arith.constant 5.000000e-01 : f32
    %276 = vector.broadcast %cst_109 : f32 to vector<3x32xf32>
    %277 = arith.mulf %276, %275 : vector<3x32xf32>
    %cst_110 = arith.constant 0.707106769 : f32
    %278 = vector.broadcast %cst_110 : f32 to vector<3x32xf32>
    %279 = arith.mulf %275, %278 : vector<3x32xf32>
    %cst_111 = arith.constant 0.000000e+00 : f32
    %280 = vector.broadcast %cst_111 : f32 to vector<3x32xf32>
    %281 = arith.cmpf oge, %279, %280 : vector<3x32xf32>
    %cst_112 = arith.constant 1.000000e+00 : f32
    %cst_113 = arith.constant -1.000000e+00 : f32
    %282 = vector.broadcast %cst_112 : f32 to vector<3x32xf32>
    %283 = vector.broadcast %cst_113 : f32 to vector<3x32xf32>
    %284 = arith.select %281, %282, %283 : vector<3x32xi1>, vector<3x32xf32>
    %285 = math.absf %279 : vector<3x32xf32>
    %cst_114 = arith.constant 0.327591091 : f32
    %286 = vector.broadcast %cst_114 : f32 to vector<3x32xf32>
    %287 = arith.mulf %286, %285 : vector<3x32xf32>
    %cst_115 = arith.constant 1.000000e+00 : f32
    %288 = vector.broadcast %cst_115 : f32 to vector<3x32xf32>
    %289 = arith.addf %288, %287 : vector<3x32xf32>
    %cst_116 = arith.constant 1.000000e+00 : f32
    %290 = vector.broadcast %cst_116 : f32 to vector<3x32xf32>
    %291 = arith.divf %290, %289 : vector<3x32xf32>
    %cst_117 = arith.constant 1.06140542 : f32
    %292 = vector.broadcast %cst_117 : f32 to vector<3x32xf32>
    %293 = arith.mulf %292, %291 : vector<3x32xf32>
    %cst_118 = arith.constant -1.45315206 : f32
    %294 = vector.broadcast %cst_118 : f32 to vector<3x32xf32>
    %295 = arith.addf %293, %294 : vector<3x32xf32>
    %296 = arith.mulf %295, %291 : vector<3x32xf32>
    %cst_119 = arith.constant 1.42141378 : f32
    %297 = vector.broadcast %cst_119 : f32 to vector<3x32xf32>
    %298 = arith.addf %296, %297 : vector<3x32xf32>
    %299 = arith.mulf %298, %291 : vector<3x32xf32>
    %cst_120 = arith.constant -0.284496725 : f32
    %300 = vector.broadcast %cst_120 : f32 to vector<3x32xf32>
    %301 = arith.addf %299, %300 : vector<3x32xf32>
    %302 = arith.mulf %301, %291 : vector<3x32xf32>
    %cst_121 = arith.constant 0.254829586 : f32
    %303 = vector.broadcast %cst_121 : f32 to vector<3x32xf32>
    %304 = arith.addf %302, %303 : vector<3x32xf32>
    %305 = arith.mulf %304, %291 : vector<3x32xf32>
    %cst_122 = arith.constant 0.000000e+00 : f32
    %306 = vector.broadcast %cst_122 : f32 to vector<3x32xf32>
    %307 = arith.subf %306, %285 : vector<3x32xf32>
    %308 = arith.mulf %307, %285 : vector<3x32xf32>
    %309 = math.exp %308 : vector<3x32xf32>
    %310 = arith.mulf %305, %309 : vector<3x32xf32>
    %cst_123 = arith.constant 1.000000e+00 : f32
    %311 = vector.broadcast %cst_123 : f32 to vector<3x32xf32>
    %312 = arith.subf %311, %310 : vector<3x32xf32>
    %313 = arith.mulf %284, %312 : vector<3x32xf32>
    %cst_124 = arith.constant 1.000000e+00 : f32
    %314 = vector.broadcast %cst_124 : f32 to vector<3x32xf32>
    %315 = arith.addf %314, %313 : vector<3x32xf32>
    %316 = arith.mulf %277, %315 : vector<3x32xf32>
    %317 = vector.extract_strided_slice %68 {offsets = [32, 0], sizes = [32, 32], strides = [1, 1]} : vector<128x32xf32> to vector<32x32xf32>
    %cst_125 = arith.constant dense<0.000000e+00> : vector<3x32xf32>
    %318 = tpu.matmul %316, %317, %cst_125 {dimension_numbers = #tpu.dot_dimension_numbers<[1], [0], [0], [1], [0, 0, 1, 1], [], []>} : vector<3x32xf32>, vector<32x32xf32>, vector<3x32xf32> -> vector<3x32xf32>
    %319 = vector.extract_strided_slice %69 {offsets = [1, 0], sizes = [1, 32], strides = [1, 1]} : vector<4x32xf32> to vector<1x32xf32>
    %320 = vector.broadcast %319 : vector<1x32xf32> to vector<3x32xf32>
    %321 = arith.addf %318, %320 : vector<3x32xf32>
    %322 = arith.addf %173, %321 : vector<3x32xf32>
    %323 = vector.extract_strided_slice %67 {offsets = [0, 0], sizes = [1, 32], strides = [1, 1]} : vector<8x32xf32> to vector<1x32xf32>
    %324 = vector.extract_strided_slice %67 {offsets = [1, 0], sizes = [1, 32], strides = [1, 1]} : vector<8x32xf32> to vector<1x32xf32>
    %cst_126 = arith.constant dense<0.000000e+00> : vector<3xf32>
    %325 = vector.multi_reduction <add>, %322, %cst_126 [1] : vector<3x32xf32> to vector<3xf32>
    %326 = vector.shape_cast %325 : vector<3xf32> to vector<3x1xf32>
    %cst_127 = arith.constant 3.200000e+01 : f32
    %327 = vector.broadcast %cst_127 : f32 to vector<3x1xf32>
    %328 = arith.divf %326, %327 : vector<3x1xf32>
    %329 = vector.broadcast %328 : vector<3x1xf32> to vector<3x32xf32>
    %330 = arith.subf %322, %329 : vector<3x32xf32>
    %331 = arith.mulf %330, %330 : vector<3x32xf32>
    %cst_128 = arith.constant dense<0.000000e+00> : vector<3xf32>
    %332 = vector.multi_reduction <add>, %331, %cst_128 [1] : vector<3x32xf32> to vector<3xf32>
    %333 = vector.shape_cast %332 : vector<3xf32> to vector<3x1xf32>
    %cst_129 = arith.constant 3.200000e+01 : f32
    %334 = vector.broadcast %cst_129 : f32 to vector<3x1xf32>
    %335 = arith.divf %333, %334 : vector<3x1xf32>
    %336 = vector.broadcast %328 : vector<3x1xf32> to vector<3x32xf32>
    %337 = arith.subf %322, %336 : vector<3x32xf32>
    %cst_130 = arith.constant 9.99999974E-6 : f32
    %338 = vector.broadcast %cst_130 : f32 to vector<3x1xf32>
    %339 = arith.addf %335, %338 : vector<3x1xf32>
    %340 = math.rsqrt %339 : vector<3x1xf32>
    %341 = vector.broadcast %340 : vector<3x1xf32> to vector<3x32xf32>
    %342 = arith.mulf %337, %341 : vector<3x32xf32>
    %343 = vector.broadcast %323 : vector<1x32xf32> to vector<3x32xf32>
    %344 = arith.mulf %342, %343 : vector<3x32xf32>
    %345 = vector.broadcast %324 : vector<1x32xf32> to vector<3x32xf32>
    %346 = arith.addf %344, %345 : vector<3x32xf32>
    %cst_131 = arith.constant dense<0.000000e+00> : vector<3x32xf32>
    %347 = tpu.matmul %346, %70, %cst_131 {dimension_numbers = #tpu.dot_dimension_numbers<[1], [0], [0], [1], [0, 0, 1, 1], [], []>} : vector<3x32xf32>, vector<32x32xf32>, vector<3x32xf32> -> vector<3x32xf32>
    %348 = vector.extract_strided_slice %67 {offsets = [2, 0], sizes = [1, 32], strides = [1, 1]} : vector<8x32xf32> to vector<1x32xf32>
    %349 = vector.extract_strided_slice %67 {offsets = [3, 0], sizes = [1, 32], strides = [1, 1]} : vector<8x32xf32> to vector<1x32xf32>
    %cst_132 = arith.constant dense<0.000000e+00> : vector<1xf32>
    %350 = vector.multi_reduction <add>, %246, %cst_132 [1] : vector<1x32xf32> to vector<1xf32>
    %351 = vector.shape_cast %350 : vector<1xf32> to vector<1x1xf32>
    %cst_133 = arith.constant 3.200000e+01 : f32
    %352 = vector.broadcast %cst_133 : f32 to vector<1x1xf32>
    %353 = arith.divf %351, %352 : vector<1x1xf32>
    %354 = vector.broadcast %353 : vector<1x1xf32> to vector<1x32xf32>
    %355 = arith.subf %246, %354 : vector<1x32xf32>
    %356 = arith.mulf %355, %355 : vector<1x32xf32>
    %cst_134 = arith.constant dense<0.000000e+00> : vector<1xf32>
    %357 = vector.multi_reduction <add>, %356, %cst_134 [1] : vector<1x32xf32> to vector<1xf32>
    %358 = vector.shape_cast %357 : vector<1xf32> to vector<1x1xf32>
    %cst_135 = arith.constant 3.200000e+01 : f32
    %359 = vector.broadcast %cst_135 : f32 to vector<1x1xf32>
    %360 = arith.divf %358, %359 : vector<1x1xf32>
    %361 = vector.broadcast %353 : vector<1x1xf32> to vector<1x32xf32>
    %362 = arith.subf %246, %361 : vector<1x32xf32>
    %cst_136 = arith.constant 9.99999974E-6 : f32
    %363 = vector.broadcast %cst_136 : f32 to vector<1x1xf32>
    %364 = arith.addf %360, %363 : vector<1x1xf32>
    %365 = math.rsqrt %364 : vector<1x1xf32>
    %366 = vector.broadcast %365 : vector<1x1xf32> to vector<1x32xf32>
    %367 = arith.mulf %362, %366 : vector<1x32xf32>
    %368 = arith.mulf %367, %348 : vector<1x32xf32>
    %369 = arith.addf %368, %349 : vector<1x32xf32>
    %cst_137 = arith.constant dense<0.000000e+00> : vector<1x32xf32>
    %370 = tpu.matmul %369, %71, %cst_137 {dimension_numbers = #tpu.dot_dimension_numbers<[1], [0], [0], [1], [0, 0, 1, 1], [], []>} : vector<1x32xf32>, vector<32x32xf32>, vector<1x32xf32> -> vector<1x32xf32>
    %cst_138 = arith.constant dense<0.000000e+00> : vector<3x32xf32>
    %371 = tpu.matmul %168, %66, %cst_138 {dimension_numbers = #tpu.dot_dimension_numbers<[1], [0], [0], [1], [0, 0, 1, 1], [], []>} : vector<3x2xf32>, vector<2x32xf32>, vector<3x32xf32> -> vector<3x32xf32>
    %cst_139 = arith.constant 0.000000e+00 : f32
    %372 = vector.broadcast %cst_139 : f32 to vector<3x32xf32>
    %373 = arith.subf %372, %371 : vector<3x32xf32>
    %374 = tpu.concatenate %72, %72, %370, %72 in 1 : vector<1x32xf32>, vector<1x32xf32>, vector<1x32xf32>, vector<1x32xf32> -> vector<1x128xf32>
    %375 = tpu.concatenate %347, %73, %73, %73 in 1 : vector<3x32xf32>, vector<3x32xf32>, vector<3x32xf32>, vector<3x32xf32> -> vector<3x128xf32>
    %376 = tpu.concatenate %374, %375 in 0 : vector<1x128xf32>, vector<3x128xf32> -> vector<4x128xf32>
    %cst_140 = arith.constant dense<0.000000e+00> : vector<4x256xf32>
    %377 = tpu.matmul %376, %37, %cst_140 {dimension_numbers = #tpu.dot_dimension_numbers<[1], [1], [0], [0], [0, 0, 1, 0], [], []>} : vector<4x128xf32>, vector<256x128xf32>, vector<4x256xf32> -> vector<4x256xf32>
    %378 = arith.mulf %347, %373 : vector<3x32xf32>
    %cst_141 = arith.constant dense<0.000000e+00> : vector<3xf32>
    %379 = vector.multi_reduction <add>, %378, %cst_141 [1] : vector<3x32xf32> to vector<3xf32>
    %380 = vector.shape_cast %379 : vector<3xf32> to vector<3x1xf32>
    %cst_142 = arith.constant 0.000000e+00 : f32
    %381 = vector.broadcast %cst_142 : f32 to vector<1x1xf32>
    %382 = tpu.concatenate %381, %380 in 0 : vector<1x1xf32>, vector<3x1xf32> -> vector<4x1xf32>
    %383 = vector.broadcast %382 : vector<4x1xf32> to vector<4x256xf32>
    %384 = arith.addf %377, %383 : vector<4x256xf32>
    %cst_143 = arith.constant 0.176776692 : f32
    %385 = vector.broadcast %cst_143 : f32 to vector<4x256xf32>
    %386 = arith.mulf %384, %385 : vector<4x256xf32>
    %cst_144 = arith.constant dense<0xFF800000> : vector<256xf32>
    %387 = vector.multi_reduction <maximumf>, %386, %cst_144 [0] : vector<4x256xf32> to vector<256xf32>
    %388 = vector.shape_cast %387 : vector<256xf32> to vector<1x256xf32>
    %389 = vector.broadcast %388 : vector<1x256xf32> to vector<4x256xf32>
    %390 = arith.subf %386, %389 : vector<4x256xf32>
    %391 = math.exp %390 : vector<4x256xf32>
    %cst_145 = arith.constant dense<0.000000e+00> : vector<256xf32>
    %392 = vector.multi_reduction <add>, %391, %cst_145 [0] : vector<4x256xf32> to vector<256xf32>
    %393 = vector.shape_cast %392 : vector<256xf32> to vector<1x256xf32>
    %394 = vector.broadcast %393 : vector<1x256xf32> to vector<4x256xf32>
    %395 = arith.divf %391, %394 : vector<4x256xf32>
    %cst_146 = arith.constant 9.99999993E-9 : f32
    %396 = vector.broadcast %cst_146 : f32 to vector<4x256xf32>
    %397 = arith.addf %395, %396 : vector<4x256xf32>
    %398 = vector.extract_strided_slice %397 {offsets = [1, 0], sizes = [3, 256], strides = [1, 1]} : vector<4x256xf32> to vector<3x256xf32>
    %399 = vector.extract_strided_slice %397 {offsets = [0, 0], sizes = [1, 256], strides = [1, 1]} : vector<4x256xf32> to vector<1x256xf32>
    %cst_147 = arith.constant dense<0.000000e+00> : vector<3xf32>
    %400 = vector.multi_reduction <add>, %398, %cst_147 [1] : vector<3x256xf32> to vector<3xf32>
    %401 = vector.shape_cast %400 : vector<3xf32> to vector<3x1xf32>
    %402 = vector.broadcast %401 : vector<3x1xf32> to vector<3x256xf32>
    %403 = arith.divf %398, %402 : vector<3x256xf32>
    %cst_148 = arith.constant dense<0.000000e+00> : vector<1xf32>
    %404 = vector.multi_reduction <add>, %399, %cst_148 [1] : vector<1x256xf32> to vector<1xf32>
    %405 = vector.shape_cast %404 : vector<1xf32> to vector<1x1xf32>
    %406 = vector.broadcast %405 : vector<1x1xf32> to vector<1x256xf32>
    %407 = arith.divf %399, %406 : vector<1x256xf32>
    %408 = tpu.concatenate %407, %403 in 0 : vector<1x256xf32>, vector<3x256xf32> -> vector<4x256xf32>
    %cst_149 = arith.constant dense<0.000000e+00> : vector<3x2xf32>
    %409 = tpu.matmul %403, %65, %cst_149 {dimension_numbers = #tpu.dot_dimension_numbers<[1], [0], [0], [1], [0, 0, 1, 1], [], []>} : vector<3x256xf32>, vector<256x2xf32>, vector<3x2xf32> -> vector<3x2xf32>
    %cst_150 = arith.constant 5.000000e-01 : f32
    %410 = vector.broadcast %cst_150 : f32 to vector<3x2xf32>
    %411 = arith.mulf %409, %410 : vector<3x2xf32>
    %cst_151 = arith.constant 5.000000e-01 : f32
    %412 = vector.broadcast %cst_151 : f32 to vector<3x2xf32>
    %413 = arith.mulf %168, %412 : vector<3x2xf32>
    %414 = arith.addf %411, %413 : vector<3x2xf32>
    %cst_152 = arith.constant dense<0.000000e+00> : vector<4x128xf32>
    %415 = tpu.matmul %408, %37, %cst_152 {dimension_numbers = #tpu.dot_dimension_numbers<[1], [0], [0], [1], [0, 0, 1, 1], [], []>} : vector<4x256xf32>, vector<256x128xf32>, vector<4x128xf32> -> vector<4x128xf32>
    %416 = vector.extract_strided_slice %415 {offsets = [1, 32], sizes = [3, 32], strides = [1, 1]} : vector<4x128xf32> to vector<3x32xf32>
    %417 = arith.addf %416, %373 : vector<3x32xf32>
    %418 = vector.extract_strided_slice %415 {offsets = [0, 96], sizes = [1, 32], strides = [1, 1]} : vector<4x128xf32> to vector<1x32xf32>
    %419 = arith.addf %322, %417 : vector<3x32xf32>
    %420 = arith.addf %246, %418 : vector<1x32xf32>
    %421 = vector.extract_strided_slice %67 {offsets = [6, 0], sizes = [1, 32], strides = [1, 1]} : vector<8x32xf32> to vector<1x32xf32>
    %422 = vector.extract_strided_slice %67 {offsets = [7, 0], sizes = [1, 32], strides = [1, 1]} : vector<8x32xf32> to vector<1x32xf32>
    %cst_153 = arith.constant dense<0.000000e+00> : vector<1xf32>
    %423 = vector.multi_reduction <add>, %420, %cst_153 [1] : vector<1x32xf32> to vector<1xf32>
    %424 = vector.shape_cast %423 : vector<1xf32> to vector<1x1xf32>
    %cst_154 = arith.constant 3.200000e+01 : f32
    %425 = vector.broadcast %cst_154 : f32 to vector<1x1xf32>
    %426 = arith.divf %424, %425 : vector<1x1xf32>
    %427 = vector.broadcast %426 : vector<1x1xf32> to vector<1x32xf32>
    %428 = arith.subf %420, %427 : vector<1x32xf32>
    %429 = arith.mulf %428, %428 : vector<1x32xf32>
    %cst_155 = arith.constant dense<0.000000e+00> : vector<1xf32>
    %430 = vector.multi_reduction <add>, %429, %cst_155 [1] : vector<1x32xf32> to vector<1xf32>
    %431 = vector.shape_cast %430 : vector<1xf32> to vector<1x1xf32>
    %cst_156 = arith.constant 3.200000e+01 : f32
    %432 = vector.broadcast %cst_156 : f32 to vector<1x1xf32>
    %433 = arith.divf %431, %432 : vector<1x1xf32>
    %434 = vector.broadcast %426 : vector<1x1xf32> to vector<1x32xf32>
    %435 = arith.subf %420, %434 : vector<1x32xf32>
    %cst_157 = arith.constant 9.99999974E-6 : f32
    %436 = vector.broadcast %cst_157 : f32 to vector<1x1xf32>
    %437 = arith.addf %433, %436 : vector<1x1xf32>
    %438 = math.rsqrt %437 : vector<1x1xf32>
    %439 = vector.broadcast %438 : vector<1x1xf32> to vector<1x32xf32>
    %440 = arith.mulf %435, %439 : vector<1x32xf32>
    %441 = arith.mulf %440, %421 : vector<1x32xf32>
    %442 = arith.addf %441, %422 : vector<1x32xf32>
    %443 = vector.extract_strided_slice %68 {offsets = [64, 0], sizes = [32, 32], strides = [1, 1]} : vector<128x32xf32> to vector<32x32xf32>
    %cst_158 = arith.constant dense<0.000000e+00> : vector<1x32xf32>
    %444 = tpu.matmul %442, %443, %cst_158 {dimension_numbers = #tpu.dot_dimension_numbers<[1], [0], [0], [1], [0, 0, 1, 1], [], []>} : vector<1x32xf32>, vector<32x32xf32>, vector<1x32xf32> -> vector<1x32xf32>
    %445 = vector.extract_strided_slice %69 {offsets = [2, 0], sizes = [1, 32], strides = [1, 1]} : vector<4x32xf32> to vector<1x32xf32>
    %446 = arith.addf %444, %445 : vector<1x32xf32>
    %cst_159 = arith.constant 5.000000e-01 : f32
    %447 = vector.broadcast %cst_159 : f32 to vector<1x32xf32>
    %448 = arith.mulf %447, %446 : vector<1x32xf32>
    %cst_160 = arith.constant 0.707106769 : f32
    %449 = vector.broadcast %cst_160 : f32 to vector<1x32xf32>
    %450 = arith.mulf %446, %449 : vector<1x32xf32>
    %cst_161 = arith.constant 0.000000e+00 : f32
    %451 = vector.broadcast %cst_161 : f32 to vector<1x32xf32>
    %452 = arith.cmpf oge, %450, %451 : vector<1x32xf32>
    %cst_162 = arith.constant 1.000000e+00 : f32
    %cst_163 = arith.constant -1.000000e+00 : f32
    %453 = vector.broadcast %cst_162 : f32 to vector<1x32xf32>
    %454 = vector.broadcast %cst_163 : f32 to vector<1x32xf32>
    %455 = arith.select %452, %453, %454 : vector<1x32xi1>, vector<1x32xf32>
    %456 = math.absf %450 : vector<1x32xf32>
    %cst_164 = arith.constant 0.327591091 : f32
    %457 = vector.broadcast %cst_164 : f32 to vector<1x32xf32>
    %458 = arith.mulf %457, %456 : vector<1x32xf32>
    %cst_165 = arith.constant 1.000000e+00 : f32
    %459 = vector.broadcast %cst_165 : f32 to vector<1x32xf32>
    %460 = arith.addf %459, %458 : vector<1x32xf32>
    %cst_166 = arith.constant 1.000000e+00 : f32
    %461 = vector.broadcast %cst_166 : f32 to vector<1x32xf32>
    %462 = arith.divf %461, %460 : vector<1x32xf32>
    %cst_167 = arith.constant 1.06140542 : f32
    %463 = vector.broadcast %cst_167 : f32 to vector<1x32xf32>
    %464 = arith.mulf %463, %462 : vector<1x32xf32>
    %cst_168 = arith.constant -1.45315206 : f32
    %465 = vector.broadcast %cst_168 : f32 to vector<1x32xf32>
    %466 = arith.addf %464, %465 : vector<1x32xf32>
    %467 = arith.mulf %466, %462 : vector<1x32xf32>
    %cst_169 = arith.constant 1.42141378 : f32
    %468 = vector.broadcast %cst_169 : f32 to vector<1x32xf32>
    %469 = arith.addf %467, %468 : vector<1x32xf32>
    %470 = arith.mulf %469, %462 : vector<1x32xf32>
    %cst_170 = arith.constant -0.284496725 : f32
    %471 = vector.broadcast %cst_170 : f32 to vector<1x32xf32>
    %472 = arith.addf %470, %471 : vector<1x32xf32>
    %473 = arith.mulf %472, %462 : vector<1x32xf32>
    %cst_171 = arith.constant 0.254829586 : f32
    %474 = vector.broadcast %cst_171 : f32 to vector<1x32xf32>
    %475 = arith.addf %473, %474 : vector<1x32xf32>
    %476 = arith.mulf %475, %462 : vector<1x32xf32>
    %cst_172 = arith.constant 0.000000e+00 : f32
    %477 = vector.broadcast %cst_172 : f32 to vector<1x32xf32>
    %478 = arith.subf %477, %456 : vector<1x32xf32>
    %479 = arith.mulf %478, %456 : vector<1x32xf32>
    %480 = math.exp %479 : vector<1x32xf32>
    %481 = arith.mulf %476, %480 : vector<1x32xf32>
    %cst_173 = arith.constant 1.000000e+00 : f32
    %482 = vector.broadcast %cst_173 : f32 to vector<1x32xf32>
    %483 = arith.subf %482, %481 : vector<1x32xf32>
    %484 = arith.mulf %455, %483 : vector<1x32xf32>
    %cst_174 = arith.constant 1.000000e+00 : f32
    %485 = vector.broadcast %cst_174 : f32 to vector<1x32xf32>
    %486 = arith.addf %485, %484 : vector<1x32xf32>
    %487 = arith.mulf %448, %486 : vector<1x32xf32>
    %488 = vector.extract_strided_slice %68 {offsets = [96, 0], sizes = [32, 32], strides = [1, 1]} : vector<128x32xf32> to vector<32x32xf32>
    %cst_175 = arith.constant dense<0.000000e+00> : vector<1x32xf32>
    %489 = tpu.matmul %487, %488, %cst_175 {dimension_numbers = #tpu.dot_dimension_numbers<[1], [0], [0], [1], [0, 0, 1, 1], [], []>} : vector<1x32xf32>, vector<32x32xf32>, vector<1x32xf32> -> vector<1x32xf32>
    %490 = vector.extract_strided_slice %69 {offsets = [3, 0], sizes = [1, 32], strides = [1, 1]} : vector<4x32xf32> to vector<1x32xf32>
    %491 = arith.addf %489, %490 : vector<1x32xf32>
    %492 = arith.addf %420, %491 : vector<1x32xf32>
    %493 = vector.extract_strided_slice %67 {offsets = [4, 0], sizes = [1, 32], strides = [1, 1]} : vector<8x32xf32> to vector<1x32xf32>
    %494 = vector.extract_strided_slice %67 {offsets = [5, 0], sizes = [1, 32], strides = [1, 1]} : vector<8x32xf32> to vector<1x32xf32>
    %cst_176 = arith.constant dense<0.000000e+00> : vector<3xf32>
    %495 = vector.multi_reduction <add>, %419, %cst_176 [1] : vector<3x32xf32> to vector<3xf32>
    %496 = vector.shape_cast %495 : vector<3xf32> to vector<3x1xf32>
    %cst_177 = arith.constant 3.200000e+01 : f32
    %497 = vector.broadcast %cst_177 : f32 to vector<3x1xf32>
    %498 = arith.divf %496, %497 : vector<3x1xf32>
    %499 = vector.broadcast %498 : vector<3x1xf32> to vector<3x32xf32>
    %500 = arith.subf %419, %499 : vector<3x32xf32>
    %501 = arith.mulf %500, %500 : vector<3x32xf32>
    %cst_178 = arith.constant dense<0.000000e+00> : vector<3xf32>
    %502 = vector.multi_reduction <add>, %501, %cst_178 [1] : vector<3x32xf32> to vector<3xf32>
    %503 = vector.shape_cast %502 : vector<3xf32> to vector<3x1xf32>
    %cst_179 = arith.constant 3.200000e+01 : f32
    %504 = vector.broadcast %cst_179 : f32 to vector<3x1xf32>
    %505 = arith.divf %503, %504 : vector<3x1xf32>
    %506 = vector.broadcast %498 : vector<3x1xf32> to vector<3x32xf32>
    %507 = arith.subf %419, %506 : vector<3x32xf32>
    %cst_180 = arith.constant 9.99999974E-6 : f32
    %508 = vector.broadcast %cst_180 : f32 to vector<3x1xf32>
    %509 = arith.addf %505, %508 : vector<3x1xf32>
    %510 = math.rsqrt %509 : vector<3x1xf32>
    %511 = vector.broadcast %510 : vector<3x1xf32> to vector<3x32xf32>
    %512 = arith.mulf %507, %511 : vector<3x32xf32>
    %513 = vector.broadcast %493 : vector<1x32xf32> to vector<3x32xf32>
    %514 = arith.mulf %512, %513 : vector<3x32xf32>
    %515 = vector.broadcast %494 : vector<1x32xf32> to vector<3x32xf32>
    %516 = arith.addf %514, %515 : vector<3x32xf32>
    %517 = vector.extract_strided_slice %68 {offsets = [0, 0], sizes = [32, 32], strides = [1, 1]} : vector<128x32xf32> to vector<32x32xf32>
    %cst_181 = arith.constant dense<0.000000e+00> : vector<3x32xf32>
    %518 = tpu.matmul %516, %517, %cst_181 {dimension_numbers = #tpu.dot_dimension_numbers<[1], [0], [0], [1], [0, 0, 1, 1], [], []>} : vector<3x32xf32>, vector<32x32xf32>, vector<3x32xf32> -> vector<3x32xf32>
    %519 = vector.extract_strided_slice %69 {offsets = [0, 0], sizes = [1, 32], strides = [1, 1]} : vector<4x32xf32> to vector<1x32xf32>
    %520 = vector.broadcast %519 : vector<1x32xf32> to vector<3x32xf32>
    %521 = arith.addf %518, %520 : vector<3x32xf32>
    %cst_182 = arith.constant 5.000000e-01 : f32
    %522 = vector.broadcast %cst_182 : f32 to vector<3x32xf32>
    %523 = arith.mulf %522, %521 : vector<3x32xf32>
    %cst_183 = arith.constant 0.707106769 : f32
    %524 = vector.broadcast %cst_183 : f32 to vector<3x32xf32>
    %525 = arith.mulf %521, %524 : vector<3x32xf32>
    %cst_184 = arith.constant 0.000000e+00 : f32
    %526 = vector.broadcast %cst_184 : f32 to vector<3x32xf32>
    %527 = arith.cmpf oge, %525, %526 : vector<3x32xf32>
    %cst_185 = arith.constant 1.000000e+00 : f32
    %cst_186 = arith.constant -1.000000e+00 : f32
    %528 = vector.broadcast %cst_185 : f32 to vector<3x32xf32>
    %529 = vector.broadcast %cst_186 : f32 to vector<3x32xf32>
    %530 = arith.select %527, %528, %529 : vector<3x32xi1>, vector<3x32xf32>
    %531 = math.absf %525 : vector<3x32xf32>
    %cst_187 = arith.constant 0.327591091 : f32
    %532 = vector.broadcast %cst_187 : f32 to vector<3x32xf32>
    %533 = arith.mulf %532, %531 : vector<3x32xf32>
    %cst_188 = arith.constant 1.000000e+00 : f32
    %534 = vector.broadcast %cst_188 : f32 to vector<3x32xf32>
    %535 = arith.addf %534, %533 : vector<3x32xf32>
    %cst_189 = arith.constant 1.000000e+00 : f32
    %536 = vector.broadcast %cst_189 : f32 to vector<3x32xf32>
    %537 = arith.divf %536, %535 : vector<3x32xf32>
    %cst_190 = arith.constant 1.06140542 : f32
    %538 = vector.broadcast %cst_190 : f32 to vector<3x32xf32>
    %539 = arith.mulf %538, %537 : vector<3x32xf32>
    %cst_191 = arith.constant -1.45315206 : f32
    %540 = vector.broadcast %cst_191 : f32 to vector<3x32xf32>
    %541 = arith.addf %539, %540 : vector<3x32xf32>
    %542 = arith.mulf %541, %537 : vector<3x32xf32>
    %cst_192 = arith.constant 1.42141378 : f32
    %543 = vector.broadcast %cst_192 : f32 to vector<3x32xf32>
    %544 = arith.addf %542, %543 : vector<3x32xf32>
    %545 = arith.mulf %544, %537 : vector<3x32xf32>
    %cst_193 = arith.constant -0.284496725 : f32
    %546 = vector.broadcast %cst_193 : f32 to vector<3x32xf32>
    %547 = arith.addf %545, %546 : vector<3x32xf32>
    %548 = arith.mulf %547, %537 : vector<3x32xf32>
    %cst_194 = arith.constant 0.254829586 : f32
    %549 = vector.broadcast %cst_194 : f32 to vector<3x32xf32>
    %550 = arith.addf %548, %549 : vector<3x32xf32>
    %551 = arith.mulf %550, %537 : vector<3x32xf32>
    %cst_195 = arith.constant 0.000000e+00 : f32
    %552 = vector.broadcast %cst_195 : f32 to vector<3x32xf32>
    %553 = arith.subf %552, %531 : vector<3x32xf32>
    %554 = arith.mulf %553, %531 : vector<3x32xf32>
    %555 = math.exp %554 : vector<3x32xf32>
    %556 = arith.mulf %551, %555 : vector<3x32xf32>
    %cst_196 = arith.constant 1.000000e+00 : f32
    %557 = vector.broadcast %cst_196 : f32 to vector<3x32xf32>
    %558 = arith.subf %557, %556 : vector<3x32xf32>
    %559 = arith.mulf %530, %558 : vector<3x32xf32>
    %cst_197 = arith.constant 1.000000e+00 : f32
    %560 = vector.broadcast %cst_197 : f32 to vector<3x32xf32>
    %561 = arith.addf %560, %559 : vector<3x32xf32>
    %562 = arith.mulf %523, %561 : vector<3x32xf32>
    %563 = vector.extract_strided_slice %68 {offsets = [32, 0], sizes = [32, 32], strides = [1, 1]} : vector<128x32xf32> to vector<32x32xf32>
    %cst_198 = arith.constant dense<0.000000e+00> : vector<3x32xf32>
    %564 = tpu.matmul %562, %563, %cst_198 {dimension_numbers = #tpu.dot_dimension_numbers<[1], [0], [0], [1], [0, 0, 1, 1], [], []>} : vector<3x32xf32>, vector<32x32xf32>, vector<3x32xf32> -> vector<3x32xf32>
    %565 = vector.extract_strided_slice %69 {offsets = [1, 0], sizes = [1, 32], strides = [1, 1]} : vector<4x32xf32> to vector<1x32xf32>
    %566 = vector.broadcast %565 : vector<1x32xf32> to vector<3x32xf32>
    %567 = arith.addf %564, %566 : vector<3x32xf32>
    %568 = arith.addf %419, %567 : vector<3x32xf32>
    %569 = vector.extract_strided_slice %67 {offsets = [0, 0], sizes = [1, 32], strides = [1, 1]} : vector<8x32xf32> to vector<1x32xf32>
    %570 = vector.extract_strided_slice %67 {offsets = [1, 0], sizes = [1, 32], strides = [1, 1]} : vector<8x32xf32> to vector<1x32xf32>
    %cst_199 = arith.constant dense<0.000000e+00> : vector<3xf32>
    %571 = vector.multi_reduction <add>, %568, %cst_199 [1] : vector<3x32xf32> to vector<3xf32>
    %572 = vector.shape_cast %571 : vector<3xf32> to vector<3x1xf32>
    %cst_200 = arith.constant 3.200000e+01 : f32
    %573 = vector.broadcast %cst_200 : f32 to vector<3x1xf32>
    %574 = arith.divf %572, %573 : vector<3x1xf32>
    %575 = vector.broadcast %574 : vector<3x1xf32> to vector<3x32xf32>
    %576 = arith.subf %568, %575 : vector<3x32xf32>
    %577 = arith.mulf %576, %576 : vector<3x32xf32>
    %cst_201 = arith.constant dense<0.000000e+00> : vector<3xf32>
    %578 = vector.multi_reduction <add>, %577, %cst_201 [1] : vector<3x32xf32> to vector<3xf32>
    %579 = vector.shape_cast %578 : vector<3xf32> to vector<3x1xf32>
    %cst_202 = arith.constant 3.200000e+01 : f32
    %580 = vector.broadcast %cst_202 : f32 to vector<3x1xf32>
    %581 = arith.divf %579, %580 : vector<3x1xf32>
    %582 = vector.broadcast %574 : vector<3x1xf32> to vector<3x32xf32>
    %583 = arith.subf %568, %582 : vector<3x32xf32>
    %cst_203 = arith.constant 9.99999974E-6 : f32
    %584 = vector.broadcast %cst_203 : f32 to vector<3x1xf32>
    %585 = arith.addf %581, %584 : vector<3x1xf32>
    %586 = math.rsqrt %585 : vector<3x1xf32>
    %587 = vector.broadcast %586 : vector<3x1xf32> to vector<3x32xf32>
    %588 = arith.mulf %583, %587 : vector<3x32xf32>
    %589 = vector.broadcast %569 : vector<1x32xf32> to vector<3x32xf32>
    %590 = arith.mulf %588, %589 : vector<3x32xf32>
    %591 = vector.broadcast %570 : vector<1x32xf32> to vector<3x32xf32>
    %592 = arith.addf %590, %591 : vector<3x32xf32>
    %cst_204 = arith.constant dense<0.000000e+00> : vector<3x32xf32>
    %593 = tpu.matmul %592, %70, %cst_204 {dimension_numbers = #tpu.dot_dimension_numbers<[1], [0], [0], [1], [0, 0, 1, 1], [], []>} : vector<3x32xf32>, vector<32x32xf32>, vector<3x32xf32> -> vector<3x32xf32>
    %594 = vector.extract_strided_slice %67 {offsets = [2, 0], sizes = [1, 32], strides = [1, 1]} : vector<8x32xf32> to vector<1x32xf32>
    %595 = vector.extract_strided_slice %67 {offsets = [3, 0], sizes = [1, 32], strides = [1, 1]} : vector<8x32xf32> to vector<1x32xf32>
    %cst_205 = arith.constant dense<0.000000e+00> : vector<1xf32>
    %596 = vector.multi_reduction <add>, %492, %cst_205 [1] : vector<1x32xf32> to vector<1xf32>
    %597 = vector.shape_cast %596 : vector<1xf32> to vector<1x1xf32>
    %cst_206 = arith.constant 3.200000e+01 : f32
    %598 = vector.broadcast %cst_206 : f32 to vector<1x1xf32>
    %599 = arith.divf %597, %598 : vector<1x1xf32>
    %600 = vector.broadcast %599 : vector<1x1xf32> to vector<1x32xf32>
    %601 = arith.subf %492, %600 : vector<1x32xf32>
    %602 = arith.mulf %601, %601 : vector<1x32xf32>
    %cst_207 = arith.constant dense<0.000000e+00> : vector<1xf32>
    %603 = vector.multi_reduction <add>, %602, %cst_207 [1] : vector<1x32xf32> to vector<1xf32>
    %604 = vector.shape_cast %603 : vector<1xf32> to vector<1x1xf32>
    %cst_208 = arith.constant 3.200000e+01 : f32
    %605 = vector.broadcast %cst_208 : f32 to vector<1x1xf32>
    %606 = arith.divf %604, %605 : vector<1x1xf32>
    %607 = vector.broadcast %599 : vector<1x1xf32> to vector<1x32xf32>
    %608 = arith.subf %492, %607 : vector<1x32xf32>
    %cst_209 = arith.constant 9.99999974E-6 : f32
    %609 = vector.broadcast %cst_209 : f32 to vector<1x1xf32>
    %610 = arith.addf %606, %609 : vector<1x1xf32>
    %611 = math.rsqrt %610 : vector<1x1xf32>
    %612 = vector.broadcast %611 : vector<1x1xf32> to vector<1x32xf32>
    %613 = arith.mulf %608, %612 : vector<1x32xf32>
    %614 = arith.mulf %613, %594 : vector<1x32xf32>
    %615 = arith.addf %614, %595 : vector<1x32xf32>
    %cst_210 = arith.constant dense<0.000000e+00> : vector<1x32xf32>
    %616 = tpu.matmul %615, %71, %cst_210 {dimension_numbers = #tpu.dot_dimension_numbers<[1], [0], [0], [1], [0, 0, 1, 1], [], []>} : vector<1x32xf32>, vector<32x32xf32>, vector<1x32xf32> -> vector<1x32xf32>
    %cst_211 = arith.constant dense<0.000000e+00> : vector<3x32xf32>
    %617 = tpu.matmul %414, %66, %cst_211 {dimension_numbers = #tpu.dot_dimension_numbers<[1], [0], [0], [1], [0, 0, 1, 1], [], []>} : vector<3x2xf32>, vector<2x32xf32>, vector<3x32xf32> -> vector<3x32xf32>
    %cst_212 = arith.constant 0.000000e+00 : f32
    %618 = vector.broadcast %cst_212 : f32 to vector<3x32xf32>
    %619 = arith.subf %618, %617 : vector<3x32xf32>
    %620 = tpu.concatenate %72, %72, %616, %72 in 1 : vector<1x32xf32>, vector<1x32xf32>, vector<1x32xf32>, vector<1x32xf32> -> vector<1x128xf32>
    %621 = tpu.concatenate %593, %73, %73, %73 in 1 : vector<3x32xf32>, vector<3x32xf32>, vector<3x32xf32>, vector<3x32xf32> -> vector<3x128xf32>
    %622 = tpu.concatenate %620, %621 in 0 : vector<1x128xf32>, vector<3x128xf32> -> vector<4x128xf32>
    %cst_213 = arith.constant dense<0.000000e+00> : vector<4x256xf32>
    %623 = tpu.matmul %622, %37, %cst_213 {dimension_numbers = #tpu.dot_dimension_numbers<[1], [1], [0], [0], [0, 0, 1, 0], [], []>} : vector<4x128xf32>, vector<256x128xf32>, vector<4x256xf32> -> vector<4x256xf32>
    %624 = arith.mulf %593, %619 : vector<3x32xf32>
    %cst_214 = arith.constant dense<0.000000e+00> : vector<3xf32>
    %625 = vector.multi_reduction <add>, %624, %cst_214 [1] : vector<3x32xf32> to vector<3xf32>
    %626 = vector.shape_cast %625 : vector<3xf32> to vector<3x1xf32>
    %cst_215 = arith.constant 0.000000e+00 : f32
    %627 = vector.broadcast %cst_215 : f32 to vector<1x1xf32>
    %628 = tpu.concatenate %627, %626 in 0 : vector<1x1xf32>, vector<3x1xf32> -> vector<4x1xf32>
    %629 = vector.broadcast %628 : vector<4x1xf32> to vector<4x256xf32>
    %630 = arith.addf %623, %629 : vector<4x256xf32>
    %cst_216 = arith.constant 0.176776692 : f32
    %631 = vector.broadcast %cst_216 : f32 to vector<4x256xf32>
    %632 = arith.mulf %630, %631 : vector<4x256xf32>
    %cst_217 = arith.constant dense<0xFF800000> : vector<256xf32>
    %633 = vector.multi_reduction <maximumf>, %632, %cst_217 [0] : vector<4x256xf32> to vector<256xf32>
    %634 = vector.shape_cast %633 : vector<256xf32> to vector<1x256xf32>
    %635 = vector.broadcast %634 : vector<1x256xf32> to vector<4x256xf32>
    %636 = arith.subf %632, %635 : vector<4x256xf32>
    %637 = math.exp %636 : vector<4x256xf32>
    %cst_218 = arith.constant dense<0.000000e+00> : vector<256xf32>
    %638 = vector.multi_reduction <add>, %637, %cst_218 [0] : vector<4x256xf32> to vector<256xf32>
    %639 = vector.shape_cast %638 : vector<256xf32> to vector<1x256xf32>
    %640 = vector.broadcast %639 : vector<1x256xf32> to vector<4x256xf32>
    %641 = arith.divf %637, %640 : vector<4x256xf32>
    %cst_219 = arith.constant 9.99999993E-9 : f32
    %642 = vector.broadcast %cst_219 : f32 to vector<4x256xf32>
    %643 = arith.addf %641, %642 : vector<4x256xf32>
    %644 = vector.extract_strided_slice %643 {offsets = [1, 0], sizes = [3, 256], strides = [1, 1]} : vector<4x256xf32> to vector<3x256xf32>
    %645 = vector.extract_strided_slice %643 {offsets = [0, 0], sizes = [1, 256], strides = [1, 1]} : vector<4x256xf32> to vector<1x256xf32>
    %cst_220 = arith.constant dense<0.000000e+00> : vector<3xf32>
    %646 = vector.multi_reduction <add>, %644, %cst_220 [1] : vector<3x256xf32> to vector<3xf32>
    %647 = vector.shape_cast %646 : vector<3xf32> to vector<3x1xf32>
    %648 = vector.broadcast %647 : vector<3x1xf32> to vector<3x256xf32>
    %649 = arith.divf %644, %648 : vector<3x256xf32>
    %cst_221 = arith.constant dense<0.000000e+00> : vector<1xf32>
    %650 = vector.multi_reduction <add>, %645, %cst_221 [1] : vector<1x256xf32> to vector<1xf32>
    %651 = vector.shape_cast %650 : vector<1xf32> to vector<1x1xf32>
    %652 = vector.broadcast %651 : vector<1x1xf32> to vector<1x256xf32>
    %653 = arith.divf %645, %652 : vector<1x256xf32>
    %654 = tpu.concatenate %653, %649 in 0 : vector<1x256xf32>, vector<3x256xf32> -> vector<4x256xf32>
    %cst_222 = arith.constant dense<0.000000e+00> : vector<3x2xf32>
    %655 = tpu.matmul %649, %65, %cst_222 {dimension_numbers = #tpu.dot_dimension_numbers<[1], [0], [0], [1], [0, 0, 1, 1], [], []>} : vector<3x256xf32>, vector<256x2xf32>, vector<3x2xf32> -> vector<3x2xf32>
    %cst_223 = arith.constant 5.000000e-01 : f32
    %656 = vector.broadcast %cst_223 : f32 to vector<3x2xf32>
    %657 = arith.mulf %655, %656 : vector<3x2xf32>
    %cst_224 = arith.constant 5.000000e-01 : f32
    %658 = vector.broadcast %cst_224 : f32 to vector<3x2xf32>
    %659 = arith.mulf %414, %658 : vector<3x2xf32>
    %660 = arith.addf %657, %659 : vector<3x2xf32>
    %cst_225 = arith.constant dense<0.000000e+00> : vector<4x128xf32>
    %661 = tpu.matmul %654, %37, %cst_225 {dimension_numbers = #tpu.dot_dimension_numbers<[1], [0], [0], [1], [0, 0, 1, 1], [], []>} : vector<4x256xf32>, vector<256x128xf32>, vector<4x128xf32> -> vector<4x128xf32>
    %662 = vector.extract_strided_slice %661 {offsets = [1, 32], sizes = [3, 32], strides = [1, 1]} : vector<4x128xf32> to vector<3x32xf32>
    %663 = arith.addf %662, %619 : vector<3x32xf32>
    %664 = vector.extract_strided_slice %661 {offsets = [0, 96], sizes = [1, 32], strides = [1, 1]} : vector<4x128xf32> to vector<1x32xf32>
    %665 = arith.addf %568, %663 : vector<3x32xf32>
    %666 = arith.addf %492, %664 : vector<1x32xf32>
    %667 = vector.extract_strided_slice %67 {offsets = [6, 0], sizes = [1, 32], strides = [1, 1]} : vector<8x32xf32> to vector<1x32xf32>
    %668 = vector.extract_strided_slice %67 {offsets = [7, 0], sizes = [1, 32], strides = [1, 1]} : vector<8x32xf32> to vector<1x32xf32>
    %cst_226 = arith.constant dense<0.000000e+00> : vector<1xf32>
    %669 = vector.multi_reduction <add>, %666, %cst_226 [1] : vector<1x32xf32> to vector<1xf32>
    %670 = vector.shape_cast %669 : vector<1xf32> to vector<1x1xf32>
    %cst_227 = arith.constant 3.200000e+01 : f32
    %671 = vector.broadcast %cst_227 : f32 to vector<1x1xf32>
    %672 = arith.divf %670, %671 : vector<1x1xf32>
    %673 = vector.broadcast %672 : vector<1x1xf32> to vector<1x32xf32>
    %674 = arith.subf %666, %673 : vector<1x32xf32>
    %675 = arith.mulf %674, %674 : vector<1x32xf32>
    %cst_228 = arith.constant dense<0.000000e+00> : vector<1xf32>
    %676 = vector.multi_reduction <add>, %675, %cst_228 [1] : vector<1x32xf32> to vector<1xf32>
    %677 = vector.shape_cast %676 : vector<1xf32> to vector<1x1xf32>
    %cst_229 = arith.constant 3.200000e+01 : f32
    %678 = vector.broadcast %cst_229 : f32 to vector<1x1xf32>
    %679 = arith.divf %677, %678 : vector<1x1xf32>
    %680 = vector.broadcast %672 : vector<1x1xf32> to vector<1x32xf32>
    %681 = arith.subf %666, %680 : vector<1x32xf32>
    %cst_230 = arith.constant 9.99999974E-6 : f32
    %682 = vector.broadcast %cst_230 : f32 to vector<1x1xf32>
    %683 = arith.addf %679, %682 : vector<1x1xf32>
    %684 = math.rsqrt %683 : vector<1x1xf32>
    %685 = vector.broadcast %684 : vector<1x1xf32> to vector<1x32xf32>
    %686 = arith.mulf %681, %685 : vector<1x32xf32>
    %687 = arith.mulf %686, %667 : vector<1x32xf32>
    %688 = arith.addf %687, %668 : vector<1x32xf32>
    %689 = vector.extract_strided_slice %68 {offsets = [64, 0], sizes = [32, 32], strides = [1, 1]} : vector<128x32xf32> to vector<32x32xf32>
    %cst_231 = arith.constant dense<0.000000e+00> : vector<1x32xf32>
    %690 = tpu.matmul %688, %689, %cst_231 {dimension_numbers = #tpu.dot_dimension_numbers<[1], [0], [0], [1], [0, 0, 1, 1], [], []>} : vector<1x32xf32>, vector<32x32xf32>, vector<1x32xf32> -> vector<1x32xf32>
    %691 = vector.extract_strided_slice %69 {offsets = [2, 0], sizes = [1, 32], strides = [1, 1]} : vector<4x32xf32> to vector<1x32xf32>
    %692 = arith.addf %690, %691 : vector<1x32xf32>
    %cst_232 = arith.constant 5.000000e-01 : f32
    %693 = vector.broadcast %cst_232 : f32 to vector<1x32xf32>
    %694 = arith.mulf %693, %692 : vector<1x32xf32>
    %cst_233 = arith.constant 0.707106769 : f32
    %695 = vector.broadcast %cst_233 : f32 to vector<1x32xf32>
    %696 = arith.mulf %692, %695 : vector<1x32xf32>
    %cst_234 = arith.constant 0.000000e+00 : f32
    %697 = vector.broadcast %cst_234 : f32 to vector<1x32xf32>
    %698 = arith.cmpf oge, %696, %697 : vector<1x32xf32>
    %cst_235 = arith.constant 1.000000e+00 : f32
    %cst_236 = arith.constant -1.000000e+00 : f32
    %699 = vector.broadcast %cst_235 : f32 to vector<1x32xf32>
    %700 = vector.broadcast %cst_236 : f32 to vector<1x32xf32>
    %701 = arith.select %698, %699, %700 : vector<1x32xi1>, vector<1x32xf32>
    %702 = math.absf %696 : vector<1x32xf32>
    %cst_237 = arith.constant 0.327591091 : f32
    %703 = vector.broadcast %cst_237 : f32 to vector<1x32xf32>
    %704 = arith.mulf %703, %702 : vector<1x32xf32>
    %cst_238 = arith.constant 1.000000e+00 : f32
    %705 = vector.broadcast %cst_238 : f32 to vector<1x32xf32>
    %706 = arith.addf %705, %704 : vector<1x32xf32>
    %cst_239 = arith.constant 1.000000e+00 : f32
    %707 = vector.broadcast %cst_239 : f32 to vector<1x32xf32>
    %708 = arith.divf %707, %706 : vector<1x32xf32>
    %cst_240 = arith.constant 1.06140542 : f32
    %709 = vector.broadcast %cst_240 : f32 to vector<1x32xf32>
    %710 = arith.mulf %709, %708 : vector<1x32xf32>
    %cst_241 = arith.constant -1.45315206 : f32
    %711 = vector.broadcast %cst_241 : f32 to vector<1x32xf32>
    %712 = arith.addf %710, %711 : vector<1x32xf32>
    %713 = arith.mulf %712, %708 : vector<1x32xf32>
    %cst_242 = arith.constant 1.42141378 : f32
    %714 = vector.broadcast %cst_242 : f32 to vector<1x32xf32>
    %715 = arith.addf %713, %714 : vector<1x32xf32>
    %716 = arith.mulf %715, %708 : vector<1x32xf32>
    %cst_243 = arith.constant -0.284496725 : f32
    %717 = vector.broadcast %cst_243 : f32 to vector<1x32xf32>
    %718 = arith.addf %716, %717 : vector<1x32xf32>
    %719 = arith.mulf %718, %708 : vector<1x32xf32>
    %cst_244 = arith.constant 0.254829586 : f32
    %720 = vector.broadcast %cst_244 : f32 to vector<1x32xf32>
    %721 = arith.addf %719, %720 : vector<1x32xf32>
    %722 = arith.mulf %721, %708 : vector<1x32xf32>
    %cst_245 = arith.constant 0.000000e+00 : f32
    %723 = vector.broadcast %cst_245 : f32 to vector<1x32xf32>
    %724 = arith.subf %723, %702 : vector<1x32xf32>
    %725 = arith.mulf %724, %702 : vector<1x32xf32>
    %726 = math.exp %725 : vector<1x32xf32>
    %727 = arith.mulf %722, %726 : vector<1x32xf32>
    %cst_246 = arith.constant 1.000000e+00 : f32
    %728 = vector.broadcast %cst_246 : f32 to vector<1x32xf32>
    %729 = arith.subf %728, %727 : vector<1x32xf32>
    %730 = arith.mulf %701, %729 : vector<1x32xf32>
    %cst_247 = arith.constant 1.000000e+00 : f32
    %731 = vector.broadcast %cst_247 : f32 to vector<1x32xf32>
    %732 = arith.addf %731, %730 : vector<1x32xf32>
    %733 = arith.mulf %694, %732 : vector<1x32xf32>
    %734 = vector.extract_strided_slice %68 {offsets = [96, 0], sizes = [32, 32], strides = [1, 1]} : vector<128x32xf32> to vector<32x32xf32>
    %cst_248 = arith.constant dense<0.000000e+00> : vector<1x32xf32>
    %735 = tpu.matmul %733, %734, %cst_248 {dimension_numbers = #tpu.dot_dimension_numbers<[1], [0], [0], [1], [0, 0, 1, 1], [], []>} : vector<1x32xf32>, vector<32x32xf32>, vector<1x32xf32> -> vector<1x32xf32>
    %736 = vector.extract_strided_slice %69 {offsets = [3, 0], sizes = [1, 32], strides = [1, 1]} : vector<4x32xf32> to vector<1x32xf32>
    %737 = arith.addf %735, %736 : vector<1x32xf32>
    %738 = arith.addf %666, %737 : vector<1x32xf32>
    %739 = vector.extract_strided_slice %67 {offsets = [4, 0], sizes = [1, 32], strides = [1, 1]} : vector<8x32xf32> to vector<1x32xf32>
    %740 = vector.extract_strided_slice %67 {offsets = [5, 0], sizes = [1, 32], strides = [1, 1]} : vector<8x32xf32> to vector<1x32xf32>
    %cst_249 = arith.constant dense<0.000000e+00> : vector<3xf32>
    %741 = vector.multi_reduction <add>, %665, %cst_249 [1] : vector<3x32xf32> to vector<3xf32>
    %742 = vector.shape_cast %741 : vector<3xf32> to vector<3x1xf32>
    %cst_250 = arith.constant 3.200000e+01 : f32
    %743 = vector.broadcast %cst_250 : f32 to vector<3x1xf32>
    %744 = arith.divf %742, %743 : vector<3x1xf32>
    %745 = vector.broadcast %744 : vector<3x1xf32> to vector<3x32xf32>
    %746 = arith.subf %665, %745 : vector<3x32xf32>
    %747 = arith.mulf %746, %746 : vector<3x32xf32>
    %cst_251 = arith.constant dense<0.000000e+00> : vector<3xf32>
    %748 = vector.multi_reduction <add>, %747, %cst_251 [1] : vector<3x32xf32> to vector<3xf32>
    %749 = vector.shape_cast %748 : vector<3xf32> to vector<3x1xf32>
    %cst_252 = arith.constant 3.200000e+01 : f32
    %750 = vector.broadcast %cst_252 : f32 to vector<3x1xf32>
    %751 = arith.divf %749, %750 : vector<3x1xf32>
    %752 = vector.broadcast %744 : vector<3x1xf32> to vector<3x32xf32>
    %753 = arith.subf %665, %752 : vector<3x32xf32>
    %cst_253 = arith.constant 9.99999974E-6 : f32
    %754 = vector.broadcast %cst_253 : f32 to vector<3x1xf32>
    %755 = arith.addf %751, %754 : vector<3x1xf32>
    %756 = math.rsqrt %755 : vector<3x1xf32>
    %757 = vector.broadcast %756 : vector<3x1xf32> to vector<3x32xf32>
    %758 = arith.mulf %753, %757 : vector<3x32xf32>
    %759 = vector.broadcast %739 : vector<1x32xf32> to vector<3x32xf32>
    %760 = arith.mulf %758, %759 : vector<3x32xf32>
    %761 = vector.broadcast %740 : vector<1x32xf32> to vector<3x32xf32>
    %762 = arith.addf %760, %761 : vector<3x32xf32>
    %763 = vector.extract_strided_slice %68 {offsets = [0, 0], sizes = [32, 32], strides = [1, 1]} : vector<128x32xf32> to vector<32x32xf32>
    %cst_254 = arith.constant dense<0.000000e+00> : vector<3x32xf32>
    %764 = tpu.matmul %762, %763, %cst_254 {dimension_numbers = #tpu.dot_dimension_numbers<[1], [0], [0], [1], [0, 0, 1, 1], [], []>} : vector<3x32xf32>, vector<32x32xf32>, vector<3x32xf32> -> vector<3x32xf32>
    %765 = vector.extract_strided_slice %69 {offsets = [0, 0], sizes = [1, 32], strides = [1, 1]} : vector<4x32xf32> to vector<1x32xf32>
    %766 = vector.broadcast %765 : vector<1x32xf32> to vector<3x32xf32>
    %767 = arith.addf %764, %766 : vector<3x32xf32>
    %cst_255 = arith.constant 5.000000e-01 : f32
    %768 = vector.broadcast %cst_255 : f32 to vector<3x32xf32>
    %769 = arith.mulf %768, %767 : vector<3x32xf32>
    %cst_256 = arith.constant 0.707106769 : f32
    %770 = vector.broadcast %cst_256 : f32 to vector<3x32xf32>
    %771 = arith.mulf %767, %770 : vector<3x32xf32>
    %cst_257 = arith.constant 0.000000e+00 : f32
    %772 = vector.broadcast %cst_257 : f32 to vector<3x32xf32>
    %773 = arith.cmpf oge, %771, %772 : vector<3x32xf32>
    %cst_258 = arith.constant 1.000000e+00 : f32
    %cst_259 = arith.constant -1.000000e+00 : f32
    %774 = vector.broadcast %cst_258 : f32 to vector<3x32xf32>
    %775 = vector.broadcast %cst_259 : f32 to vector<3x32xf32>
    %776 = arith.select %773, %774, %775 : vector<3x32xi1>, vector<3x32xf32>
    %777 = math.absf %771 : vector<3x32xf32>
    %cst_260 = arith.constant 0.327591091 : f32
    %778 = vector.broadcast %cst_260 : f32 to vector<3x32xf32>
    %779 = arith.mulf %778, %777 : vector<3x32xf32>
    %cst_261 = arith.constant 1.000000e+00 : f32
    %780 = vector.broadcast %cst_261 : f32 to vector<3x32xf32>
    %781 = arith.addf %780, %779 : vector<3x32xf32>
    %cst_262 = arith.constant 1.000000e+00 : f32
    %782 = vector.broadcast %cst_262 : f32 to vector<3x32xf32>
    %783 = arith.divf %782, %781 : vector<3x32xf32>
    %cst_263 = arith.constant 1.06140542 : f32
    %784 = vector.broadcast %cst_263 : f32 to vector<3x32xf32>
    %785 = arith.mulf %784, %783 : vector<3x32xf32>
    %cst_264 = arith.constant -1.45315206 : f32
    %786 = vector.broadcast %cst_264 : f32 to vector<3x32xf32>
    %787 = arith.addf %785, %786 : vector<3x32xf32>
    %788 = arith.mulf %787, %783 : vector<3x32xf32>
    %cst_265 = arith.constant 1.42141378 : f32
    %789 = vector.broadcast %cst_265 : f32 to vector<3x32xf32>
    %790 = arith.addf %788, %789 : vector<3x32xf32>
    %791 = arith.mulf %790, %783 : vector<3x32xf32>
    %cst_266 = arith.constant -0.284496725 : f32
    %792 = vector.broadcast %cst_266 : f32 to vector<3x32xf32>
    %793 = arith.addf %791, %792 : vector<3x32xf32>
    %794 = arith.mulf %793, %783 : vector<3x32xf32>
    %cst_267 = arith.constant 0.254829586 : f32
    %795 = vector.broadcast %cst_267 : f32 to vector<3x32xf32>
    %796 = arith.addf %794, %795 : vector<3x32xf32>
    %797 = arith.mulf %796, %783 : vector<3x32xf32>
    %cst_268 = arith.constant 0.000000e+00 : f32
    %798 = vector.broadcast %cst_268 : f32 to vector<3x32xf32>
    %799 = arith.subf %798, %777 : vector<3x32xf32>
    %800 = arith.mulf %799, %777 : vector<3x32xf32>
    %801 = math.exp %800 : vector<3x32xf32>
    %802 = arith.mulf %797, %801 : vector<3x32xf32>
    %cst_269 = arith.constant 1.000000e+00 : f32
    %803 = vector.broadcast %cst_269 : f32 to vector<3x32xf32>
    %804 = arith.subf %803, %802 : vector<3x32xf32>
    %805 = arith.mulf %776, %804 : vector<3x32xf32>
    %cst_270 = arith.constant 1.000000e+00 : f32
    %806 = vector.broadcast %cst_270 : f32 to vector<3x32xf32>
    %807 = arith.addf %806, %805 : vector<3x32xf32>
    %808 = arith.mulf %769, %807 : vector<3x32xf32>
    %809 = vector.extract_strided_slice %68 {offsets = [32, 0], sizes = [32, 32], strides = [1, 1]} : vector<128x32xf32> to vector<32x32xf32>
    %cst_271 = arith.constant dense<0.000000e+00> : vector<3x32xf32>
    %810 = tpu.matmul %808, %809, %cst_271 {dimension_numbers = #tpu.dot_dimension_numbers<[1], [0], [0], [1], [0, 0, 1, 1], [], []>} : vector<3x32xf32>, vector<32x32xf32>, vector<3x32xf32> -> vector<3x32xf32>
    %811 = vector.extract_strided_slice %69 {offsets = [1, 0], sizes = [1, 32], strides = [1, 1]} : vector<4x32xf32> to vector<1x32xf32>
    %812 = vector.broadcast %811 : vector<1x32xf32> to vector<3x32xf32>
    %813 = arith.addf %810, %812 : vector<3x32xf32>
    %814 = arith.addf %665, %813 : vector<3x32xf32>
    %815 = vector.extract_strided_slice %67 {offsets = [0, 0], sizes = [1, 32], strides = [1, 1]} : vector<8x32xf32> to vector<1x32xf32>
    %816 = vector.extract_strided_slice %67 {offsets = [1, 0], sizes = [1, 32], strides = [1, 1]} : vector<8x32xf32> to vector<1x32xf32>
    %cst_272 = arith.constant dense<0.000000e+00> : vector<3xf32>
    %817 = vector.multi_reduction <add>, %814, %cst_272 [1] : vector<3x32xf32> to vector<3xf32>
    %818 = vector.shape_cast %817 : vector<3xf32> to vector<3x1xf32>
    %cst_273 = arith.constant 3.200000e+01 : f32
    %819 = vector.broadcast %cst_273 : f32 to vector<3x1xf32>
    %820 = arith.divf %818, %819 : vector<3x1xf32>
    %821 = vector.broadcast %820 : vector<3x1xf32> to vector<3x32xf32>
    %822 = arith.subf %814, %821 : vector<3x32xf32>
    %823 = arith.mulf %822, %822 : vector<3x32xf32>
    %cst_274 = arith.constant dense<0.000000e+00> : vector<3xf32>
    %824 = vector.multi_reduction <add>, %823, %cst_274 [1] : vector<3x32xf32> to vector<3xf32>
    %825 = vector.shape_cast %824 : vector<3xf32> to vector<3x1xf32>
    %cst_275 = arith.constant 3.200000e+01 : f32
    %826 = vector.broadcast %cst_275 : f32 to vector<3x1xf32>
    %827 = arith.divf %825, %826 : vector<3x1xf32>
    %828 = vector.broadcast %820 : vector<3x1xf32> to vector<3x32xf32>
    %829 = arith.subf %814, %828 : vector<3x32xf32>
    %cst_276 = arith.constant 9.99999974E-6 : f32
    %830 = vector.broadcast %cst_276 : f32 to vector<3x1xf32>
    %831 = arith.addf %827, %830 : vector<3x1xf32>
    %832 = math.rsqrt %831 : vector<3x1xf32>
    %833 = vector.broadcast %832 : vector<3x1xf32> to vector<3x32xf32>
    %834 = arith.mulf %829, %833 : vector<3x32xf32>
    %835 = vector.broadcast %815 : vector<1x32xf32> to vector<3x32xf32>
    %836 = arith.mulf %834, %835 : vector<3x32xf32>
    %837 = vector.broadcast %816 : vector<1x32xf32> to vector<3x32xf32>
    %838 = arith.addf %836, %837 : vector<3x32xf32>
    %cst_277 = arith.constant dense<0.000000e+00> : vector<3x32xf32>
    %839 = tpu.matmul %838, %70, %cst_277 {dimension_numbers = #tpu.dot_dimension_numbers<[1], [0], [0], [1], [0, 0, 1, 1], [], []>} : vector<3x32xf32>, vector<32x32xf32>, vector<3x32xf32> -> vector<3x32xf32>
    %840 = vector.extract_strided_slice %67 {offsets = [2, 0], sizes = [1, 32], strides = [1, 1]} : vector<8x32xf32> to vector<1x32xf32>
    %841 = vector.extract_strided_slice %67 {offsets = [3, 0], sizes = [1, 32], strides = [1, 1]} : vector<8x32xf32> to vector<1x32xf32>
    %cst_278 = arith.constant dense<0.000000e+00> : vector<1xf32>
    %842 = vector.multi_reduction <add>, %738, %cst_278 [1] : vector<1x32xf32> to vector<1xf32>
    %843 = vector.shape_cast %842 : vector<1xf32> to vector<1x1xf32>
    %cst_279 = arith.constant 3.200000e+01 : f32
    %844 = vector.broadcast %cst_279 : f32 to vector<1x1xf32>
    %845 = arith.divf %843, %844 : vector<1x1xf32>
    %846 = vector.broadcast %845 : vector<1x1xf32> to vector<1x32xf32>
    %847 = arith.subf %738, %846 : vector<1x32xf32>
    %848 = arith.mulf %847, %847 : vector<1x32xf32>
    %cst_280 = arith.constant dense<0.000000e+00> : vector<1xf32>
    %849 = vector.multi_reduction <add>, %848, %cst_280 [1] : vector<1x32xf32> to vector<1xf32>
    %850 = vector.shape_cast %849 : vector<1xf32> to vector<1x1xf32>
    %cst_281 = arith.constant 3.200000e+01 : f32
    %851 = vector.broadcast %cst_281 : f32 to vector<1x1xf32>
    %852 = arith.divf %850, %851 : vector<1x1xf32>
    %853 = vector.broadcast %845 : vector<1x1xf32> to vector<1x32xf32>
    %854 = arith.subf %738, %853 : vector<1x32xf32>
    %cst_282 = arith.constant 9.99999974E-6 : f32
    %855 = vector.broadcast %cst_282 : f32 to vector<1x1xf32>
    %856 = arith.addf %852, %855 : vector<1x1xf32>
    %857 = math.rsqrt %856 : vector<1x1xf32>
    %858 = vector.broadcast %857 : vector<1x1xf32> to vector<1x32xf32>
    %859 = arith.mulf %854, %858 : vector<1x32xf32>
    %860 = arith.mulf %859, %840 : vector<1x32xf32>
    %861 = arith.addf %860, %841 : vector<1x32xf32>
    %cst_283 = arith.constant dense<0.000000e+00> : vector<1x32xf32>
    %862 = tpu.matmul %861, %71, %cst_283 {dimension_numbers = #tpu.dot_dimension_numbers<[1], [0], [0], [1], [0, 0, 1, 1], [], []>} : vector<1x32xf32>, vector<32x32xf32>, vector<1x32xf32> -> vector<1x32xf32>
    %cst_284 = arith.constant dense<0.000000e+00> : vector<3x32xf32>
    %863 = tpu.matmul %660, %66, %cst_284 {dimension_numbers = #tpu.dot_dimension_numbers<[1], [0], [0], [1], [0, 0, 1, 1], [], []>} : vector<3x2xf32>, vector<2x32xf32>, vector<3x32xf32> -> vector<3x32xf32>
    %cst_285 = arith.constant 0.000000e+00 : f32
    %864 = vector.broadcast %cst_285 : f32 to vector<3x32xf32>
    %865 = arith.subf %864, %863 : vector<3x32xf32>
    %866 = tpu.concatenate %72, %72, %862, %72 in 1 : vector<1x32xf32>, vector<1x32xf32>, vector<1x32xf32>, vector<1x32xf32> -> vector<1x128xf32>
    %867 = tpu.concatenate %839, %73, %73, %73 in 1 : vector<3x32xf32>, vector<3x32xf32>, vector<3x32xf32>, vector<3x32xf32> -> vector<3x128xf32>
    %868 = tpu.concatenate %866, %867 in 0 : vector<1x128xf32>, vector<3x128xf32> -> vector<4x128xf32>
    %cst_286 = arith.constant dense<0.000000e+00> : vector<4x256xf32>
    %869 = tpu.matmul %868, %37, %cst_286 {dimension_numbers = #tpu.dot_dimension_numbers<[1], [1], [0], [0], [0, 0, 1, 0], [], []>} : vector<4x128xf32>, vector<256x128xf32>, vector<4x256xf32> -> vector<4x256xf32>
    %870 = arith.mulf %839, %865 : vector<3x32xf32>
    %cst_287 = arith.constant dense<0.000000e+00> : vector<3xf32>
    %871 = vector.multi_reduction <add>, %870, %cst_287 [1] : vector<3x32xf32> to vector<3xf32>
    %872 = vector.shape_cast %871 : vector<3xf32> to vector<3x1xf32>
    %cst_288 = arith.constant 0.000000e+00 : f32
    %873 = vector.broadcast %cst_288 : f32 to vector<1x1xf32>
    %874 = tpu.concatenate %873, %872 in 0 : vector<1x1xf32>, vector<3x1xf32> -> vector<4x1xf32>
    %875 = vector.broadcast %874 : vector<4x1xf32> to vector<4x256xf32>
    %876 = arith.addf %869, %875 : vector<4x256xf32>
    %cst_289 = arith.constant 0.176776692 : f32
    %877 = vector.broadcast %cst_289 : f32 to vector<4x256xf32>
    %878 = arith.mulf %876, %877 : vector<4x256xf32>
    %cst_290 = arith.constant dense<0xFF800000> : vector<256xf32>
    %879 = vector.multi_reduction <maximumf>, %878, %cst_290 [0] : vector<4x256xf32> to vector<256xf32>
    %880 = vector.shape_cast %879 : vector<256xf32> to vector<1x256xf32>
    %881 = vector.broadcast %880 : vector<1x256xf32> to vector<4x256xf32>
    %882 = arith.subf %878, %881 : vector<4x256xf32>
    %883 = math.exp %882 : vector<4x256xf32>
    %cst_291 = arith.constant dense<0.000000e+00> : vector<256xf32>
    %884 = vector.multi_reduction <add>, %883, %cst_291 [0] : vector<4x256xf32> to vector<256xf32>
    %885 = vector.shape_cast %884 : vector<256xf32> to vector<1x256xf32>
    %886 = vector.broadcast %885 : vector<1x256xf32> to vector<4x256xf32>
    %887 = arith.divf %883, %886 : vector<4x256xf32>
    %cst_292 = arith.constant 9.99999993E-9 : f32
    %888 = vector.broadcast %cst_292 : f32 to vector<4x256xf32>
    %889 = arith.addf %887, %888 : vector<4x256xf32>
    %890 = vector.extract_strided_slice %889 {offsets = [1, 0], sizes = [3, 256], strides = [1, 1]} : vector<4x256xf32> to vector<3x256xf32>
    %891 = vector.extract_strided_slice %889 {offsets = [0, 0], sizes = [1, 256], strides = [1, 1]} : vector<4x256xf32> to vector<1x256xf32>
    %cst_293 = arith.constant dense<0.000000e+00> : vector<3xf32>
    %892 = vector.multi_reduction <add>, %890, %cst_293 [1] : vector<3x256xf32> to vector<3xf32>
    %893 = vector.shape_cast %892 : vector<3xf32> to vector<3x1xf32>
    %894 = vector.broadcast %893 : vector<3x1xf32> to vector<3x256xf32>
    %895 = arith.divf %890, %894 : vector<3x256xf32>
    %cst_294 = arith.constant dense<0.000000e+00> : vector<1xf32>
    %896 = vector.multi_reduction <add>, %891, %cst_294 [1] : vector<1x256xf32> to vector<1xf32>
    %897 = vector.shape_cast %896 : vector<1xf32> to vector<1x1xf32>
    %898 = vector.broadcast %897 : vector<1x1xf32> to vector<1x256xf32>
    %899 = arith.divf %891, %898 : vector<1x256xf32>
    %900 = tpu.concatenate %899, %895 in 0 : vector<1x256xf32>, vector<3x256xf32> -> vector<4x256xf32>
    %cst_295 = arith.constant dense<0.000000e+00> : vector<3x2xf32>
    %901 = tpu.matmul %895, %65, %cst_295 {dimension_numbers = #tpu.dot_dimension_numbers<[1], [0], [0], [1], [0, 0, 1, 1], [], []>} : vector<3x256xf32>, vector<256x2xf32>, vector<3x2xf32> -> vector<3x2xf32>
    %cst_296 = arith.constant 5.000000e-01 : f32
    %902 = vector.broadcast %cst_296 : f32 to vector<3x2xf32>
    %903 = arith.mulf %901, %902 : vector<3x2xf32>
    %cst_297 = arith.constant 5.000000e-01 : f32
    %904 = vector.broadcast %cst_297 : f32 to vector<3x2xf32>
    %905 = arith.mulf %660, %904 : vector<3x2xf32>
    %906 = arith.addf %903, %905 : vector<3x2xf32>
    %c0_298 = arith.constant 0 : index
    %c0_299 = arith.constant 0 : index
    %907 = vector.load %arg19[%c0_298, %c0_299] : memref<256x2xf32, #tpu.memory_space<vmem>>, vector<256x2xf32>
    %cst_300 = arith.constant dense<0.000000e+00> : vector<3x2xf32>
    %908 = tpu.matmul %895, %907, %cst_300 {dimension_numbers = #tpu.dot_dimension_numbers<[1], [0], [0], [1], [0, 0, 1, 1], [], []>} : vector<3x256xf32>, vector<256x2xf32>, vector<3x2xf32> -> vector<3x2xf32>
    %c0_301 = arith.constant 0 : index
    %c0_302 = arith.constant 0 : index
    %909 = vector.load %arg20[%c0_301, %c0_302] : memref<1x2xf32, #tpu.memory_space<vmem>>, vector<1x2xf32>
    %910 = vector.broadcast %909 : vector<1x2xf32> to vector<3x2xf32>
    %911 = arith.addf %908, %910 : vector<3x2xf32>
    %912 = math.tanh %911 : vector<3x2xf32>
    %cst_303 = arith.constant 1.000000e-01 : f32
    %913 = vector.broadcast %cst_303 : f32 to vector<3x2xf32>
    %914 = arith.mulf %912, %913 : vector<3x2xf32>
    %915 = arith.addf %906, %914 : vector<3x2xf32>
    %cst_304 = arith.constant -1.000000e+00 : f32
    %cst_305 = arith.constant 1.000000e+00 : f32
    %916 = vector.broadcast %cst_304 : f32 to vector<3x2xf32>
    %917 = arith.maximumf %916, %915 : vector<3x2xf32>
    %918 = vector.broadcast %cst_305 : f32 to vector<3x2xf32>
    %919 = arith.minimumf %918, %917 : vector<3x2xf32>
    %cst_306 = arith.constant dense<0.000000e+00> : vector<4x8xf32>
    %920 = tpu.matmul %900, %64, %cst_306 {dimension_numbers = #tpu.dot_dimension_numbers<[1], [0], [0], [1], [0, 0, 1, 1], [], []>} : vector<4x256xf32>, vector<256x8xf32>, vector<4x8xf32> -> vector<4x8xf32>
    %c0_307 = arith.constant 0 : index
    %c0_308 = arith.constant 0 : index
    %c0_309 = arith.constant 0 : index
    %921 = vector.load %arg21[%c0_307, %c0_308, %c0_309] : memref<1x4x256xf32, #tpu.memory_space<vmem>>, vector<1x4x256xf32>
    %922 = vector.shape_cast %921 : vector<1x4x256xf32> to vector<4x256xf32>
    %923 = vector.shape_cast %889 : vector<4x256xf32> to vector<1x4x256xf32>
    tpu.vector_store %arg21[%c0_307, %c0_308, %c0_309], %923 {strides = array<i32>} : memref<1x4x256xf32, #tpu.memory_space<vmem>>, vector<1x4x256xf32>,
    %cst_310 = arith.constant 0.000000e+00 : f32
    %924 = vector.broadcast %cst_310 : f32 to vector<8x128xf32>
    %c0_311 = arith.constant 0 : index
    %c0_312 = arith.constant 0 : index
    %c0_313 = arith.constant 0 : index
    %925 = vector.load %arg22[%c0_311, %c0_312, %c0_313] : memref<1x8x128xf32, #tpu.memory_space<vmem>>, vector<1x8x128xf32>
    %926 = vector.shape_cast %925 : vector<1x8x128xf32> to vector<8x128xf32>
    %927 = vector.shape_cast %924 : vector<8x128xf32> to vector<1x8x128xf32>
    tpu.vector_store %arg22[%c0_311, %c0_312, %c0_313], %927 {strides = array<i32>} : memref<1x8x128xf32, #tpu.memory_space<vmem>>, vector<1x8x128xf32>,
    %928 = tpu.concatenate %738, %814 in 0 : vector<1x32xf32>, vector<3x32xf32> -> vector<4x32xf32>
    %c0_314 = arith.constant 0 : index
    %c0_315 = arith.constant 0 : index
    %c0_316 = arith.constant 0 : index
    %929 = vector.load %arg22[%c0_314, %c0_315, %c0_316] : memref<1x8x128xf32, #tpu.memory_space<vmem>>, vector<1x4x32xf32>
    %930 = vector.shape_cast %929 : vector<1x4x32xf32> to vector<4x32xf32>
    %931 = vector.shape_cast %928 : vector<4x32xf32> to vector<1x4x32xf32>
    tpu.vector_store %arg22[%c0_314, %c0_315, %c0_316], %931 {strides = array<i32>} : memref<1x8x128xf32, #tpu.memory_space<vmem>>, vector<1x4x32xf32>,
    %c0_317 = arith.constant 0 : index
    %c0_318 = arith.constant 0 : index
    %c32 = arith.constant 32 : index
    %932 = vector.load %arg22[%c0_317, %c0_318, %c32] : memref<1x8x128xf32, #tpu.memory_space<vmem>>, vector<1x4x8xf32>
    %933 = vector.shape_cast %932 : vector<1x4x8xf32> to vector<4x8xf32>
    %934 = vector.shape_cast %920 : vector<4x8xf32> to vector<1x4x8xf32>
    tpu.vector_store %arg22[%c0_317, %c0_318, %c32], %934 {strides = array<i32>} : memref<1x8x128xf32, #tpu.memory_space<vmem>>, vector<1x4x8xf32>,
    %c0_319 = arith.constant 0 : index
    %c4 = arith.constant 4 : index
    %c0_320 = arith.constant 0 : index
    %935 = vector.load %arg22[%c0_319, %c4, %c0_320] : memref<1x8x128xf32, #tpu.memory_space<vmem>>, vector<1x3x2xf32>
    %936 = vector.shape_cast %935 : vector<1x3x2xf32> to vector<3x2xf32>
    %937 = vector.shape_cast %919 : vector<3x2xf32> to vector<1x3x2xf32>
    tpu.vector_store %arg22[%c0_319, %c4, %c0_320], %937 {strides = array<i32>} : memref<1x8x128xf32, #tpu.memory_space<vmem>>, vector<1x3x2xf32>,
    return
  }
  func.func @transform_0(%arg0: i32) -> (i32, i32, i32) {
    %c0_i32 = arith.constant 0 : i32
    %c0_i32_0 = arith.constant 0 : i32
    %c0_i32_1 = arith.constant 0 : i32
    return %arg0, %c0_i32, %c0_i32_0 : i32, i32, i32
  }
  func.func @transform_1(%arg0: i32) -> (i32, i32, i32) {
    %c0_i32 = arith.constant 0 : i32
    %c0_i32_0 = arith.constant 0 : i32
    %c0_i32_1 = arith.constant 0 : i32
    return %arg0, %c0_i32, %c0_i32_0 : i32, i32, i32
  }
  func.func @transform_2(%arg0: i32) -> (i32, i32) {
    %c0_i32 = arith.constant 0 : i32
    %c0_i32_0 = arith.constant 0 : i32
    %c0_i32_1 = arith.constant 0 : i32
    return %c0_i32, %c0_i32_0 : i32, i32
  }
  func.func @transform_3(%arg0: i32) -> (i32, i32) {
    %c0_i32 = arith.constant 0 : i32
    %c0_i32_0 = arith.constant 0 : i32
    %c0_i32_1 = arith.constant 0 : i32
    return %c0_i32, %c0_i32_0 : i32, i32
  }
  func.func @transform_4(%arg0: i32) -> (i32, i32) {
    %c0_i32 = arith.constant 0 : i32
    %c0_i32_0 = arith.constant 0 : i32
    %c0_i32_1 = arith.constant 0 : i32
    return %c0_i32, %c0_i32_0 : i32, i32
  }
  func.func @transform_5(%arg0: i32) -> (i32, i32) {
    %c0_i32 = arith.constant 0 : i32
    %c0_i32_0 = arith.constant 0 : i32
    %c0_i32_1 = arith.constant 0 : i32
    return %c0_i32, %c0_i32_0 : i32, i32
  }
  func.func @transform_6(%arg0: i32) -> (i32, i32) {
    %c0_i32 = arith.constant 0 : i32
    %c0_i32_0 = arith.constant 0 : i32
    %c0_i32_1 = arith.constant 0 : i32
    return %c0_i32, %c0_i32_0 : i32, i32
  }
  func.func @transform_7(%arg0: i32) -> (i32, i32) {
    %c0_i32 = arith.constant 0 : i32
    %c0_i32_0 = arith.constant 0 : i32
    %c0_i32_1 = arith.constant 0 : i32
    return %c0_i32, %c0_i32_0 : i32, i32
  }
  func.func @transform_8(%arg0: i32) -> (i32, i32) {
    %c0_i32 = arith.constant 0 : i32
    %c0_i32_0 = arith.constant 0 : i32
    %c0_i32_1 = arith.constant 0 : i32
    return %c0_i32, %c0_i32_0 : i32, i32
  }
  func.func @transform_9(%arg0: i32) -> (i32, i32) {
    %c0_i32 = arith.constant 0 : i32
    %c0_i32_0 = arith.constant 0 : i32
    %c0_i32_1 = arith.constant 0 : i32
    return %c0_i32, %c0_i32_0 : i32, i32
  }
  func.func @transform_10(%arg0: i32) -> (i32, i32) {
    %c0_i32 = arith.constant 0 : i32
    %c0_i32_0 = arith.constant 0 : i32
    %c0_i32_1 = arith.constant 0 : i32
    return %c0_i32, %c0_i32_0 : i32, i32
  }
  func.func @transform_11(%arg0: i32) -> (i32, i32) {
    %c0_i32 = arith.constant 0 : i32
    %c0_i32_0 = arith.constant 0 : i32
    %c0_i32_1 = arith.constant 0 : i32
    return %c0_i32, %c0_i32_0 : i32, i32
  }
  func.func @transform_12(%arg0: i32) -> (i32, i32) {
    %c0_i32 = arith.constant 0 : i32
    %c0_i32_0 = arith.constant 0 : i32
    %c0_i32_1 = arith.constant 0 : i32
    return %c0_i32, %c0_i32_0 : i32, i32
  }
  func.func @transform_13(%arg0: i32) -> (i32, i32) {
    %c0_i32 = arith.constant 0 : i32
    %c0_i32_0 = arith.constant 0 : i32
    %c0_i32_1 = arith.constant 0 : i32
    return %c0_i32, %c0_i32_0 : i32, i32
  }
  func.func @transform_14(%arg0: i32) -> (i32, i32) {
    %c0_i32 = arith.constant 0 : i32
    %c0_i32_0 = arith.constant 0 : i32
    %c0_i32_1 = arith.constant 0 : i32
    return %c0_i32, %c0_i32_0 : i32, i32
  }
  func.func @transform_15(%arg0: i32) -> (i32, i32) {
    %c0_i32 = arith.constant 0 : i32
    %c0_i32_0 = arith.constant 0 : i32
    %c0_i32_1 = arith.constant 0 : i32
    return %c0_i32, %c0_i32_0 : i32, i32
  }
  func.func @transform_16(%arg0: i32) -> (i32, i32) {
    %c0_i32 = arith.constant 0 : i32
    %c0_i32_0 = arith.constant 0 : i32
    %c0_i32_1 = arith.constant 0 : i32
    return %c0_i32, %c0_i32_0 : i32, i32
  }
  func.func @transform_17(%arg0: i32) -> (i32, i32) {
    %c0_i32 = arith.constant 0 : i32
    %c0_i32_0 = arith.constant 0 : i32
    %c0_i32_1 = arith.constant 0 : i32
    return %c0_i32, %c0_i32_0 : i32, i32
  }
  func.func @transform_18(%arg0: i32) -> (i32, i32) {
    %c0_i32 = arith.constant 0 : i32
    %c0_i32_0 = arith.constant 0 : i32
    %c0_i32_1 = arith.constant 0 : i32
    return %c0_i32, %c0_i32_0 : i32, i32
  }
  func.func @transform_19(%arg0: i32) -> (i32, i32) {
    %c0_i32 = arith.constant 0 : i32
    %c0_i32_0 = arith.constant 0 : i32
    %c0_i32_1 = arith.constant 0 : i32
    return %c0_i32, %c0_i32_0 : i32, i32
  }
  func.func @transform_20(%arg0: i32) -> (i32, i32, i32) {
    %c0_i32 = arith.constant 0 : i32
    %c0_i32_0 = arith.constant 0 : i32
    %c0_i32_1 = arith.constant 0 : i32
    return %arg0, %c0_i32, %c0_i32_0 : i32, i32, i32
  }
  func.func @transform_21(%arg0: i32) -> (i32, i32, i32) {
    %c0_i32 = arith.constant 0 : i32
    %c0_i32_0 = arith.constant 0 : i32
    %c0_i32_1 = arith.constant 0 : i32
    return %arg0, %c0_i32, %c0_i32_0 : i32, i32, i32
  }
}

</mosaic_0001>

<bundles_post_ra>
// kernel: tpu_custom_call.1
= control target key start
LH: loop header
LB: loop body
LE: loop exit
PB: predicated region body
PF: predicated region fallthrough
CT: control target
= control target key end

     0   :  { %s11231_s0 = inlined_call_operand.vmem [shape: f32[2,256,32], index: 0, kind: input, shape index: {}]   ;;  %s11232_s1 = inlined_call_operand.vmem [shape: f32[2,256,8], index: 1, kind: input, shape index: {}]   ;;  %s11233_s2 = inlined_call_operand.vmem [shape: f32[2,32], index: 2, kind: input, shape index: {}]   ;;  %s11234_s3 = inlined_call_operand.vmem [shape: f32[2,8], index: 3, kind: input, shape index: {}]   ;;  %s11235_s4 = inlined_call_operand.vmem [shape: f32[32,128], index: 4, kind: input, shape index: {}]   ;;  %s11236_s5 = inlined_call_operand.vmem [shape: f32[2,128], index: 5, kind: input, shape index: {}]   ;;  %s11237_s6 = inlined_call_operand.vmem [shape: f32[1,128], index: 6, kind: input, shape index: {}]   ;;  %s11238_s7 = inlined_call_operand.vmem [shape: f32[128,128], index: 7, kind: input, shape index: {}]   ;;  %s11239_s8 = inlined_call_operand.vmem [shape: f32[2,32], index: 8, kind: input, shape index: {}]   ;;  %s11240_s9 = inlined_call_operand.vmem [shape: f32[256,2], index: 9, kind: input, shape index: {}]   ;;  %s11241_s10 = inlined_call_operand.vmem [shape: f32[32,32], index: 10, kind: input, shape index: {}]   ;;  %s11242_s11 = inlined_call_operand.vmem [shape: f32[32,32], index: 11, kind: input, shape index: {}]   ;;  %s11243_s12 = inlined_call_operand.vmem [shape: f32[8,32], index: 12, kind: input, shape index: {}]   ;;  %s11244_s13 = inlined_call_operand.vmem [shape: f32[128,32], index: 13, kind: input, shape index: {}]   ;;  %s11245_s14 = inlined_call_operand.vmem [shape: f32[4,32], index: 14, kind: input, shape index: {}]   ;;  %s11246_s15 = inlined_call_operand.vmem [shape: f32[3,32], index: 15, kind: input, shape index: {}]   ;;  %s11247_s16 = inlined_call_operand.vmem [shape: f32[1,32], index: 16, kind: input, shape index: {}]   ;;  %s11248_s17 = inlined_call_operand.vmem [shape: f32[3,2], index: 17, kind: input, shape index: {}]   ;;  %s11249_s18 = inlined_call_operand.vmem [shape: f32[256,2], index: 18, kind: input, shape index: {}]   ;;  %s11250_s19 = inlined_call_operand.vmem [shape: f32[1,2], index: 19, kind: input, shape index: {}]   ;;  %s11251_s20 = inlined_call_operand.hbm [shape: f32[2,4,256], index: 20, kind: output, shape index: {0}]   ;;  %s11252_s21 = inlined_call_operand.hbm [shape: f32[2,8,128], index: 21, kind: output, shape index: {1}]  }
   0x1   :  { %11355 = sst [smem:[#allocation51_spill]] %s11231_s0 }
   0x2   :  { %11356 = sst [smem:[#allocation52_spill]] %s11232_s1 }
   0x3   :  { %11357 = sst [smem:[#allocation53_spill]] %s11233_s2 }
   0x4   :  { %11358 = sst [smem:[#allocation54_spill]] %s11234_s3 }
   0x5   :  { %11359 = sst [smem:[#allocation55_spill]] %s11235_s4 }
   0x6   :  { %11360 = sst [smem:[#allocation56_spill]] %s11236_s5 }
   0x7   :  { %11361 = sst [smem:[#allocation57_spill]] %s11237_s6 }
   0x8   :  { %11362 = sst [smem:[#allocation58_spill]] %s11238_s7 }
   0x9   :  { %27 = vsyncpa [#allocation3], 0 }
   0xa   :  { %29 = vsyncpa [#allocation3 + $0x1], 0 }
   0xb   :  { %30 = vsyncpa [#allocation5], 0 }
   0xc   :  { %32 = vsyncpa [#allocation5 + $0x1], 0  ;;  %s8872_s2 = smov 0   ;;  %s8874_s25 = smov 0  }
   0xd   :  { %s8876_s26 = smov 0   ;;  %s8878_s27 = smov 0  }
   0xe LB: > { %11363 = sst [smem:[#allocation8_spill]] %s8737_s2  ;;  %s8893_s3 = sadd.s32 4294967295, %s8749_s27   ;;  %s8749_s27 = sphi %s8878_s27, %s11505_s27   ;;  %s8745_s26 = sphi %s8876_s26, %s11507_s26   ;;  %s8741_s25 = sphi %s8874_s25, %s11509_s25   ;;  %s8737_s2 = sphi %s8872_s2, %s11508_s2  }
   0xf   : > { %11364 = sst [smem:[#allocation9_spill]] %s8745_s26  ;;  %s6508_s28 = sadd.s32 4294967294, %s8749_s27  }
  0x10   : > { %11365 = sst [smem:[#allocation10_spill]] %s8749_s27  ;;  %s8897_s29 = sadd.s32 1, %s8749_s27  }
  0x11   : > { %11366 = sst [smem:[#allocation11_spill]] %s8897_s29  ;;  %s475_s0 = sadd.s32 1, %s8745_s26 }
  0x12   : > { %s472_s4 = ssub.s32 %s8749_s27, %s8897_s29  ;;  %p485_p0 = scmp.ne.s32.totalorder %s8745_s26, %s8741_s25 }
  0x13   : > { %p473_p1 = scmp.eq.s32.totalorder %s472_s4, 0  ;;  %p486_p2 = scmp.eq.s32.totalorder %s8893_s3, 1 }
  0x14   : > { %p491_p3 = scmp.ne.s32.totalorder %s8741_s25, %s8737_s2  ;;  %p492_p4 = scmp.eq.s32.totalorder %s6508_s28, 1 }
  0x15   : > { %s8908_s30 = scalar_select %p473_p1, %s8745_s26, %s475_s0  }
  0x16   : > { %p8910_p5 = por %p486_p2, %p485_p0  ;;  %p8914_p6 = por %p492_p4, %p491_p3 }
  0x17   : > { %11367 = sst [smem:[#allocation12_spill]] %s8908_s30  ;;  %p6511_p7 = scmp.ge.s32.totalorder %s8749_s27, 1 }
  0x18   : > { %s11369_s22 = scalar_select %p8914_p6, 1, 0 }
  0x19   : > { %p606_p8 = scmp.lt.s32.totalorder %s8749_s27, 3 }
  0x1a   : > { %11370 = sst [smem:[#allocation13_spill]] %s11369_s22 }
  0x1b   : > { %p607_p9 = pnand %p6511_p7, %p606_p8 }
  0x1d   : > { %610 = sbr.rel (%p607_p9) target bundleno = 8436 (0x20f4), region = 100 }
  0x24   : > { %p676_p10 = scmp.lt.s32.totalorder %s8893_s3, 1  ;;  %vm719_vm0 = vcmask 261120   ;;  %s11371_s0 = sld [smem:[#allocation51_spill]]  ;;  %vm1350_vm1 = vcmask 1041408   ;;  %vm1253_vm2 = vcmask 15360   ;;  %vm2694_vm3 = vcmask 256000  }
  0x25   : > { %s11373_s24 = sld [smem:[#allocation55_spill]]  ;;  %vm2791_vm4 = vcmask 253952   ;;  %s11383_s7 = sld [smem:[#allocation58_spill]]  ;;  %vm8753_vm5 = vmmov 0   ;;  %vm2988_vm6 = vcmask 523264   ;;  %vm2990_vm7 = vcmask 785408  }
  0x26   : > { %s8922_s23 = scalar_select %p676_p10, %s8893_s3, 1  ;;  %vm2998_vm8 = vcmask 1040384   ;;  %vm3086_vm9 = vcmask 1043456   ;;  %vm3127_vm10 = vcmask 1043457  }
  0x27   : > { %s11385_s28 = sld [smem:[#allocation53_spill]]  ;;  %s11387_s6 = sld [smem:[#allocation57_spill]] }
  0x28   : > { %s11254_s1 = sshll.u32 %s8922_s23, 8  ;;  %s8755_s22 = smov 64  }
  0x29   : > { %s11443_s29 = smov 96   ;;  %s10465_s2 = sand.u32 1, %s8741_s25  }
  0x2a   : > { %s8930_s4 = scalar_lea.vmem %s11371_s0, %s11254_s1  ;;  %s11372_s0 = sld [smem:[#allocation56_spill]] }
  0x2b   : > { %v8933_v0 = vld [vmem:[%s8930_s4] sm:$0xff]  ;;  %v8936_v1 = vld [vmem:[%s8930_s4 + $0x10] sm:$0xff]  ;;  %v8939_v2 = vld [vmem:[%s8930_s4 + $0x8] sm:$0xff]  ;;  %s11495_s26 = sshll.u32 %s8922_s23, 8  ;;  %s11496_s30 = sld [smem:[#allocation52_spill]] }
  0x2c   : > { %v720_v3 = vsel %vm719_vm0, %v8933_v0, 0.0  ;;  %v726_v4 = vsel %vm719_vm0, %v8936_v1, 0.0  ;;  %v8946_v5 = vld [vmem:[%s8930_s4 + $0x18] sm:$0xff]  ;;  %v723_v6 = vsel %vm719_vm0, %v8939_v2, 0.0  ;;  %v8953_v8 = vld [vmem:[%s8930_s4 + $0x20] sm:$0xff]  ;;  %v8956_v9 = vld [vmem:[%s8930_s4 + $0x28] sm:$0xff] }
  0x2d   : > { %721 = vadd.xlane.f32.xlu0 %v720_v3  ;;  %727 = vadd.xlane.f32.xlu1 %v726_v4  ;;  %v729_v7 = vsel %vm719_vm0, %v8946_v5, 0.0  ;;  %v732_v10 = vsel %vm719_vm0, %v8953_v8, 0.0  ;;  %v735_v11 = vsel %vm719_vm0, %v8956_v9, 0.0  ;;  %v8963_v12 = vld [vmem:[%s8930_s4 + $0x30] sm:$0xff]  ;;  %v8966_v13 = vld [vmem:[%s8930_s4 + $0x38] sm:$0xff]  ;;  %v8973_v16 = vld [vmem:[%s8930_s4 + $0x40] sm:$0xff] }
  0x2e   : > { %v738_v14 = vsel %vm719_vm0, %v8963_v12, 0.0  ;;  %v741_v15 = vsel %vm719_vm0, %v8966_v13, 0.0  ;;  %v8976_v17 = vld [vmem:[%s8930_s4 + $0x48] sm:$0xff]  ;;  %v744_v18 = vsel %vm719_vm0, %v8973_v16, 0.0  ;;  %v8983_v20 = vld [vmem:[%s8930_s4 + $0x50] sm:$0xff]  ;;  %v8986_v21 = vld [vmem:[%s8930_s4 + $0x58] sm:$0xff] }
  0x2f   : > { %v747_v19 = vsel %vm719_vm0, %v8976_v17, 0.0  ;;  %v750_v22 = vsel %vm719_vm0, %v8983_v20, 0.0  ;;  %v753_v23 = vsel %vm719_vm0, %v8986_v21, 0.0  ;;  %v8993_v24 = vld [vmem:[%s8930_s4 + $0x60] sm:$0xff]  ;;  %v8996_v25 = vld [vmem:[%s8930_s4 + $0x68] sm:$0xff]  ;;  %v9003_v28 = vld [vmem:[%s8930_s4 + $0x70] sm:$0xff] }
  0x30   : > { %v756_v26 = vsel %vm719_vm0, %v8993_v24, 0.0  ;;  %v759_v27 = vsel %vm719_vm0, %v8996_v25, 0.0  ;;  %v9006_v29 = vld [vmem:[%s8930_s4 + $0x78] sm:$0xff]  ;;  %v762_v30 = vsel %vm719_vm0, %v9003_v28, 0.0  ;;  %v9013_v32 = vld [vmem:[%s8930_s4 + $0x80] sm:$0xff]  ;;  %v9016_v33 = vld [vmem:[%s8930_s4 + $0x88] sm:$0xff] }
  0x31   : > { %724 = vadd.xlane.f32.xlu0 %v723_v6  ;;  %730 = vadd.xlane.f32.xlu1 %v729_v7  ;;  %v765_v31 = vsel %vm719_vm0, %v9006_v29, 0.0  ;;  %v768_v34 = vsel %vm719_vm0, %v9013_v32, 0.0  ;;  %v771_v35 = vsel %vm719_vm0, %v9016_v33, 0.0  ;;  %v9023_v36 = vld [vmem:[%s8930_s4 + $0x90] sm:$0xff]  ;;  %v9026_v37 = vld [vmem:[%s8930_s4 + $0x98] sm:$0xff]  ;;  %v9033_v40 = vld [vmem:[%s8930_s4 + $0xa0] sm:$0xff]  ;;  %s10540_s1 = scalar_lea.vmem %s11496_s30, %s11495_s26 }
  0x32   : > { %v774_v38 = vsel %vm719_vm0, %v9023_v36, 0.0  ;;  %v777_v39 = vsel %vm719_vm0, %v9026_v37, 0.0  ;;  %v9036_v41 = vld [vmem:[%s8930_s4 + $0xa8] sm:$0xff]  ;;  %v780_v42 = vsel %vm719_vm0, %v9033_v40, 0.0  ;;  %v9043_v44 = vld [vmem:[%s8930_s4 + $0xb0] sm:$0xff]  ;;  %v9046_v45 = vld [vmem:[%s8930_s4 + $0xb8] sm:$0xff] }
  0x33   : > { %v783_v43 = vsel %vm719_vm0, %v9036_v41, 0.0  ;;  %v786_v46 = vsel %vm719_vm0, %v9043_v44, 0.0  ;;  %v789_v47 = vsel %vm719_vm0, %v9046_v45, 0.0  ;;  %v9053_v48 = vld [vmem:[%s8930_s4 + $0xc0] sm:$0xff]  ;;  %v9056_v49 = vld [vmem:[%s8930_s4 + $0xc8] sm:$0xff]  ;;  %v9063_v52 = vld [vmem:[%s8930_s4 + $0xd0] sm:$0xff] }
  0x34   : > { %v792_v50 = vsel %vm719_vm0, %v9053_v48, 0.0  ;;  %v795_v51 = vsel %vm719_vm0, %v9056_v49, 0.0  ;;  %v9066_v53 = vld [vmem:[%s8930_s4 + $0xd8] sm:$0xff]  ;;  %v798_v54 = vsel %vm719_vm0, %v9063_v52, 0.0  ;;  %v9073_v56 = vld [vmem:[%s8930_s4 + $0xe0] sm:$0xff]  ;;  %v9076_v57 = vld [vmem:[%s8930_s4 + $0xe8] sm:$0xff] }
  0x35   : > { %733 = vadd.xlane.f32.xlu0 %v732_v10  ;;  %736 = vadd.xlane.f32.xlu1 %v735_v11  ;;  %v801_v55 = vsel %vm719_vm0, %v9066_v53, 0.0  ;;  %v804_v58 = vsel %vm719_vm0, %v9073_v56, 0.0  ;;  %v807_v59 = vsel %vm719_vm0, %v9076_v57, 0.0  ;;  %v9083_v60 = vld [vmem:[%s8930_s4 + $0xf0] sm:$0xff]  ;;  %v9086_v61 = vld [vmem:[%s8930_s4 + $0xf8] sm:$0xff]  ;;  %v1213_v4 = vld [vmem:[%s11240_s9] sm:$0xff] }
  0x36   : > { %v810_v62 = vsel %vm719_vm0, %v9083_v60, 0.0  ;;  %v813_v63 = vsel %vm719_vm0, %v9086_v61, 0.0  ;;  %v1245_v3 = vld [vmem:[%s11372_s0] sm:$0x3]  ;;  %v1214_v6 = vld [vmem:[%s11240_s9 + $0x8] sm:$0xff]  ;;  %7302 = vmatprep.mubr.msk.f32.mxu0 %vm1253_vm2, %v1213_v4  ;;  %s11289_s0 = smov 96  }
  0x37   : > { %7300 = vmatprep.subr.msk.mxu0 %vm1350_vm1, %v1245_v3  ;;  %v9103_v7 = vpack.c.bf16 %v1214_v6, %v1213_v4  ;;  %v1209_v10 = vld [vmem:[%s11373_s24] sm:$0xff]  ;;  %v1210_v11 = vld [vmem:[%s11373_s24 + $0x8] sm:$0xff]  ;;  %s11497_s26 = sld [smem:[#allocation54_spill]]  ;;  %s11354_s30 = sshll.u32 %s8893_s3, 7 }
  0x38   : > { %7301 = vmatpush3.msk.msra.mxu0 %vm1350_vm1, %v1245_v3  ;;  %v1212_v3 = vld [vmem:[%s11373_s24 + $0x18] sm:$0xff]  ;;  %s11154_s23 = scalar_lea.hbm %s11251_s20, %s11354_s30 }
  0x39   : > { %739 = vadd.xlane.f32.xlu0 %v738_v14  ;;  %742 = vadd.xlane.f32.xlu1 %v741_v15  ;;  %v1215_v14 = vld [vmem:[%s11240_s9 + $0x10] sm:$0xff]  ;;  %v7726_v15 = vpack.c.bf16 %v1210_v11, %v1209_v10  ;;  %v1232_v10 = vld [vmem:[%s11240_s9 + $0x98] sm:$0xff] }
  0x3a   : > { %7303 = vmatmul.mubr.msk.f32.vlgmr.msra.gmra.mrb[0].mxu0 %vm1253_vm2, %v1214_v6  ;;  %v1231_v6 = vld [vmem:[%s11240_s9 + $0x90] sm:$0xff] }
  0x3b   : > { %7727 = vmatprep.subr.bf16.mxu0 %v7726_v15  ;;  %7305 = vmatprep.mubr.msk.f32.mxu0 %vm1253_vm2, %v1215_v14  ;;  %v9192_v11 = vpack.c.bf16 %v1232_v10, %v1231_v6 }
  0x3c   : > { %7729 = vmatpush3.bf16.msra.mxu0 %v7726_v15 }
  0x3d   : > { %745 = vadd.xlane.f32.xlu0 %v744_v18  ;;  %748 = vadd.xlane.f32.xlu1 %v747_v19  ;;  %v1216_v18 = vld [vmem:[%s11240_s9 + $0x18] sm:$0xff]  ;;  %v1217_v19 = vld [vmem:[%s11240_s9 + $0x20] sm:$0xff] }
  0x3e   : > { %7306 = vmatmul.mubr.msk.f32.gmra.mrb[2].mxu0 %vm1253_vm2, %v1216_v18 }
  0x3f   : > { %7308 = vmatprep.mubr.msk.f32.mxu0 %vm1253_vm2, %v1217_v19 }
  0x41   : > { %751 = vadd.xlane.f32.xlu0 %v750_v22  ;;  %754 = vadd.xlane.f32.xlu1 %v753_v23  ;;  %v1218_v22 = vld [vmem:[%s11240_s9 + $0x28] sm:$0xff]  ;;  %v9125_v23 = vpack.c.bf16 %v1216_v18, %v1215_v14  ;;  %v9211_v14 = vld [vmem:[%s11240_s9 + $0xa0] sm:$0xff] }
  0x42   : > { %7309 = vmatmul.mubr.msk.f32.gmra.mrb[4].mxu0 %vm1253_vm2, %v1218_v22 }
  0x45   : > { %757 = vadd.xlane.f32.xlu0 %v756_v26  ;;  %760 = vadd.xlane.f32.xlu1 %v759_v27  ;;  %v9127_v26 = vpack.c.bf16 %v1218_v22, %v1217_v19  ;;  %v1219_v27 = vld [vmem:[%s11240_s9 + $0x30] sm:$0xff] }
  0x46   : > { %7311 = vmatprep.mubr.msk.f32.mxu0 %vm1253_vm2, %v1219_v27 }
  0x49   : > { %763 = vadd.xlane.f32.xlu0 %v762_v30  ;;  %766 = vadd.xlane.f32.xlu1 %v765_v31  ;;  %v1220_v30 = vld [vmem:[%s11240_s9 + $0x38] sm:$0xff]  ;;  %v1221_v31 = vld [vmem:[%s11240_s9 + $0x40] sm:$0xff] }
  0x4a   : > { %7312 = vmatmul.mubr.msk.f32.gmra.mrb[6].mxu0 %vm1253_vm2, %v1220_v30 }
  0x4b   : > { %7314 = vmatprep.mubr.msk.f32.mxu0 %vm1253_vm2, %v1221_v31 }
  0x4d   : > { %769 = vadd.xlane.f32.xlu0 %v768_v34  ;;  %772 = vadd.xlane.f32.xlu1 %v771_v35  ;;  %v9139_v34 = vpack.c.bf16 %v1220_v30, %v1219_v27  ;;  %v1222_v35 = vld [vmem:[%s11240_s9 + $0x48] sm:$0xff] }
  0x4e   : > { %7315 = vmatmul.mubr.msk.f32.gmra.mrb[8].mxu0 %vm1253_vm2, %v1222_v35 }
  0x4f   : > { %11374 = vst [vmem:[#allocation14_spill] sm:$0xff] %v9139_v34 }
  0x51   : > { %775 = vadd.xlane.f32.xlu0 %v774_v38  ;;  %778 = vadd.xlane.f32.xlu1 %v777_v39  ;;  %v1223_v38 = vld [vmem:[%s11240_s9 + $0x50] sm:$0xff]  ;;  %v1224_v39 = vld [vmem:[%s11240_s9 + $0x58] sm:$0xff] }
  0x52   : > { %7317 = vmatprep.mubr.msk.f32.mxu0 %vm1253_vm2, %v1223_v38 }
  0x53   : > { %7318 = vmatmul.mubr.msk.f32.gmra.mrb[10].mxu0 %vm1253_vm2, %v1224_v39 }
  0x55   : > { %781 = vadd.xlane.f32.xlu0 %v780_v42  ;;  %784 = vadd.xlane.f32.xlu1 %v783_v43  ;;  %v9150_v42 = vpack.c.bf16 %v1222_v35, %v1221_v31  ;;  %v9152_v43 = vpack.c.bf16 %v1224_v39, %v1223_v38 }
  0x57   : > { %11375 = vst [vmem:[#allocation15_spill] sm:$0xff] %v9150_v42  ;;  %11376 = vst [vmem:[#allocation16_spill] sm:$0xff] %v9152_v43 }
  0x59   : > { %787 = vadd.xlane.f32.xlu0 %v786_v46  ;;  %790 = vadd.xlane.f32.xlu1 %v789_v47  ;;  %v1225_v46 = vld [vmem:[%s11240_s9 + $0x60] sm:$0xff]  ;;  %v1226_v47 = vld [vmem:[%s11240_s9 + $0x68] sm:$0xff] }
  0x5a   : > { %7320 = vmatprep.mubr.msk.f32.mxu0 %vm1253_vm2, %v1225_v46 }
  0x5b   : > { %7321 = vmatmul.mubr.msk.f32.gmra.mrb[12].mxu0 %vm1253_vm2, %v1226_v47 }
  0x5d   : > { %793 = vadd.xlane.f32.xlu0 %v792_v50  ;;  %796 = vadd.xlane.f32.xlu1 %v795_v51  ;;  %v1227_v50 = vld [vmem:[%s11240_s9 + $0x70] sm:$0xff]  ;;  %v9163_v51 = vpack.c.bf16 %v1226_v47, %v1225_v46 }
  0x5e   : > { %7323 = vmatprep.mubr.msk.f32.mxu0 %vm1253_vm2, %v1227_v50 }
  0x5f   : > { %11377 = vst [vmem:[#allocation17_spill] sm:$0xff] %v9163_v51 }
  0x61   : > { %799 = vadd.xlane.f32.xlu0 %v798_v54  ;;  %802 = vadd.xlane.f32.xlu1 %v801_v55  ;;  %v1228_v54 = vld [vmem:[%s11240_s9 + $0x78] sm:$0xff]  ;;  %v1229_v55 = vld [vmem:[%s11240_s9 + $0x80] sm:$0xff] }
  0x62   : > { %7324 = vmatmul.mubr.msk.f32.gmra.mrb[14].mxu0 %vm1253_vm2, %v1228_v54 }
  0x63   : > { %7326 = vmatprep.mubr.msk.f32.mxu0 %vm1253_vm2, %v1229_v55 }
  0x65   : > { %805 = vadd.xlane.f32.xlu0 %v804_v58  ;;  %808 = vadd.xlane.f32.xlu1 %v807_v59  ;;  %v1230_v58 = vld [vmem:[%s11240_s9 + $0x88] sm:$0xff]  ;;  %v9175_v59 = vpack.c.bf16 %v1228_v54, %v1227_v50 }
  0x66   : > { %7327 = vmatmul.mubr.msk.f32.gmra.mrb[16].mxu0 %vm1253_vm2, %v1230_v58 }
  0x67   : > { %11378 = vst [vmem:[#allocation18_spill] sm:$0xff] %v9175_v59  ;;  %7329 = vmatprep.mubr.msk.f32.mxu0 %vm1253_vm2, %v1231_v6 }
  0x69   : > { %811 = vadd.xlane.f32.xlu0 %v810_v62  ;;  %814 = vadd.xlane.f32.xlu1 %v813_v63  ;;  %v9177_v62 = vpack.c.bf16 %v1230_v58, %v1229_v55  ;;  %v1211_v63 = vld [vmem:[%s11373_s24 + $0x10] sm:$0xff] }
  0x6a   : > { %v7730_v4 = vpack.c.bf16 %v1212_v3, %v1211_v63  ;;  %7330 = vmatmul.mubr.msk.f32.gmra.mrb[18].mxu0 %vm1253_vm2, %v1232_v10 }
  0x6b   : > { %7332 = vmatprep.mubr.msk.f32.mxu0 %vm1253_vm2, %v9211_v14 }
  0x6c   : > { %7731 = vmatprep.subr.bf16.mxu0 %v7730_v4 }
  0x6d   : > { %7733 = vmatpush3.bf16.msra.mxu0 %v7730_v4 }
  0xba   : > { %v722_v15 = vpop.xlane.xlu0 %721  ;;  %v728_v18 = vpop.xlane.xlu1 %727 }
  0xbb   : > { %v817_v19 = vmul.f32 0.03125, %v722_v15  ;;  %v819_v22 = vmul.f32 0.03125, %v728_v18 }
  0xbd   : > { %v9217_v27 = vsub.f32 %v8933_v0, %v817_v19  ;;  %v9220_v30 = vsub.f32 %v8936_v1, %v819_v22 }
  0xbe   : > { %v725_v31 = vpop.xlane.xlu0 %724  ;;  %v731_v35 = vpop.xlane.xlu1 %730 }
  0xbf   : > { %v818_v38 = vmul.f32 0.03125, %v725_v31  ;;  %v820_v39 = vmul.f32 0.03125, %v731_v35  ;;  %v881_v46 = vmul.f32 %v9217_v27, %v9217_v27  ;;  %v883_v47 = vmul.f32 %v9220_v30, %v9220_v30 }
  0xc1   : > { %v9227_v50 = vsub.f32 %v8939_v2, %v818_v38  ;;  %v9230_v54 = vsub.f32 %v8946_v5, %v820_v39  ;;  %v913_v0 = vsel %vm719_vm0, %v881_v46, 0.0  ;;  %v919_v58 = vsel %vm719_vm0, %v883_v47, 0.0 }
  0xc2   : > { %914 = vadd.xlane.f32.xlu0 %v913_v0  ;;  %v734_v1 = vpop.xlane.xlu0 %733  ;;  %v737_v55 = vpop.xlane.xlu1 %736 }
  0xc3   : > { %v821_v63 = vmul.f32 0.03125, %v734_v1  ;;  %v822_v3 = vmul.f32 0.03125, %v737_v55  ;;  %v882_v4 = vmul.f32 %v9227_v50, %v9227_v50  ;;  %v884_v6 = vmul.f32 %v9230_v54, %v9230_v54 }
  0xc5   : > { %v9239_v2 = vsub.f32 %v8953_v8, %v821_v63  ;;  %v9242_v5 = vsub.f32 %v8956_v9, %v822_v3  ;;  %v916_v10 = vsel %vm719_vm0, %v882_v4, 0.0  ;;  %v922_v19 = vsel %vm719_vm0, %v884_v6, 0.0 }
  0xc6   : > { %920 = vadd.xlane.f32.xlu0 %v919_v58  ;;  %917 = vadd.xlane.f32.xlu1 %v916_v10  ;;  %v740_v15 = vpop.xlane.xlu0 %739  ;;  %v743_v18 = vpop.xlane.xlu1 %742 }
  0xc7   : > { %v823_v22 = vmul.f32 0.03125, %v740_v15  ;;  %v824_v31 = vmul.f32 0.03125, %v743_v18  ;;  %v885_v35 = vmul.f32 %v9239_v2, %v9239_v2  ;;  %v886_v8 = vmul.f32 %v9242_v5, %v9242_v5 }
  0xc9   : > { %v9251_v38 = vsub.f32 %v8963_v12, %v823_v22  ;;  %v9254_v9 = vsub.f32 %v8966_v13, %v824_v31  ;;  %v925_v39 = vsel %vm719_vm0, %v885_v35, 0.0  ;;  %v928_v0 = vsel %vm719_vm0, %v886_v8, 0.0 }
  0xca   : > { %923 = vadd.xlane.f32.xlu1 %v922_v19  ;;  %926 = vadd.xlane.f32.xlu0 %v925_v39  ;;  %v746_v46 = vpop.xlane.xlu0 %745  ;;  %v749_v47 = vpop.xlane.xlu1 %748 }
  0xcb   : > { %v825_v1 = vmul.f32 0.03125, %v746_v46  ;;  %v826_v55 = vmul.f32 0.03125, %v749_v47  ;;  %v887_v58 = vmul.f32 %v9251_v38, %v9251_v38  ;;  %v888_v12 = vmul.f32 %v9254_v9, %v9254_v9  ;;  %v9289_v47 = vld [vmem:[%s11240_s9 + $0xb0] sm:$0xff] }
  0xcd   : > { %v9263_v63 = vsub.f32 %v8973_v16, %v825_v1  ;;  %v9266_v13 = vsub.f32 %v8976_v17, %v826_v55  ;;  %v931_v3 = vsel %vm719_vm0, %v887_v58, 0.0  ;;  %v934_v10 = vsel %vm719_vm0, %v888_v12, 0.0  ;;  %v1234_v17 = vld [vmem:[%s11240_s9 + $0xa8] sm:$0xff]  ;;  %v9303_v58 = vld [vmem:[%s11240_s9 + $0xb8] sm:$0xff] }
  0xce   : > { %929 = vadd.xlane.f32.xlu1 %v928_v0  ;;  %932 = vadd.xlane.f32.xlu0 %v931_v3  ;;  %v752_v4 = vpop.xlane.xlu0 %751  ;;  %v755_v6 = vpop.xlane.xlu1 %754  ;;  %v9298_v55 = vpack.c.bf16 %v1234_v17, %v9211_v14 }
  0xcf   : > { %v827_v15 = vmul.f32 0.03125, %v752_v4  ;;  %v828_v18 = vmul.f32 0.03125, %v755_v6  ;;  %v889_v19 = vmul.f32 %v9263_v63, %v9263_v63  ;;  %v890_v16 = vmul.f32 %v9266_v13, %v9266_v13  ;;  %7333 = vmatmul.mubr.msk.f32.gmra.mrb[20].mxu0 %vm1253_vm2, %v1234_v17 }
  0xd0   : > { %7335 = vmatprep.mubr.msk.f32.mxu0 %vm1253_vm2, %v9289_v47 }
  0xd1   : > { %v9279_v22 = vsub.f32 %v8983_v20, %v827_v15  ;;  %v9282_v31 = vsub.f32 %v8986_v21, %v828_v18  ;;  %v937_v35 = vsel %vm719_vm0, %v889_v19, 0.0  ;;  %v940_v46 = vsel %vm719_vm0, %v890_v16, 0.0  ;;  %v1237_v19 = vld [vmem:[%s11240_s9 + $0xc0] sm:$0xff]  ;;  %v1238_v16 = vld [vmem:[%s11240_s9 + $0xc8] sm:$0xff] }
  0xd2   : > { %935 = vadd.xlane.f32.xlu1 %v934_v10  ;;  %938 = vadd.xlane.f32.xlu0 %v937_v35  ;;  %v758_v8 = vpop.xlane.xlu0 %757  ;;  %v761_v39 = vpop.xlane.xlu1 %760  ;;  %v9399_v51 = vpack.c.bf16 %v1238_v16, %v1237_v19 }
  0xd3   : > { %v829_v0 = vmul.f32 0.03125, %v758_v8  ;;  %v830_v1 = vmul.f32 0.03125, %v761_v39  ;;  %v891_v20 = vmul.f32 %v9279_v22, %v9279_v22  ;;  %v892_v21 = vmul.f32 %v9282_v31, %v9282_v31  ;;  %7336 = vmatmul.mubr.msk.f32.gmra.mrb[22].mxu0 %vm1253_vm2, %v9303_v58 }
  0xd4   : > { %7338 = vmatprep.mubr.msk.f32.mxu0 %vm1253_vm2, %v1237_v19  ;;  %11379 = vst [vmem:[#allocation19_spill] sm:$0xff] %v9399_v51 }
  0xd5   : > { %v9306_v12 = vsub.f32 %v8993_v24, %v829_v0  ;;  %v9309_v3 = vsub.f32 %v8996_v25, %v830_v1  ;;  %v943_v4 = vsel %vm719_vm0, %v891_v20, 0.0  ;;  %v946_v10 = vsel %vm719_vm0, %v892_v21, 0.0 }
  0xd6   : > { %941 = vadd.xlane.f32.xlu1 %v940_v46  ;;  %944 = vadd.xlane.f32.xlu0 %v943_v4  ;;  %v764_v14 = vpop.xlane.xlu0 %763  ;;  %v767_v6 = vpop.xlane.xlu1 %766  ;;  %v1240_v4 = vld [vmem:[%s11240_s9 + $0xd8] sm:$0xff] }
  0xd7   : > { %v831_v15 = vmul.f32 0.03125, %v764_v14  ;;  %v832_v18 = vmul.f32 0.03125, %v767_v6  ;;  %v893_v24 = vmul.f32 %v9306_v12, %v9306_v12  ;;  %v894_v25 = vmul.f32 %v9309_v3, %v9309_v3  ;;  %7339 = vmatmul.mubr.msk.f32.gmra.mrb[24].mxu0 %vm1253_vm2, %v1238_v16 }
  0xd9   : > { %v9327_v17 = vsub.f32 %v9003_v28, %v831_v15  ;;  %v9330_v35 = vsub.f32 %v9006_v29, %v832_v18  ;;  %v949_v8 = vsel %vm719_vm0, %v893_v24, 0.0  ;;  %v952_v0 = vsel %vm719_vm0, %v894_v25, 0.0  ;;  %v1239_v29 = vld [vmem:[%s11240_s9 + $0xd0] sm:$0xff] }
  0xda   : > { %947 = vadd.xlane.f32.xlu1 %v946_v10  ;;  %950 = vadd.xlane.f32.xlu0 %v949_v8  ;;  %v770_v39 = vpop.xlane.xlu0 %769  ;;  %v773_v46 = vpop.xlane.xlu1 %772 }
  0xdb   : > { %v833_v1 = vmul.f32 0.03125, %v770_v39  ;;  %v834_v20 = vmul.f32 0.03125, %v773_v46  ;;  %v895_v21 = vmul.f32 %v9327_v17, %v9327_v17  ;;  %v896_v28 = vmul.f32 %v9330_v35, %v9330_v35  ;;  %7341 = vmatprep.mubr.msk.f32.mxu0 %vm1253_vm2, %v1239_v29  ;;  %v1242_v46 = vld [vmem:[%s11240_s9 + $0xe8] sm:$0xff] }
  0xdc   : > { %7342 = vmatmul.mubr.msk.f32.gmra.mrb[26].mxu0 %vm1253_vm2, %v1240_v4 }
  0xdd   : > { %v9347_v14 = vsub.f32 %v9013_v32, %v833_v1  ;;  %v9350_v6 = vsub.f32 %v9016_v33, %v834_v20  ;;  %v955_v10 = vsel %vm719_vm0, %v895_v21, 0.0  ;;  %v958_v24 = vsel %vm719_vm0, %v896_v28, 0.0  ;;  %v1241_v33 = vld [vmem:[%s11240_s9 + $0xe0] sm:$0xff] }
  0xde   : > { %953 = vadd.xlane.f32.xlu1 %v952_v0  ;;  %956 = vadd.xlane.f32.xlu0 %v955_v10  ;;  %v776_v15 = vpop.xlane.xlu0 %775  ;;  %v779_v18 = vpop.xlane.xlu1 %778 }
  0xdf   : > { %v835_v25 = vmul.f32 0.03125, %v776_v15  ;;  %v836_v8 = vmul.f32 0.03125, %v779_v18  ;;  %v897_v39 = vmul.f32 %v9347_v14, %v9347_v14  ;;  %v898_v32 = vmul.f32 %v9350_v6, %v9350_v6  ;;  %7344 = vmatprep.mubr.msk.f32.mxu0 %vm1253_vm2, %v1241_v33 }
  0xe0   : > { %7345 = vmatmul.mubr.msk.f32.gmra.mrb[28].mxu0 %vm1253_vm2, %v1242_v46 }
  0xe1   : > { %v9367_v0 = vsub.f32 %v9023_v36, %v835_v25  ;;  %v9370_v1 = vsub.f32 %v9026_v37, %v836_v8  ;;  %v961_v20 = vsel %vm719_vm0, %v897_v39, 0.0  ;;  %v964_v10 = vsel %vm719_vm0, %v898_v32, 0.0  ;;  %v1243_v37 = vld [vmem:[%s11240_s9 + $0xf0] sm:$0xff] }
  0xe2   : > { %959 = vadd.xlane.f32.xlu1 %v958_v24  ;;  %962 = vadd.xlane.f32.xlu0 %v961_v20  ;;  %v782_v21 = vpop.xlane.xlu0 %781  ;;  %v785_v28 = vpop.xlane.xlu1 %784  ;;  %v1244_v24 = vld [vmem:[%s11240_s9 + $0xf8] sm:$0xff] }
  0xe3   : > { %v837_v15 = vmul.f32 0.03125, %v782_v21  ;;  %v838_v18 = vmul.f32 0.03125, %v785_v28  ;;  %v899_v59 = vmul.f32 %v9367_v0, %v9367_v0  ;;  %v900_v36 = vmul.f32 %v9370_v1, %v9370_v1  ;;  %7347 = vmatprep.mubr.msk.f32.mxu0 %vm1253_vm2, %v1243_v37 }
  0xe4   : > { %7348 = vmatmul.mubr.msk.f32.gmra.mrb[30].mxu0 %vm1253_vm2, %v1244_v24  ;;  %v9397_v28 = vpack.c.bf16 %v9303_v58, %v9289_v47 }
  0xe5   : > { %v9387_v25 = vsub.f32 %v9033_v40, %v837_v15  ;;  %v9390_v8 = vsub.f32 %v9036_v41, %v838_v18  ;;  %v967_v39 = vsel %vm719_vm0, %v899_v59, 0.0  ;;  %v970_v21 = vsel %vm719_vm0, %v900_v36, 0.0 }
  0xe6   : > { %965 = vadd.xlane.f32.xlu1 %v964_v10  ;;  %968 = vadd.xlane.f32.xlu0 %v967_v39  ;;  %v788_v32 = vpop.xlane.xlu0 %787  ;;  %v791_v20 = vpop.xlane.xlu1 %790  ;;  %v9401_v40 = vpack.c.bf16 %v1240_v4, %v1239_v29  ;;  %v9407_v18 = vpack.c.bf16 %v1242_v46, %v1241_v33  ;;  %v9417_v4 = vpack.c.bf16 %v1244_v24, %v1243_v37 }
  0xe7   : > { %v839_v41 = vmul.f32 0.03125, %v788_v32  ;;  %v840_v15 = vmul.f32 0.03125, %v791_v20  ;;  %v901_v59 = vmul.f32 %v9387_v25, %v9387_v25  ;;  %v902_v10 = vmul.f32 %v9390_v8, %v9390_v8 }
  0xe8   : > { %11380 = vst [vmem:[#allocation20_spill] sm:$0xff] %v9401_v40  ;;  %11381 = vst [vmem:[#allocation21_spill] sm:$0xff] %v9407_v18 }
  0xe9   : > { %v9410_v36 = vsub.f32 %v9043_v44, %v839_v41  ;;  %v9413_v47 = vsub.f32 %v9046_v45, %v840_v15  ;;  %v973_v58 = vsel %vm719_vm0, %v901_v59, 0.0  ;;  %v976_v29 = vsel %vm719_vm0, %v902_v10, 0.0  ;;  %11382 = vst [vmem:[#allocation22_spill] sm:$0xff] %v9417_v4 }
  0xea   : > { %971 = vadd.xlane.f32.xlu1 %v970_v21  ;;  %974 = vadd.xlane.f32.xlu0 %v973_v58  ;;  %v794_v19 = vpop.xlane.xlu0 %793  ;;  %v797_v16 = vpop.xlane.xlu1 %796 }
  0xeb   : > { %v841_v39 = vmul.f32 0.03125, %v794_v19  ;;  %v842_v32 = vmul.f32 0.03125, %v797_v16  ;;  %v903_v33 = vmul.f32 %v9410_v36, %v9410_v36  ;;  %v904_v44 = vmul.f32 %v9413_v47, %v9413_v47 }
  0xed   : > { %v9424_v45 = vsub.f32 %v9053_v48, %v841_v39  ;;  %v9427_v46 = vsub.f32 %v9056_v49, %v842_v32  ;;  %v979_v20 = vsel %vm719_vm0, %v903_v33, 0.0  ;;  %v982_v21 = vsel %vm719_vm0, %v904_v44, 0.0 }
  0xee   : > { %977 = vadd.xlane.f32.xlu1 %v976_v29  ;;  %980 = vadd.xlane.f32.xlu0 %v979_v20  ;;  %v800_v37 = vpop.xlane.xlu0 %799  ;;  %v803_v24 = vpop.xlane.xlu1 %802 }
  0xef   : > { %v843_v41 = vmul.f32 0.03125, %v800_v37  ;;  %v844_v15 = vmul.f32 0.03125, %v803_v24  ;;  %v905_v59 = vmul.f32 %v9424_v45, %v9424_v45  ;;  %v906_v48 = vmul.f32 %v9427_v46, %v9427_v46 }
  0xf1   : > { %v9436_v10 = vsub.f32 %v9063_v52, %v843_v41  ;;  %v9439_v49 = vsub.f32 %v9066_v53, %v844_v15  ;;  %v985_v58 = vsel %vm719_vm0, %v905_v59, 0.0  ;;  %v988_v29 = vsel %vm719_vm0, %v906_v48, 0.0 }
  0xf2   : > { %983 = vadd.xlane.f32.xlu1 %v982_v21  ;;  %986 = vadd.xlane.f32.xlu0 %v985_v58  ;;  %v806_v19 = vpop.xlane.xlu0 %805  ;;  %v809_v16 = vpop.xlane.xlu1 %808 }
  0xf3   : > { %v845_v39 = vmul.f32 0.03125, %v806_v19  ;;  %v846_v32 = vmul.f32 0.03125, %v809_v16  ;;  %v907_v33 = vmul.f32 %v9436_v10, %v9436_v10  ;;  %v908_v52 = vmul.f32 %v9439_v49, %v9439_v49 }
  0xf5   : > { %v9448_v44 = vsub.f32 %v9073_v56, %v845_v39  ;;  %v9451_v53 = vsub.f32 %v9076_v57, %v846_v32  ;;  %v991_v20 = vsel %vm719_vm0, %v907_v33, 0.0  ;;  %v994_v21 = vsel %vm719_vm0, %v908_v52, 0.0  ;;  %v9483_v33 = vld [vmem:[%s11247_s16] sm:$0x1] }
  0xf6   : > { %989 = vadd.xlane.f32.xlu1 %v988_v29  ;;  %992 = vadd.xlane.f32.xlu0 %v991_v20  ;;  %v812_v37 = vpop.xlane.xlu0 %811  ;;  %v815_v24 = vpop.xlane.xlu1 %814  ;;  %v2792_v52 = vsel %vm2791_vm4, %v9483_v33, 0.0  ;;  %v1900_v20 = vld [vmem:[%s11383_s7] sm:$0xff] }
  0xf7   : > { %v847_v41 = vmul.f32 0.03125, %v812_v37  ;;  %v848_v15 = vmul.f32 0.03125, %v815_v24  ;;  %v909_v59 = vmul.f32 %v9448_v44, %v9448_v44  ;;  %v910_v56 = vmul.f32 %v9451_v53, %v9451_v53  ;;  %v1901_v37 = vld [vmem:[%s11383_s7 + $0x8] sm:$0xff]  ;;  %v1902_v24 = vld [vmem:[%s11383_s7 + $0x10] sm:$0xff] }
  0xf9   : > { %v9460_v48 = vsub.f32 %v9083_v60, %v847_v41  ;;  %v9463_v57 = vsub.f32 %v9086_v61, %v848_v15  ;;  %v997_v58 = vsel %vm719_vm0, %v909_v59, 0.0  ;;  %v1000_v19 = vsel %vm719_vm0, %v910_v56, 0.0  ;;  %v9474_v60 = vld [vmem:[%s11246_s15] sm:$0x7]  ;;  %v1903_v41 = vld [vmem:[%s11383_s7 + $0x18] sm:$0xff] }
  0xfa   : > { %995 = vadd.xlane.f32.xlu1 %v994_v21  ;;  %998 = vadd.xlane.f32.xlu0 %v997_v58  ;;  %v2695_v32 = vsel %vm2694_vm3, %v9474_v60, 0.0  ;;  %v7734_v21 = vpack.c.bf16 %v1901_v37, %v1900_v20  ;;  %v7738_v15 = vpack.c.bf16 %v1903_v41, %v1902_v24  ;;  %v1137_v58 = vlaneseq }
  0xfb   : > { %v911_v16 = vmul.f32 %v9460_v48, %v9460_v48  ;;  %v912_v29 = vmul.f32 %v9463_v57, %v9463_v57 }
  0xfc   : > { %7735 = vmatprep.subr.bf16.mxu1 %v7734_v21 }
  0xfd   : > { %v1003_v61 = vsel %vm719_vm0, %v911_v16, 0.0  ;;  %v1006_v39 = vsel %vm719_vm0, %v912_v29, 0.0  ;;  %7737 = vmatpush3.bf16.msra.mxu1 %v7734_v21 }
  0xfe   : > { %1001 = vadd.xlane.f32.xlu1 %v1000_v19  ;;  %1004 = vadd.xlane.f32.xlu0 %v1003_v61 }
  0xff   : > { %7739 = vmatprep.subr.bf16.mxu1 %v7738_v15 }
 0x101   : > { %7741 = vmatpush3.bf16.msra.mxu1 %v7738_v15  ;;  %v718_v15 = vld [vmem:[%s11385_s28] sm:$0x3]  ;;  %s11353_s28 = smov 32  }
 0x102   : > { %1007 = vadd.xlane.f32.xlu1 %v1006_v39  ;;  %2696 = vadd.xlane.f32.xlu0 %v2695_v32  ;;  %v9499_v32 = vshrl.u32 %v1137_v58, 7 }
 0x104   : > { %v9502_v41 = vsub.s32 0, %v9499_v32 }
 0x106   : > { %2793 = vadd.xlane.f32.xlu1 %v2792_v52  ;;  %11384 = vst [vmem:[#allocation23_spill] sm:$0xff] %v9502_v41 }
 0x14f   : > { %v915_v59 = vpop.xlane.xlu0 %914 }
 0x150   : > { %v1009_v56 = vmul.f32 0.03125, %v915_v59 }
 0x152   : > { %v1041_v19 = vadd.f32 1e-05, %v1009_v56 }
 0x153   : > { %v918_v16 = vpop.xlane.xlu1 %917  ;;  %v921_v29 = vpop.xlane.xlu0 %920 }
 0x154   : > { %8422 = vrsqrt.f32 %v1041_v19  ;;  %v1010_v61 = vmul.f32 0.03125, %v918_v16  ;;  %v1011_v39 = vmul.f32 0.03125, %v921_v29  ;;  %v9508_v16 = vsub.s32 1, %v9499_v32 }
 0x156   : > { %v1042_v52 = vadd.f32 1e-05, %v1010_v61  ;;  %v1043_v20 = vadd.f32 1e-05, %v1011_v39  ;;  %11386 = vst [vmem:[#allocation24_spill] sm:$0xff] %v9508_v16 }
 0x157   : > { %v924_v37 = vpop.xlane.xlu1 %923  ;;  %v927_v4 = vpop.xlane.xlu0 %926 }
 0x158   : > { %8424 = vrsqrt.f32 %v1042_v52  ;;  %v1012_v24 = vmul.f32 0.03125, %v924_v37  ;;  %v1013_v21 = vmul.f32 0.03125, %v927_v4  ;;  %v9511_v4 = vrot.slane %v718_v15, %v9502_v41 }
 0x159   : > { %8426 = vrsqrt.f32 %v1043_v20 }
 0x15a   : > { %v1044_v59 = vadd.f32 1e-05, %v1012_v24  ;;  %v1045_v56 = vadd.f32 1e-05, %v1013_v21  ;;  %v9515_v21 = vrot.slane %v718_v15, %v9508_v16 }
 0x15b   : > { %v930_v19 = vpop.xlane.xlu1 %929  ;;  %v933_v58 = vpop.xlane.xlu0 %932 }
 0x15c   : > { %8428 = vrsqrt.f32 %v1044_v59  ;;  %v1014_v29 = vmul.f32 0.03125, %v930_v19  ;;  %v1015_v61 = vmul.f32 0.03125, %v933_v58 }
 0x15d   : > { %8430 = vrsqrt.f32 %v1045_v56 }
 0x15e   : > { %v8423_v39 = vpop.eup %8422  ;;  %v1046_v52 = vadd.f32 1e-05, %v1014_v29  ;;  %v1047_v20 = vadd.f32 1e-05, %v1015_v61 }
 0x15f   : > { %v936_v37 = vpop.xlane.xlu1 %935  ;;  %v939_v18 = vpop.xlane.xlu0 %938  ;;  %v1105_v24 = vmul.f32 %v8423_v39, %v9217_v27 }
 0x160   : > { %8432 = vrsqrt.f32 %v1046_v52  ;;  %v1016_v43 = vmul.f32 0.03125, %v936_v37  ;;  %v1017_v40 = vmul.f32 0.03125, %v939_v18 }
 0x161   : > { %8434 = vrsqrt.f32 %v1047_v20  ;;  %v1141_v59 = vmul.f32 %v9511_v4, %v1105_v24 }
 0x162   : > { %v8425_v19 = vpop.eup %8424  ;;  %v1048_v58 = vadd.f32 1e-05, %v1016_v43  ;;  %v1049_v42 = vadd.f32 1e-05, %v1017_v40 }
 0x163   : > { %v8427_v56 = vpop.eup %8426  ;;  %v1106_v29 = vmul.f32 %v8425_v19, %v9227_v50  ;;  %v942_v61 = vpop.xlane.xlu1 %941  ;;  %v1177_v34 = vadd.f32 %v9515_v21, %v1141_v59 }
 0x164   : > { %v945_v51 = vpop.xlane.xlu0 %944  ;;  %8436 = vrsqrt.f32 %v1048_v58  ;;  %v1018_v27 = vmul.f32 0.03125, %v942_v61  ;;  %v1107_v39 = vmul.f32 %v8427_v56, %v9220_v30 }
 0x165   : > { %v1019_v15 = vmul.f32 0.03125, %v945_v51  ;;  %v1142_v18 = vmul.f32 %v9511_v4, %v1106_v29  ;;  %8438 = vrsqrt.f32 %v1049_v42  ;;  %7358 = vmatprep.mubr.msk.f32.mxu0 %vm719_vm0, %v1177_v34 }
 0x166   : > { %v8429_v52 = vpop.eup %8428  ;;  %v1050_v43 = vadd.f32 1e-05, %v1018_v27  ;;  %v1143_v20 = vmul.f32 %v9511_v4, %v1107_v39 }
 0x167   : > { %v1051_v40 = vadd.f32 1e-05, %v1019_v15  ;;  %v8431_v50 = vpop.eup %8430  ;;  %v948_v37 = vpop.xlane.xlu1 %947  ;;  %v1178_v59 = vadd.f32 %v9515_v21, %v1142_v18  ;;  %v1108_v19 = vmul.f32 %v8429_v52, %v9230_v54 }
 0x168   : > { %v951_v24 = vpop.xlane.xlu0 %950  ;;  %8440 = vrsqrt.f32 %v1050_v43  ;;  %v1020_v51 = vmul.f32 0.03125, %v948_v37  ;;  %v1179_v58 = vadd.f32 %v9515_v21, %v1143_v20  ;;  %v1109_v42 = vmul.f32 %v8431_v50, %v9239_v2 }
 0x169   : > { %v1021_v30 = vmul.f32 0.03125, %v951_v24  ;;  %8442 = vrsqrt.f32 %v1051_v40  ;;  %7359 = vmatmul.mubr.msk.f32.vlgmr.msra.gmra.mrb[0].mxu0 %vm719_vm0, %v1178_v59  ;;  %v1144_v34 = vmul.f32 %v9511_v4, %v1108_v19 }
 0x16a   : > { %v8433_v56 = vpop.eup %8432  ;;  %v1052_v29 = vadd.f32 1e-05, %v1020_v51  ;;  %7361 = vmatprep.mubr.msk.f32.mxu0 %vm719_vm0, %v1179_v58  ;;  %v1145_v18 = vmul.f32 %v9511_v4, %v1109_v42 }
 0x16b   : > { %v1053_v61 = vadd.f32 1e-05, %v1021_v30  ;;  %v8435_v27 = vpop.eup %8434  ;;  %v954_v15 = vpop.xlane.xlu1 %953  ;;  %v1180_v39 = vadd.f32 %v9515_v21, %v1144_v34  ;;  %v1110_v52 = vmul.f32 %v8433_v56, %v9242_v5 }
 0x16c   : > { %v957_v54 = vpop.xlane.xlu0 %956  ;;  %8444 = vrsqrt.f32 %v1052_v29  ;;  %v1022_v43 = vmul.f32 0.03125, %v954_v15  ;;  %v1111_v20 = vmul.f32 %v8435_v27, %v9251_v38  ;;  %v1181_v2 = vadd.f32 %v9515_v21, %v1145_v18 }
 0x16d   : > { %v1023_v40 = vmul.f32 0.03125, %v957_v54  ;;  %8446 = vrsqrt.f32 %v1053_v61  ;;  %7362 = vmatmul.mubr.msk.f32.gmra.mrb[2].mxu0 %vm719_vm0, %v1180_v39  ;;  %v1146_v50 = vmul.f32 %v9511_v4, %v1110_v52 }
 0x16e   : > { %v8437_v37 = vpop.eup %8436  ;;  %v1054_v24 = vadd.f32 1e-05, %v1022_v43  ;;  %v1147_v19 = vmul.f32 %v9511_v4, %v1111_v20  ;;  %7364 = vmatprep.mubr.msk.f32.mxu0 %vm719_vm0, %v1181_v2 }
 0x16f   : > { %v1055_v59 = vadd.f32 1e-05, %v1023_v40  ;;  %v8439_v51 = vpop.eup %8438  ;;  %v960_v5 = vpop.xlane.xlu1 %959  ;;  %v1182_v58 = vadd.f32 %v9515_v21, %v1146_v50  ;;  %v1112_v38 = vmul.f32 %v8437_v37, %v9254_v9 }
 0x170   : > { %v963_v30 = vpop.xlane.xlu0 %962  ;;  %8448 = vrsqrt.f32 %v1054_v24  ;;  %v1024_v34 = vmul.f32 0.03125, %v960_v5  ;;  %v1183_v56 = vadd.f32 %v9515_v21, %v1147_v19  ;;  %v1113_v61 = vmul.f32 %v8439_v51, %v9263_v63 }
 0x171   : > { %v1025_v42 = vmul.f32 0.03125, %v963_v30  ;;  %8450 = vrsqrt.f32 %v1055_v59  ;;  %7365 = vmatmul.mubr.msk.f32.gmra.mrb[4].mxu0 %vm719_vm0, %v1182_v58  ;;  %v1148_v29 = vmul.f32 %v9511_v4, %v1112_v38 }
 0x172   : > { %v8441_v27 = vpop.eup %8440  ;;  %v1056_v15 = vadd.f32 1e-05, %v1024_v34  ;;  %7367 = vmatprep.mubr.msk.f32.mxu0 %vm719_vm0, %v1183_v56  ;;  %v1149_v43 = vmul.f32 %v9511_v4, %v1113_v61 }
 0x173   : > { %v1057_v54 = vadd.f32 1e-05, %v1025_v42  ;;  %v8443_v39 = vpop.eup %8442  ;;  %v966_v18 = vpop.xlane.xlu1 %965  ;;  %v1184_v52 = vadd.f32 %v9515_v21, %v1148_v29  ;;  %v1114_v40 = vmul.f32 %v8441_v27, %v9266_v13 }
 0x174   : > { %v969_v9 = vpop.xlane.xlu0 %968  ;;  %8452 = vrsqrt.f32 %v1056_v15  ;;  %v1026_v20 = vmul.f32 0.03125, %v966_v18  ;;  %v1115_v50 = vmul.f32 %v8443_v39, %v9279_v22  ;;  %v1185_v63 = vadd.f32 %v9515_v21, %v1149_v43 }
 0x175   : > { %v1027_v2 = vmul.f32 0.03125, %v969_v9  ;;  %8454 = vrsqrt.f32 %v1057_v54  ;;  %7368 = vmatmul.mubr.msk.f32.gmra.mrb[6].mxu0 %vm719_vm0, %v1184_v52  ;;  %v1150_v37 = vmul.f32 %v9511_v4, %v1114_v40 }
 0x176   : > { %v8445_v24 = vpop.eup %8444  ;;  %v1058_v59 = vadd.f32 1e-05, %v1026_v20  ;;  %v1151_v51 = vmul.f32 %v9511_v4, %v1115_v50  ;;  %7370 = vmatprep.mubr.msk.f32.mxu0 %vm719_vm0, %v1185_v63 }
 0x177   : > { %v1059_v19 = vadd.f32 1e-05, %v1027_v2  ;;  %v8447_v5 = vpop.eup %8446  ;;  %v972_v13 = vpop.xlane.xlu1 %971  ;;  %v1186_v58 = vadd.f32 %v9515_v21, %v1150_v37  ;;  %v1116_v22 = vmul.f32 %v8445_v24, %v9282_v31 }
 0x178   : > { %v975_v30 = vpop.xlane.xlu0 %974  ;;  %8456 = vrsqrt.f32 %v1058_v59  ;;  %v1028_v38 = vmul.f32 0.03125, %v972_v13  ;;  %v1187_v42 = vadd.f32 %v9515_v21, %v1151_v51  ;;  %v1117_v29 = vmul.f32 %v8447_v5, %v9306_v12 }
 0x179   : > { %v1029_v34 = vmul.f32 0.03125, %v975_v30  ;;  %8458 = vrsqrt.f32 %v1059_v19  ;;  %7371 = vmatmul.mubr.msk.f32.gmra.mrb[8].mxu0 %vm719_vm0, %v1186_v58  ;;  %v1152_v56 = vmul.f32 %v9511_v4, %v1116_v22 }
 0x17a   : > { %v8449_v61 = vpop.eup %8448  ;;  %v1060_v27 = vadd.f32 1e-05, %v1028_v38  ;;  %7373 = vmatprep.mubr.msk.f32.mxu0 %vm719_vm0, %v1187_v42  ;;  %v1153_v9 = vmul.f32 %v9511_v4, %v1117_v29 }
 0x17b   : > { %v1061_v15 = vadd.f32 1e-05, %v1029_v34  ;;  %v8451_v54 = vpop.eup %8450  ;;  %v978_v39 = vpop.xlane.xlu1 %977  ;;  %v1188_v18 = vadd.f32 %v9515_v21, %v1152_v56  ;;  %v1118_v52 = vmul.f32 %v8449_v61, %v9309_v3 }
 0x17c   : > { %v981_v31 = vpop.xlane.xlu0 %980  ;;  %8460 = vrsqrt.f32 %v1060_v27  ;;  %v1030_v43 = vmul.f32 0.03125, %v978_v39  ;;  %v1119_v20 = vmul.f32 %v8451_v54, %v9327_v17  ;;  %v1189_v12 = vadd.f32 %v9515_v21, %v1153_v9 }
 0x17d   : > { %v1031_v40 = vmul.f32 0.03125, %v981_v31  ;;  %8462 = vrsqrt.f32 %v1061_v15  ;;  %7374 = vmatmul.mubr.msk.f32.gmra.mrb[10].mxu0 %vm719_vm0, %v1188_v18  ;;  %v1154_v2 = vmul.f32 %v9511_v4, %v1118_v52 }
 0x17e   : > { %v8453_v50 = vpop.eup %8452  ;;  %v1062_v63 = vadd.f32 1e-05, %v1030_v43  ;;  %v1155_v24 = vmul.f32 %v9511_v4, %v1119_v20  ;;  %7376 = vmatprep.mubr.msk.f32.mxu0 %vm719_vm0, %v1189_v12 }
 0x17f   : > { %v1063_v37 = vadd.f32 1e-05, %v1031_v40  ;;  %v8455_v59 = vpop.eup %8454  ;;  %v984_v3 = vpop.xlane.xlu1 %983  ;;  %v1190_v51 = vadd.f32 %v9515_v21, %v1154_v2  ;;  %v1120_v17 = vmul.f32 %v8453_v50, %v9330_v35 }
 0x180   : > { %v987_v19 = vpop.xlane.xlu0 %986  ;;  %8464 = vrsqrt.f32 %v1062_v63  ;;  %v1032_v5 = vmul.f32 0.03125, %v984_v3  ;;  %v1191_v30 = vadd.f32 %v9515_v21, %v1155_v24  ;;  %v1121_v22 = vmul.f32 %v8455_v59, %v9347_v14 }
 0x181   : > { %v1033_v13 = vmul.f32 0.03125, %v987_v19  ;;  %8466 = vrsqrt.f32 %v1063_v37  ;;  %7377 = vmatmul.mubr.msk.f32.gmra.mrb[12].mxu0 %vm719_vm0, %v1190_v51  ;;  %v1156_v58 = vmul.f32 %v9511_v4, %v1120_v17 }
 0x182   : > { %v8457_v38 = vpop.eup %8456  ;;  %v1064_v34 = vadd.f32 1e-05, %v1032_v5  ;;  %7379 = vmatprep.mubr.msk.f32.mxu0 %vm719_vm0, %v1191_v30  ;;  %v1157_v27 = vmul.f32 %v9511_v4, %v1121_v22 }
 0x183   : > { %v1065_v42 = vadd.f32 1e-05, %v1033_v13  ;;  %v8459_v56 = vpop.eup %8458  ;;  %v990_v29 = vpop.xlane.xlu1 %989  ;;  %v1192_v61 = vadd.f32 %v9515_v21, %v1156_v58  ;;  %v1122_v15 = vmul.f32 %v8457_v38, %v9350_v6 }
 0x184   : > { %v993_v35 = vpop.xlane.xlu0 %992  ;;  %8468 = vrsqrt.f32 %v1064_v34  ;;  %v1034_v54 = vmul.f32 0.03125, %v990_v29  ;;  %v1123_v31 = vmul.f32 %v8459_v56, %v9367_v0  ;;  %v1193_v14 = vadd.f32 %v9515_v21, %v1157_v27 }
 0x185   : > { %v1035_v39 = vmul.f32 0.03125, %v993_v35  ;;  %8470 = vrsqrt.f32 %v1065_v42  ;;  %7380 = vmatmul.mubr.msk.f32.gmra.mrb[14].mxu0 %vm719_vm0, %v1192_v61  ;;  %v1158_v18 = vmul.f32 %v9511_v4, %v1122_v15 }
 0x186   : > { %v8461_v9 = vpop.eup %8460  ;;  %v1066_v52 = vadd.f32 1e-05, %v1034_v54  ;;  %v1159_v40 = vmul.f32 %v9511_v4, %v1123_v31  ;;  %7382 = vmatprep.mubr.msk.f32.mxu0 %vm719_vm0, %v1193_v14 }
 0x187   : > { %v1067_v43 = vadd.f32 1e-05, %v1035_v39  ;;  %v8463_v20 = vpop.eup %8462  ;;  %v996_v6 = vpop.xlane.xlu1 %995  ;;  %v1194_v2 = vadd.f32 %v9515_v21, %v1158_v18  ;;  %v1124_v0 = vmul.f32 %v8461_v9, %v9370_v1 }
 0x188   : > { %v999_v12 = vpop.xlane.xlu0 %998  ;;  %8472 = vrsqrt.f32 %v1066_v52  ;;  %v1036_v50 = vmul.f32 0.03125, %v996_v6  ;;  %v1195_v37 = vadd.f32 %v9515_v21, %v1159_v40  ;;  %v1125_v59 = vmul.f32 %v8463_v20, %v9387_v25 }
 0x189   : > { %v1037_v63 = vmul.f32 0.03125, %v999_v12  ;;  %8474 = vrsqrt.f32 %v1067_v43  ;;  %7383 = vmatmul.mubr.msk.f32.gmra.mrb[16].mxu0 %vm719_vm0, %v1194_v2  ;;  %v1160_v24 = vmul.f32 %v9511_v4, %v1124_v0 }
 0x18a   : > { %v8465_v3 = vpop.eup %8464  ;;  %v1068_v19 = vadd.f32 1e-05, %v1036_v50  ;;  %7385 = vmatprep.mubr.msk.f32.mxu0 %vm719_vm0, %v1195_v37  ;;  %v1161_v30 = vmul.f32 %v9511_v4, %v1125_v59 }
 0x18b   : > { %v1069_v51 = vadd.f32 1e-05, %v1037_v63  ;;  %v8467_v17 = vpop.eup %8466  ;;  %v1002_v5 = vpop.xlane.xlu1 %1001  ;;  %v1196_v13 = vadd.f32 %v9515_v21, %v1160_v24  ;;  %v1126_v58 = vmul.f32 %v8465_v3, %v9390_v8 }
 0x18c   : > { %v1005_v1 = vpop.xlane.xlu0 %1004  ;;  %8476 = vrsqrt.f32 %v1068_v19  ;;  %v1038_v22 = vmul.f32 0.03125, %v1002_v5  ;;  %v1127_v34 = vmul.f32 %v8467_v17, %v9410_v36  ;;  %v1197_v25 = vadd.f32 %v9515_v21, %v1161_v30 }
 0x18d   : > { %v1039_v38 = vmul.f32 0.03125, %v1005_v1  ;;  %8478 = vrsqrt.f32 %v1069_v51  ;;  %7386 = vmatmul.mubr.msk.f32.gmra.mrb[18].mxu0 %vm719_vm0, %v1196_v13  ;;  %v1162_v42 = vmul.f32 %v9511_v4, %v1126_v58 }
 0x18e   : > { %v8469_v56 = vpop.eup %8468  ;;  %v1070_v29 = vadd.f32 1e-05, %v1038_v22  ;;  %v1163_v61 = vmul.f32 %v9511_v4, %v1127_v34  ;;  %7388 = vmatprep.mubr.msk.f32.mxu0 %vm719_vm0, %v1197_v25 }
 0x18f   : > { %v1071_v35 = vadd.f32 1e-05, %v1039_v38  ;;  %v8471_v27 = vpop.eup %8470  ;;  %v1008_v8 = vpop.xlane.xlu1 %1007  ;;  %v1198_v54 = vadd.f32 %v9515_v21, %v1162_v42  ;;  %v1128_v36 = vmul.f32 %v8469_v56, %v9413_v47 }
 0x190   : > { %v2697_v15 = vpop.xlane.xlu0 %2696  ;;  %8480 = vrsqrt.f32 %v1070_v29  ;;  %v1040_v39 = vmul.f32 0.03125, %v1008_v8  ;;  %v1199_v14 = vadd.f32 %v9515_v21, %v1163_v61  ;;  %v1129_v9 = vmul.f32 %v8471_v27, %v9424_v45  ;;  %v1904_v61 = vld [vmem:[%s11383_s7 + $0x20] sm:$0xff] }
 0x191   : > { %v2698_v31 = vmul.f32 0.03125, %v2697_v15  ;;  %8482 = vrsqrt.f32 %v1071_v35  ;;  %7389 = vmatmul.mubr.msk.f32.gmra.mrb[20].mxu0 %vm719_vm0, %v1198_v54  ;;  %v1164_v18 = vmul.f32 %v9511_v4, %v1128_v36  ;;  %v1908_v15 = vld [vmem:[%s11383_s7 + $0x40] sm:$0xff]  ;;  %v1909_v54 = vld [vmem:[%s11383_s7 + $0x48] sm:$0xff] }
 0x192   : > { %v8473_v52 = vpop.eup %8472  ;;  %v1072_v43 = vadd.f32 1e-05, %v1040_v39  ;;  %7391 = vmatprep.mubr.msk.f32.mxu0 %vm719_vm0, %v1199_v14  ;;  %v1165_v12 = vmul.f32 %v9511_v4, %v1129_v9  ;;  %v7750_v36 = vpack.c.bf16 %v1909_v54, %v1908_v15  ;;  %v1910_v39 = vld [vmem:[%s11383_s7 + $0x50] sm:$0xff]  ;;  %v1913_v9 = vld [vmem:[%s11383_s7 + $0x68] sm:$0xff] }
 0x193   : > { %v9611_v40 = vsub.f32 %v9474_v60, %v2698_v31  ;;  %v8475_v47 = vpop.eup %8474  ;;  %v2794_v20 = vpop.xlane.xlu1 %2793  ;;  %v1200_v6 = vadd.f32 %v9515_v21, %v1164_v18  ;;  %v1130_v2 = vmul.f32 %v8473_v52, %v9427_v46  ;;  %v1911_v31 = vld [vmem:[%s11383_s7 + $0x58] sm:$0xff]  ;;  %v1912_v18 = vld [vmem:[%s11383_s7 + $0x60] sm:$0xff] }
 0x194   : > { %8484 = vrsqrt.f32 %v1072_v43  ;;  %v2795_v0 = vmul.f32 0.03125, %v2794_v20  ;;  %v1131_v50 = vmul.f32 %v8475_v47, %v9436_v10  ;;  %v1201_v60 = vadd.f32 %v9515_v21, %v1165_v12  ;;  %v1914_v43 = vld [vmem:[%s11383_s7 + $0x70] sm:$0xff]  ;;  %v1915_v47 = vld [vmem:[%s11383_s7 + $0x78] sm:$0xff]  ;;  %v9696_v12 = vld [vmem:[%s11387_s6] ss:$0 sm:$0xff] }
 0x195   : > { %v2700_v45 = vmul.f32 %v9611_v40, %v9611_v40  ;;  %7392 = vmatmul.mubr.msk.f32.gmra.mrb[22].mxu0 %vm719_vm0, %v1200_v6  ;;  %v1166_v63 = vmul.f32 %v9511_v4, %v1130_v2  ;;  %v7754_v14 = vpack.c.bf16 %v1911_v31, %v1910_v39  ;;  %v7758_v52 = vpack.c.bf16 %v1913_v9, %v1912_v18  ;;  %v2683_v2 = vld [vmem:[%s11241_s10] sm:$0xff] }
 0x196   : > { %v8477_v37 = vpop.eup %8476  ;;  %v9624_v24 = vsub.f32 %v9483_v33, %v2795_v0  ;;  %v1167_v46 = vmul.f32 %v9511_v4, %v1131_v50  ;;  %7394 = vmatprep.mubr.msk.f32.mxu0 %vm719_vm0, %v1201_v60  ;;  %v7762_v20 = vpack.c.bf16 %v1915_v47, %v1914_v43  ;;  %v11272_v6 = vmov 0.0|0.0   ;;  %v2684_v0 = vld [vmem:[%s11241_s10 + $0x8] sm:$0xff] }
 0x197   : > { %v2701_v59 = vsel %vm2694_vm3, %v2700_v45, 0.0  ;;  %v8479_v3 = vpop.eup %8478  ;;  %v1202_v10 = vadd.f32 %v9515_v21, %v1166_v63  ;;  %v1132_v19 = vmul.f32 %v8477_v37, %v9439_v49  ;;  %v9705_v63 = vpack.c.bf16 %v2684_v0, %v2683_v2 }
 0x198   : > { %2702 = vadd.xlane.f32.xlu0 %v2701_v59  ;;  %v1203_v51 = vadd.f32 %v9515_v21, %v1167_v46  ;;  %v2797_v17 = vmul.f32 %v9624_v24, %v9624_v24  ;;  %v1133_v33 = vmul.f32 %v8479_v3, %v9448_v44  ;;  %v2685_v59 = vld [vmem:[%s11241_s10 + $0x10] sm:$0xff]  ;;  %v2686_v46 = vld [vmem:[%s11241_s10 + $0x18] sm:$0xff] }
 0x199   : > { %7395 = vmatmul.mubr.msk.f32.gmra.mrb[24].mxu0 %vm719_vm0, %v1202_v10  ;;  %v1168_v5 = vmul.f32 %v9511_v4, %v1132_v19  ;;  %11388 = vst [vmem:[#allocation25_spill] sm:$0xff] %v9705_v63 }
 0x19a   : > { %v8481_v1 = vpop.eup %8480  ;;  %7397 = vmatprep.mubr.msk.f32.mxu0 %vm719_vm0, %v1203_v51  ;;  %v2798_v13 = vsel %vm2791_vm4, %v2797_v17, 0.0  ;;  %v1169_v30 = vmul.f32 %v9511_v4, %v1133_v33  ;;  %v9716_v51 = vpack.c.bf16 %v2686_v46, %v2685_v59 }
 0x19b   : > { %v8483_v58 = vpop.eup %8482  ;;  %2799 = vadd.xlane.f32.xlu1 %v2798_v13  ;;  %v1204_v49 = vadd.f32 %v9515_v21, %v1168_v5  ;;  %v1134_v22 = vmul.f32 %v8481_v1, %v9451_v53 }
 0x19c   : > { %v1205_v38 = vadd.f32 %v9515_v21, %v1169_v30  ;;  %v1135_v44 = vmul.f32 %v8483_v58, %v9460_v48  ;;  %11389 = vst [vmem:[#allocation26_spill] sm:$0xff] %v9716_v51 }
 0x19d   : > { %7398 = vmatmul.mubr.msk.f32.gmra.mrb[26].mxu0 %vm719_vm0, %v1204_v49  ;;  %v1170_v34 = vmul.f32 %v9511_v4, %v1134_v22 }
 0x19e   : > { %v8485_v25 = vpop.eup %8484  ;;  %7400 = vmatprep.mubr.msk.f32.mxu0 %vm719_vm0, %v1205_v38  ;;  %v1171_v42 = vmul.f32 %v9511_v4, %v1135_v44 }
 0x19f   : > { %v1206_v56 = vadd.f32 %v9515_v21, %v1170_v34  ;;  %v1136_v29 = vmul.f32 %v8485_v25, %v9463_v57  ;;  %v1905_v57 = vld [vmem:[%s11383_s7 + $0x28] sm:$0xff] }
 0x1a0   : > { %v1207_v35 = vadd.f32 %v9515_v21, %v1171_v42  ;;  %v7742_v27 = vpack.c.bf16 %v1905_v57, %v1904_v61 }
 0x1a1   : > { %7401 = vmatmul.mubr.msk.f32.gmra.mrb[28].mxu0 %vm719_vm0, %v1206_v56  ;;  %v1172_v53 = vmul.f32 %v9511_v4, %v1136_v29  ;;  %v1906_v4 = vld [vmem:[%s11383_s7 + $0x30] sm:$0xff] }
 0x1a2   : > { %7403 = vmatprep.mubr.msk.f32.mxu0 %vm719_vm0, %v1207_v35  ;;  %7743 = vmatprep.subr.bf16.mxu1 %v7742_v27 }
 0x1a3   : > { %v1208_v48 = vadd.f32 %v9515_v21, %v1172_v53  ;;  %7745 = vmatpush3.bf16.msra.mxu1 %v7742_v27  ;;  %v1907_v21 = vld [vmem:[%s11383_s7 + $0x38] sm:$0xff]  ;;  %s6373_s7 = scalar_lea.sflag [#allocation3], %s10465_s2 }
 0x1a4   : > { %v7746_v8 = vpack.c.bf16 %v1907_v21, %v1906_v4 }
 0x1a5   : > { %7404 = vmatmul.mubr.msk.f32.gmra.mrb[30].mxu0 %vm719_vm0, %v1208_v48 }
 0x1a6   : > { %7747 = vmatprep.subr.bf16.mxu1 %v7746_v8 }
 0x1a7   : > { %7749 = vmatpush3.bf16.msra.mxu1 %v7746_v8 }
 0x1a8   : > { %7751 = vmatprep.subr.bf16.mxu1 %v7750_v36 }
 0x1ab   : > { %7753 = vmatpush3.bf16.msra.mxu1 %v7750_v36 }
 0x1ac   : > { %7755 = vmatprep.subr.bf16.mxu1 %v7754_v14 }
 0x1af   : > { %7757 = vmatpush3.bf16.msra.mxu1 %v7754_v14 }
 0x1b0   : > { %7759 = vmatprep.subr.bf16.mxu1 %v7758_v52 }
 0x1b3   : > { %7761 = vmatpush3.bf16.msra.mxu1 %v7758_v52 }
 0x1b4   : > { %7763 = vmatprep.subr.bf16.mxu1 %v7762_v20 }
 0x1b7   : > { %7765 = vmatpush3.bf16.msra.mxu1 %v7762_v20 }
 0x1b8   : > { %7766 = vmatprep.subr.bf16.mxu1 %v11272_v6 }
 0x225   : > { %v2703_v39 = vpop.xlane.xlu0 %2702 }
 0x226   : > { %v2704_v9 = vmul.f32 0.03125, %v2703_v39  ;;  %v2688_v39 = vld [vmem:[%s11242_s11 + $0x8] sm:$0xff] }
 0x228   : > { %v2705_v2 = vadd.f32 1e-05, %v2704_v9 }
 0x22a   : > { %8486 = vrsqrt.f32 %v2705_v2 }
 0x23c   : > { %v7360_v45 = vpop.f32.mrb[0].mxu0 }
 0x23d   : > { %v1741_v50 = vpop.f32.mrb[1].mxu0  ;;  %v8302_v37 = vadd.f32 %v7360_v45, %v9696_v12  ;;  %v2800_v45 = vpop.xlane.xlu1 %2799 }
 0x23e   : > { %v8303_v60 = vadd.f32 %v9696_v12, %v1741_v50  ;;  %v2801_v59 = vmul.f32 0.03125, %v2800_v45 }
 0x240   : > { %v7363_v3 = vpop.f32.mrb[2].mxu0  ;;  %7438 = vmatprep.mubr.f32.mxu1 %v8303_v60 }
 0x241   : > { %v1751_v10 = vpop.f32.mrb[3].mxu0  ;;  %7439 = vmatmul.mubr.f32.vlgmr.msra.gmra.mrb[0].mxu1 %v8302_v37  ;;  %v8304_v17 = vadd.f32 %v7363_v3, %v9696_v12  ;;  %v8752_v3 = vmov 1966171168  }
 0x242   : > { %v8305_v19 = vadd.f32 %v9696_v12, %v1751_v10  ;;  %7768 = vmatpush3.bf16.msra.mxu1 %v9705_v63  ;;  %v2807_v10 = vunpack.c.l.s4 %v8752_v3  ;;  %v11394_v3 = vld [vmem:[#allocation20_spill] sm:$0xff] }
 0x243   : > { %7769 = vmatprep.subr.bf16.mxu1 %v11272_v6 }
 0x244   : > { %v7366_v33 = vpop.f32.mrb[4].mxu0  ;;  %7441 = vmatprep.mubr.f32.mxu1 %v8305_v19 }
 0x245   : > { %v1761_v5 = vpop.f32.mrb[5].mxu0  ;;  %7442 = vmatmul.mubr.f32.gmra.mrb[2].mxu1 %v8304_v17  ;;  %v8306_v13 = vadd.f32 %v7366_v33, %v9696_v12 }
 0x246   : > { %v8307_v1 = vadd.f32 %v9696_v12, %v1761_v5  ;;  %7771 = vmatpush3.bf16.msra.mxu1 %v9716_v51  ;;  %v2802_v5 = vadd.f32 1e-05, %v2801_v59  ;;  %v11392_v59 = vld [vmem:[#allocation19_spill] sm:$0xff] }
 0x247   : > { %7772 = vmatprep.subr.bf16.mxu1 %v11272_v6 }
 0x248   : > { %v7369_v30 = vpop.f32.mrb[6].mxu0  ;;  %7444 = vmatprep.mubr.f32.mxu1 %v8307_v1  ;;  %8488 = vrsqrt.f32 %v2802_v5  ;;  %v11399_v5 = vld [vmem:[#allocation18_spill] sm:$0xff] }
 0x249   : > { %v1771_v58 = vpop.f32.mrb[7].mxu0  ;;  %7445 = vmatmul.mubr.f32.gmra.mrb[4].mxu1 %v8306_v13  ;;  %v8308_v22 = vadd.f32 %v7369_v30, %v9696_v12  ;;  %v2808_v13 = vunpack.c.0.s8 %v2807_v10  ;;  %v11395_v10 = vld [vmem:[#allocation16_spill] sm:$0xff] }
 0x24a   : > { %v8309_v49 = vadd.f32 %v9696_v12, %v1771_v58 }
 0x24c   : > { %v7372_v38 = vpop.f32.mrb[8].mxu0  ;;  %7447 = vmatprep.mubr.f32.mxu1 %v8309_v49 }
 0x24d   : > { %v1781_v44 = vpop.f32.mrb[9].mxu0  ;;  %7448 = vmatmul.mubr.f32.gmra.mrb[6].mxu1 %v8308_v22  ;;  %v8310_v25 = vadd.f32 %v7372_v38, %v9696_v12  ;;  %v9746_v38 = vsub.s32 %v2808_v13, %v9499_v32 }
 0x24e   : > { %v8311_v34 = vadd.f32 %v9696_v12, %v1781_v44  ;;  %v9751_v44 = vld [vmem:[%s11243_s12] sm:$0xff] }
 0x24f   : > { %11390 = vst [vmem:[#allocation27_spill] sm:$0xff] %v9746_v38 }
 0x250   : > { %v7375_v42 = vpop.f32.mrb[10].mxu0  ;;  %7450 = vmatprep.mubr.f32.mxu1 %v8311_v34 }
 0x251   : > { %v1791_v56 = vpop.f32.mrb[11].mxu0  ;;  %7451 = vmatmul.mubr.f32.gmra.mrb[8].mxu1 %v8310_v25  ;;  %v8312_v35 = vadd.f32 %v7375_v42, %v9696_v12  ;;  %v8487_v25 = vpop.eup %8486 }
 0x252   : > { %v8313_v29 = vadd.f32 %v9696_v12, %v1791_v56 }
 0x254   : > { %v7378_v53 = vpop.f32.mrb[12].mxu0  ;;  %7453 = vmatprep.mubr.f32.mxu1 %v8313_v29 }
 0x255   : > { %v1801_v48 = vpop.f32.mrb[13].mxu0  ;;  %7454 = vmatmul.mubr.f32.gmra.mrb[10].mxu1 %v8312_v35  ;;  %v8314_v57 = vadd.f32 %v7378_v53, %v9696_v12  ;;  %v2812_v35 = vrot.slane %v9751_v44, %v9746_v38  ;;  %v9759_v53 = vrot.slane %v9751_v44, %v9502_v41 }
 0x256   : > { %v8315_v61 = vadd.f32 %v9696_v12, %v1801_v48  ;;  %v2707_v48 = vmul.f32 %v8487_v25, %v9611_v40  ;;  %v2687_v40 = vld [vmem:[%s11242_s11] sm:$0xff] }
 0x258   : > { %v7381_v27 = vpop.f32.mrb[14].mxu0  ;;  %7456 = vmatprep.mubr.f32.mxu1 %v8315_v61 }
 0x259   : > { %v1811_v4 = vpop.f32.mrb[15].mxu0  ;;  %7457 = vmatmul.mubr.f32.gmra.mrb[12].mxu1 %v8314_v57  ;;  %v8316_v8 = vadd.f32 %v7381_v27, %v9696_v12 }
 0x25a   : > { %v8317_v21 = vadd.f32 %v9696_v12, %v1811_v4 }
 0x25c   : > { %v7384_v15 = vpop.f32.mrb[16].mxu0  ;;  %7459 = vmatprep.mubr.f32.mxu1 %v8317_v21  ;;  %v9766_v21 = vrot.slane %v9751_v44, %v9508_v16 }
 0x25d   : > { %v1821_v54 = vpop.f32.mrb[17].mxu0  ;;  %7460 = vmatmul.mubr.f32.gmra.mrb[14].mxu1 %v8316_v8  ;;  %v8318_v31 = vadd.f32 %v7384_v15, %v9696_v12  ;;  %v2819_v8 = vrot.slane %v2812_v35, %v9746_v38  ;;  %v2823_v15 = vcombine.high %v2812_v35, %v2812_v35 }
 0x25e   : > { %v8319_v36 = vadd.f32 %v9696_v12, %v1821_v54  ;;  %v2712_v54 = vmul.f32 %v9759_v53, %v2707_v48 }
 0x260   : > { %v7387_v14 = vpop.f32.mrb[18].mxu0  ;;  %7462 = vmatprep.mubr.f32.mxu1 %v8319_v36  ;;  %v2717_v9 = vadd.f32 %v9766_v21, %v2712_v54 }
 0x261   : > { %v1831_v18 = vpop.f32.mrb[19].mxu0  ;;  %7463 = vmatmul.mubr.f32.gmra.mrb[16].mxu1 %v8318_v31  ;;  %v8320_v43 = vadd.f32 %v7387_v14, %v9696_v12  ;;  %v8489_v31 = vpop.eup %8488  ;;  %v11270_v14 = vmov 0.0  }
 0x262   : > { %v8321_v52 = vadd.f32 %v9696_v12, %v1831_v18  ;;  %v9779_v18 = vpack.c.bf16 %v2688_v39, %v2687_v40 }
 0x264   : > { %v7390_v47 = vpop.f32.mrb[20].mxu0  ;;  %7465 = vmatprep.mubr.f32.mxu1 %v8321_v52  ;;  %v2689_v52 = vld [vmem:[%s11242_s11 + $0x10] sm:$0xff] }
 0x265   : > { %v1841_v20 = vpop.f32.mrb[21].mxu0  ;;  %7466 = vmatmul.mubr.f32.gmra.mrb[18].mxu1 %v8320_v43  ;;  %v8322_v50 = vadd.f32 %v7390_v47, %v9696_v12  ;;  %v2690_v43 = vld [vmem:[%s11242_s11 + $0x18] sm:$0xff]  ;;  %v9789_v47 = vcombine.high %v2819_v8, %v2819_v8 }
 0x266   : > { %v8323_v0 = vadd.f32 %v9696_v12, %v1841_v20  ;;  %v2830_v20 = vrot.slane %v2823_v15, %v9746_v38  ;;  %v9794_v2 = vpack.c.bf16 %v2690_v43, %v2689_v52 }
 0x268   : > { %v7393_v60 = vpop.f32.mrb[22].mxu0  ;;  %7468 = vmatprep.mubr.f32.mxu1 %v8323_v0  ;;  %v9800_v0 = vcombine.high %v2830_v20, %v2830_v20 }
 0x269   : > { %v1851_v37 = vpop.f32.mrb[23].mxu0  ;;  %7469 = vmatmul.mubr.f32.gmra.mrb[20].mxu1 %v8322_v50  ;;  %v8324_v19 = vadd.f32 %v7393_v60, %v9696_v12  ;;  %v9808_v50 = vld [vmem:[%s11239_s8] sm:$0x3] }
 0x26a   : > { %v8325_v46 = vadd.f32 %v9696_v12, %v1851_v37  ;;  %v9818_v60 = vld [vmem:[%s11248_s17] sm:$0x7] }
 0x26b   : > { %v11391_v37 = vld [vmem:[#allocation14_spill] sm:$0xff] }
 0x26c   : > { %v7396_v17 = vpop.f32.mrb[24].mxu0  ;;  %7471 = vmatprep.mubr.f32.mxu1 %v8325_v46  ;;  %v11393_v46 = vld [vmem:[#allocation15_spill] sm:$0xff] }
 0x26d   : > { %v1861_v33 = vpop.f32.mrb[25].mxu0  ;;  %7472 = vmatmul.mubr.f32.gmra.mrb[22].mxu1 %v8324_v19  ;;  %v8326_v30 = vadd.f32 %v7396_v17, %v9696_v12  ;;  %v11396_v19 = vld [vmem:[#allocation21_spill] sm:$0xff] }
 0x26e   : > { %v8327_v1 = vadd.f32 %v9696_v12, %v1861_v33  ;;  %v11397_v17 = vld [vmem:[#allocation17_spill] sm:$0xff]  ;;  %v11398_v33 = vld [vmem:[#allocation22_spill] sm:$0xff] }
 0x270   : > { %v7399_v58 = vpop.f32.mrb[26].mxu0  ;;  %7474 = vmatprep.mubr.f32.mxu1 %v8327_v1 }
 0x271   : > { %v1871_v49 = vpop.f32.mrb[27].mxu0  ;;  %7475 = vmatmul.mubr.f32.gmra.mrb[24].mxu1 %v8326_v30  ;;  %v8328_v34 = vadd.f32 %v7399_v58, %v9696_v12 }
 0x272   : > { %v8329_v22 = vadd.f32 %v9696_v12, %v1871_v49 }
 0x274   : > { %v7402_v42 = vpop.f32.mrb[28].mxu0  ;;  %7477 = vmatprep.mubr.f32.mxu1 %v8329_v22 }
 0x275   : > { %v1881_v56 = vpop.f32.mrb[29].mxu0  ;;  %7478 = vmatmul.mubr.f32.gmra.mrb[26].mxu1 %v8328_v34  ;;  %v8330_v61 = vadd.f32 %v7402_v42, %v9696_v12 }
 0x276   : > { %v8331_v29 = vadd.f32 %v9696_v12, %v1881_v56 }
 0x278   : > { %v7405_v57 = vpop.f32.mrb[30].mxu0  ;;  %7480 = vmatprep.mubr.f32.mxu1 %v8331_v29 }
 0x279   : > { %v1891_v27 = vpop.f32.mrb[31].mxu0  ;;  %7481 = vmatmul.mubr.f32.gmra.mrb[28].mxu1 %v8330_v61  ;;  %v8332_v36 = vadd.f32 %v7405_v57, %v9696_v12 }
 0x27a   : > { %v8333_v4 = vadd.f32 %v9696_v12, %v1891_v27  ;;  %v2804_v12 = vmul.f32 %v8489_v31, %v9624_v24 }
 0x27c   : > { %7483 = vmatprep.mubr.f32.mxu1 %v8333_v4  ;;  %v2822_v24 = vmul.f32 %v9789_v47, %v2804_v12 }
 0x27d   : > { %7484 = vmatmul.mubr.f32.gmra.mrb[30].mxu1 %v8332_v36 }
 0x27e   : > { %7494 = vmatprep.mubr.msk.f32.mxu1 %vm8753_vm5, %v11270_v14  ;;  %v2833_v45 = vadd.f32 %v9800_v0, %v2822_v24 }
 0x281   : > { %7495 = vmatmul.mubr.msk.f32.vlgmr.msra.gmra.mrb[32].mxu1 %vm719_vm0, %v2717_v9 }
 0x282   : > { %7774 = vmatpush3.bf16.msra.mxu1 %v9779_v18  ;;  %7505 = vmatprep.mubr.msk.f32.mxu1 %vm8753_vm5, %v11270_v14 }
 0x283   : > { %7775 = vmatprep.subr.bf16.mxu1 %v11272_v6 }
 0x286   : > { %7777 = vmatpush3.bf16.msra.mxu1 %v9794_v2 }
 0x287   : > { %7508 = vmatprep.subr.mxu1 %v11270_v14 }
 0x289   : > { %7506 = vmatmul.mubr.msk.f32.vlgmr.msra.gmra.mrb[34].mxu1 %vm719_vm0, %v2833_v45 }
 0x28a   : > { %7509 = vmatpush3.msk.msra.mxu1 %vm1350_vm1, %v9808_v50  ;;  %7510 = vmatprep.mubr.msk.f32.mxu1 %vm8753_vm5, %v11270_v14 }
 0x28b   : > { %7811 = vmatprep.subr.bf16.mxu1 %v9177_v62 }
 0x28d   : > { %7511 = vmatmul.mubr.msk.f32.vlgmr.msra.gmra.mrb[36].mxu1 %vm1253_vm2, %v9818_v60 }
 0x28e   : > { %7813 = vmatpush3.bf16.msra.mxu1 %v9103_v7 }
 0x28f   : > { %7815 = vmatprep.subr.bf16.mxu1 %v9192_v11 }
 0x292   : > { %7817 = vmatpush3.bf16.msra.mxu1 %v9125_v23 }
 0x293   : > { %7819 = vmatprep.subr.bf16.mxu1 %v9298_v55 }
 0x296   : > { %7821 = vmatpush3.bf16.msra.mxu1 %v9127_v26 }
 0x297   : > { %7823 = vmatprep.subr.bf16.mxu1 %v9397_v28 }
 0x29a   : > { %7825 = vmatpush3.bf16.msra.mxu1 %v11391_v37 }
 0x29b   : > { %7827 = vmatprep.subr.bf16.mxu1 %v11392_v59 }
 0x29e   : > { %7829 = vmatpush3.bf16.msra.mxu1 %v11393_v46 }
 0x29f   : > { %7831 = vmatprep.subr.bf16.mxu1 %v11394_v3 }
 0x2a2   : > { %7833 = vmatpush3.bf16.msra.mxu1 %v11395_v10 }
 0x2a3   : > { %7835 = vmatprep.subr.bf16.mxu1 %v11396_v19 }
 0x2a6   : > { %7837 = vmatpush3.bf16.msra.mxu1 %v11397_v17 }
 0x2a7   : > { %7839 = vmatprep.subr.bf16.mxu1 %v11398_v33 }
 0x2aa   : > { %7841 = vmatpush3.bf16.msra.mxu1 %v11399_v5 }
 0x2ab   : > { %7886 = vmatprep.subr.bf16.mxu1 %v11272_v6 }
 0x314   : > { %v7440_v1 = vpop.f32.mrb[0].mxu1 }
 0x315   : > { %v1982_v13 = vpop.f32.mrb[1].mxu1 }
 0x316   : > { %v9839_v30 = vpack.c.bf16 %v7440_v1, %v1982_v13 }
 0x318   : > { %v7443_v58 = vpop.f32.mrb[2].mxu1 }
 0x319   : > { %v1992_v49 = vpop.f32.mrb[3].mxu1 }
 0x31a   : > { %v9841_v22 = vpack.c.bf16 %v7443_v58, %v1992_v49 }
 0x31c   : > { %v7446_v34 = vpop.f32.mrb[4].mxu1 }
 0x31d   : > { %v2002_v25 = vpop.f32.mrb[5].mxu1 }
 0x31e   : > { %v9843_v42 = vpack.c.bf16 %v7446_v34, %v2002_v25 }
 0x320   : > { %11400 = vst [vmem:[#allocation28_spill] sm:$0xff] %v9843_v42  ;;  %v7449_v56 = vpop.f32.mrb[6].mxu1 }
 0x321   : > { %v2012_v29 = vpop.f32.mrb[7].mxu1 }
 0x322   : > { %v9845_v35 = vpack.c.bf16 %v7449_v56, %v2012_v29 }
 0x324   : > { %11401 = vst [vmem:[#allocation29_spill] sm:$0xff] %v9845_v35  ;;  %v7452_v48 = vpop.f32.mrb[8].mxu1 }
 0x325   : > { %v2022_v61 = vpop.f32.mrb[9].mxu1 }
 0x326   : > { %v9847_v57 = vpack.c.bf16 %v7452_v48, %v2022_v61 }
 0x328   : > { %11402 = vst [vmem:[#allocation30_spill] sm:$0xff] %v9847_v57  ;;  %v7455_v27 = vpop.f32.mrb[10].mxu1 }
 0x329   : > { %v2032_v4 = vpop.f32.mrb[11].mxu1 }
 0x32a   : > { %v9849_v8 = vpack.c.bf16 %v7455_v27, %v2032_v4 }
 0x32c   : > { %11403 = vst [vmem:[#allocation31_spill] sm:$0xff] %v9849_v8  ;;  %v7458_v15 = vpop.f32.mrb[12].mxu1 }
 0x32d   : > { %v2042_v54 = vpop.f32.mrb[13].mxu1 }
 0x32e   : > { %v9851_v36 = vpack.c.bf16 %v7458_v15, %v2042_v54 }
 0x330   : > { %11404 = vst [vmem:[#allocation32_spill] sm:$0xff] %v9851_v36  ;;  %v7461_v40 = vpop.f32.mrb[14].mxu1 }
 0x331   : > { %v2052_v39 = vpop.f32.mrb[15].mxu1 }
 0x332   : > { %v9853_v31 = vpack.c.bf16 %v7461_v40, %v2052_v39 }
 0x334   : > { %11405 = vst [vmem:[#allocation33_spill] sm:$0xff] %v9853_v31  ;;  %v7464_v12 = vpop.f32.mrb[16].mxu1 }
 0x335   : > { %v2062_v9 = vpop.f32.mrb[17].mxu1 }
 0x336   : > { %v9855_v52 = vpack.c.bf16 %v7464_v12, %v2062_v9 }
 0x338   : > { %v7467_v43 = vpop.f32.mrb[18].mxu1  ;;  %7779 = vmatprep.subr.bf16.mxu0 %v9855_v52 }
 0x339   : > { %v2072_v20 = vpop.f32.mrb[19].mxu1  ;;  %7781 = vmatpush3.bf16.xpose.msra.mxu0 %v9839_v30 }
 0x33a   : > { %v9859_v24 = vpack.c.bf16 %v7467_v43, %v2072_v20 }
 0x33c   : > { %v7470_v45 = vpop.f32.mrb[20].mxu1  ;;  %7783 = vmatprep.subr.bf16.mxu0 %v9859_v24 }
 0x33d   : > { %v2082_v1 = vpop.f32.mrb[21].mxu1 }
 0x33e   : > { %v9862_v13 = vpack.c.bf16 %v7470_v45, %v2082_v1 }
 0x340   : > { %v7473_v58 = vpop.f32.mrb[22].mxu1 }
 0x341   : > { %v2092_v49 = vpop.f32.mrb[23].mxu1  ;;  %7785 = vmatpush3.bf16.xpose.msra.mxu0 %v9841_v22 }
 0x342   : > { %v9865_v34 = vpack.c.bf16 %v7473_v58, %v2092_v49  ;;  %7787 = vmatprep.subr.bf16.mxu0 %v9862_v13 }
 0x344   : > { %11406 = vst [vmem:[#allocation34_spill] sm:$0xff] %v9865_v34  ;;  %v7476_v25 = vpop.f32.mrb[24].mxu1 }
 0x345   : > { %v2102_v56 = vpop.f32.mrb[25].mxu1 }
 0x346   : > { %v9868_v29 = vpack.c.bf16 %v7476_v25, %v2102_v56 }
 0x348   : > { %11407 = vst [vmem:[#allocation35_spill] sm:$0xff] %v9868_v29  ;;  %v7479_v48 = vpop.f32.mrb[26].mxu1 }
 0x349   : > { %v2112_v61 = vpop.f32.mrb[27].mxu1  ;;  %7789 = vmatpush3.bf16.xpose.msra.mxu0 %v9843_v42 }
 0x34a   : > { %v9871_v27 = vpack.c.bf16 %v7479_v48, %v2112_v61  ;;  %7791 = vmatprep.subr.bf16.mxu0 %v9865_v34  ;;  %v8756_v48 = vmov 0  }
 0x34b   : > { %8419 = vset.pattern.permute.xlu1 %v8756_v48  ;;  %8420 = vset.pattern.permute.xlu0 %v8756_v48 }
 0x34c   : > { %11408 = vst [vmem:[#allocation36_spill] sm:$0xff] %v9871_v27  ;;  %v7482_v4 = vpop.f32.mrb[28].mxu1 }
 0x34d   : > { %v2122_v15 = vpop.f32.mrb[29].mxu1 }
 0x34e   : > { %v9874_v54 = vpack.c.bf16 %v7482_v4, %v2122_v15 }
 0x350   : > { %11409 = vst [vmem:[#allocation37_spill] sm:$0xff] %v9874_v54  ;;  %v7485_v40 = vpop.f32.mrb[30].mxu1 }
 0x351   : > { %v2132_v39 = vpop.f32.mrb[31].mxu1  ;;  %7793 = vmatpush3.bf16.xpose.msra.mxu0 %v9845_v35 }
 0x352   : > { %v9877_v12 = vpack.c.bf16 %v7485_v40, %v2132_v39  ;;  %7795 = vmatprep.subr.bf16.mxu0 %v9868_v29 }
 0x354   : > { %11410 = vst [vmem:[#allocation38_spill] sm:$0xff] %v9877_v12  ;;  %v2787_v9 = vpop.f32.mrb[32].mxu1 }
 0x355   : > { %v7496_v43 = vpop.f32.mrb[33].mxu1  ;;  %v2992_v61 = vsel %vm719_vm0, %v2787_v9, 0.0 }
 0x356   : > { %v2993_v4 = vsel %vm2988_vm6, %v2992_v61, 0.0 }
 0x357   : > { %v2994_v15 = vsel %vm2990_vm7, %v2993_v4, 0.0 }
 0x358   : > { %v2996_v39 = vrot.slane %v2994_v15, 7 }
 0x359   : > { %7797 = vmatpush3.bf16.xpose.msra.mxu0 %v9847_v57 }
 0x35a   : > { %7799 = vmatprep.subr.bf16.mxu0 %v9871_v27 }
 0x35c   : > { %v2903_v20 = vpop.f32.mrb[34].mxu1 }
 0x35d   : > { %2985 = vrot.lane.b32.xlu0 %v2903_v20, %s8755_s22  ;;  %v7507_v45 = vpop.f32.mrb[35].mxu1 }
 0x360   : > { %v9883_v1 = vpop.f32.mrb[36].mxu1 }
 0x361   : > { %v11274_v58 = vsub.f32 0.0, %v9883_v1  ;;  %7801 = vmatpush3.bf16.xpose.msra.mxu0 %v9849_v8  ;;  %v7512_v49 = vpop.f32.mrb[37].mxu1 }
 0x362   : > { %7803 = vmatprep.subr.bf16.mxu0 %v9874_v54 }
 0x363   : > { %v3000_v25 = vmul.f32 %v11274_v58, %v2787_v9 }
 0x365   : > { %v3001_v56 = vsel %vm2694_vm3, %v3000_v25, 0.0 }
 0x366   : > { %3002 = vadd.xlane.f32.xlu1 %v3001_v56 }
 0x369   : > { %7805 = vmatpush3.bf16.xpose.msra.mxu0 %v9851_v36 }
 0x36a   : > { %7807 = vmatprep.subr.bf16.mxu0 %v9877_v12 }
 0x371   : > { %7809 = vmatpush3.bf16.xpose.msra.mxu0 %v9853_v31 }
 0x372   : > { %7843 = vmatprep.subr.bf16.mxu0 %v9855_v52 }
 0x3cf   : > { %v2986_v40 = vpop.permute.xlu0 %2985 }
 0x3d0   : > { %v2989_v43 = vsel %vm2988_vm6, 0.0, %v2986_v40 }
 0x3d1   : > { %v2991_v20 = vsel %vm2990_vm7, %v2989_v43, 0.0 }
 0x3d2   : > { %v2999_v45 = vsel %vm2998_vm8, %v2991_v20, %v2996_v39 }
 0x3d3   : > { %6785 = vmatprep.mubr.f32.mxu0 %v2999_v45 }
 0x3d4   : > { %6786 = vmatmul.mubr.f32.vlgmr.msra.gmra.mrb[32].mxu0 %v2999_v45 }
 0x3d5   : > { %7845 = vmatpush3.bf16.msra.mxu0 %v9839_v30 }
 0x3d6   : > { %7847 = vmatprep.subr.bf16.mxu0 %v9859_v24 }
 0x3d9   : > { %7849 = vmatpush3.bf16.msra.mxu0 %v9841_v22 }
 0x3da   : > { %7851 = vmatprep.subr.bf16.mxu0 %v9862_v13 }
 0x3dd   : > { %7853 = vmatpush3.bf16.msra.mxu0 %v9843_v42 }
 0x3de   : > { %7855 = vmatprep.subr.bf16.mxu0 %v9865_v34 }
 0x3e1   : > { %7857 = vmatpush3.bf16.msra.mxu0 %v9845_v35 }
 0x3e2   : > { %7859 = vmatprep.subr.bf16.mxu0 %v9868_v29 }
 0x3e5   : > { %7861 = vmatpush3.bf16.msra.mxu0 %v9847_v57 }
 0x3e6   : > { %7863 = vmatprep.subr.bf16.mxu0 %v9871_v27 }
 0x3e9   : > { %7865 = vmatpush3.bf16.msra.mxu0 %v9849_v8 }
 0x3ea   : > { %7867 = vmatprep.subr.bf16.mxu0 %v9874_v54 }
 0x3ed   : > { %7869 = vmatpush3.bf16.msra.mxu0 %v9851_v36 }
 0x3ee   : > { %7871 = vmatprep.subr.bf16.mxu0 %v9877_v12 }
 0x3f1   : > { %7873 = vmatpush3.bf16.msra.mxu0 %v9853_v31 }
 0x3f2   : > { %7874 = vmatprep.subr.bf16.mxu0 %v11272_v6 }
 0x3f3   : > { %v3003_v9 = vpop.xlane.xlu1 %3002 }
 0x3f4   : > { %v3005_v49 = vrot.slane %v3003_v9, 7 }
 0x3f6   : > { %v3007_v25 = vsel %vm2998_vm8, 0.0, %v3005_v49 }
 0x3f7   : > { %3010 = vperm.xlu1 %8419, %v3007_v25  }
 0x476   : > { %v3011_v56 = vpop.permute.xlu1 %3010 }
 0x4a7   : > { %v3079_v48 = vpop.f32.mrb[32].mxu0 }
 0x4a8   : > { %v3080_v61 = vadd.f32 %v3079_v48, %v3011_v56  ;;  %v3081_v4 = vpop.f32.mrb[33].mxu0 }
 0x4a9   : > { %v3082_v15 = vadd.f32 %v3081_v4, %v3011_v56 }
 0x4aa   : > { %v3084_v40 = vmul.f32 0.17677669, %v3080_v61 }
 0x4ab   : > { %v3085_v39 = vmul.f32 0.17677669, %v3082_v15 }
 0x4ac   : > { %v3087_v43 = vsel %vm3086_vm9, %v3084_v40, -inf }
 0x4ad   : > { %v3088_v20 = vrot.slane %v3087_v43, 4  ;;  %v3094_v45 = vsel %vm3086_vm9, %v3085_v39, -inf }
 0x4ae   : > { %v3095_v14 = vrot.slane %v3094_v45, 4 }
 0x4af   : > { %v3089_v6 = vmax.f32 %v3087_v43, %v3088_v20 }
 0x4b0   : > { %v3096_v58 = vmax.f32 %v3094_v45, %v3095_v14 }
 0x4b1   : > { %v3090_v9 = vrot.slane %v3089_v6, 2 }
 0x4b2   : > { %v3097_v31 = vrot.slane %v3096_v58, 2 }
 0x4b3   : > { %v3091_v49 = vmax.f32 %v3089_v6, %v3090_v9 }
 0x4b4   : > { %v3098_v25 = vmax.f32 %v3096_v58, %v3097_v31 }
 0x4b5   : > { %v3092_v12 = vrot.slane %v3091_v49, 1 }
 0x4b6   : > { %v3099_v36 = vrot.slane %v3098_v25, 1 }
 0x4b7   : > { %v3093_v48 = vmax.f32 %v3091_v49, %v3092_v12 }
 0x4b8   : > { %v3100_v54 = vmax.f32 %v3098_v25, %v3099_v36 }
 0x4b9   : > { %v3101_v8 = vsub.f32 %v3084_v40, %v3093_v48 }
 0x4ba   : > { %v3102_v56 = vsub.f32 %v3085_v39, %v3100_v54 }
 0x4bb   : > { %v3103_v61 = vmul.f32 1.442695, %v3101_v8 }
 0x4bc   : > { %v3105_v4 = vmul.f32 1.442695, %v3102_v56 }
 0x4bd   : > { %8490 = vpow2.f32 %v3103_v61 }
 0x4be   : > { %8492 = vpow2.f32 %v3105_v4 }
 0x4c7   : > { %v8491_v15 = vpop.eup %8490 }
 0x4c8   : > { %v8493_v27 = vpop.eup %8492  ;;  %v3107_v57 = vsel %vm3086_vm9, %v8491_v15, 0.0 }
 0x4c9   : > { %v3108_v43 = vrot.slane %v3107_v57, 4  ;;  %v3114_v14 = vsel %vm3086_vm9, %v8493_v27, 0.0 }
 0x4ca   : > { %v3115_v20 = vrot.slane %v3114_v14, 4 }
 0x4cb   : > { %v3109_v6 = vadd.f32 %v3108_v43, %v3107_v57 }
 0x4cc   : > { %v3116_v31 = vadd.f32 %v3115_v20, %v3114_v14 }
 0x4cd   : > { %v3110_v58 = vrot.slane %v3109_v6, 2 }
 0x4ce   : > { %v3117_v45 = vrot.slane %v3116_v31, 2 }
 0x4cf   : > { %v3111_v12 = vadd.f32 %v3110_v58, %v3109_v6 }
 0x4d0   : > { %v3118_v36 = vadd.f32 %v3117_v45, %v3116_v31  ;;  %v11411_v31 = vsub.f32 0.0, %v9883_v1 }
 0x4d1   : > { %v3112_v40 = vrot.slane %v3111_v12, 1 }
 0x4d2   : > { %v3119_v54 = vrot.slane %v3118_v36, 1  ;;  %v3296_v58 = vrot.slane %v11411_v31, 7 }
 0x4d3   : > { %v3113_v8 = vadd.f32 %v3112_v40, %v3111_v12 }
 0x4d4   : > { %v3120_v39 = vadd.f32 %v3119_v54, %v3118_v36 }
 0x4d5   : > { %8494 = vrcp.f32 %v3113_v8 }
 0x4d6   : > { %8496 = vrcp.f32 %v3120_v39 }
 0x4df   : > { %v8495_v9 = vpop.eup %8494 }
 0x4e0   : > { %v8497_v49 = vpop.eup %8496  ;;  %v3122_v25 = vmul.f32 %v8495_v9, %v8491_v15 }
 0x4e1   : > { %v3124_v48 = vmul.f32 %v8497_v49, %v8493_v27 }
 0x4e2   : > { %v3125_v56 = vadd.f32 1e-08, %v3122_v25  ;;  %v11412_v25 = vmov 0.0  }
 0x4e3   : > { %v3126_v61 = vadd.f32 1e-08, %v3124_v48 }
 0x4e4   : > { %v3136_v57 = vsel %vm2998_vm8, %v3125_v56, 0.0  ;;  %v3128_v4 = vsel %vm3127_vm10, %v3125_v56, 0.0 }
 0x4e5   : > { %v3137_v43 = vsel %vm2998_vm8, %v3126_v61, 0.0  ;;  %v3129_v14 = vsel %vm3127_vm10, %v3126_v61, 0.0 }
 0x4e6   : > { %v3138_v20 = vadd.f32 %v3137_v43, %v3136_v57  ;;  %v3130_v6 = vadd.f32 %v3129_v14, %v3128_v4 }
 0x4e8   : > { %3139 = vadd.xlane.f32.xlu0 %v3138_v20  ;;  %3131 = vadd.xlane.f32.xlu1 %v3130_v6 }
 0x4fe   : > { %3297 = vrot.lane.b32.xlu0 %v3296_v58, %s11353_s28 }
 0x575   : > { %v3140_v27 = vpop.xlane.xlu0 %3139  ;;  %v3132_v15 = vpop.xlane.xlu1 %3131 }
 0x576   : > { %8498 = vrcp.f32 %v3140_v27 }
 0x577   : > { %8500 = vrcp.f32 %v3132_v15  ;;  %v8652_v15 = vld [vmem:[%s11247_s16] sm:$0x1] }
 0x579   : > { %v3298_v20 = vpop.permute.xlu0 %3297 }
 0x580   : > { %v8499_v45 = vpop.eup %8498 }
 0x581   : > { %v8501_v12 = vpop.eup %8500  ;;  %v3143_v36 = vmul.f32 %v8499_v45, %v3126_v61  ;;  %v3142_v40 = vmul.f32 %v8499_v45, %v3125_v56 }
 0x582   : > { %v3135_v54 = vmul.f32 %v8501_v12, %v3126_v61  ;;  %v3134_v8 = vmul.f32 %v8501_v12, %v3125_v56 }
 0x584   : > { %v3145_v39 = vsel %vm2998_vm8, %v3143_v36, %v3135_v54  ;;  %v3149_v9 = vrot.slane %v3135_v54, 1  ;;  %v3144_v49 = vsel %vm2998_vm8, %v3142_v40, %v3134_v8  ;;  %v3148_v1 = vrot.slane %v3134_v8, 1  ;;  %v8653_v40 = vld [vmem:[%s11246_s15] sm:$0x7] }
 0x585   : > { %3289 = vmatprep.mubr.f32.mxu0 %v3145_v39 }
 0x586   : > { %3216 = vmatprep.mubr.f32.mxu1 %v3149_v9  ;;  %3290 = vmatmul.mubr.f32.vlgmr.msra.gmra.mrb[34].mxu0 %v3144_v49 }
 0x587   : > { %3217 = vmatmul.mubr.f32.vlgmr.msra.gmra.mrb[38].mxu1 %v3148_v1  ;;  %7521 = vmatprep.mubr.msk.f32.mxu0 %vm8753_vm5, %v11412_v25 }
 0x588   : > { %7543 = vmatprep.mubr.msk.f32.mxu1 %vm8753_vm5, %v11412_v25 }
 0x659   : > { %v6854_v48 = vpop.f32.mrb[34].mxu0 }
 0x65a   : > { %v6819_v57 = vpop.f32.mrb[38].mxu1  ;;  %v6855_v61 = vpop.f32.mrb[35].mxu0 }
 0x65b   : > { %v6856_v56 = vadd.f32 %v6855_v61, %v6854_v48  ;;  %v6820_v4 = vpop.f32.mrb[39].mxu1 }
 0x65c   : > { %v9935_v43 = vadd.f32 %v6820_v4, %v6819_v57 }
 0x65d   : > { %v3314_v14 = vrot.slane %v6856_v56, %v9746_v38  ;;  %v3300_v6 = vadd.f32 %v6856_v56, %v3298_v20  ;;  %v2674_v20 = vld [vmem:[%s11244_s13 + $0x40] sm:$0xff] }
 0x65f   : > { %v3321_v31 = vrot.slane %v3314_v14, %v9746_v38  ;;  %v3302_v58 = vrot.slane %v3300_v6, 1  ;;  %v2675_v6 = vld [vmem:[%s11244_s13 + $0x48] sm:$0xff] }
 0x661   : > { %3322 = vrot.lane.b32.xlu1 %v3321_v31, %s11353_s28  ;;  %v9965_v31 = vpack.c.bf16 %v2675_v6, %v2674_v20 }
 0x663   : > { %11413 = vst [vmem:[#allocation39_spill] sm:$0xff] %v9965_v31  ;;  %7876 = vmatpush3.bf16.msra.mxu0 %v9965_v31 }
 0x665   : > { %3303 = vrot.lane.b32.xlu1 %v3302_v58, %s11289_s0  ;;  %v11414_v58 = vmov 0.0|0.0   ;;  %s6512_s0 = sshll.u32 %s10465_s2, 3 }
 0x666   : > { %7877 = vmatprep.subr.bf16.mxu0 %v11414_v58  ;;  %s10470_s27 = scalar_lea.vmem [#allocation4], %s6512_s0  ;;  %s10965_s4 = scalar_lea.vmem [#allocation2], %s6512_s0 }
 0x667   : > { %6357 = vst [vmem:[%s10470_s27] sm:$0xff] %v11412_v25  ;;  %s6392_s6 = sshll.u32 %s10965_s4, 4  ;;  %s6393_s6 = int_to_ptr.vmem [resolvable:$true] %s6392_s6 }
 0x6d3   : > { %v3323_v27 = vpop.permute.xlu1 %3322 }
 0x6d4   : > { %v9944_v45 = vadd.f32 %v8652_v15, %v3323_v27  ;;  %v2676_v27 = vld [vmem:[%s11244_s13 + $0x50] sm:$0xff]  ;;  %v2677_v15 = vld [vmem:[%s11244_s13 + $0x58] sm:$0xff] }
 0x6d6   : > { %v3326_v12 = vsel %vm2791_vm4, %v9944_v45, 0.0 }
 0x6d7   : > { %3327 = vadd.xlane.f32.xlu0 %v3326_v12  ;;  %v3304_v36 = vpop.permute.xlu1 %3303  ;;  %v2666_v12 = vld [vmem:[%s11244_s13] sm:$0xff] }
 0x6d8   : > { %v9951_v54 = vadd.f32 %v8653_v40, %v3304_v36  ;;  %v9978_v36 = vpack.c.bf16 %v2677_v15, %v2676_v27  ;;  %v2667_v40 = vld [vmem:[%s11244_s13 + $0x8] sm:$0xff] }
 0x6da   : > { %v3547_v8 = vsel %vm2694_vm3, %v9951_v54, 0.0  ;;  %11415 = vst [vmem:[#allocation40_spill] sm:$0xff] %v9978_v36  ;;  %7879 = vmatpush3.bf16.msra.mxu0 %v9978_v36 }
 0x6db   : > { %3548 = vadd.xlane.f32.xlu1 %v3547_v8  ;;  %v9983_v8 = vpack.c.bf16 %v2667_v40, %v2666_v12  ;;  %7880 = vmatprep.subr.bf16.mxu0 %v11414_v58 }
 0x6dd   : > { %11416 = vst [vmem:[#allocation41_spill] sm:$0xff] %v9983_v8  ;;  %7888 = vmatpush3.bf16.msra.mxu1 %v9983_v8 }
 0x6de   : > { %7889 = vmatprep.subr.bf16.mxu1 %v11414_v58 }
 0x764   : > { %v3328_v39 = vpop.xlane.xlu0 %3327 }
 0x765   : > { %v3329_v9 = vmul.f32 0.03125, %v3328_v39  ;;  %v2668_v39 = vld [vmem:[%s11244_s13 + $0x10] sm:$0xff] }
 0x767   : > { %v3330_v49 = vsub.f32 %v9944_v45, %v3329_v9  ;;  %v2669_v9 = vld [vmem:[%s11244_s13 + $0x18] sm:$0xff] }
 0x768   : > { %v3549_v1 = vpop.xlane.xlu1 %3548 }
 0x769   : > { %v3550_v48 = vmul.f32 0.03125, %v3549_v1  ;;  %v3331_v57 = vmul.f32 %v3330_v49, %v3330_v49  ;;  %v9995_v1 = vpack.c.bf16 %v2669_v9, %v2668_v39  ;;  %v3562_v9 = vsub.s32 4, %v9499_v32 }
 0x76b   : > { %v3551_v61 = vsub.f32 %v9951_v54, %v3550_v48  ;;  %v3332_v56 = vsel %vm2791_vm4, %v3331_v57, 0.0  ;;  %11417 = vst [vmem:[#allocation42_spill] sm:$0xff] %v9995_v1  ;;  %7891 = vmatpush3.bf16.msra.mxu1 %v9995_v1  ;;  %v3339_v57 = vcombine.high %v9751_v44, %v9751_v44 }
 0x76c   : > { %3333 = vadd.xlane.f32.xlu0 %v3332_v56  ;;  %7898 = vmatprep.subr.bf16.mxu1 %v11414_v58 }
 0x76d   : > { %v3552_v4 = vmul.f32 %v3551_v61, %v3551_v61  ;;  %v3346_v20 = vrot.slane %v3339_v57, %v9746_v38 }
 0x76f   : > { %v3553_v14 = vsel %vm2694_vm3, %v3552_v4, 0.0  ;;  %v3357_v15 = vcombine.high %v3346_v20, %v3346_v20  ;;  %v3353_v12 = vrot.slane %v3346_v20, %v9746_v38 }
 0x770   : > { %3554 = vadd.xlane.f32.xlu0 %v3553_v14 }
 0x771   : > { %v3364_v40 = vrot.slane %v3357_v15, %v9746_v38  ;;  %v10004_v39 = vcombine.high %v3353_v12, %v3353_v12  ;;  %v2681_v15 = vld [vmem:[%s11244_s13 + $0x78] sm:$0xff] }
 0x773   : > { %11418 = vst [vmem:[#allocation43_spill] sm:$0xff] %v10004_v39 }
 0x7f9   : > { %v3334_v48 = vpop.xlane.xlu0 %3333 }
 0x7fa   : > { %v3335_v56 = vmul.f32 0.03125, %v3334_v48  ;;  %v10007_v48 = vcombine.high %v3364_v40, %v3364_v40  ;;  %v10053_v40 = vld [vmem:[%s11245_s14] sm:$0xf] }
 0x7fc   : > { %v3336_v4 = vadd.f32 1e-05, %v3335_v56  ;;  %11419 = vst [vmem:[#allocation44_spill] sm:$0xff] %v10007_v48  ;;  %v3567_v56 = vsub.s32 5, %v9499_v32 }
 0x7fd   : > { %v3555_v14 = vpop.xlane.xlu0 %3554 }
 0x7fe   : > { %8502 = vrsqrt.f32 %v3336_v4  ;;  %v3556_v6 = vmul.f32 0.03125, %v3555_v14  ;;  %v10012_v4 = vrot.slane %v9751_v44, %v3562_v9  ;;  %v10056_v9 = vrot.slane %v10053_v40, 2 }
 0x800   : > { %v3557_v27 = vadd.f32 1e-05, %v3556_v6  ;;  %11420 = vst [vmem:[#allocation45_spill] sm:$0xff] %v10012_v4  ;;  %11424 = vst [vmem:[#allocation49_spill] sm:$0xff] %v10056_v9 }
 0x802   : > { %8504 = vrsqrt.f32 %v3557_v27  ;;  %v10016_v27 = vrot.slane %v9751_v44, %v3567_v56  ;;  %v2678_v44 = vld [vmem:[%s11244_s13 + $0x60] sm:$0xff] }
 0x804   : > { %11421 = vst [vmem:[#allocation46_spill] sm:$0xff] %v10016_v27 }
 0x808   : > { %v8503_v1 = vpop.eup %8502 }
 0x809   : > { %v3338_v8 = vmul.f32 %v8503_v1, %v3330_v49  ;;  %v2680_v1 = vld [vmem:[%s11244_s13 + $0x70] sm:$0xff] }
 0x80a   : > { %v10046_v12 = vpack.c.bf16 %v2681_v15, %v2680_v1 }
 0x80b   : > { %v3356_v57 = vmul.f32 %v10004_v39, %v3338_v8 }
 0x80c   : > { %v8505_v14 = vpop.eup %8504  ;;  %11423 = vst [vmem:[#allocation48_spill] sm:$0xff] %v10046_v12 }
 0x80d   : > { %v3559_v6 = vmul.f32 %v8505_v14, %v3551_v61  ;;  %v3367_v20 = vadd.f32 %v10007_v48, %v3356_v57  ;;  %v2679_v61 = vld [vmem:[%s11244_s13 + $0x68] sm:$0xff] }
 0x80e   : > { %v10036_v8 = vpack.c.bf16 %v2679_v61, %v2678_v44 }
 0x80f   : > { %7522 = vmatmul.mubr.msk.f32.vlgmr.msra.gmra.mrb[36].mxu0 %vm719_vm0, %v3367_v20  ;;  %v3564_v49 = vmul.f32 %v10012_v4, %v3559_v6  ;;  %v10061_v6 = vrot.slane %v10053_v40, %v9502_v41 }
 0x810   : > { %7532 = vmatprep.mubr.msk.f32.mxu0 %vm8753_vm5, %v11412_v25  ;;  %11422 = vst [vmem:[#allocation47_spill] sm:$0xff] %v10036_v8  ;;  %7882 = vmatpush3.bf16.msra.mxu0 %v10036_v8 }
 0x811   : > { %v3569_v32 = vadd.f32 %v10016_v27, %v3564_v49  ;;  %7883 = vmatprep.subr.bf16.mxu0 %v11414_v58  ;;  %11425 = vst [vmem:[#allocation50_spill] sm:$0xff] %v10061_v6 }
 0x813   : > { %7544 = vmatmul.mubr.msk.f32.vlgmr.msra.gmra.mrb[40].mxu1 %vm719_vm0, %v3569_v32 }
 0x814   : > { %7900 = vmatpush3.bf16.msra.mxu1 %v9705_v63  ;;  %7565 = vmatprep.mubr.msk.f32.mxu1 %vm8753_vm5, %v11412_v25 }
 0x815   : > { %7901 = vmatprep.subr.bf16.mxu1 %v11414_v58  ;;  %7885 = vmatpush3.bf16.msra.mxu0 %v10046_v12 }
 0x816   : > { %7892 = vmatprep.subr.bf16.mxu0 %v11414_v58 }
 0x818   : > { %7903 = vmatpush3.bf16.msra.mxu1 %v9716_v51 }
 0x819   : > { %7579 = vmatprep.subr.mxu1 %v11412_v25 }
 0x8e2   : > { %v3440_v56 = vpop.f32.mrb[36].mxu0 }
 0x8e3   : > { %v3441_v57 = vadd.f32 %v3440_v56, %v10056_v9  ;;  %v7523_v14 = vpop.f32.mrb[37].mxu0 }
 0x8e5   : > { %v3445_v20 = vmul.f32 0.70710677, %v3441_v57 }
 0x8e6   : > { %v3643_v49 = vpop.f32.mrb[40].mxu1 }
 0x8e7   : > { %v3448_v32 = vand.u32 2147483647, %v3445_v20  ;;  %v10064_v44 = vadd.f32 %v3643_v49, %v10061_v6  ;;  %v7545_v61 = vpop.f32.mrb[41].mxu1  ;;  %vm3446_vm11 = vcmp.ge.f32.partialorder %v3445_v20, 0.0 }
 0x8e9   : > { %v3449_v1 = vmul.f32 0.3275911, %v3448_v32  ;;  %v3648_v15 = vmul.f32 0.70710677, %v10064_v44  ;;  %v3462_v14 = vsub.f32 0.0, %v3448_v32 }
 0x8eb   : > { %v3450_v51 = vadd.f32 1.0, %v3449_v1  ;;  %v3651_v63 = vand.u32 2147483647, %v3648_v15  ;;  %v3463_v41 = vmul.f32 %v3462_v14, %v3448_v32  ;;  %vm3649_vm12 = vcmp.ge.f32.partialorder %v3648_v15, 0.0  ;;  %v2672_v15 = vld [vmem:[%s11244_s13 + $0x30] sm:$0xff] }
 0x8ed   : > { %8506 = vrcp.f32 %v3450_v51  ;;  %v3652_v27 = vmul.f32 0.3275911, %v3651_v63  ;;  %v3665_v4 = vsub.f32 0.0, %v3651_v63  ;;  %v3464_v12 = vmul.f32 1.442695, %v3463_v41 }
 0x8ef   : > { %v3653_v56 = vadd.f32 1.0, %v3652_v27  ;;  %v3666_v49 = vmul.f32 %v3665_v4, %v3651_v63 }
 0x8f1   : > { %8508 = vrcp.f32 %v3653_v56  ;;  %v3667_v1 = vmul.f32 1.442695, %v3666_v49 }
 0x8f2   : > { %8510 = vpow2.f32 %v3464_v12  ;;  %v11330_v12 = vmov -1.0  }
 0x8f3   : > { %8512 = vpow2.f32 %v3667_v1  ;;  %v2673_v1 = vld [vmem:[%s11244_s13 + $0x38] sm:$0xff] }
 0x8f7   : > { %v8507_v9 = vpop.eup %8506 }
 0x8f8   : > { %v3453_v48 = vmul.f32 1.0614054, %v8507_v9 }
 0x8fa   : > { %v3454_v39 = vadd.f32 -1.4531521, %v3453_v48 }
 0x8fb   : > { %v8509_v38 = vpop.eup %8508 }
 0x8fc   : > { %v3455_v6 = vmul.f32 %v8507_v9, %v3454_v39  ;;  %v3656_v61 = vmul.f32 1.0614054, %v8509_v38  ;;  %v8511_v42 = vpop.eup %8510 }
 0x8fe   : > { %v3456_v8 = vadd.f32 1.4214138, %v3455_v6  ;;  %v3657_v36 = vadd.f32 -1.4531521, %v3656_v61  ;;  %v8513_v6 = vpop.eup %8512 }
 0x900   : > { %v3457_v31 = vmul.f32 %v8507_v9, %v3456_v8  ;;  %v3658_v51 = vmul.f32 %v8509_v38, %v3657_v36  ;;  %v3447_v8 = vsel %vm3446_vm11, 1.0, %v11330_v12 }
 0x902   : > { %v3458_v29 = vadd.f32 -0.28449672, %v3457_v31  ;;  %v3659_v27 = vadd.f32 1.4214138, %v3658_v51 }
 0x904   : > { %v3459_v56 = vmul.f32 %v8507_v9, %v3458_v29  ;;  %v3660_v35 = vmul.f32 %v8509_v38, %v3659_v27  ;;  %v2670_v29 = vld [vmem:[%s11244_s13 + $0x20] sm:$0xff]  ;;  %v3647_v27 = vmul.f32 0.5, %v10064_v44  ;;  %v10101_v44 = vrot.slane %v10053_v40, 3 }
 0x906   : > { %v3460_v32 = vadd.f32 0.2548296, %v3459_v56  ;;  %v3661_v14 = vadd.f32 -0.28449672, %v3660_v35  ;;  %v2671_v35 = vld [vmem:[%s11244_s13 + $0x28] sm:$0xff] }
 0x907   : > { %v10075_v20 = vpack.c.bf16 %v2671_v35, %v2670_v29 }
 0x908   : > { %v3461_v34 = vmul.f32 %v8507_v9, %v3460_v32  ;;  %v3662_v48 = vmul.f32 %v8509_v38, %v3661_v14  ;;  %v3444_v9 = vmul.f32 0.5, %v3441_v57  ;;  %v10085_v57 = vpack.c.bf16 %v2673_v1, %v2672_v15 }
 0x90a   : > { %v3466_v41 = vmul.f32 %v8511_v42, %v3461_v34  ;;  %v3663_v63 = vadd.f32 0.2548296, %v3662_v48 }
 0x90c   : > { %v3467_v39 = vsub.f32 1.0, %v3466_v41  ;;  %v3664_v4 = vmul.f32 %v8509_v38, %v3663_v63  ;;  %v3650_v38 = vsel %vm3649_vm12, 1.0, %v11330_v12  ;;  %vm6362_vm12 = vcmask 257024  }
 0x90e   : > { %v3468_v36 = vmul.f32 %v3467_v39, %v3447_v8  ;;  %v3669_v31 = vmul.f32 %v8513_v6, %v3664_v4  ;;  %v10111_v39 = vrot.slane %v10053_v40, %v9508_v16 }
 0x910   : > { %v3469_v42 = vadd.f32 1.0, %v3468_v36  ;;  %v3670_v34 = vsub.f32 1.0, %v3669_v31 }
 0x912   : > { %v3470_v49 = vmul.f32 %v3469_v42, %v3444_v9  ;;  %v3671_v61 = vmul.f32 %v3670_v34, %v3650_v38 }
 0x914   : > { %7533 = vmatmul.mubr.msk.f32.vlgmr.msra.gmra.mrb[38].mxu0 %vm719_vm0, %v3470_v49  ;;  %v3672_v51 = vadd.f32 1.0, %v3671_v61 }
 0x915   : > { %7894 = vmatpush3.bf16.msra.mxu0 %v10075_v20  ;;  %7554 = vmatprep.mubr.msk.f32.mxu0 %vm8753_vm5, %v11412_v25 }
 0x916   : > { %7895 = vmatprep.subr.bf16.mxu0 %v11414_v58  ;;  %v3673_v56 = vmul.f32 %v3672_v51, %v3647_v27 }
 0x919   : > { %7897 = vmatpush3.bf16.msra.mxu0 %v10085_v57 }
 0x91a   : > { %7904 = vmatprep.subr.bf16.mxu0 %v11414_v58 }
 0x91c   : > { %7555 = vmatmul.mubr.msk.f32.vlgmr.msra.gmra.mrb[40].mxu0 %vm719_vm0, %v3673_v56 }
 0x91d   : > { %7906 = vmatpush3.bf16.msra.mxu0 %v9779_v18  ;;  %7576 = vmatprep.mubr.msk.f32.mxu0 %vm8753_vm5, %v11412_v25 }
 0x91e   : > { %7907 = vmatprep.subr.bf16.mxu0 %v11414_v58 }
 0x921   : > { %7909 = vmatpush3.bf16.msra.mxu0 %v9794_v2 }
 0x922   : > { %7943 = vmatprep.subr.bf16.mxu0 %v9177_v62 }
 0x9e7   : > { %v3542_v32 = vpop.f32.mrb[38].mxu0 }
 0x9e8   : > { %v3543_v14 = vadd.f32 %v3542_v32, %v10101_v44  ;;  %v7534_v48 = vpop.f32.mrb[39].mxu0 }
 0x9ea   : > { %v10105_v41 = vadd.f32 %v3543_v14, %v9944_v45 }
 0x9ec   : > { %v3840_v63 = vsel %vm2791_vm4, %v10105_v41, 0.0 }
 0x9ed   : > { %3841 = vadd.xlane.f32.xlu0 %v3840_v63 }
 0x9ef   : > { %v3747_v4 = vpop.f32.mrb[40].mxu0 }
 0x9f0   : > { %v3748_v6 = vadd.f32 %v3747_v4, %v10111_v39  ;;  %v7556_v8 = vpop.f32.mrb[41].mxu0 }
 0x9f2   : > { %v10115_v36 = vadd.f32 %v3748_v6, %v9951_v54 }
 0x9f4   : > { %v3752_v31 = vsel %vm2694_vm3, %v10115_v36, 0.0 }
 0x9f5   : > { %3753 = vadd.xlane.f32.xlu1 %v3752_v31  ;;  %v3222_v31 = vmul.f32 0.5, %v9935_v43  ;;  %v11428_v43 = vld [vmem:[#allocation29_spill] sm:$0xff] }
 0xa7a   : > { %v3842_v45 = vpop.xlane.xlu0 %3841 }
 0xa7b   : > { %v3843_v29 = vmul.f32 0.03125, %v3842_v45  ;;  %v3223_v45 = vmul.f32 0.5, %v9818_v60  ;;  %v11427_v60 = vld [vmem:[#allocation34_spill] sm:$0xff] }
 0xa7d   : > { %v3844_v35 = vsub.f32 %v10105_v41, %v3843_v29 }
 0xa7f   : > { %v3845_v9 = vmul.f32 %v3844_v35, %v3844_v35 }
 0xa81   : > { %v3846_v40 = vsel %vm2791_vm4, %v3845_v9, 0.0  ;;  %v11429_v9 = vld [vmem:[#allocation35_spill] sm:$0xff] }
 0xa82   : > { %v3754_v42 = vpop.xlane.xlu1 %3753  ;;  %3847 = vadd.xlane.f32.xlu0 %v3846_v40  ;;  %v11430_v40 = vld [vmem:[#allocation30_spill] sm:$0xff] }
 0xa83   : > { %v3755_v34 = vmul.f32 0.03125, %v3754_v42  ;;  %v11431_v42 = vld [vmem:[#allocation36_spill] sm:$0xff] }
 0xa85   : > { %v3756_v38 = vsub.f32 %v10115_v36, %v3755_v34  ;;  %v11432_v34 = vld [vmem:[#allocation31_spill] sm:$0xff] }
 0xa87   : > { %v3757_v49 = vmul.f32 %v3756_v38, %v3756_v38 }
 0xa89   : > { %v3758_v54 = vsel %vm2694_vm3, %v3757_v49, 0.0  ;;  %v11434_v49 = vld [vmem:[#allocation32_spill] sm:$0xff] }
 0xa8a   : > { %3759 = vadd.xlane.f32.xlu1 %v3758_v54  ;;  %v11435_v54 = vld [vmem:[#allocation38_spill] sm:$0xff] }
 0xb0f   : > { %v3848_v61 = vpop.xlane.xlu0 %3847 }
 0xb10   : > { %v3849_v15 = vmul.f32 0.03125, %v3848_v61  ;;  %v11436_v61 = vld [vmem:[#allocation33_spill] sm:$0xff] }
 0xb12   : > { %v3850_v1 = vadd.f32 1e-05, %v3849_v15 }
 0xb14   : > { %8514 = vrsqrt.f32 %v3850_v1 }
 0xb17   : > { %v3760_v51 = vpop.xlane.xlu1 %3759 }
 0xb18   : > { %v3761_v27 = vmul.f32 0.03125, %v3760_v51 }
 0xb1a   : > { %v3762_v56 = vadd.f32 1e-05, %v3761_v27 }
 0xb1c   : > { %8516 = vrsqrt.f32 %v3762_v56 }
 0xb1e   : > { %v8515_v32 = vpop.eup %8514 }
 0xb1f   : > { %v3852_v14 = vmul.f32 %v8515_v32, %v3844_v35  ;;  %v10138_v35 = vadd.f32 %v3223_v45, %v3222_v31 }
 0xb21   : > { %v3853_v48 = vmul.f32 %v3852_v14, %v9789_v47 }
 0xb23   : > { %v3854_v63 = vadd.f32 %v3853_v48, %v9800_v0 }
 0xb25   : > { %7577 = vmatmul.mubr.msk.f32.vlgmr.msra.gmra.mrb[42].mxu0 %vm719_vm0, %v3854_v63 }
 0xb26   : > { %v8517_v4 = vpop.eup %8516  ;;  %7945 = vmatpush3.bf16.msra.mxu0 %v9103_v7 }
 0xb27   : > { %v3764_v6 = vmul.f32 %v8517_v4, %v3756_v38  ;;  %7947 = vmatprep.subr.bf16.mxu0 %v9192_v11  ;;  %v11433_v38 = vld [vmem:[#allocation37_spill] sm:$0xff] }
 0xb29   : > { %v3765_v8 = vmul.f32 %v3764_v6, %v9759_v53 }
 0xb2a   : > { %7949 = vmatpush3.bf16.msra.mxu0 %v9125_v23 }
 0xb2b   : > { %v3766_v29 = vadd.f32 %v3765_v8, %v9766_v21  ;;  %7951 = vmatprep.subr.bf16.mxu0 %v9298_v55 }
 0xb2d   : > { %7566 = vmatmul.mubr.msk.f32.vlgmr.msra.gmra.mrb[42].mxu1 %vm719_vm0, %v3766_v29 }
 0xb2e   : > { %7580 = vmatpush3.msk.msra.mxu1 %vm1350_vm1, %v9808_v50  ;;  %7953 = vmatpush3.bf16.msra.mxu0 %v9127_v26  ;;  %v11426_v50 = vld [vmem:[#allocation28_spill] sm:$0xff] }
 0xb2f   : > { %7911 = vmatprep.subr.bf16.mxu1 %v9855_v52  ;;  %7581 = vmatprep.mubr.msk.f32.mxu1 %vm8753_vm5, %v11412_v25 }
 0xb30   : > { %7955 = vmatprep.subr.bf16.mxu0 %v9397_v28 }
 0xb31   : > { %7582 = vmatmul.mubr.msk.f32.vlgmr.msra.gmra.mrb[44].mxu1 %vm1253_vm2, %v10138_v35 }
 0xb32   : > { %7957 = vmatpush3.bf16.msra.mxu0 %v11391_v37 }
 0xb33   : > { %7959 = vmatprep.subr.bf16.mxu0 %v11392_v59 }
 0xb35   : > { %7913 = vmatpush3.bf16.xpose.msra.mxu1 %v9839_v30 }
 0xb36   : > { %7915 = vmatprep.subr.bf16.mxu1 %v9859_v24  ;;  %7961 = vmatpush3.bf16.msra.mxu0 %v11393_v46 }
 0xb37   : > { %7963 = vmatprep.subr.bf16.mxu0 %v11394_v3 }
 0xb3a   : > { %7965 = vmatpush3.bf16.msra.mxu0 %v11395_v10 }
 0xb3b   : > { %7967 = vmatprep.subr.bf16.mxu0 %v11396_v19 }
 0xb3d   : > { %7917 = vmatpush3.bf16.xpose.msra.mxu1 %v9841_v22 }
 0xb3e   : > { %7919 = vmatprep.subr.bf16.mxu1 %v9862_v13  ;;  %7969 = vmatpush3.bf16.msra.mxu0 %v11397_v17 }
 0xb3f   : > { %7971 = vmatprep.subr.bf16.mxu0 %v11398_v33 }
 0xb42   : > { %7973 = vmatpush3.bf16.msra.mxu0 %v11399_v5 }
 0xb43   : > { %7975 = vmatprep.subr.bf16.mxu0 %v9855_v52 }
 0xb45   : > { %7921 = vmatpush3.bf16.xpose.msra.mxu1 %v11426_v50 }
 0xb46   : > { %7923 = vmatprep.subr.bf16.mxu1 %v11427_v60 }
 0xb4d   : > { %7925 = vmatpush3.bf16.xpose.msra.mxu1 %v11428_v43 }
 0xb4e   : > { %7927 = vmatprep.subr.bf16.mxu1 %v11429_v9 }
 0xb55   : > { %7929 = vmatpush3.bf16.xpose.msra.mxu1 %v11430_v40 }
 0xb56   : > { %7931 = vmatprep.subr.bf16.mxu1 %v11431_v42 }
 0xb5d   : > { %7933 = vmatpush3.bf16.xpose.msra.mxu1 %v11432_v34 }
 0xb5e   : > { %7935 = vmatprep.subr.bf16.mxu1 %v11433_v38 }
 0xb65   : > { %7937 = vmatpush3.bf16.xpose.msra.mxu1 %v11434_v49 }
 0xb66   : > { %7939 = vmatprep.subr.bf16.mxu1 %v11435_v54 }
 0xb6d   : > { %7941 = vmatpush3.bf16.xpose.msra.mxu1 %v11436_v61 }
 0xb6e   : > { %8006 = vmatprep.subr.bf16.mxu1 %v11414_v58 }
 0xbf8   : > { %v3924_v15 = vpop.f32.mrb[42].mxu0 }
 0xbf9   : > { %4003 = vrot.lane.b32.xlu0 %v3924_v15, %s8755_s22  ;;  %v7578_v1 = vpop.f32.mrb[43].mxu0 }
 0xc00   : > { %v3836_v51 = vpop.f32.mrb[42].mxu1 }
 0xc01   : > { %v7567_v27 = vpop.f32.mrb[43].mxu1  ;;  %v4008_v4 = vsel %vm719_vm0, %v3836_v51, 0.0 }
 0xc02   : > { %v4009_v6 = vsel %vm2988_vm6, %v4008_v4, 0.0  ;;  %v11437_v27 = vld [vmem:[#allocation39_spill] sm:$0xff] }
 0xc03   : > { %v4010_v8 = vsel %vm2990_vm7, %v4009_v6, 0.0 }
 0xc04   : > { %v10173_v56 = vpop.f32.mrb[44].mxu1  ;;  %v4012_v45 = vrot.slane %v4010_v8, 7 }
 0xc05   : > { %v11332_v32 = vsub.f32 0.0, %v10173_v56  ;;  %v7583_v14 = vpop.f32.mrb[45].mxu1 }
 0xc07   : > { %v4015_v48 = vmul.f32 %v11332_v32, %v3836_v51  ;;  %v11438_v51 = vld [vmem:[#allocation40_spill] sm:$0xff] }
 0xc09   : > { %v4016_v63 = vsel %vm2694_vm3, %v4015_v48, 0.0 }
 0xc0a   : > { %4017 = vadd.xlane.f32.xlu1 %v4016_v63 }
 0xc6b   : > { %v4004_v31 = vpop.permute.xlu0 %4003 }
 0xc6c   : > { %v4006_v29 = vsel %vm2988_vm6, 0.0, %v4004_v31 }
 0xc6d   : > { %v4007_v15 = vsel %vm2990_vm7, %v4006_v29, 0.0 }
 0xc6e   : > { %v4014_v1 = vsel %vm2998_vm8, %v4007_v15, %v4012_v45 }
 0xc6f   : > { %6921 = vmatprep.mubr.f32.mxu1 %v4014_v1 }
 0xc70   : > { %6922 = vmatmul.mubr.f32.vlgmr.msra.gmra.mrb[46].mxu1 %v4014_v1 }
 0xc71   : > { %8008 = vmatpush3.bf16.msra.mxu1 %v11437_v27  ;;  %7592 = vmatprep.mubr.msk.f32.mxu1 %vm8753_vm5, %v11412_v25 }
 0xc72   : > { %8009 = vmatprep.subr.bf16.mxu1 %v11414_v58 }
 0xc75   : > { %8011 = vmatpush3.bf16.msra.mxu1 %v11438_v51 }
 0xc76   : > { %8018 = vmatprep.subr.bf16.mxu1 %v11414_v58 }
 0xc97   : > { %v4018_v14 = vpop.xlane.xlu1 %4017 }
 0xc98   : > { %v4020_v48 = vrot.slane %v4018_v14, 7 }
 0xc9a   : > { %v4022_v63 = vsel %vm2998_vm8, 0.0, %v4020_v48 }
 0xc9b   : > { %4025 = vperm.xlu1 %8419, %v4022_v63  }
 0xd1a   : > { %v4026_v4 = vpop.permute.xlu1 %4025 }
 0xd43   : > { %v4094_v6 = vpop.f32.mrb[46].mxu1 }
 0xd44   : > { %v4095_v8 = vadd.f32 %v4094_v6, %v4026_v4  ;;  %v4096_v31 = vpop.f32.mrb[47].mxu1 }
 0xd45   : > { %v4097_v45 = vadd.f32 %v4096_v31, %v4026_v4 }
 0xd46   : > { %v4099_v29 = vmul.f32 0.17677669, %v4095_v8 }
 0xd47   : > { %v4100_v15 = vmul.f32 0.17677669, %v4097_v45 }
 0xd48   : > { %v4101_v1 = vsel %vm3086_vm9, %v4099_v29, -inf }
 0xd49   : > { %v4102_v12 = vrot.slane %v4101_v1, 4  ;;  %v4108_v32 = vsel %vm3086_vm9, %v4100_v15, -inf }
 0xd4a   : > { %v4109_v16 = vrot.slane %v4108_v32, 4 }
 0xd4b   : > { %v4103_v51 = vmax.f32 %v4101_v1, %v4102_v12 }
 0xd4c   : > { %v4110_v27 = vmax.f32 %v4108_v32, %v4109_v16 }
 0xd4d   : > { %v4104_v5 = vrot.slane %v4103_v51, 2 }
 0xd4e   : > { %v4111_v14 = vrot.slane %v4110_v27, 2 }
 0xd4f   : > { %v4105_v33 = vmax.f32 %v4103_v51, %v4104_v5 }
 0xd50   : > { %v4112_v48 = vmax.f32 %v4110_v27, %v4111_v14 }
 0xd51   : > { %v4106_v63 = vrot.slane %v4105_v33, 1 }
 0xd52   : > { %v4113_v17 = vrot.slane %v4112_v48, 1 }
 0xd53   : > { %v4107_v19 = vmax.f32 %v4105_v33, %v4106_v63 }
 0xd54   : > { %v4114_v6 = vmax.f32 %v4112_v48, %v4113_v17 }
 0xd55   : > { %v4115_v10 = vsub.f32 %v4099_v29, %v4107_v19 }
 0xd56   : > { %v4116_v4 = vsub.f32 %v4100_v15, %v4114_v6 }
 0xd57   : > { %v4117_v8 = vmul.f32 1.442695, %v4115_v10 }
 0xd58   : > { %v4119_v31 = vmul.f32 1.442695, %v4116_v4 }
 0xd59   : > { %8518 = vpow2.f32 %v4117_v8 }
 0xd5a   : > { %8520 = vpow2.f32 %v4119_v31 }
 0xd63   : > { %v8519_v45 = vpop.eup %8518 }
 0xd64   : > { %v8521_v3 = vpop.eup %8520  ;;  %v4121_v46 = vsel %vm3086_vm9, %v8519_v45, 0.0 }
 0xd65   : > { %v4122_v12 = vrot.slane %v4121_v46, 4  ;;  %v4128_v16 = vsel %vm3086_vm9, %v8521_v3, 0.0 }
 0xd66   : > { %v4129_v32 = vrot.slane %v4128_v16, 4 }
 0xd67   : > { %v4123_v5 = vadd.f32 %v4122_v12, %v4121_v46 }
 0xd68   : > { %v4130_v27 = vadd.f32 %v4129_v32, %v4128_v16 }
 0xd69   : > { %v4124_v51 = vrot.slane %v4123_v5, 2 }
 0xd6a   : > { %v4131_v1 = vrot.slane %v4130_v27, 2 }
 0xd6b   : > { %v4125_v33 = vadd.f32 %v4124_v51, %v4123_v5 }
 0xd6c   : > { %v4132_v17 = vadd.f32 %v4131_v1, %v4130_v27  ;;  %v11439_v27 = vsub.f32 0.0, %v10173_v56 }
 0xd6d   : > { %v4126_v19 = vrot.slane %v4125_v33, 1 }
 0xd6e   : > { %v4133_v29 = vrot.slane %v4132_v17, 1  ;;  %v4309_v51 = vrot.slane %v11439_v27, 7 }
 0xd6f   : > { %v4127_v10 = vadd.f32 %v4126_v19, %v4125_v33 }
 0xd70   : > { %v4134_v15 = vadd.f32 %v4133_v29, %v4132_v17 }
 0xd71   : > { %8522 = vrcp.f32 %v4127_v10 }
 0xd72   : > { %8524 = vrcp.f32 %v4134_v15 }
 0xd7b   : > { %v8523_v14 = vpop.eup %8522 }
 0xd7c   : > { %v8525_v48 = vpop.eup %8524  ;;  %v4136_v63 = vmul.f32 %v8523_v14, %v8519_v45 }
 0xd7d   : > { %v4138_v6 = vmul.f32 %v8525_v48, %v8521_v3 }
 0xd7e   : > { %v4139_v4 = vadd.f32 1e-08, %v4136_v63  ;;  %v11440_v63 = vld [vmem:[#allocation47_spill] sm:$0xff] }
 0xd7f   : > { %v4140_v8 = vadd.f32 1e-08, %v4138_v6  ;;  %v11441_v6 = vld [vmem:[#allocation48_spill] sm:$0xff] }
 0xd80   : > { %v4149_v31 = vsel %vm2998_vm8, %v4139_v4, 0.0  ;;  %v4141_v46 = vsel %vm3127_vm10, %v4139_v4, 0.0 }
 0xd81   : > { %v4150_v12 = vsel %vm2998_vm8, %v4140_v8, 0.0  ;;  %v4142_v16 = vsel %vm3127_vm10, %v4140_v8, 0.0 }
 0xd82   : > { %v4151_v32 = vadd.f32 %v4150_v12, %v4149_v31  ;;  %v4143_v5 = vadd.f32 %v4142_v16, %v4141_v46 }
 0xd84   : > { %4152 = vadd.xlane.f32.xlu0 %v4151_v32  ;;  %4144 = vadd.xlane.f32.xlu1 %v4143_v5  ;;  %v11442_v32 = vld [vmem:[#allocation27_spill] sm:$0xff] }
 0xd9a   : > { %4310 = vrot.lane.b32.xlu0 %v4309_v51, %s11353_s28 }
 0xe11   : > { %v4153_v3 = vpop.xlane.xlu0 %4152  ;;  %v4145_v45 = vpop.xlane.xlu1 %4144 }
 0xe12   : > { %8526 = vrcp.f32 %v4153_v3 }
 0xe13   : > { %8528 = vrcp.f32 %v4145_v45 }
 0xe15   : > { %v4311_v27 = vpop.permute.xlu0 %4310 }
 0xe1c   : > { %v8527_v1 = vpop.eup %8526 }
 0xe1d   : > { %v8529_v33 = vpop.eup %8528  ;;  %v4156_v29 = vmul.f32 %v8527_v1, %v4140_v8  ;;  %v4155_v56 = vmul.f32 %v8527_v1, %v4139_v4 }
 0xe1e   : > { %v4148_v17 = vmul.f32 %v8529_v33, %v4140_v8  ;;  %v4147_v19 = vmul.f32 %v8529_v33, %v4139_v4 }
 0xe20   : > { %v4162_v10 = vrot.slane %v4148_v17, 1  ;;  %v4161_v15 = vrot.slane %v4147_v19, 1  ;;  %v4158_v14 = vsel %vm2998_vm8, %v4156_v29, %v4148_v17  ;;  %v4157_v48 = vsel %vm2998_vm8, %v4155_v56, %v4147_v19 }
 0xe22   : > { %4229 = vmatprep.mubr.f32.mxu0 %v4162_v10 }
 0xe23   : > { %4230 = vmatmul.mubr.f32.vlgmr.msra.gmra.mrb[44].mxu0 %v4161_v15 }
 0xe24   : > { %7977 = vmatpush3.bf16.msra.mxu0 %v9839_v30  ;;  %4302 = vmatprep.mubr.f32.mxu0 %v4158_v14 }
 0xe25   : > { %7979 = vmatprep.subr.bf16.mxu0 %v9859_v24 }
 0xe28   : > { %7981 = vmatpush3.bf16.msra.mxu0 %v9841_v22 }
 0xe29   : > { %7983 = vmatprep.subr.bf16.mxu0 %v9862_v13 }
 0xe2c   : > { %7985 = vmatpush3.bf16.msra.mxu0 %v11426_v50 }
 0xe2d   : > { %7987 = vmatprep.subr.bf16.mxu0 %v11427_v60 }
 0xe30   : > { %7989 = vmatpush3.bf16.msra.mxu0 %v11428_v43 }
 0xe31   : > { %7991 = vmatprep.subr.bf16.mxu0 %v11429_v9 }
 0xe34   : > { %7993 = vmatpush3.bf16.msra.mxu0 %v11430_v40 }
 0xe35   : > { %7995 = vmatprep.subr.bf16.mxu0 %v11431_v42 }
 0xe38   : > { %7997 = vmatpush3.bf16.msra.mxu0 %v11432_v34 }
 0xe39   : > { %7999 = vmatprep.subr.bf16.mxu0 %v11433_v38 }
 0xe3c   : > { %8001 = vmatpush3.bf16.msra.mxu0 %v11434_v49 }
 0xe3d   : > { %8003 = vmatprep.subr.bf16.mxu0 %v11435_v54 }
 0xe40   : > { %8005 = vmatpush3.bf16.msra.mxu0 %v11436_v61 }
 0xe41   : > { %8012 = vmatprep.subr.bf16.mxu0 %v11414_v58 }
 0xe43   : > { %4303 = vmatmul.mubr.f32.vlgmr.msra.gmra.mrb[46].mxu0 %v4157_v48 }
 0xe44   : > { %8014 = vmatpush3.bf16.msra.mxu0 %v11440_v63  ;;  %7603 = vmatprep.mubr.msk.f32.mxu0 %vm8753_vm5, %v11412_v25 }
 0xe45   : > { %8015 = vmatprep.subr.bf16.mxu0 %v11414_v58 }
 0xe48   : > { %8017 = vmatpush3.bf16.msra.mxu0 %v11441_v6 }
 0xe49   : > { %8024 = vmatprep.subr.bf16.mxu0 %v11414_v58 }
 0xef6   : > { %v6955_v8 = vpop.f32.mrb[44].mxu0 }
 0xef7   : > { %v6956_v4 = vpop.f32.mrb[45].mxu0 }
 0xef8   : > { %v10227_v31 = vadd.f32 %v6956_v4, %v6955_v8 }
 0xf16   : > { %v6990_v46 = vpop.f32.mrb[46].mxu0 }
 0xf17   : > { %v6991_v12 = vpop.f32.mrb[47].mxu0 }
 0xf18   : > { %v6992_v16 = vadd.f32 %v6991_v12, %v6990_v46 }
 0xf1a   : > { %v4327_v5 = vrot.slane %v6992_v16, %v11442_v32  ;;  %v4313_v51 = vadd.f32 %v6992_v16, %v4311_v27 }
 0xf1c   : > { %v4334_v3 = vrot.slane %v4327_v5, %v11442_v32  ;;  %v4315_v45 = vrot.slane %v4313_v51, 1 }
 0xf1e   : > { %4335 = vrot.lane.b32.xlu1 %v4334_v3, %s11353_s28 }
 0xf22   : > { %4316 = vrot.lane.b32.xlu1 %v4315_v45, %s11443_s29 }
 0xf90   : > { %v4336_v1 = vpop.permute.xlu1 %4335 }
 0xf91   : > { %v10234_v33 = vadd.f32 %v4336_v1, %v10105_v41 }
 0xf93   : > { %v4339_v17 = vsel %vm2791_vm4, %v10234_v33, 0.0 }
 0xf94   : > { %4340 = vadd.xlane.f32.xlu0 %v4339_v17  ;;  %v4317_v19 = vpop.permute.xlu1 %4316 }
 0xf95   : > { %v10239_v29 = vadd.f32 %v4317_v19, %v10115_v36  ;;  %v11444_v19 = vld [vmem:[#allocation43_spill] sm:$0xff] }
 0xf97   : > { %v4528_v10 = vsel %vm2694_vm3, %v10239_v29, 0.0 }
 0xf98   : > { %4529 = vadd.xlane.f32.xlu1 %v4528_v10 }
0x1021   : > { %v4341_v15 = vpop.xlane.xlu0 %4340 }
0x1022   : > { %v4342_v14 = vmul.f32 0.03125, %v4341_v15 }
0x1024   : > { %v4343_v56 = vsub.f32 %v10234_v33, %v4342_v14 }
0x1025   : > { %v4530_v48 = vpop.xlane.xlu1 %4529 }
0x1026   : > { %v4531_v8 = vmul.f32 0.03125, %v4530_v48  ;;  %v4344_v41 = vmul.f32 %v4343_v56, %v4343_v56  ;;  %v11445_v48 = vld [vmem:[#allocation44_spill] sm:$0xff] }
0x1028   : > { %v4532_v4 = vsub.f32 %v10239_v29, %v4531_v8  ;;  %v4345_v46 = vsel %vm2791_vm4, %v4344_v41, 0.0  ;;  %v11446_v41 = vld [vmem:[#allocation41_spill] sm:$0xff] }
0x1029   : > { %4346 = vadd.xlane.f32.xlu0 %v4345_v46  ;;  %v11447_v46 = vld [vmem:[#allocation45_spill] sm:$0xff] }
0x102a   : > { %v4533_v12 = vmul.f32 %v4532_v4, %v4532_v4 }
0x102c   : > { %v4534_v36 = vsel %vm2694_vm3, %v4533_v12, 0.0 }
0x102d   : > { %4535 = vadd.xlane.f32.xlu0 %v4534_v36  ;;  %v11448_v36 = vld [vmem:[#allocation42_spill] sm:$0xff] }
0x10b6   : > { %v4347_v16 = vpop.xlane.xlu0 %4346 }
0x10b7   : > { %v4348_v5 = vmul.f32 0.03125, %v4347_v16 }
0x10b9   : > { %v4349_v27 = vadd.f32 1e-05, %v4348_v5  ;;  %v11451_v5 = vld [vmem:[#allocation26_spill] sm:$0xff] }
0x10ba   : > { %v4536_v51 = vpop.xlane.xlu0 %4535 }
0x10bb   : > { %8530 = vrsqrt.f32 %v4349_v27  ;;  %v4537_v3 = vmul.f32 0.03125, %v4536_v51  ;;  %v11452_v51 = vld [vmem:[#allocation49_spill] sm:$0xff] }
0x10bd   : > { %v4538_v45 = vadd.f32 1e-05, %v4537_v3 }
0x10bf   : > { %8532 = vrsqrt.f32 %v4538_v45 }
0x10c5   : > { %v8531_v1 = vpop.eup %8530 }
0x10c6   : > { %v4351_v17 = vmul.f32 %v8531_v1, %v4343_v56  ;;  %v11449_v56 = vld [vmem:[#allocation46_spill] sm:$0xff] }
0x10c8   : > { %v4352_v10 = vmul.f32 %v4351_v17, %v11444_v19 }
0x10c9   : > { %v8533_v15 = vpop.eup %8532 }
0x10ca   : > { %v4540_v14 = vmul.f32 %v8533_v15, %v4532_v4  ;;  %v4353_v8 = vadd.f32 %v4352_v10, %v11445_v48  ;;  %v11450_v4 = vld [vmem:[#allocation25_spill] sm:$0xff] }
0x10cc   : > { %7593 = vmatmul.mubr.msk.f32.vlgmr.msra.gmra.mrb[48].mxu1 %vm719_vm0, %v4353_v8  ;;  %v4541_v12 = vmul.f32 %v4540_v14, %v11447_v46  ;;  %v11453_v8 = vld [vmem:[#allocation50_spill] sm:$0xff] }
0x10cd   : > { %8020 = vmatpush3.bf16.msra.mxu1 %v11446_v41  ;;  %7614 = vmatprep.mubr.msk.f32.mxu1 %vm8753_vm5, %v11412_v25 }
0x10ce   : > { %8021 = vmatprep.subr.bf16.mxu1 %v11414_v58  ;;  %v4542_v16 = vadd.f32 %v4541_v12, %v11449_v56 }
0x10d1   : > { %8023 = vmatpush3.bf16.msra.mxu1 %v11448_v36 }
0x10d2   : > { %8030 = vmatprep.subr.bf16.mxu1 %v11414_v58 }
0x10d4   : > { %7615 = vmatmul.mubr.msk.f32.vlgmr.msra.gmra.mrb[50].mxu1 %vm719_vm0, %v4542_v16 }
0x10d5   : > { %8032 = vmatpush3.bf16.msra.mxu1 %v11450_v4  ;;  %7636 = vmatprep.mubr.msk.f32.mxu1 %vm8753_vm5, %v11412_v25 }
0x10d6   : > { %8033 = vmatprep.subr.bf16.mxu1 %v11414_v58 }
0x10d9   : > { %8035 = vmatpush3.bf16.msra.mxu1 %v11451_v5 }
0x10da   : > { %7650 = vmatprep.subr.mxu1 %v11412_v25 }
0x119f   : > { %v4423_v27 = vpop.f32.mrb[48].mxu1 }
0x11a0   : > { %v4424_v3 = vadd.f32 %v4423_v27, %v11452_v51  ;;  %v7594_v45 = vpop.f32.mrb[49].mxu1 }
0x11a2   : > { %v4428_v1 = vmul.f32 0.70710677, %v4424_v3 }
0x11a4   : > { %v4431_v17 = vand.u32 2147483647, %v4428_v1  ;;  %vm4429_vm13 = vcmp.ge.f32.partialorder %v4428_v1, 0.0 }
0x11a6   : > { %v4432_v10 = vmul.f32 0.3275911, %v4431_v17  ;;  %v4445_v46 = vsub.f32 0.0, %v4431_v17 }
0x11a7   : > { %v4612_v15 = vpop.f32.mrb[50].mxu1 }
0x11a8   : > { %v4433_v14 = vadd.f32 1.0, %v4432_v10  ;;  %v4613_v12 = vadd.f32 %v4612_v15, %v11453_v8  ;;  %v7616_v16 = vpop.f32.mrb[51].mxu1  ;;  %v4446_v48 = vmul.f32 %v4445_v46, %v4431_v17 }
0x11aa   : > { %8534 = vrcp.f32 %v4433_v14  ;;  %v4617_v4 = vmul.f32 0.70710677, %v4613_v12  ;;  %v4447_v45 = vmul.f32 1.442695, %v4446_v48 }
0x11ac   : > { %v4620_v56 = vand.u32 2147483647, %v4617_v4  ;;  %vm4618_vm14 = vcmp.ge.f32.partialorder %v4617_v4, 0.0 }
0x11ae   : > { %v4621_v36 = vmul.f32 0.3275911, %v4620_v56  ;;  %v4634_v51 = vsub.f32 0.0, %v4620_v56 }
0x11b0   : > { %v4622_v5 = vadd.f32 1.0, %v4621_v36  ;;  %v4635_v10 = vmul.f32 %v4634_v51, %v4620_v56 }
0x11b2   : > { %8536 = vrcp.f32 %v4622_v5  ;;  %v4636_v61 = vmul.f32 1.442695, %v4635_v10 }
0x11b3   : > { %8538 = vpow2.f32 %v4447_v45  ;;  %v11454_v45 = vmov -1.0  }
0x11b4   : > { %v8535_v41 = vpop.eup %8534  ;;  %8540 = vpow2.f32 %v4636_v61  ;;  %v4430_v56 = vsel %vm4429_vm13, 1.0, %v11454_v45  ;;  %v4619_v61 = vsel %vm4618_vm14, 1.0, %v11454_v45 }
0x11b5   : > { %v4436_v19 = vmul.f32 1.0614054, %v8535_v41 }
0x11b7   : > { %v4437_v27 = vadd.f32 -1.4531521, %v4436_v19 }
0x11b9   : > { %v4438_v32 = vmul.f32 %v8535_v41, %v4437_v27 }
0x11bb   : > { %v4439_v6 = vadd.f32 1.4214138, %v4438_v32 }
0x11bc   : > { %v8537_v63 = vpop.eup %8536 }
0x11bd   : > { %v4440_v15 = vmul.f32 %v8535_v41, %v4439_v6  ;;  %v4625_v16 = vmul.f32 1.0614054, %v8537_v63  ;;  %v8539_v19 = vpop.eup %8538 }
0x11bf   : > { %v4441_v14 = vadd.f32 -0.28449672, %v4440_v15  ;;  %v4626_v8 = vadd.f32 -1.4531521, %v4625_v16  ;;  %v4427_v15 = vmul.f32 0.5, %v4424_v3 }
0x11c1   : > { %v4442_v54 = vmul.f32 %v8535_v41, %v4441_v14  ;;  %v4627_v49 = vmul.f32 %v8537_v63, %v4626_v8  ;;  %v8541_v14 = vpop.eup %8540 }
0x11c3   : > { %v4443_v36 = vadd.f32 0.2548296, %v4442_v54  ;;  %v4628_v5 = vadd.f32 1.4214138, %v4627_v49 }
0x11c5   : > { %v4444_v46 = vmul.f32 %v8535_v41, %v4443_v36  ;;  %v4629_v17 = vmul.f32 %v8537_v63, %v4628_v5 }
0x11c7   : > { %v4449_v48 = vmul.f32 %v8539_v19, %v4444_v46  ;;  %v4630_v27 = vadd.f32 -0.28449672, %v4629_v17 }
0x11c9   : > { %v4450_v32 = vsub.f32 1.0, %v4449_v48  ;;  %v4631_v38 = vmul.f32 %v8537_v63, %v4630_v27 }
0x11cb   : > { %v4451_v6 = vmul.f32 %v4450_v32, %v4430_v56  ;;  %v4632_v51 = vadd.f32 0.2548296, %v4631_v38  ;;  %v4616_v38 = vmul.f32 0.5, %v4613_v12 }
0x11cd   : > { %v4452_v16 = vadd.f32 1.0, %v4451_v6  ;;  %v4633_v10 = vmul.f32 %v8537_v63, %v4632_v51 }
0x11cf   : > { %v4453_v8 = vmul.f32 %v4452_v16, %v4427_v15  ;;  %v4638_v49 = vmul.f32 %v8541_v14, %v4633_v10 }
0x11d1   : > { %v4639_v54 = vsub.f32 1.0, %v4638_v49  ;;  %7604 = vmatmul.mubr.msk.f32.vlgmr.msra.gmra.mrb[48].mxu0 %vm719_vm0, %v4453_v8 }
0x11d2   : > { %8026 = vmatpush3.bf16.msra.mxu0 %v10075_v20  ;;  %7625 = vmatprep.mubr.msk.f32.mxu0 %vm8753_vm5, %v11412_v25 }
0x11d3   : > { %v4640_v41 = vmul.f32 %v4639_v54, %v4619_v61  ;;  %8027 = vmatprep.subr.bf16.mxu0 %v11414_v58 }
0x11d5   : > { %v4641_v3 = vadd.f32 1.0, %v4640_v41 }
0x11d6   : > { %8029 = vmatpush3.bf16.msra.mxu0 %v10085_v57 }
0x11d7   : > { %v4642_v63 = vmul.f32 %v4641_v3, %v4616_v38  ;;  %8036 = vmatprep.subr.bf16.mxu0 %v11414_v58 }
0x11d9   : > { %7626 = vmatmul.mubr.msk.f32.vlgmr.msra.gmra.mrb[50].mxu0 %vm719_vm0, %v4642_v63 }
0x11da   : > { %8038 = vmatpush3.bf16.msra.mxu0 %v9779_v18  ;;  %7647 = vmatprep.mubr.msk.f32.mxu0 %vm8753_vm5, %v11412_v25 }
0x11db   : > { %8039 = vmatprep.subr.bf16.mxu0 %v11414_v58 }
0x11de   : > { %8041 = vmatpush3.bf16.msra.mxu0 %v9794_v2 }
0x11df   : > { %8043 = vmatprep.subr.bf16.mxu0 %v9855_v52 }
0x12a4   : > { %v4523_v4 = vpop.f32.mrb[48].mxu0 }
0x12a5   : > { %v4524_v1 = vadd.f32 %v4523_v4, %v10101_v44  ;;  %v7605_v12 = vpop.f32.mrb[49].mxu0 }
0x12a7   : > { %v10285_v36 = vadd.f32 %v4524_v1, %v10234_v33 }
0x12a9   : > { %v4805_v5 = vsel %vm2791_vm4, %v10285_v36, 0.0 }
0x12aa   : > { %4806 = vadd.xlane.f32.xlu0 %v4805_v5 }
0x12ac   : > { %v4712_v46 = vpop.f32.mrb[50].mxu0 }
0x12ad   : > { %v4713_v17 = vadd.f32 %v4712_v46, %v10111_v39  ;;  %v7627_v19 = vpop.f32.mrb[51].mxu0 }
0x12af   : > { %v10291_v48 = vadd.f32 %v4713_v17, %v10239_v29  ;;  %v4235_v17 = vmul.f32 0.5, %v10227_v31  ;;  %v11456_v31 = vld [vmem:[#allocation20_spill] sm:$0xff] }
0x12b1   : > { %v4717_v27 = vsel %vm2694_vm3, %v10291_v48, 0.0 }
0x12b2   : > { %4718 = vadd.xlane.f32.xlu1 %v4717_v27  ;;  %v4236_v27 = vmul.f32 0.5, %v10138_v35  ;;  %v11455_v35 = vld [vmem:[#allocation15_spill] sm:$0xff] }
0x1337   : > { %v4807_v32 = vpop.xlane.xlu0 %4806 }
0x1338   : > { %v4808_v56 = vmul.f32 0.03125, %v4807_v32  ;;  %v10313_v32 = vld [vmem:[%s11239_s8] sm:$0x3] }
0x133a   : > { %v4809_v33 = vsub.f32 %v10285_v36, %v4808_v56  ;;  %v10317_v56 = vadd.f32 %v4236_v27, %v4235_v17 }
0x133c   : > { %v4810_v6 = vmul.f32 %v4809_v33, %v4809_v33 }
0x133e   : > { %v4811_v51 = vsel %vm2791_vm4, %v4810_v6, 0.0  ;;  %v11458_v6 = vld [vmem:[#allocation21_spill] sm:$0xff] }
0x133f   : > { %v4719_v15 = vpop.xlane.xlu1 %4718  ;;  %4812 = vadd.xlane.f32.xlu0 %v4811_v51  ;;  %v11459_v51 = vld [vmem:[#allocation17_spill] sm:$0xff] }
0x1340   : > { %v4720_v16 = vmul.f32 0.03125, %v4719_v15  ;;  %v11460_v15 = vld [vmem:[#allocation22_spill] sm:$0xff] }
0x1342   : > { %v4721_v10 = vsub.f32 %v10291_v48, %v4720_v16  ;;  %v11461_v16 = vld [vmem:[#allocation18_spill] sm:$0xff] }
0x1344   : > { %v4722_v14 = vmul.f32 %v4721_v10, %v4721_v10 }
0x1346   : > { %v4723_v29 = vsel %vm2694_vm3, %v4722_v14, 0.0  ;;  %v11463_v14 = vld [vmem:[#allocation32_spill] sm:$0xff] }
0x1347   : > { %4724 = vadd.xlane.f32.xlu1 %v4723_v29  ;;  %v11464_v29 = vld [vmem:[#allocation38_spill] sm:$0xff] }
0x13cc   : > { %v4813_v8 = vpop.xlane.xlu0 %4812 }
0x13cd   : > { %v4814_v49 = vmul.f32 0.03125, %v4813_v8  ;;  %v11465_v8 = vld [vmem:[#allocation33_spill] sm:$0xff] }
0x13cf   : > { %v4815_v54 = vadd.f32 1e-05, %v4814_v49 }
0x13d1   : > { %8542 = vrsqrt.f32 %v4815_v54 }
0x13d4   : > { %v4725_v61 = vpop.xlane.xlu1 %4724 }
0x13d5   : > { %v4726_v41 = vmul.f32 0.03125, %v4725_v61 }
0x13d7   : > { %v4727_v38 = vadd.f32 1e-05, %v4726_v41 }
0x13d9   : > { %8544 = vrsqrt.f32 %v4727_v38 }
0x13db   : > { %v8543_v3 = vpop.eup %8542 }
0x13dc   : > { %v4817_v63 = vmul.f32 %v8543_v3, %v4809_v33  ;;  %v11457_v33 = vld [vmem:[#allocation16_spill] sm:$0xff] }
0x13de   : > { %v4818_v4 = vmul.f32 %v4817_v63, %v9789_v47 }
0x13e0   : > { %v4819_v1 = vadd.f32 %v4818_v4, %v9800_v0 }
0x13e2   : > { %7648 = vmatmul.mubr.msk.f32.vlgmr.msra.gmra.mrb[52].mxu0 %vm719_vm0, %v4819_v1 }
0x13e3   : > { %v8545_v12 = vpop.eup %8544  ;;  %8045 = vmatpush3.bf16.xpose.msra.mxu0 %v9839_v30 }
0x13e4   : > { %v4729_v5 = vmul.f32 %v8545_v12, %v4721_v10  ;;  %8047 = vmatprep.subr.bf16.mxu0 %v9859_v24  ;;  %v11462_v10 = vld [vmem:[#allocation37_spill] sm:$0xff] }
0x13e6   : > { %v4730_v46 = vmul.f32 %v4729_v5, %v9759_v53 }
0x13e8   : > { %v4731_v19 = vadd.f32 %v4730_v46, %v9766_v21 }
0x13ea   : > { %7637 = vmatmul.mubr.msk.f32.vlgmr.msra.gmra.mrb[52].mxu1 %vm719_vm0, %v4731_v19 }
0x13eb   : > { %8049 = vmatpush3.bf16.xpose.msra.mxu0 %v9841_v22  ;;  %7651 = vmatpush3.msk.msra.mxu1 %vm1350_vm1, %v10313_v32 }
0x13ec   : > { %8051 = vmatprep.subr.bf16.mxu0 %v9862_v13  ;;  %7652 = vmatprep.mubr.msk.f32.mxu1 %vm8753_vm5, %v11412_v25 }
0x13ed   : > { %8075 = vmatprep.subr.bf16.mxu1 %v9177_v62 }
0x13ee   : > { %7653 = vmatmul.mubr.msk.f32.vlgmr.msra.gmra.mrb[54].mxu1 %vm1253_vm2, %v10317_v56 }
0x13ef   : > { %8077 = vmatpush3.bf16.msra.mxu1 %v9103_v7 }
0x13f0   : > { %8079 = vmatprep.subr.bf16.mxu1 %v9192_v11 }
0x13f3   : > { %8081 = vmatpush3.bf16.msra.mxu1 %v9125_v23  ;;  %8053 = vmatpush3.bf16.xpose.msra.mxu0 %v11426_v50 }
0x13f4   : > { %8055 = vmatprep.subr.bf16.mxu0 %v11427_v60  ;;  %8083 = vmatprep.subr.bf16.mxu1 %v9298_v55 }
0x13f7   : > { %8085 = vmatpush3.bf16.msra.mxu1 %v9127_v26 }
0x13f8   : > { %8087 = vmatprep.subr.bf16.mxu1 %v9397_v28 }
0x13fb   : > { %8089 = vmatpush3.bf16.msra.mxu1 %v11391_v37  ;;  %8057 = vmatpush3.bf16.xpose.msra.mxu0 %v11428_v43 }
0x13fc   : > { %8059 = vmatprep.subr.bf16.mxu0 %v11429_v9  ;;  %8091 = vmatprep.subr.bf16.mxu1 %v11392_v59 }
0x13ff   : > { %8093 = vmatpush3.bf16.msra.mxu1 %v11455_v35 }
0x1400   : > { %8095 = vmatprep.subr.bf16.mxu1 %v11456_v31 }
0x1403   : > { %8097 = vmatpush3.bf16.msra.mxu1 %v11457_v33  ;;  %8061 = vmatpush3.bf16.xpose.msra.mxu0 %v11430_v40 }
0x1404   : > { %8063 = vmatprep.subr.bf16.mxu0 %v11431_v42  ;;  %8099 = vmatprep.subr.bf16.mxu1 %v11458_v6 }
0x1407   : > { %8101 = vmatpush3.bf16.msra.mxu1 %v11459_v51 }
0x1408   : > { %8103 = vmatprep.subr.bf16.mxu1 %v11460_v15 }
0x140b   : > { %8105 = vmatpush3.bf16.msra.mxu1 %v11461_v16  ;;  %8065 = vmatpush3.bf16.xpose.msra.mxu0 %v11432_v34 }
0x140c   : > { %8107 = vmatprep.subr.bf16.mxu1 %v9855_v52  ;;  %8067 = vmatprep.subr.bf16.mxu0 %v11462_v10 }
0x1413   : > { %8069 = vmatpush3.bf16.xpose.msra.mxu0 %v11463_v14 }
0x1414   : > { %8071 = vmatprep.subr.bf16.mxu0 %v11464_v29 }
0x141b   : > { %8073 = vmatpush3.bf16.xpose.msra.mxu0 %v11465_v8 }
0x141c   : > { %8138 = vmatprep.subr.bf16.mxu0 %v11414_v58 }
0x14b5   : > { %v4889_v49 = vpop.f32.mrb[52].mxu0 }
0x14b6   : > { %4968 = vrot.lane.b32.xlu0 %v4889_v49, %s8755_s22  ;;  %v7649_v54 = vpop.f32.mrb[53].mxu0 }
0x14bd   : > { %v4801_v61 = vpop.f32.mrb[52].mxu1 }
0x14be   : > { %v7638_v41 = vpop.f32.mrb[53].mxu1  ;;  %v4973_v12 = vsel %vm719_vm0, %v4801_v61, 0.0 }
0x14bf   : > { %v4974_v5 = vsel %vm2988_vm6, %v4973_v12, 0.0  ;;  %v11466_v41 = vld [vmem:[#allocation39_spill] sm:$0xff] }
0x14c0   : > { %v4975_v46 = vsel %vm2990_vm7, %v4974_v5, 0.0 }
0x14c1   : > { %v10354_v38 = vpop.f32.mrb[54].mxu1  ;;  %v4977_v19 = vrot.slane %v4975_v46, 7 }
0x14c2   : > { %v11346_v3 = vsub.f32 0.0, %v10354_v38  ;;  %v7654_v63 = vpop.f32.mrb[55].mxu1 }
0x14c4   : > { %v4980_v4 = vmul.f32 %v11346_v3, %v4801_v61  ;;  %v11467_v61 = vld [vmem:[#allocation40_spill] sm:$0xff] }
0x14c6   : > { %v4981_v1 = vsel %vm2694_vm3, %v4980_v4, 0.0 }
0x14c7   : > { %4982 = vadd.xlane.f32.xlu1 %v4981_v1 }
0x1528   : > { %v4969_v17 = vpop.permute.xlu0 %4968 }
0x1529   : > { %v4971_v27 = vsel %vm2988_vm6, 0.0, %v4969_v17 }
0x152a   : > { %v4972_v49 = vsel %vm2990_vm7, %v4971_v27, 0.0 }
0x152b   : > { %v4979_v54 = vsel %vm2998_vm8, %v4972_v49, %v4977_v19 }
0x152c   : > { %7057 = vmatprep.mubr.f32.mxu0 %v4979_v54 }
0x152d   : > { %7058 = vmatmul.mubr.f32.vlgmr.msra.gmra.mrb[54].mxu0 %v4979_v54 }
0x152e   : > { %8140 = vmatpush3.bf16.msra.mxu0 %v11466_v41  ;;  %7663 = vmatprep.mubr.msk.f32.mxu0 %vm8753_vm5, %v11412_v25 }
0x152f   : > { %8141 = vmatprep.subr.bf16.mxu0 %v11414_v58 }
0x1532   : > { %8143 = vmatpush3.bf16.msra.mxu0 %v11467_v61 }
0x1533   : > { %8150 = vmatprep.subr.bf16.mxu0 %v11414_v58 }
0x1554   : > { %v4983_v63 = vpop.xlane.xlu1 %4982 }
0x1555   : > { %v4985_v4 = vrot.slane %v4983_v63, 7 }
0x1557   : > { %v4987_v1 = vsel %vm2998_vm8, 0.0, %v4985_v4 }
0x1558   : > { %4990 = vperm.xlu1 %8419, %v4987_v1  }
0x15d7   : > { %v4991_v12 = vpop.permute.xlu1 %4990 }
0x1600   : > { %v5059_v5 = vpop.f32.mrb[54].mxu0 }
0x1601   : > { %v5060_v46 = vadd.f32 %v5059_v5, %v4991_v12  ;;  %v5061_v17 = vpop.f32.mrb[55].mxu0 }
0x1602   : > { %v5062_v19 = vadd.f32 %v5061_v17, %v4991_v12 }
0x1603   : > { %v5064_v27 = vmul.f32 0.17677669, %v5060_v46 }
0x1604   : > { %v5065_v49 = vmul.f32 0.17677669, %v5062_v19 }
0x1605   : > { %v5066_v54 = vsel %vm3086_vm9, %v5064_v27, -inf }
0x1606   : > { %v5067_v41 = vrot.slane %v5066_v54, 4  ;;  %v5073_v3 = vsel %vm3086_vm9, %v5065_v49, -inf }
0x1607   : > { %v5074_v61 = vrot.slane %v5073_v3, 4 }
0x1608   : > { %v5068_v16 = vmax.f32 %v5066_v54, %v5067_v41 }
0x1609   : > { %v5075_v15 = vmax.f32 %v5073_v3, %v5074_v61 }
0x160a   : > { %v5069_v51 = vrot.slane %v5068_v16, 2 }
0x160b   : > { %v5076_v63 = vrot.slane %v5075_v15, 2 }
0x160c   : > { %v5070_v6 = vmax.f32 %v5068_v16, %v5069_v51 }
0x160d   : > { %v5077_v4 = vmax.f32 %v5075_v15, %v5076_v63 }
0x160e   : > { %v5071_v1 = vrot.slane %v5070_v6, 1 }
0x160f   : > { %v5078_v33 = vrot.slane %v5077_v4, 1 }
0x1610   : > { %v5072_v31 = vmax.f32 %v5070_v6, %v5071_v1 }
0x1611   : > { %v5079_v5 = vmax.f32 %v5077_v4, %v5078_v33 }
0x1612   : > { %v5080_v35 = vsub.f32 %v5064_v27, %v5072_v31 }
0x1613   : > { %v5081_v12 = vsub.f32 %v5065_v49, %v5079_v5 }
0x1614   : > { %v5082_v46 = vmul.f32 1.442695, %v5080_v35 }
0x1615   : > { %v5084_v17 = vmul.f32 1.442695, %v5081_v12 }
0x1616   : > { %8546 = vpow2.f32 %v5082_v46 }
0x1617   : > { %8548 = vpow2.f32 %v5084_v17 }
0x1620   : > { %v8547_v19 = vpop.eup %8546 }
0x1621   : > { %v8549_v59 = vpop.eup %8548  ;;  %v5086_v37 = vsel %vm3086_vm9, %v8547_v19, 0.0 }
0x1622   : > { %v5087_v54 = vrot.slane %v5086_v37, 4  ;;  %v5093_v3 = vsel %vm3086_vm9, %v8549_v59, 0.0 }
0x1623   : > { %v5094_v41 = vrot.slane %v5093_v3, 4 }
0x1624   : > { %v5088_v51 = vadd.f32 %v5087_v54, %v5086_v37 }
0x1625   : > { %v5095_v15 = vadd.f32 %v5094_v41, %v5093_v3 }
0x1626   : > { %v5089_v16 = vrot.slane %v5088_v51, 2 }
0x1627   : > { %v5096_v61 = vrot.slane %v5095_v15, 2 }
0x1628   : > { %v5090_v6 = vadd.f32 %v5089_v16, %v5088_v51 }
0x1629   : > { %v5097_v33 = vadd.f32 %v5096_v61, %v5095_v15  ;;  %v11468_v15 = vsub.f32 0.0, %v10354_v38 }
0x162a   : > { %v5091_v31 = vrot.slane %v5090_v6, 1 }
0x162b   : > { %v5098_v27 = vrot.slane %v5097_v33, 1  ;;  %v5274_v16 = vrot.slane %v11468_v15, 7 }
0x162c   : > { %v5092_v35 = vadd.f32 %v5091_v31, %v5090_v6 }
0x162d   : > { %v5099_v49 = vadd.f32 %v5098_v27, %v5097_v33 }
0x162e   : > { %8550 = vrcp.f32 %v5092_v35 }
0x162f   : > { %8552 = vrcp.f32 %v5099_v49 }
0x1638   : > { %v8551_v63 = vpop.eup %8550 }
0x1639   : > { %v8553_v4 = vpop.eup %8552  ;;  %v5101_v1 = vmul.f32 %v8551_v63, %v8547_v19 }
0x163a   : > { %v5103_v5 = vmul.f32 %v8553_v4, %v8549_v59 }
0x163b   : > { %v5104_v12 = vadd.f32 1e-08, %v5101_v1  ;;  %v11469_v1 = vld [vmem:[#allocation47_spill] sm:$0xff] }
0x163c   : > { %v5105_v46 = vadd.f32 1e-08, %v5103_v5  ;;  %v11470_v5 = vld [vmem:[#allocation48_spill] sm:$0xff] }
0x163d   : > { %v5114_v17 = vsel %vm2998_vm8, %v5104_v12, 0.0  ;;  %v5106_v37 = vsel %vm3127_vm10, %v5104_v12, 0.0 }
0x163e   : > { %v5115_v54 = vsel %vm2998_vm8, %v5105_v46, 0.0  ;;  %v5107_v3 = vsel %vm3127_vm10, %v5105_v46, 0.0 }
0x163f   : > { %v5116_v41 = vadd.f32 %v5115_v54, %v5114_v17  ;;  %v5108_v51 = vadd.f32 %v5107_v3, %v5106_v37 }
0x1641   : > { %5117 = vadd.xlane.f32.xlu0 %v5116_v41  ;;  %5109 = vadd.xlane.f32.xlu1 %v5108_v51  ;;  %v11471_v41 = vld [vmem:[#allocation27_spill] sm:$0xff] }
0x1657   : > { %5275 = vrot.lane.b32.xlu0 %v5274_v16, %s11353_s28 }
0x16ce   : > { %v5118_v59 = vpop.xlane.xlu0 %5117  ;;  %v5110_v19 = vpop.xlane.xlu1 %5109 }
0x16cf   : > { %8554 = vrcp.f32 %v5118_v59 }
0x16d0   : > { %8556 = vrcp.f32 %v5110_v19 }
0x16d2   : > { %v5276_v15 = vpop.permute.xlu0 %5275 }
0x16d9   : > { %v8555_v61 = vpop.eup %8554 }
0x16da   : > { %v8557_v6 = vpop.eup %8556  ;;  %v5121_v27 = vmul.f32 %v8555_v61, %v5105_v46  ;;  %v5120_v38 = vmul.f32 %v8555_v61, %v5104_v12 }
0x16db   : > { %v5113_v33 = vmul.f32 %v8557_v6, %v5105_v46  ;;  %v5112_v31 = vmul.f32 %v8557_v6, %v5104_v12 }
0x16dd   : > { %v5127_v35 = vrot.slane %v5113_v33, 1  ;;  %v5126_v49 = vrot.slane %v5112_v31, 1  ;;  %v5123_v63 = vsel %vm2998_vm8, %v5121_v27, %v5113_v33  ;;  %v5122_v4 = vsel %vm2998_vm8, %v5120_v38, %v5112_v31 }
0x16df   : > { %5194 = vmatprep.mubr.f32.mxu1 %v5127_v35 }
0x16e0   : > { %5195 = vmatmul.mubr.f32.vlgmr.msra.gmra.mrb[56].mxu1 %v5126_v49 }
0x16e1   : > { %8109 = vmatpush3.bf16.msra.mxu1 %v9839_v30  ;;  %5267 = vmatprep.mubr.f32.mxu1 %v5123_v63 }
0x16e2   : > { %8111 = vmatprep.subr.bf16.mxu1 %v9859_v24 }
0x16e5   : > { %8113 = vmatpush3.bf16.msra.mxu1 %v9841_v22 }
0x16e6   : > { %8115 = vmatprep.subr.bf16.mxu1 %v9862_v13 }
0x16e9   : > { %8117 = vmatpush3.bf16.msra.mxu1 %v11426_v50 }
0x16ea   : > { %8119 = vmatprep.subr.bf16.mxu1 %v11427_v60 }
0x16ed   : > { %8121 = vmatpush3.bf16.msra.mxu1 %v11428_v43 }
0x16ee   : > { %8123 = vmatprep.subr.bf16.mxu1 %v11429_v9 }
0x16f1   : > { %8125 = vmatpush3.bf16.msra.mxu1 %v11430_v40 }
0x16f2   : > { %8127 = vmatprep.subr.bf16.mxu1 %v11431_v42 }
0x16f5   : > { %8129 = vmatpush3.bf16.msra.mxu1 %v11432_v34 }
0x16f6   : > { %8131 = vmatprep.subr.bf16.mxu1 %v11462_v10 }
0x16f9   : > { %8133 = vmatpush3.bf16.msra.mxu1 %v11463_v14 }
0x16fa   : > { %8135 = vmatprep.subr.bf16.mxu1 %v11464_v29 }
0x16fd   : > { %8137 = vmatpush3.bf16.msra.mxu1 %v11465_v8 }
0x16fe   : > { %8144 = vmatprep.subr.bf16.mxu1 %v11414_v58 }
0x1700   : > { %5268 = vmatmul.mubr.f32.vlgmr.msra.gmra.mrb[58].mxu1 %v5122_v4 }
0x1701   : > { %8146 = vmatpush3.bf16.msra.mxu1 %v11469_v1  ;;  %7674 = vmatprep.mubr.msk.f32.mxu1 %vm8753_vm5, %v11412_v25 }
0x1702   : > { %8147 = vmatprep.subr.bf16.mxu1 %v11414_v58 }
0x1705   : > { %8149 = vmatpush3.bf16.msra.mxu1 %v11470_v5 }
0x1706   : > { %8156 = vmatprep.subr.bf16.mxu1 %v11414_v58 }
0x17b3   : > { %v7091_v46 = vpop.f32.mrb[56].mxu1 }
0x17b4   : > { %v7092_v12 = vpop.f32.mrb[57].mxu1 }
0x17b5   : > { %v10408_v17 = vadd.f32 %v7092_v12, %v7091_v46 }
0x17d3   : > { %v7126_v37 = vpop.f32.mrb[58].mxu1 }
0x17d4   : > { %v7127_v54 = vpop.f32.mrb[59].mxu1 }
0x17d5   : > { %v7128_v3 = vadd.f32 %v7127_v54, %v7126_v37 }
0x17d7   : > { %v5292_v51 = vrot.slane %v7128_v3, %v11471_v41  ;;  %v5278_v16 = vadd.f32 %v7128_v3, %v5276_v15 }
0x17d9   : > { %v5299_v59 = vrot.slane %v5292_v51, %v11471_v41  ;;  %v5280_v19 = vrot.slane %v5278_v16, 1 }
0x17db   : > { %5300 = vrot.lane.b32.xlu1 %v5299_v59, %s11353_s28 }
0x17df   : > { %5281 = vrot.lane.b32.xlu1 %v5280_v19, %s11443_s29  ;;  %v11472_v19 = vld [vmem:[#allocation43_spill] sm:$0xff] }
0x184d   : > { %v5301_v61 = vpop.permute.xlu1 %5300 }
0x184e   : > { %v10415_v6 = vadd.f32 %v5301_v61, %v10285_v36 }
0x1850   : > { %v5304_v33 = vsel %vm2791_vm4, %v10415_v6, 0.0 }
0x1851   : > { %5305 = vadd.xlane.f32.xlu0 %v5304_v33  ;;  %v5282_v31 = vpop.permute.xlu1 %5281 }
0x1852   : > { %v10420_v27 = vadd.f32 %v5282_v31, %v10291_v48 }
0x1854   : > { %v5493_v35 = vsel %vm2694_vm3, %v10420_v27, 0.0 }
0x1855   : > { %5494 = vadd.xlane.f32.xlu1 %v5493_v35  ;;  %v11473_v35 = vld [vmem:[#allocation44_spill] sm:$0xff] }
0x18de   : > { %v5306_v49 = vpop.xlane.xlu0 %5305 }
0x18df   : > { %v5307_v63 = vmul.f32 0.03125, %v5306_v49 }
0x18e1   : > { %v5308_v38 = vsub.f32 %v10415_v6, %v5307_v63  ;;  %v11474_v63 = vld [vmem:[#allocation41_spill] sm:$0xff] }
0x18e2   : > { %v5495_v4 = vpop.xlane.xlu1 %5494 }
0x18e3   : > { %v5496_v1 = vmul.f32 0.03125, %v5495_v4  ;;  %v5309_v36 = vmul.f32 %v5308_v38, %v5308_v38  ;;  %v11475_v4 = vld [vmem:[#allocation45_spill] sm:$0xff] }
0x18e5   : > { %v5497_v5 = vsub.f32 %v10420_v27, %v5496_v1  ;;  %v5310_v46 = vsel %vm2791_vm4, %v5309_v36, 0.0  ;;  %v11476_v36 = vld [vmem:[#allocation42_spill] sm:$0xff] }
0x18e6   : > { %5311 = vadd.xlane.f32.xlu0 %v5310_v46 }
0x18e7   : > { %v5498_v12 = vmul.f32 %v5497_v5, %v5497_v5 }
0x18e9   : > { %v5499_v48 = vsel %vm2694_vm3, %v5498_v12, 0.0  ;;  %v11479_v12 = vld [vmem:[#allocation26_spill] sm:$0xff] }
0x18ea   : > { %5500 = vadd.xlane.f32.xlu0 %v5499_v48 }
0x1973   : > { %v5312_v37 = vpop.xlane.xlu0 %5311 }
0x1974   : > { %v5313_v54 = vmul.f32 0.03125, %v5312_v37  ;;  %v11480_v37 = vld [vmem:[#allocation49_spill] sm:$0xff] }
0x1976   : > { %v5314_v3 = vadd.f32 1e-05, %v5313_v54 }
0x1977   : > { %v5501_v41 = vpop.xlane.xlu0 %5500 }
0x1978   : > { %8558 = vrsqrt.f32 %v5314_v3  ;;  %v5502_v51 = vmul.f32 0.03125, %v5501_v41 }
0x197a   : > { %v5503_v15 = vadd.f32 1e-05, %v5502_v51 }
0x197c   : > { %8560 = vrsqrt.f32 %v5503_v15 }
0x1982   : > { %v8559_v16 = vpop.eup %8558 }
0x1983   : > { %v5316_v59 = vmul.f32 %v8559_v16, %v5308_v38  ;;  %v11477_v38 = vld [vmem:[#allocation46_spill] sm:$0xff] }
0x1985   : > { %v5317_v61 = vmul.f32 %v5316_v59, %v11472_v19  ;;  %v11481_v19 = vld [vmem:[#allocation50_spill] sm:$0xff] }
0x1986   : > { %v8561_v33 = vpop.eup %8560 }
0x1987   : > { %v5505_v31 = vmul.f32 %v8561_v33, %v5497_v5  ;;  %v5318_v49 = vadd.f32 %v5317_v61, %v11473_v35  ;;  %v11478_v5 = vld [vmem:[#allocation25_spill] sm:$0xff] }
0x1989   : > { %7664 = vmatmul.mubr.msk.f32.vlgmr.msra.gmra.mrb[56].mxu0 %vm719_vm0, %v5318_v49  ;;  %v5506_v1 = vmul.f32 %v5505_v31, %v11475_v4 }
0x198a   : > { %8152 = vmatpush3.bf16.msra.mxu0 %v11474_v63  ;;  %7685 = vmatprep.mubr.msk.f32.mxu0 %vm8753_vm5, %v11412_v25 }
0x198b   : > { %8153 = vmatprep.subr.bf16.mxu0 %v11414_v58  ;;  %v5507_v46 = vadd.f32 %v5506_v1, %v11477_v38 }
0x198e   : > { %8155 = vmatpush3.bf16.msra.mxu0 %v11476_v36 }
0x198f   : > { %8162 = vmatprep.subr.bf16.mxu0 %v11414_v58 }
0x1991   : > { %7686 = vmatmul.mubr.msk.f32.vlgmr.msra.gmra.mrb[58].mxu0 %vm719_vm0, %v5507_v46 }
0x1992   : > { %8164 = vmatpush3.bf16.msra.mxu0 %v11478_v5  ;;  %7707 = vmatprep.mubr.msk.f32.mxu0 %vm8753_vm5, %v11412_v25 }
0x1993   : > { %8165 = vmatprep.subr.bf16.mxu0 %v11414_v58 }
0x1996   : > { %8167 = vmatpush3.bf16.msra.mxu0 %v11479_v12 }
0x1997   : > { %7721 = vmatprep.subr.mxu0 %v11412_v25 }
0x1a5c   : > { %v5388_v48 = vpop.f32.mrb[56].mxu0 }
0x1a5d   : > { %v5389_v54 = vadd.f32 %v5388_v48, %v11480_v37  ;;  %v7665_v3 = vpop.f32.mrb[57].mxu0 }
0x1a5f   : > { %v5393_v41 = vmul.f32 0.70710677, %v5389_v54 }
0x1a61   : > { %v5396_v51 = vand.u32 2147483647, %v5393_v41  ;;  %vm5394_vm15 = vcmp.ge.f32.partialorder %v5393_v41, 0.0 }
0x1a63   : > { %v5397_v15 = vmul.f32 0.3275911, %v5396_v51  ;;  %v5410_v63 = vsub.f32 0.0, %v5396_v51 }
0x1a64   : > { %v5577_v16 = vpop.f32.mrb[58].mxu0 }
0x1a65   : > { %v5398_v59 = vadd.f32 1.0, %v5397_v15  ;;  %v5578_v61 = vadd.f32 %v5577_v16, %v11481_v19  ;;  %v7687_v33 = vpop.f32.mrb[59].mxu0  ;;  %v5411_v36 = vmul.f32 %v5410_v63, %v5396_v51 }
0x1a67   : > { %8562 = vrcp.f32 %v5398_v59  ;;  %v5582_v31 = vmul.f32 0.70710677, %v5578_v61  ;;  %v5412_v5 = vmul.f32 1.442695, %v5411_v36 }
0x1a69   : > { %v5585_v35 = vand.u32 2147483647, %v5582_v31  ;;  %vm5583_vm11 = vcmp.ge.f32.partialorder %v5582_v31, 0.0 }
0x1a6b   : > { %v5586_v49 = vmul.f32 0.3275911, %v5585_v35  ;;  %v5599_v12 = vsub.f32 0.0, %v5585_v35 }
0x1a6d   : > { %v5587_v4 = vadd.f32 1.0, %v5586_v49  ;;  %v5600_v15 = vmul.f32 %v5599_v12, %v5585_v35  ;;  %v5395_v35 = vsel %vm5394_vm15, 1.0, %v11454_v45 }
0x1a6f   : > { %8564 = vrcp.f32 %v5587_v4  ;;  %v5601_v8 = vmul.f32 1.442695, %v5600_v15 }
0x1a70   : > { %8566 = vpow2.f32 %v5412_v5 }
0x1a71   : > { %v8563_v1 = vpop.eup %8562  ;;  %8568 = vpow2.f32 %v5601_v8  ;;  %v5584_v8 = vsel %vm5583_vm11, 1.0, %v11454_v45 }
0x1a72   : > { %v5401_v38 = vmul.f32 1.0614054, %v8563_v1 }
0x1a74   : > { %v5402_v46 = vadd.f32 -1.4531521, %v5401_v38 }
0x1a76   : > { %v5403_v48 = vmul.f32 %v8563_v1, %v5402_v46 }
0x1a78   : > { %v5404_v37 = vadd.f32 1.4214138, %v5403_v48 }
0x1a79   : > { %v8565_v3 = vpop.eup %8564 }
0x1a7a   : > { %v5405_v16 = vmul.f32 %v8563_v1, %v5404_v37  ;;  %v5590_v19 = vmul.f32 1.0614054, %v8565_v3  ;;  %v8567_v38 = vpop.eup %8566  ;;  %v5392_v37 = vmul.f32 0.5, %v5389_v54 }
0x1a7c   : > { %v5406_v59 = vadd.f32 -0.28449672, %v5405_v16  ;;  %v5591_v33 = vadd.f32 -1.4531521, %v5590_v19  ;;  %v8569_v19 = vpop.eup %8568 }
0x1a7e   : > { %v5407_v29 = vmul.f32 %v8563_v1, %v5406_v59  ;;  %v5592_v14 = vmul.f32 %v8565_v3, %v5591_v33 }
0x1a80   : > { %v5408_v49 = vadd.f32 0.2548296, %v5407_v29  ;;  %v5593_v4 = vadd.f32 1.4214138, %v5592_v14 }
0x1a82   : > { %v5409_v51 = vmul.f32 %v8563_v1, %v5408_v49  ;;  %v5594_v63 = vmul.f32 %v8565_v3, %v5593_v4 }
0x1a84   : > { %v5414_v36 = vmul.f32 %v8567_v38, %v5409_v51  ;;  %v5595_v46 = vadd.f32 -0.28449672, %v5594_v63 }
0x1a86   : > { %v5415_v48 = vsub.f32 1.0, %v5414_v36  ;;  %v5596_v10 = vmul.f32 %v8565_v3, %v5595_v46 }
0x1a88   : > { %v5416_v5 = vmul.f32 %v5415_v48, %v5395_v35  ;;  %v5597_v12 = vadd.f32 0.2548296, %v5596_v10  ;;  %v5581_v10 = vmul.f32 0.5, %v5578_v61 }
0x1a8a   : > { %v5417_v16 = vadd.f32 1.0, %v5416_v5  ;;  %v5598_v15 = vmul.f32 %v8565_v3, %v5597_v12 }
0x1a8c   : > { %v5418_v59 = vmul.f32 %v5417_v16, %v5392_v37  ;;  %v5603_v14 = vmul.f32 %v8569_v19, %v5598_v15 }
0x1a8e   : > { %v5604_v29 = vsub.f32 1.0, %v5603_v14  ;;  %7675 = vmatmul.mubr.msk.f32.vlgmr.msra.gmra.mrb[60].mxu1 %vm719_vm0, %v5418_v59 }
0x1a8f   : > { %8158 = vmatpush3.bf16.msra.mxu1 %v10075_v20  ;;  %7696 = vmatprep.mubr.msk.f32.mxu1 %vm8753_vm5, %v11412_v25 }
0x1a90   : > { %v5605_v41 = vmul.f32 %v5604_v29, %v5584_v8  ;;  %8159 = vmatprep.subr.bf16.mxu1 %v11414_v58 }
0x1a92   : > { %v5606_v54 = vadd.f32 1.0, %v5605_v41 }
0x1a93   : > { %8161 = vmatpush3.bf16.msra.mxu1 %v10085_v57 }
0x1a94   : > { %v5607_v31 = vmul.f32 %v5606_v54, %v5581_v10  ;;  %8168 = vmatprep.subr.bf16.mxu1 %v11414_v58  ;;  %v5200_v10 = vmul.f32 0.5, %v10408_v17  ;;  %v10549_v17 = vld [vmem:[%s10540_s1 + $0x90] sm:$0xff] }
0x1a96   : > { %7697 = vmatmul.mubr.msk.f32.vlgmr.msra.gmra.mrb[62].mxu1 %vm719_vm0, %v5607_v31  ;;  %v5201_v31 = vmul.f32 0.5, %v10317_v56 }
0x1a97   : > { %8170 = vmatpush3.bf16.msra.mxu1 %v9779_v18  ;;  %7718 = vmatprep.mubr.msk.f32.mxu1 %vm8753_vm5, %v11412_v25 }
0x1a98   : > { %8171 = vmatprep.subr.bf16.mxu1 %v11414_v58 }
0x1a9b   : > { %8173 = vmatpush3.bf16.msra.mxu1 %v9794_v2 }
0x1a9c   : > { %8175 = vmatprep.subr.bf16.mxu1 %v9855_v52 }
0x1b61   : > { %v5488_v18 = vpop.f32.mrb[60].mxu1 }
0x1b62   : > { %v5489_v20 = vadd.f32 %v5488_v18, %v10101_v44  ;;  %v7676_v58 = vpop.f32.mrb[61].mxu1 }
0x1b63   : > { %v10557_v58 = vld [vmem:[%s10540_s1 + $0x88] sm:$0xff] }
0x1b64   : > { %v5492_v2 = vadd.f32 %v5489_v20, %v10415_v6  ;;  %v10554_v20 = vld [vmem:[%s10540_s1 + $0x10] sm:$0xff] }
0x1b66   : > { %v5770_v52 = vsel %vm2791_vm4, %v5492_v2, 0.0 }
0x1b67   : > { %5771 = vadd.xlane.f32.xlu0 %v5770_v52  ;;  %v10562_v52 = vld [vmem:[%s10540_s1 + $0xa0] sm:$0xff] }
0x1b69   : > { %v5677_v57 = vpop.f32.mrb[62].mxu1 }
0x1b6a   : > { %v5678_v45 = vadd.f32 %v5677_v57, %v10111_v39  ;;  %v7698_v61 = vpop.f32.mrb[63].mxu1 }
0x1b6c   : > { %v5681_v1 = vadd.f32 %v5678_v45, %v10420_v27  ;;  %v10567_v45 = vld [vmem:[%s10540_s1] sm:$0xff] }
0x1b6e   : > { %v6359_v3 = vrot.slane %v5681_v1, 7  ;;  %v5682_v33 = vsel %vm2694_vm3, %v5681_v1, 0.0 }
0x1b6f   : > { %5683 = vadd.xlane.f32.xlu1 %v5682_v33  ;;  %v10577_v33 = vld [vmem:[%s10540_s1 + $0x8] sm:$0xff] }
0x1b70   : > { %v6361_v49 = vsel %vm2998_vm8, %v5492_v2, %v6359_v3 }
0x1b71   : > { %6363 = vst.msk [vmem:[%s10470_s27] sm:$0xf] %vm6362_vm12, %v6361_v49 }
0x1bf4   : > { %v5772_v44 = vpop.xlane.xlu0 %5771 }
0x1bf5   : > { %v5773_v4 = vmul.f32 0.03125, %v5772_v44  ;;  %v10582_v44 = vld [vmem:[%s10540_s1 + $0xb0] sm:$0xff] }
0x1bf7   : > { %v5774_v6 = vsub.f32 %v5492_v2, %v5773_v4 }
0x1bf9   : > { %v5775_v51 = vmul.f32 %v5774_v6, %v5774_v6 }
0x1bfb   : > { %v5776_v63 = vsel %vm2791_vm4, %v5775_v51, 0.0 }
0x1bfc   : > { %v5684_v38 = vpop.xlane.xlu1 %5683  ;;  %5777 = vadd.xlane.f32.xlu0 %v5776_v63  ;;  %v10592_v63 = vld [vmem:[%s10540_s1 + $0x30] sm:$0xff] }
0x1bfd   : > { %v5685_v39 = vmul.f32 0.03125, %v5684_v38 }
0x1bff   : > { %v5686_v36 = vsub.f32 %v5681_v1, %v5685_v39  ;;  %v10572_v1 = vld [vmem:[%s10540_s1 + $0x20] sm:$0xff]  ;;  %v10597_v39 = vld [vmem:[%s10540_s1 + $0x18] sm:$0xff] }
0x1c01   : > { %v5687_v46 = vmul.f32 %v5686_v36, %v5686_v36 }
0x1c03   : > { %v5688_v27 = vsel %vm2694_vm3, %v5687_v46, 0.0  ;;  %v10602_v46 = vld [vmem:[%s10540_s1 + $0xc0] sm:$0xff] }
0x1c04   : > { %5689 = vadd.xlane.f32.xlu1 %v5688_v27 }
0x1c89   : > { %v5778_v48 = vpop.xlane.xlu0 %5777 }
0x1c8a   : > { %v5779_v35 = vmul.f32 0.03125, %v5778_v48  ;;  %v10607_v48 = vld [vmem:[%s10540_s1 + $0xa8] sm:$0xff] }
0x1c8c   : > { %v5780_v5 = vadd.f32 1e-05, %v5779_v35 }
0x1c8e   : > { %8570 = vrsqrt.f32 %v5780_v5 }
0x1c91   : > { %v5690_v12 = vpop.xlane.xlu1 %5689 }
0x1c92   : > { %v5691_v37 = vmul.f32 0.03125, %v5690_v12  ;;  %v10614_v12 = vld [vmem:[%s10540_s1 + $0x28] sm:$0xff] }
0x1c94   : > { %v5692_v16 = vadd.f32 1e-05, %v5691_v37 }
0x1c96   : > { %8572 = vrsqrt.f32 %v5692_v16  ;;  %v10619_v16 = vld [vmem:[%s10540_s1 + $0xb8] sm:$0xff] }
0x1c98   : > { %v8571_v15 = vpop.eup %8570 }
0x1c99   : > { %v5782_v19 = vmul.f32 %v8571_v15, %v5774_v6  ;;  %v10587_v6 = vld [vmem:[%s10540_s1 + $0x98] sm:$0xff] }
0x1c9b   : > { %v5783_v59 = vmul.f32 %v5782_v19, %v9789_v47  ;;  %v10497_v47 = vadd.f32 %v5201_v31, %v5200_v10  ;;  %v10624_v19 = vld [vmem:[%s10540_s1 + $0x38] sm:$0xff] }
0x1c9c   : > { %v10639_v10 = vld [vmem:[%s10540_s1 + $0xd8] sm:$0xff] }
0x1c9d   : > { %v5784_v14 = vadd.f32 %v5783_v59, %v9800_v0  ;;  %v11491_v0 = vld [vmem:[#allocation37_spill] sm:$0xff] }
0x1c9e   : > { %v10644_v31 = vld [vmem:[%s10540_s1 + $0x58] sm:$0xff] }
0x1c9f   : > { %7719 = vmatmul.mubr.msk.f32.vlgmr.msra.gmra.mrb[64].mxu1 %vm719_vm0, %v5784_v14  ;;  %v10629_v14 = vld [vmem:[%s10540_s1 + $0xc8] sm:$0xff] }
0x1ca0   : > { %v8573_v29 = vpop.eup %8572  ;;  %8177 = vmatpush3.bf16.xpose.msra.mxu1 %v9839_v30  ;;  %v11492_v30 = vld [vmem:[#allocation32_spill] sm:$0xff] }
0x1ca1   : > { %v5694_v8 = vmul.f32 %v8573_v29, %v5686_v36  ;;  %8179 = vmatprep.subr.bf16.mxu1 %v9859_v24  ;;  %v11494_v24 = vld [vmem:[#allocation33_spill] sm:$0xff] }
0x1ca3   : > { %v5695_v41 = vmul.f32 %v5694_v8, %v9759_v53  ;;  %v11485_v53 = vld [vmem:[#allocation20_spill] sm:$0xff]  ;;  %v10634_v8 = vld [vmem:[%s10540_s1 + $0x48] sm:$0xff] }
0x1ca5   : > { %v5696_v54 = vadd.f32 %v5695_v41, %v9766_v21  ;;  %v11490_v21 = vld [vmem:[#allocation18_spill] sm:$0xff] }
0x1ca7   : > { %7708 = vmatmul.mubr.msk.f32.vlgmr.msra.gmra.mrb[60].mxu0 %vm719_vm0, %v5696_v54 }
0x1ca8   : > { %8181 = vmatpush3.bf16.xpose.msra.mxu1 %v9841_v22  ;;  %7722 = vmatpush3.msk.msra.mxu0 %vm1350_vm1, %v10313_v32  ;;  %v11493_v22 = vld [vmem:[#allocation38_spill] sm:$0xff]  ;;  %vm2174_vm1 = vcmask 64512  }
0x1ca9   : > { %8183 = vmatprep.subr.bf16.mxu1 %v9862_v13  ;;  %7723 = vmatprep.mubr.msk.f32.mxu0 %vm8753_vm5, %v11412_v25  ;;  %v2229_v18 = vsel %vm2174_vm1, %v10549_v17, 0.0  ;;  %v2181_v2 = vsel %vm2174_vm1, %v10554_v20, 0.0  ;;  %v2226_v57 = vsel %vm2174_vm1, %v10557_v58, 0.0  ;;  %v2235_v61 = vsel %vm2174_vm1, %v10562_v52, 0.0 }
0x1caa   : > { %8207 = vmatprep.subr.bf16.mxu0 %v9177_v62  ;;  %v11482_v62 = vld [vmem:[#allocation14_spill] sm:$0xff]  ;;  %v2175_v3 = vsel %vm2174_vm1, %v10567_v45, 0.0  ;;  %v2187_v49 = vsel %vm2174_vm1, %v10572_v1, 0.0  ;;  %v2178_v4 = vsel %vm2174_vm1, %v10577_v33, 0.0  ;;  %v2241_v51 = vsel %vm2174_vm1, %v10582_v44, 0.0 }
0x1cab   : > { %7724 = vmatmul.mubr.msk.f32.vlgmr.msra.gmra.mrb[62].mxu0 %vm1253_vm2, %v10497_v47  ;;  %v2232_v38 = vsel %vm2174_vm1, %v10587_v6, 0.0  ;;  %v2193_v36 = vsel %vm2174_vm1, %v10592_v63, 0.0  ;;  %v2184_v27 = vsel %vm2174_vm1, %v10597_v39, 0.0  ;;  %v2247_v35 = vsel %vm2174_vm1, %v10602_v46, 0.0 }
0x1cac   : > { %8209 = vmatpush3.bf16.msra.mxu0 %v9103_v7  ;;  %v11483_v7 = vld [vmem:[#allocation19_spill] sm:$0xff]  ;;  %v2238_v5 = vsel %vm2174_vm1, %v10607_v48, 0.0  ;;  %v2190_v37 = vsel %vm2174_vm1, %v10614_v12, 0.0  ;;  %v2244_v15 = vsel %vm2174_vm1, %v10619_v16, 0.0  ;;  %v2196_v59 = vsel %vm2174_vm1, %v10624_v19, 0.0 }
0x1cad   : > { %8211 = vmatprep.subr.bf16.mxu0 %v9192_v11  ;;  %v11484_v11 = vld [vmem:[#allocation15_spill] sm:$0xff]  ;;  %v2250_v29 = vsel %vm2174_vm1, %v10629_v14, 0.0  ;;  %v2202_v41 = vsel %vm2174_vm1, %v10634_v8, 0.0  ;;  %v2256_v54 = vsel %vm2174_vm1, %v10639_v10, 0.0 }
0x1cb0   : > { %8185 = vmatpush3.bf16.xpose.msra.mxu1 %v11426_v50  ;;  %8213 = vmatpush3.bf16.msra.mxu0 %v9125_v23  ;;  %v11486_v23 = vld [vmem:[#allocation16_spill] sm:$0xff] }
0x1cb1   : > { %8187 = vmatprep.subr.bf16.mxu1 %v11427_v60  ;;  %8215 = vmatprep.subr.bf16.mxu0 %v9298_v55  ;;  %v11488_v55 = vld [vmem:[#allocation17_spill] sm:$0xff] }
0x1cb4   : > { %8217 = vmatpush3.bf16.msra.mxu0 %v9127_v26  ;;  %v11487_v26 = vld [vmem:[#allocation21_spill] sm:$0xff] }
0x1cb5   : > { %8219 = vmatprep.subr.bf16.mxu0 %v9397_v28  ;;  %v11489_v28 = vld [vmem:[#allocation22_spill] sm:$0xff] }
0x1cb8   : > { %8189 = vmatpush3.bf16.xpose.msra.mxu1 %v11428_v43  ;;  %8221 = vmatpush3.bf16.msra.mxu0 %v11482_v62  ;;  %v2208_v62 = vsel %vm2174_vm1, %v10644_v31, 0.0 }
0x1cb9   : > { %8191 = vmatprep.subr.bf16.mxu1 %v11429_v9  ;;  %8223 = vmatprep.subr.bf16.mxu0 %v11483_v7  ;;  %v10649_v7 = vld [vmem:[%s10540_s1 + $0xe8] sm:$0xff] }
0x1cbc   : > { %8225 = vmatpush3.bf16.msra.mxu0 %v11484_v11  ;;  %v2262_v11 = vsel %vm2174_vm1, %v10649_v7, 0.0 }
0x1cbd   : > { %8227 = vmatprep.subr.bf16.mxu0 %v11485_v53  ;;  %v10654_v53 = vld [vmem:[%s10540_s1 + $0x68] sm:$0xff] }
0x1cc0   : > { %8193 = vmatpush3.bf16.xpose.msra.mxu1 %v11430_v40  ;;  %8229 = vmatpush3.bf16.msra.mxu0 %v11486_v23  ;;  %v2214_v23 = vsel %vm2174_vm1, %v10654_v53, 0.0 }
0x1cc1   : > { %8195 = vmatprep.subr.bf16.mxu1 %v11431_v42  ;;  %8231 = vmatprep.subr.bf16.mxu0 %v11487_v26  ;;  %v10659_v26 = vld [vmem:[%s10540_s1 + $0xf8] sm:$0xff] }
0x1cc4   : > { %8233 = vmatpush3.bf16.msra.mxu0 %v11488_v55  ;;  %v2268_v55 = vsel %vm2174_vm1, %v10659_v26, 0.0 }
0x1cc5   : > { %8235 = vmatprep.subr.bf16.mxu0 %v11489_v28  ;;  %v10664_v28 = vld [vmem:[%s10540_s1 + $0x78] sm:$0xff] }
0x1cc8   : > { %8197 = vmatpush3.bf16.xpose.msra.mxu1 %v11432_v34  ;;  %8237 = vmatpush3.bf16.msra.mxu0 %v11490_v21  ;;  %v10543_v34 = vld [vmem:[%s10540_s1 + $0x80] sm:$0xff]  ;;  %v2220_v21 = vsel %vm2174_vm1, %v10664_v28, 0.0 }
0x1cc9   : > { %8199 = vmatprep.subr.bf16.mxu1 %v11491_v0  ;;  %v2223_v56 = vsel %vm2174_vm1, %v10543_v34, 0.0 }
0x1cd0   : > { %8201 = vmatpush3.bf16.xpose.msra.mxu1 %v11492_v30 }
0x1cd1   : > { %8203 = vmatprep.subr.bf16.mxu1 %v11493_v22 }
0x1cd8   : > { %8205 = vmatpush3.bf16.xpose.msra.mxu1 %v11494_v24 }
0x1d72   : > { %v5854_v13 = vpop.f32.mrb[64].mxu1 }
0x1d73   : > { %5933 = vrot.lane.b32.xlu0 %v5854_v13, %s8755_s22  ;;  %v7720_v25 = vpop.f32.mrb[65].mxu1  ;;  %s8655_s22 = scalar_lea.vmem %s6393_s6, 128 }
0x1d74   : > { %p8656_p11 = scmp.ne.s32.totalorder %s6393_s6, %s8655_s22 }
0x1d76   : > { %p8657_p12 = pnand %p8656_p11, %p8910_p5 }
0x1d78   : > { %p8658_p13 = pneg %p8657_p12 }
0x1d7a   : > { %v10532_v50 = vpop.f32.mrb[60].mxu0 }
0x1d7b   : > { %v7709_v60 = vpop.f32.mrb[61].mxu0  ;;  %v5938_v0 = vsel %vm719_vm0, %v10532_v50, 0.0 }
0x1d7c   : > { %v5939_v30 = vsel %vm2988_vm6, %v5938_v0, 0.0 }
0x1d7d   : > { %v5940_v22 = vsel %vm2990_vm7, %v5939_v30, 0.0 }
0x1d7e   : > { %v5927_v43 = vpop.f32.mrb[62].mxu0  ;;  %v5942_v13 = vrot.slane %v5940_v22, 7  ;;  %v10722_v22 = vld [vmem:[%s10540_s1 + $0x50] sm:$0xff] }
0x1d7f   : > { %v5931_v9 = vsub.f32 0.0, %v5927_v43  ;;  %v7725_v40 = vpop.f32.mrb[63].mxu0 }
0x1d81   : > { %v5945_v42 = vmul.f32 %v5931_v9, %v10532_v50 }
0x1d83   : > { %v5946_v32 = vsel %vm2694_vm3, %v5945_v42, 0.0 }
0x1d84   : > { %5947 = vadd.xlane.f32.xlu1 %v5946_v32 }
0x1d88   : > { %2224 = vadd.xlane.f32.xlu1 %v2223_v56 }
0x1d8c   : > { %2230 = vadd.xlane.f32.xlu1 %v2229_v18 }
0x1d90   : > { %2182 = vadd.xlane.f32.xlu1 %v2181_v2 }
0x1d92   : > { %2227 = vadd.xlane.f32.xlu0 %v2226_v57 }
0x1d94   : > { %2236 = vadd.xlane.f32.xlu1 %v2235_v61 }
0x1d96   : > { %2176 = vadd.xlane.f32.xlu0 %v2175_v3 }
0x1d98   : > { %2188 = vadd.xlane.f32.xlu1 %v2187_v49 }
0x1d9a   : > { %2179 = vadd.xlane.f32.xlu0 %v2178_v4 }
0x1d9c   : > { %2242 = vadd.xlane.f32.xlu1 %v2241_v51 }
0x1d9e   : > { %2233 = vadd.xlane.f32.xlu0 %v2232_v38 }
0x1da0   : > { %2194 = vadd.xlane.f32.xlu1 %v2193_v36 }
0x1da2   : > { %2185 = vadd.xlane.f32.xlu0 %v2184_v27 }
0x1da4   : > { %2248 = vadd.xlane.f32.xlu1 %v2247_v35 }
0x1da6   : > { %2239 = vadd.xlane.f32.xlu0 %v2238_v5 }
0x1daa   : > { %2191 = vadd.xlane.f32.xlu0 %v2190_v37 }
0x1dae   : > { %2245 = vadd.xlane.f32.xlu0 %v2244_v15 }
0x1db2   : > { %2197 = vadd.xlane.f32.xlu0 %v2196_v59  ;;  %v10700_v59 = vld [vmem:[%s10540_s1 + $0x40] sm:$0xff] }
0x1db6   : > { %2251 = vadd.xlane.f32.xlu0 %v2250_v29 }
0x1dba   : > { %2203 = vadd.xlane.f32.xlu0 %v2202_v41 }
0x1dbe   : > { %2257 = vadd.xlane.f32.xlu0 %v2256_v54 }
0x1dc2   : > { %2209 = vadd.xlane.f32.xlu0 %v2208_v62 }
0x1dc6   : > { %2263 = vadd.xlane.f32.xlu0 %v2262_v11  ;;  %v10711_v11 = vld [vmem:[%s10540_s1 + $0xd0] sm:$0xff] }
0x1dc7   : > { %v2253_v0 = vsel %vm2174_vm1, %v10711_v11, 0.0 }
0x1dca   : > { %2215 = vadd.xlane.f32.xlu0 %v2214_v23 }
0x1dce   : > { %2269 = vadd.xlane.f32.xlu0 %v2268_v55 }
0x1dd2   : > { %2221 = vadd.xlane.f32.xlu0 %v2220_v21 }
0x1de5   : > { %v5934_v24 = vpop.permute.xlu0 %5933 }
0x1de6   : > { %v5936_v25 = vsel %vm2988_vm6, 0.0, %v5934_v24 }
0x1de7   : > { %v5937_v60 = vsel %vm2990_vm7, %v5936_v25, 0.0 }
0x1de8   : > { %v5944_v43 = vsel %vm2998_vm8, %v5937_v60, %v5942_v13 }
0x1de9   : > { %7193 = vmatprep.mubr.f32.mxu1 %v5944_v43 }
0x1dea   : > { %7194 = vmatmul.mubr.f32.vlgmr.msra.gmra.mrb[66].mxu1 %v5944_v43  ;;  %v2205_v43 = vsel %vm2174_vm1, %v10722_v22, 0.0 }
0x1e11   : > { %v5948_v9 = vpop.xlane.xlu1 %5947 }
0x1e12   : > { %v5950_v40 = vrot.slane %v5948_v9, 7 }
0x1e14   : > { %v5952_v42 = vsel %vm2998_vm8, 0.0, %v5950_v40  ;;  %v10733_v40 = vld [vmem:[%s10540_s1 + $0xe0] sm:$0xff] }
0x1e15   : > { %5955 = vperm.xlu1 %8419, %v5952_v42   ;;  %v2225_v24 = vpop.xlane.xlu1 %2224 }
0x1e19   : > { %v2231_v42 = vpop.xlane.xlu1 %2230 }
0x1e1f   : > { %v2228_v50 = vpop.xlane.xlu0 %2227 }
0x1e20   : > { %v2289_v32 = vmul.f32 0.125, %v2228_v50 }
0x1e22   : > { %v10677_v56 = vsub.f32 %v10557_v58, %v2289_v32 }
0x1e23   : > { %v10679_v18 = vpop.xlane.xlu0 %2176 }
0x1e24   : > { %v2353_v2 = vmul.f32 %v10677_v56, %v10677_v56 }
0x1e26   : > { %v2419_v57 = vsel %vm2174_vm1, %v2353_v2, 0.0 }
0x1e27   : > { %2420 = vadd.xlane.f32.xlu0 %v2419_v57  ;;  %v2180_v61 = vpop.xlane.xlu0 %2179  ;;  %v2259_v57 = vsel %vm2174_vm1, %v10733_v40, 0.0 }
0x1e28   : > { %v2273_v3 = vmul.f32 0.125, %v2180_v61 }
0x1e2a   : > { %v10685_v49 = vsub.f32 %v10577_v33, %v2273_v3  ;;  %v10744_v3 = vld [vmem:[%s10540_s1 + $0x60] sm:$0xff] }
0x1e2b   : > { %v2234_v4 = vpop.xlane.xlu0 %2233 }
0x1e2c   : > { %v2291_v51 = vmul.f32 0.125, %v2234_v4  ;;  %v2337_v58 = vmul.f32 %v10685_v49, %v10685_v49 }
0x1e2e   : > { %v10690_v38 = vsub.f32 %v10587_v6, %v2291_v51  ;;  %v2371_v36 = vsel %vm2174_vm1, %v2337_v58, 0.0  ;;  %v2288_v58 = vmul.f32 0.125, %v2225_v24 }
0x1e2f   : > { %2372 = vadd.xlane.f32.xlu0 %v2371_v36  ;;  %v2186_v27 = vpop.xlane.xlu0 %2185  ;;  %v2183_v36 = vpop.xlane.xlu1 %2182 }
0x1e30   : > { %v2275_v35 = vmul.f32 0.125, %v2186_v27  ;;  %v2355_v5 = vmul.f32 %v10690_v38, %v10690_v38 }
0x1e32   : > { %v10696_v33 = vsub.f32 %v10597_v39, %v2275_v35  ;;  %v2425_v37 = vsel %vm2174_vm1, %v2355_v5, 0.0  ;;  %v2199_v39 = vsel %vm2174_vm1, %v10700_v59, 0.0  ;;  %v2211_v35 = vsel %vm2174_vm1, %v10744_v3, 0.0 }
0x1e33   : > { %2426 = vadd.xlane.f32.xlu0 %v2425_v37  ;;  %v2240_v15 = vpop.xlane.xlu0 %2239  ;;  %v10755_v37 = vld [vmem:[%s10540_s1 + $0xf0] sm:$0xff] }
0x1e34   : > { %v2293_v6 = vmul.f32 0.125, %v2240_v15  ;;  %v2339_v29 = vmul.f32 %v10696_v33, %v10696_v33 }
0x1e36   : > { %v10705_v41 = vsub.f32 %v10607_v48, %v2293_v6  ;;  %v2377_v54 = vsel %vm2174_vm1, %v2339_v29, 0.0  ;;  %v10760_v29 = vsub.f32 %v10543_v34, %v2288_v58 }
0x1e37   : > { %2378 = vadd.xlane.f32.xlu0 %v2377_v54  ;;  %v2192_v62 = vpop.xlane.xlu0 %2191 }
0x1e38   : > { %v2277_v23 = vmul.f32 0.125, %v2192_v62  ;;  %v2357_v55 = vmul.f32 %v10705_v41, %v10705_v41  ;;  %v2265_v62 = vsel %vm2174_vm1, %v10755_v37, 0.0 }
0x1e39   : > { %2200 = vadd.xlane.f32.xlu1 %v2199_v39 }
0x1e3a   : > { %v10716_v21 = vsub.f32 %v10614_v12, %v2277_v23  ;;  %v2431_v48 = vsel %vm2174_vm1, %v2357_v55, 0.0  ;;  %v10770_v55 = vld [vmem:[%s10540_s1 + $0x70] sm:$0xff] }
0x1e3b   : > { %2432 = vadd.xlane.f32.xlu0 %v2431_v48  ;;  %v2246_v30 = vpop.xlane.xlu0 %2245  ;;  %v2237_v48 = vpop.xlane.xlu1 %2236 }
0x1e3c   : > { %v2295_v13 = vmul.f32 0.125, %v2246_v30  ;;  %v2341_v25 = vmul.f32 %v10716_v21, %v10716_v21  ;;  %v2292_v58 = vmul.f32 0.125, %v2237_v48 }
0x1e3d   : > { %2254 = vadd.xlane.f32.xlu1 %v2253_v0 }
0x1e3e   : > { %v10727_v60 = vsub.f32 %v10619_v16, %v2295_v13  ;;  %v2383_v12 = vsel %vm2174_vm1, %v2341_v25, 0.0  ;;  %v2217_v25 = vsel %vm2174_vm1, %v10770_v55, 0.0 }
0x1e3f   : > { %2384 = vadd.xlane.f32.xlu0 %v2383_v12  ;;  %v2198_v9 = vpop.xlane.xlu0 %2197 }
0x1e40   : > { %v2279_v50 = vmul.f32 0.125, %v2198_v9  ;;  %v2359_v32 = vmul.f32 %v10727_v60, %v10727_v60 }
0x1e41   : > { %2206 = vadd.xlane.f32.xlu1 %v2205_v43 }
0x1e42   : > { %v10738_v2 = vsub.f32 %v10624_v19, %v2279_v50  ;;  %v2437_v16 = vsel %vm2174_vm1, %v2359_v32, 0.0  ;;  %v2189_v50 = vpop.xlane.xlu1 %2188 }
0x1e43   : > { %2438 = vadd.xlane.f32.xlu0 %v2437_v16  ;;  %v2252_v61 = vpop.xlane.xlu0 %2251  ;;  %v2274_v16 = vmul.f32 0.125, %v2183_v36 }
0x1e44   : > { %v2297_v4 = vmul.f32 0.125, %v2252_v61  ;;  %v2343_v51 = vmul.f32 %v10738_v2, %v10738_v2 }
0x1e45   : > { %2260 = vadd.xlane.f32.xlu1 %v2259_v57  ;;  %v10806_v36 = vsub.f32 %v10554_v20, %v2274_v16 }
0x1e46   : > { %v10749_v19 = vsub.f32 %v10629_v14, %v2297_v4  ;;  %v2389_v27 = vsel %vm2174_vm1, %v2343_v51, 0.0  ;;  %v2272_v14 = vmul.f32 0.125, %v10679_v18  ;;  %v2352_v18 = vmul.f32 %v10760_v29, %v10760_v29 }
0x1e47   : > { %2390 = vadd.xlane.f32.xlu0 %v2389_v27  ;;  %v2204_v5 = vpop.xlane.xlu0 %2203  ;;  %v2338_v48 = vmul.f32 %v10806_v36, %v10806_v36 }
0x1e48   : > { %v2281_v15 = vmul.f32 0.125, %v2204_v5  ;;  %v2361_v6 = vmul.f32 %v10749_v19, %v10749_v19  ;;  %v10777_v30 = vsub.f32 %v10567_v45, %v2272_v14 }
0x1e49   : > { %2212 = vadd.xlane.f32.xlu1 %v2211_v35 }
0x1e4a   : > { %v10764_v54 = vsub.f32 %v10634_v8, %v2281_v15  ;;  %v2443_v39 = vsel %vm2174_vm1, %v2361_v6, 0.0  ;;  %v2290_v8 = vmul.f32 0.125, %v2231_v42  ;;  %v2416_v42 = vsel %vm2174_vm1, %v2352_v18, 0.0  ;;  %v2243_v15 = vpop.xlane.xlu1 %2242 }
0x1e4b   : > { %2444 = vadd.xlane.f32.xlu0 %v2443_v39  ;;  %v2258_v23 = vpop.xlane.xlu0 %2257  ;;  %v2336_v57 = vmul.f32 %v10777_v30, %v10777_v30  ;;  %v10812_v39 = vsub.f32 %v10562_v52, %v2292_v58 }
0x1e4c   : > { %v2299_v0 = vmul.f32 0.125, %v2258_v23  ;;  %v2345_v34 = vmul.f32 %v10764_v54, %v10764_v54  ;;  %v10789_v45 = vsub.f32 %v10549_v17, %v2290_v8 }
0x1e4d   : > { %2266 = vadd.xlane.f32.xlu1 %v2265_v62  ;;  %v2368_v35 = vsel %vm2174_vm1, %v2336_v57, 0.0 }
0x1e4e   : > { %v10780_v24 = vsub.f32 %v10639_v10, %v2299_v0  ;;  %v2395_v13 = vsel %vm2174_vm1, %v2345_v34, 0.0  ;;  %v2354_v17 = vmul.f32 %v10789_v45, %v10789_v45  ;;  %v2195_v8 = vpop.xlane.xlu1 %2194 }
0x1e4f   : > { %2396 = vadd.xlane.f32.xlu0 %v2395_v13  ;;  %v2210_v12 = vpop.xlane.xlu0 %2209 }
0x1e50   : > { %v2283_v43 = vmul.f32 0.125, %v2210_v12  ;;  %v2363_v9 = vmul.f32 %v10780_v24, %v10780_v24  ;;  %v2422_v23 = vsel %vm2174_vm1, %v2354_v17, 0.0  ;;  %v2374_v12 = vsel %vm2174_vm1, %v2338_v48, 0.0 }
0x1e51   : > { %2218 = vadd.xlane.f32.xlu1 %v2217_v25 }
0x1e52   : > { %v10792_v10 = vsub.f32 %v10644_v31, %v2283_v43  ;;  %v2449_v32 = vsel %vm2174_vm1, %v2363_v9, 0.0  ;;  %v2294_v43 = vmul.f32 0.125, %v2243_v15 }
0x1e53   : > { %2450 = vadd.xlane.f32.xlu0 %v2449_v32  ;;  %v2264_v61 = vpop.xlane.xlu0 %2263 }
0x1e54   : > { %v2301_v4 = vmul.f32 0.125, %v2264_v61  ;;  %v2347_v51 = vmul.f32 %v10792_v10, %v10792_v10  ;;  %v10843_v57 = vsub.f32 %v10582_v44, %v2294_v43  ;;  %v2278_v61 = vmul.f32 0.125, %v2195_v8 }
0x1e55   : > { %2417 = vadd.xlane.f32.xlu1 %v2416_v42 }
0x1e56   : > { %v10802_v31 = vsub.f32 %v10649_v7, %v2301_v4  ;;  %v2401_v27 = vsel %vm2174_vm1, %v2347_v51, 0.0  ;;  %v2276_v7 = vmul.f32 0.125, %v2189_v50  ;;  %v2249_v4 = vpop.xlane.xlu1 %2248 }
0x1e57   : > { %2402 = vadd.xlane.f32.xlu0 %v2401_v27  ;;  %v2216_v5 = vpop.xlane.xlu0 %2215  ;;  %v10850_v27 = vsub.f32 %v10592_v63, %v2278_v61 }
0x1e58   : > { %v2285_v6 = vmul.f32 0.125, %v2216_v5  ;;  %v2365_v14 = vmul.f32 %v10802_v31, %v10802_v31  ;;  %v10824_v52 = vsub.f32 %v10572_v1, %v2276_v7 }
0x1e59   : > { %2369 = vadd.xlane.f32.xlu1 %v2368_v35  ;;  %v2358_v35 = vmul.f32 %v10843_v57, %v10843_v57  ;;  %v2342_v15 = vmul.f32 %v10850_v27, %v10850_v27 }
0x1e5a   : > { %v10815_v62 = vsub.f32 %v10654_v53, %v2285_v6  ;;  %v2455_v20 = vsel %vm2174_vm1, %v2365_v14, 0.0  ;;  %v2356_v53 = vmul.f32 %v10812_v39, %v10812_v39  ;;  %v2340_v32 = vmul.f32 %v10824_v52, %v10824_v52 }
0x1e5b   : > { %2456 = vadd.xlane.f32.xlu0 %v2455_v20  ;;  %v2270_v0 = vpop.xlane.xlu0 %2269  ;;  %v2434_v5 = vsel %vm2174_vm1, %v2358_v35, 0.0  ;;  %v2386_v6 = vsel %vm2174_vm1, %v2342_v15, 0.0 }
0x1e5c   : > { %v2303_v34 = vmul.f32 0.125, %v2270_v0  ;;  %v2349_v18 = vmul.f32 %v10815_v62, %v10815_v62  ;;  %v2428_v1 = vsel %vm2174_vm1, %v2356_v53, 0.0  ;;  %v2380_v58 = vsel %vm2174_vm1, %v2340_v32, 0.0 }
0x1e5d   : > { %2423 = vadd.xlane.f32.xlu1 %v2422_v23 }
0x1e5e   : > { %v10829_v13 = vsub.f32 %v10659_v26, %v2303_v34  ;;  %v2407_v25 = vsel %vm2174_vm1, %v2349_v18, 0.0 }
0x1e5f   : > { %2408 = vadd.xlane.f32.xlu0 %v2407_v25  ;;  %v2222_v9 = vpop.xlane.xlu0 %2221 }
0x1e60   : > { %v2287_v42 = vmul.f32 0.125, %v2222_v9  ;;  %v2367_v50 = vmul.f32 %v10829_v13, %v10829_v13 }
0x1e61   : > { %2375 = vadd.xlane.f32.xlu1 %v2374_v12 }
0x1e62   : > { %v10839_v26 = vsub.f32 %v10664_v28, %v2287_v42  ;;  %v2461_v16 = vsel %vm2174_vm1, %v2367_v50, 0.0  ;;  %v2296_v28 = vmul.f32 0.125, %v2249_v4 }
0x1e63   : > { %2462 = vadd.xlane.f32.xlu0 %v2461_v16 }
0x1e64   : > { %v2351_v51 = vmul.f32 %v10839_v26, %v10839_v26  ;;  %v10855_v44 = vsub.f32 %v10602_v46, %v2296_v28 }
0x1e65   : > { %2429 = vadd.xlane.f32.xlu1 %v2428_v1 }
0x1e66   : > { %v2413_v17 = vsel %vm2174_vm1, %v2351_v51, 0.0  ;;  %v2360_v63 = vmul.f32 %v10855_v44, %v10855_v44 }
0x1e67   : > { %2414 = vadd.xlane.f32.xlu0 %v2413_v17 }
0x1e68   : > { %v2440_v14 = vsel %vm2174_vm1, %v2360_v63, 0.0 }
0x1e69   : > { %2381 = vadd.xlane.f32.xlu1 %v2380_v58 }
0x1e6d   : > { %2435 = vadd.xlane.f32.xlu1 %v2434_v5 }
0x1e71   : > { %2387 = vadd.xlane.f32.xlu1 %v2386_v6 }
0x1e75   : > { %2441 = vadd.xlane.f32.xlu1 %v2440_v14 }
0x1e94   : > { %v5956_v7 = vpop.permute.xlu1 %5955 }
0x1eb4   : > { %v2421_v1 = vpop.xlane.xlu0 %2420 }
0x1ebc   : > { %v2373_v35 = vpop.xlane.xlu0 %2372 }
0x1ebd   : > { %v6024_v20 = vpop.f32.mrb[66].mxu1 }
0x1ebe   : > { %v6025_v23 = vadd.f32 %v6024_v20, %v5956_v7  ;;  %v6026_v46 = vpop.f32.mrb[67].mxu1 }
0x1ebf   : > { %v6027_v48 = vadd.f32 %v6026_v46, %v5956_v7 }
0x1ec0   : > { %v6029_v0 = vmul.f32 0.17677669, %v6025_v23 }
0x1ec1   : > { %v6030_v34 = vmul.f32 0.17677669, %v6027_v48 }
0x1ec2   : > { %v6031_v18 = vsel %vm3086_vm9, %v6029_v0, -inf }
0x1ec3   : > { %v6032_v53 = vrot.slane %v6031_v18, 4  ;;  %v6038_v8 = vsel %vm3086_vm9, %v6030_v34, -inf }
0x1ec4   : > { %v6039_v25 = vrot.slane %v6038_v8, 4 }
0x1ec5   : > { %v6033_v12 = vmax.f32 %v6031_v18, %v6032_v53 }
0x1ec6   : > { %v6040_v43 = vmax.f32 %v6038_v8, %v6039_v25  ;;  %v2201_v9 = vpop.xlane.xlu1 %2200  ;;  %v2427_v8 = vpop.xlane.xlu0 %2426 }
0x1ec7   : > { %v6034_v42 = vrot.slane %v6033_v12, 2  ;;  %v2280_v50 = vmul.f32 0.125, %v2201_v9 }
0x1ec8   : > { %v6041_v32 = vrot.slane %v6040_v43, 2 }
0x1ec9   : > { %v6035_v16 = vmax.f32 %v6033_v12, %v6034_v42  ;;  %v10867_v61 = vsub.f32 %v10700_v59, %v2280_v50 }
0x1eca   : > { %v6042_v4 = vmax.f32 %v6040_v43, %v6041_v32  ;;  %v2255_v51 = vpop.xlane.xlu1 %2254  ;;  %v2379_v32 = vpop.xlane.xlu0 %2378 }
0x1ecb   : > { %v6036_v58 = vrot.slane %v6035_v16, 1  ;;  %v2298_v17 = vmul.f32 0.125, %v2255_v51  ;;  %v2344_v28 = vmul.f32 %v10867_v61, %v10867_v61 }
0x1ecc   : > { %v6043_v5 = vrot.slane %v6042_v4, 1 }
0x1ecd   : > { %v6037_v15 = vmax.f32 %v6035_v16, %v6036_v58  ;;  %v10872_v6 = vsub.f32 %v10711_v11, %v2298_v17  ;;  %v2392_v7 = vsel %vm2174_vm1, %v2344_v28, 0.0  ;;  %v2465_v16 = vmul.f32 0.125, %v2373_v35 }
0x1ece   : > { %v6044_v63 = vmax.f32 %v6042_v4, %v6043_v5  ;;  %v2207_v14 = vpop.xlane.xlu1 %2206  ;;  %2393 = vadd.xlane.f32.xlu1 %v2392_v7  ;;  %v2433_v7 = vpop.xlane.xlu0 %2432 }
0x1ecf   : > { %v6045_v20 = vsub.f32 %v6029_v0, %v6037_v15  ;;  %v2282_v59 = vmul.f32 0.125, %v2207_v14  ;;  %v2362_v23 = vmul.f32 %v10872_v6, %v10872_v6  ;;  %v2497_v5 = vadd.f32 1e-05, %v2465_v16 }
0x1ed0   : > { %v6046_v46 = vsub.f32 %v6030_v34, %v6044_v63  ;;  %v2483_v14 = vmul.f32 0.125, %v2427_v8 }
0x1ed1   : > { %v6047_v48 = vmul.f32 1.442695, %v6045_v20  ;;  %v10878_v18 = vsub.f32 %v10722_v22, %v2282_v59  ;;  %v2446_v11 = vsel %vm2174_vm1, %v2362_v23, 0.0  ;;  %v2481_v22 = vmul.f32 0.125, %v2421_v1 }
0x1ed2   : > { %v6049_v53 = vmul.f32 1.442695, %v6046_v46  ;;  %v2261_v25 = vpop.xlane.xlu1 %2260  ;;  %2447 = vadd.xlane.f32.xlu1 %v2446_v11  ;;  %v2385_v16 = vpop.xlane.xlu0 %2384 }
0x1ed3   : > { %8574 = vpow2.f32 %v6047_v48  ;;  %v2300_v12 = vmul.f32 0.125, %v2261_v25  ;;  %v2346_v0 = vmul.f32 %v10878_v18, %v10878_v18  ;;  %v2513_v17 = vadd.f32 1e-05, %v2481_v22 }
0x1ed4   : > { %8576 = vpow2.f32 %v6049_v53 }
0x1ed5   : > { %v10884_v43 = vsub.f32 %v10733_v40, %v2300_v12  ;;  %v2398_v34 = vsel %vm2174_vm1, %v2346_v0, 0.0  ;;  %8578 = vrsqrt.f32 %v2513_v17  ;;  %v2515_v12 = vadd.f32 1e-05, %v2483_v14 }
0x1ed6   : > { %v2213_v9 = vpop.xlane.xlu1 %2212  ;;  %2399 = vadd.xlane.f32.xlu1 %v2398_v34  ;;  %8580 = vrsqrt.f32 %v2497_v5 }
0x1ed7   : > { %v2284_v42 = vmul.f32 0.125, %v2213_v9  ;;  %v2364_v50 = vmul.f32 %v10884_v43, %v10884_v43  ;;  %8582 = vrsqrt.f32 %v2515_v12  ;;  %v11498_v12 = vld [vmem:[#allocation23_spill] sm:$0xff] }
0x1ed9   : > { %v10890_v4 = vsub.f32 %v10744_v3, %v2284_v42  ;;  %v2452_v51 = vsel %vm2174_vm1, %v2364_v50, 0.0 }
0x1eda   : > { %v2267_v58 = vpop.xlane.xlu1 %2266  ;;  %2453 = vadd.xlane.f32.xlu1 %v2452_v51 }
0x1edb   : > { %v2302_v40 = vmul.f32 0.125, %v2267_v58  ;;  %v2348_v28 = vmul.f32 %v10890_v4, %v10890_v4 }
0x1edd   : > { %v10895_v1 = vpop.eup %8574  ;;  %v10898_v15 = vsub.f32 %v10755_v37, %v2302_v40  ;;  %v2404_v35 = vsel %vm2174_vm1, %v2348_v28, 0.0  ;;  %v2467_v37 = vmul.f32 0.125, %v2379_v32 }
0x1ede   : > { %v10901_v63 = vpop.eup %8576  ;;  %v6051_v3 = vsel %vm3086_vm9, %v10895_v1, 0.0  ;;  %v2219_v20 = vpop.xlane.xlu1 %2218  ;;  %2405 = vadd.xlane.f32.xlu1 %v2404_v35 }
0x1edf   : > { %v6052_v59 = vrot.slane %v6051_v3, 4  ;;  %v6058_v23 = vsel %vm3086_vm9, %v10901_v63, 0.0  ;;  %v2286_v46 = vmul.f32 0.125, %v2219_v20  ;;  %v2366_v53 = vmul.f32 %v10898_v15, %v10898_v15 }
0x1ee0   : > { %v6059_v48 = vrot.slane %v6058_v23, 4  ;;  %v2499_v32 = vadd.f32 1e-05, %v2467_v37  ;;  %v2485_v20 = vmul.f32 0.125, %v2433_v7 }
0x1ee1   : > { %v6053_v25 = vadd.f32 %v6052_v59, %v6051_v3  ;;  %v10910_v11 = vsub.f32 %v10770_v55, %v2286_v46  ;;  %v2458_v34 = vsel %vm2174_vm1, %v2366_v53, 0.0  ;;  %v8579_v3 = vpop.eup %8578 }
0x1ee2   : > { %v6060_v8 = vadd.f32 %v6059_v48, %v6058_v23  ;;  %v2418_v0 = vpop.xlane.xlu1 %2417  ;;  %2459 = vadd.xlane.f32.xlu1 %v2458_v34  ;;  %v2173_v23 = vld [vmem:[%s11497_s26] sm:$0x3]  ;;  %v2439_v48 = vpop.xlane.xlu0 %2438  ;;  %v2517_v34 = vadd.f32 1e-05, %v2485_v20  ;;  %s8760_s26 = smov [#allocation2]  }
0x1ee3   : > { %v6054_v9 = vrot.slane %v6053_v25, 2  ;;  %v2480_v22 = vmul.f32 0.125, %v2418_v0  ;;  %v2350_v42 = vmul.f32 %v10910_v11, %v10910_v11  ;;  %v8581_v53 = vpop.eup %8580  ;;  %v10921_v0 = vrot.slane %v2173_v23, %v11498_v12  ;;  %s8659_s0 = sshll.u32 %s8760_s26, 4  ;;  %s8660_s0 = int_to_ptr.vmem [resolvable:$false] %s8659_s0 }
0x1ee4   : > { %v6061_v50 = vrot.slane %v6060_v8, 2  ;;  %s8661_s29 = scalar_lea.vmem %s8660_s0, 256  ;;  %p8662_p0 = scmp.lt.s32.totalorder %s6393_s6, %s8660_s0 }
0x1ee5   : > { %v6055_v51 = vadd.f32 %v6054_v9, %v6053_v25  ;;  %v2512_v58 = vadd.f32 1e-05, %v2480_v22  ;;  %v2410_v55 = vsel %vm2174_vm1, %v2350_v42, 0.0  ;;  %v2469_v9 = vmul.f32 0.125, %v2385_v16  ;;  %p8663_p1 = scmp.lt.s32.totalorder %s8661_s29, %s8655_s22 }
0x1ee6   : > { %v6062_v17 = vadd.f32 %v6061_v50, %v6060_v8  ;;  %v2370_v40 = vpop.xlane.xlu1 %2369  ;;  %2411 = vadd.xlane.f32.xlu1 %v2410_v55  ;;  %v2577_v8 = vmul.f32 %v8579_v3, %v10677_v56  ;;  %v2561_v22 = vmul.f32 %v8581_v53, %v10685_v49  ;;  %v2487_v42 = vmul.f32 0.125, %v2439_v48 }
0x1ee7   : > { %v6056_v28 = vrot.slane %v6055_v51, 1  ;;  %8584 = vrsqrt.f32 %v2512_v58  ;;  %v2464_v5 = vmul.f32 0.125, %v2370_v40  ;;  %v2391_v58 = vpop.xlane.xlu0 %2390  ;;  %v2501_v56 = vadd.f32 1e-05, %v2469_v9  ;;  %p8664_p2 = por %p8663_p1, %p8662_p0 }
0x1ee8   : > { %v6063_v35 = vrot.slane %v6062_v17, 1  ;;  %8586 = vrsqrt.f32 %v2499_v32 }
0x1ee9   : > { %v6057_v14 = vadd.f32 %v6056_v28, %v6055_v51  ;;  %v2496_v59 = vadd.f32 1e-05, %v2464_v5  ;;  %v8583_v51 = vpop.eup %8582  ;;  %v2613_v5 = vmul.f32 %v10921_v0, %v2577_v8  ;;  %p8665_p3 = pnand %p8664_p2, %p8658_p13 }
0x1eea   : > { %v6064_v46 = vadd.f32 %v6063_v35, %v6062_v17  ;;  %v2424_v37 = vpop.xlane.xlu1 %2423  ;;  %v11499_v17 = vld [vmem:[#allocation24_spill] sm:$0xff]  ;;  %v2519_v35 = vadd.f32 1e-05, %v2487_v42 }
0x1eeb   : > { %8588 = vrcp.f32 %v6057_v14  ;;  %v2482_v25 = vmul.f32 0.125, %v2424_v37  ;;  %v10925_v55 = vrot.slane %v2173_v23, %v11499_v17  ;;  %v2597_v14 = vmul.f32 %v10921_v0, %v2561_v22 }
0x1eec   : > { %8590 = vrcp.f32 %v6064_v46  ;;  %v2471_v46 = vmul.f32 0.125, %v2391_v58 }
0x1eed   : > { %8592 = vrsqrt.f32 %v2496_v59  ;;  %v2514_v7 = vadd.f32 1e-05, %v2482_v25  ;;  %v2579_v59 = vmul.f32 %v8583_v51, %v10690_v38  ;;  %v2649_v25 = vadd.f32 %v10925_v55, %v2613_v5 }
0x1eee   : > { %v2376_v50 = vpop.xlane.xlu1 %2375  ;;  %v2633_v38 = vadd.f32 %v10925_v55, %v2597_v14 }
0x1eef   : > { %8594 = vrsqrt.f32 %v2514_v7  ;;  %v2466_v32 = vmul.f32 0.125, %v2376_v50 }
0x1ef0   : > { %8596 = vrsqrt.f32 %v2517_v34 }
0x1ef1   : > { %v8585_v40 = vpop.eup %8584  ;;  %v2498_v28 = vadd.f32 1e-05, %v2466_v32  ;;  %v2503_v32 = vadd.f32 1e-05, %v2471_v46 }
0x1ef2   : > { %v8587_v16 = vpop.eup %8586  ;;  %v2430_v3 = vpop.xlane.xlu1 %2429  ;;  %v2576_v49 = vmul.f32 %v8585_v40, %v10760_v29 }
0x1ef3   : > { %8598 = vrsqrt.f32 %v2498_v28  ;;  %v2484_v20 = vmul.f32 0.125, %v2430_v3  ;;  %v2563_v37 = vmul.f32 %v8587_v16, %v10696_v33  ;;  %v2445_v29 = vpop.xlane.xlu0 %2444  ;;  %v2615_v33 = vmul.f32 %v10921_v0, %v2579_v59 }
0x1ef4   : > { %v2612_v23 = vmul.f32 %v10921_v0, %v2576_v49  ;;  %8600 = vrsqrt.f32 %v2501_v56  ;;  %v2489_v40 = vmul.f32 0.125, %v2445_v29 }
0x1ef5   : > { %v8589_v48 = vpop.eup %8588  ;;  %v2516_v53 = vadd.f32 1e-05, %v2484_v20  ;;  %8602 = vrsqrt.f32 %v2519_v35  ;;  %v2599_v28 = vmul.f32 %v10921_v0, %v2563_v37 }
0x1ef6   : > { %v8591_v8 = vpop.eup %8590  ;;  %v6066_v12 = vmul.f32 %v8589_v48, %v10895_v1  ;;  %v2382_v34 = vpop.xlane.xlu1 %2381  ;;  %v2648_v9 = vadd.f32 %v10925_v55, %v2612_v23  ;;  %v2521_v37 = vadd.f32 1e-05, %v2489_v40 }
0x1ef7   : > { %v8593_v7 = vpop.eup %8592  ;;  %v6068_v22 = vmul.f32 %v8591_v8, %v10901_v63  ;;  %8604 = vrsqrt.f32 %v2516_v53  ;;  %v2468_v42 = vmul.f32 0.125, %v2382_v34 }
0x1ef8   : > { %v10939_v50 = vadd.f32 1e-08, %v6066_v12  ;;  %v2560_v51 = vmul.f32 %v8593_v7, %v10777_v30  ;;  %v8270_v1 = vpack.c.bf16 %v2649_v25, %v2648_v9 }
0x1ef9   : > { %v8595_v58 = vpop.eup %8594  ;;  %v10942_v17 = vadd.f32 1e-08, %v6068_v22  ;;  %v2500_v56 = vadd.f32 1e-05, %v2468_v42  ;;  %v2651_v42 = vadd.f32 %v10925_v55, %v2615_v33 }
0x1efa   : > { %v2436_v5 = vpop.xlane.xlu1 %2435  ;;  %8271 = vmatprep.subr.bf16.mxu1 %v8270_v1  ;;  %v2596_v63 = vmul.f32 %v10921_v0, %v2560_v51  ;;  %v6079_v16 = vsel %vm2998_vm8, %v10939_v50, 0.0  ;;  %v6071_v35 = vsel %vm3127_vm10, %v10939_v50, 0.0  ;;  %v2578_v30 = vmul.f32 %v8595_v58, %v10789_v45  ;;  %v8597_v3 = vpop.eup %8596 }
0x1efb   : > { %8606 = vrsqrt.f32 %v2500_v56  ;;  %v2486_v49 = vmul.f32 0.125, %v2436_v5  ;;  %v6080_v14 = vsel %vm2998_vm8, %v10942_v17, 0.0  ;;  %v6072_v20 = vsel %vm3127_vm10, %v10942_v17, 0.0 }
0x1efc   : > { %8608 = vrsqrt.f32 %v2503_v32  ;;  %v2632_v59 = vadd.f32 %v10925_v55, %v2596_v63  ;;  %v6081_v46 = vadd.f32 %v6080_v14, %v6079_v16  ;;  %v6073_v23 = vadd.f32 %v6072_v20, %v6071_v35 }
0x1efd   : > { %v8599_v48 = vpop.eup %8598  ;;  %v2518_v53 = vadd.f32 1e-05, %v2486_v49  ;;  %v2614_v45 = vmul.f32 %v10921_v0, %v2578_v30  ;;  %v6354_v25 = vcombine.low %v10939_v50, %v10942_v17  ;;  %v2581_v34 = vmul.f32 %v8597_v3, %v10705_v41 }
0x1efe   : > { %v2562_v8 = vmul.f32 %v8599_v48, %v10806_v36  ;;  %v2388_v12 = vpop.xlane.xlu1 %2387  ;;  %v8272_v29 = vpack.c.bf16 %v2633_v38, %v2632_v59  ;;  %6082 = vadd.xlane.f32.xlu0 %v6081_v46  ;;  %6074 = vadd.xlane.f32.xlu1 %v6073_v23  ;;  %v8601_v9 = vpop.eup %8600  ;;  %v2635_v1 = vadd.f32 %v10925_v55, %v2599_v28 }
0x1eff   : > { %8610 = vrsqrt.f32 %v2518_v53  ;;  %v2470_v7 = vmul.f32 0.125, %v2388_v12  ;;  %v2650_v22 = vadd.f32 %v10925_v55, %v2614_v45  ;;  %6356 = vst [vmem:[%s10965_s4] sm:$0xff] %v6354_v25  ;;  %v8603_v32 = vpop.eup %8602  ;;  %v2565_v58 = vmul.f32 %v8601_v9, %v10716_v21 }
0x1f00   : > { %8273 = vmatpush3.bf16.msra.mxu1 %v8272_v29  ;;  %v2598_v36 = vmul.f32 %v10921_v0, %v2562_v8  ;;  %8612 = vrsqrt.f32 %v2521_v37  ;;  %v2617_v5 = vmul.f32 %v10921_v0, %v2581_v34  ;;  %v2583_v49 = vmul.f32 %v8603_v32, %v10727_v60 }
0x1f01   : > { %v8605_v38 = vpop.eup %8604  ;;  %v2502_v51 = vadd.f32 1e-05, %v2470_v7  ;;  %v8274_v41 = vpack.c.bf16 %v2651_v42, %v2650_v22  ;;  %v2601_v20 = vmul.f32 %v10921_v0, %v2565_v58 }
0x1f02   : > { %v2442_v40 = vpop.xlane.xlu1 %2441  ;;  %v2634_v33 = vadd.f32 %v10925_v55, %v2598_v36  ;;  %v2580_v56 = vmul.f32 %v8605_v38, %v10812_v39  ;;  %v2653_v39 = vadd.f32 %v10925_v55, %v2617_v5  ;;  %v2619_v48 = vmul.f32 %v10921_v0, %v2583_v49 }
0x1f03   : > { %8614 = vrsqrt.f32 %v2502_v51  ;;  %v2488_v63 = vmul.f32 0.125, %v2442_v40  ;;  %8275 = vmatprep.subr.bf16.mxu1 %v8274_v41  ;;  %v6184_v40 = vld [vmem:[%s11249_s18 + $0x80] sm:$0xff] }
0x1f04   : > { %v8276_v16 = vpack.c.bf16 %v2635_v1, %v2634_v33  ;;  %v2616_v35 = vmul.f32 %v10921_v0, %v2580_v56  ;;  %v2655_v29 = vadd.f32 %v10925_v55, %v2619_v48  ;;  %v2397_v56 = vpop.xlane.xlu0 %2396 }
0x1f05   : > { %v8607_v30 = vpop.eup %8606  ;;  %v2520_v3 = vadd.f32 1e-05, %v2488_v63 }
0x1f06   : > { %v8609_v28 = vpop.eup %8608  ;;  %v2564_v21 = vmul.f32 %v8607_v30, %v10824_v52  ;;  %8277 = vmatpush3.bf16.msra.mxu1 %v8276_v16  ;;  %v2652_v14 = vadd.f32 %v10925_v55, %v2616_v35  ;;  %v2637_v52 = vadd.f32 %v10925_v55, %v2601_v20  ;;  %v2473_v16 = vmul.f32 0.125, %v2397_v56 }
0x1f07   : > { %8616 = vrsqrt.f32 %v2520_v3  ;;  %v2567_v37 = vmul.f32 %v8609_v28, %v10738_v2 }
0x1f08   : > { %v8278_v59 = vpack.c.bf16 %v2653_v39, %v2652_v14  ;;  %v2600_v46 = vmul.f32 %v10921_v0, %v2564_v21  ;;  %v2451_v5 = vpop.xlane.xlu0 %2450  ;;  %v2505_v3 = vadd.f32 1e-05, %v2473_v16 }
0x1f09   : > { %v8611_v23 = vpop.eup %8610  ;;  %v2603_v2 = vmul.f32 %v10921_v0, %v2567_v37  ;;  %v2491_v35 = vmul.f32 0.125, %v2451_v5 }
0x1f0a   : > { %8279 = vmatprep.subr.bf16.mxu1 %v8278_v59  ;;  %v2636_v60 = vadd.f32 %v10925_v55, %v2600_v46  ;;  %v2582_v53 = vmul.f32 %v8611_v23, %v10843_v57  ;;  %v8613_v45 = vpop.eup %8612  ;;  %8618 = vrsqrt.f32 %v2505_v3 }
0x1f0b   : > { %v2585_v7 = vmul.f32 %v8613_v45, %v10749_v19  ;;  %v2639_v36 = vadd.f32 %v10925_v55, %v2603_v2  ;;  %v2523_v49 = vadd.f32 1e-05, %v2491_v35 }
0x1f0c   : > { %v8280_v25 = vpack.c.bf16 %v2637_v52, %v2636_v60  ;;  %v2618_v8 = vmul.f32 %v10921_v0, %v2582_v53  ;;  %v2403_v63 = vpop.xlane.xlu0 %2402 }
0x1f0d   : > { %v8615_v12 = vpop.eup %8614  ;;  %v2475_v28 = vmul.f32 0.125, %v2403_v63  ;;  %8620 = vrsqrt.f32 %v2523_v49 }
0x1f0e   : > { %v2566_v34 = vmul.f32 %v8615_v12, %v10850_v27  ;;  %8281 = vmatpush3.bf16.msra.mxu1 %v8280_v25  ;;  %v2654_v9 = vadd.f32 %v10925_v55, %v2618_v8  ;;  %v2621_v27 = vmul.f32 %v10921_v0, %v2585_v7 }
0x1f0f   : > { %v2507_v20 = vadd.f32 1e-05, %v2475_v28 }
0x1f10   : > { %v8282_v22 = vpack.c.bf16 %v2655_v29, %v2654_v9  ;;  %v2602_v42 = vmul.f32 %v10921_v0, %v2566_v34  ;;  %v2657_v19 = vadd.f32 %v10925_v55, %v2621_v27  ;;  %v2457_v30 = vpop.xlane.xlu0 %2456 }
0x1f11   : > { %v8617_v57 = vpop.eup %8616  ;;  %v2493_v59 = vmul.f32 0.125, %v2457_v30 }
0x1f12   : > { %8283 = vmatprep.subr.bf16.mxu1 %v8282_v22  ;;  %v2638_v32 = vadd.f32 %v10925_v55, %v2602_v42  ;;  %v2584_v38 = vmul.f32 %v8617_v57, %v10855_v44  ;;  %v6185_v44 = vld [vmem:[%s11249_s18 + $0x88] sm:$0xff] }
0x1f13   : > { %v8238_v33 = vpack.c.bf16 %v6185_v44, %v6184_v40  ;;  %v2525_v52 = vadd.f32 1e-05, %v2493_v59 }
0x1f14   : > { %v8284_v51 = vpack.c.bf16 %v2639_v36, %v2638_v32  ;;  %v2620_v41 = vmul.f32 %v10921_v0, %v2584_v38  ;;  %v2409_v21 = vpop.xlane.xlu0 %2408  ;;  %v8619_v25 = vpop.eup %8618 }
0x1f15   : > { %8239 = vmatprep.subr.bf16.mxu0 %v8238_v33  ;;  %v2477_v37 = vmul.f32 0.125, %v2409_v21  ;;  %v2569_v2 = vmul.f32 %v8619_v25, %v10764_v54 }
0x1f16   : > { %8285 = vmatpush3.bf16.msra.mxu1 %v8284_v51  ;;  %v2656_v1 = vadd.f32 %v10925_v55, %v2620_v41 }
0x1f17   : > { %v2509_v12 = vadd.f32 1e-05, %v2477_v37  ;;  %v8621_v9 = vpop.eup %8620 }
0x1f18   : > { %v8286_v58 = vpack.c.bf16 %v2657_v19, %v2656_v1  ;;  %v2463_v60 = vpop.xlane.xlu0 %2462  ;;  %v2587_v27 = vmul.f32 %v8621_v9, %v10780_v24  ;;  %v2605_v1 = vmul.f32 %v10921_v0, %v2569_v2 }
0x1f19   : > { %v2495_v29 = vmul.f32 0.125, %v2463_v60 }
0x1f1a   : > { %8287 = vmatprep.subr.bf16.mxu1 %v8286_v58  ;;  %v2623_v56 = vmul.f32 %v10921_v0, %v2587_v27 }
0x1f1b   : > { %v2527_v32 = vadd.f32 1e-05, %v2495_v29 }
0x1f1c   : > { %v2415_v7 = vpop.xlane.xlu0 %2414 }
0x1f1d   : > { %v2479_v36 = vmul.f32 0.125, %v2415_v7 }
0x1f1f   : > { %v2511_v44 = vadd.f32 1e-05, %v2479_v36 }
0x1f5b   : > { %v2394_v14 = vpop.xlane.xlu1 %2393 }
0x1f5c   : > { %v2472_v39 = vmul.f32 0.125, %v2394_v14  ;;  %v2659_v14 = vadd.f32 %v10925_v55, %v2623_v56 }
0x1f5e   : > { %v2504_v46 = vadd.f32 1e-05, %v2472_v39 }
0x1f5f   : > { %v2448_v23 = vpop.xlane.xlu1 %2447 }
0x1f60   : > { %8622 = vrsqrt.f32 %v2504_v46  ;;  %v2490_v48 = vmul.f32 0.125, %v2448_v23 }
0x1f61   : > { %8624 = vrsqrt.f32 %v2507_v20 }
0x1f62   : > { %v2522_v53 = vadd.f32 1e-05, %v2490_v48 }
0x1f63   : > { %v2400_v45 = vpop.xlane.xlu1 %2399 }
0x1f64   : > { %8626 = vrsqrt.f32 %v2522_v53  ;;  %v2474_v8 = vmul.f32 0.125, %v2400_v45 }
0x1f65   : > { %8628 = vrsqrt.f32 %v2525_v52 }
0x1f66   : > { %v2506_v34 = vadd.f32 1e-05, %v2474_v8 }
0x1f67   : > { %v2454_v22 = vpop.xlane.xlu1 %2453 }
0x1f68   : > { %8630 = vrsqrt.f32 %v2506_v34  ;;  %v2492_v42 = vmul.f32 0.125, %v2454_v22 }
0x1f69   : > { %8632 = vrsqrt.f32 %v2509_v12 }
0x1f6a   : > { %v8623_v57 = vpop.eup %8622  ;;  %v2524_v38 = vadd.f32 1e-05, %v2492_v42 }
0x1f6b   : > { %v2568_v51 = vmul.f32 %v8623_v57, %v10867_v61  ;;  %v2406_v41 = vpop.xlane.xlu1 %2405  ;;  %v8625_v19 = vpop.eup %8624  ;;  %v2641_v61 = vadd.f32 %v10925_v55, %v2605_v1 }
0x1f6c   : > { %8634 = vrsqrt.f32 %v2524_v38  ;;  %v2476_v58 = vmul.f32 0.125, %v2406_v41  ;;  %v2571_v5 = vmul.f32 %v8625_v19, %v10792_v10 }
0x1f6d   : > { %v2604_v54 = vmul.f32 %v10921_v0, %v2568_v51  ;;  %8636 = vrsqrt.f32 %v2527_v32 }
0x1f6e   : > { %v8627_v40 = vpop.eup %8626  ;;  %v2508_v33 = vadd.f32 1e-05, %v2476_v58 }
0x1f6f   : > { %v2460_v63 = vpop.xlane.xlu1 %2459  ;;  %v2640_v24 = vadd.f32 %v10925_v55, %v2604_v54  ;;  %v2586_v16 = vmul.f32 %v8627_v40, %v10872_v6  ;;  %v8629_v35 = vpop.eup %8628  ;;  %v2607_v6 = vmul.f32 %v10921_v0, %v2571_v5 }
0x1f70   : > { %8638 = vrsqrt.f32 %v2508_v33  ;;  %v2494_v30 = vmul.f32 0.125, %v2460_v63  ;;  %v2589_v46 = vmul.f32 %v8629_v35, %v10802_v31 }
0x1f71   : > { %v8288_v3 = vpack.c.bf16 %v2641_v61, %v2640_v24  ;;  %v2622_v49 = vmul.f32 %v10921_v0, %v2586_v16  ;;  %8640 = vrsqrt.f32 %v2511_v44  ;;  %v2643_v45 = vadd.f32 %v10925_v55, %v2607_v6  ;;  %v6168_v24 = vld [vmem:[%s11249_s18] sm:$0xff]  ;;  %v6189_v6 = vld [vmem:[%s11249_s18 + $0xa8] sm:$0xff] }
0x1f72   : > { %v8631_v28 = vpop.eup %8630  ;;  %v2526_v21 = vadd.f32 1e-05, %v2494_v30  ;;  %v2625_v8 = vmul.f32 %v10921_v0, %v2589_v46 }
0x1f73   : > { %v8633_v39 = vpop.eup %8632  ;;  %v2570_v10 = vmul.f32 %v8631_v28, %v10878_v18  ;;  %v2412_v20 = vpop.xlane.xlu1 %2411  ;;  %8289 = vmatpush3.bf16.msra.mxu1 %v8288_v3  ;;  %v2658_v59 = vadd.f32 %v10925_v55, %v2622_v49  ;;  %v6186_v3 = vld [vmem:[%s11249_s18 + $0x90] sm:$0xff]  ;;  %v6187_v49 = vld [vmem:[%s11249_s18 + $0x98] sm:$0xff] }
0x1f74   : > { %8642 = vrsqrt.f32 %v2526_v21  ;;  %v2478_v23 = vmul.f32 0.125, %v2412_v20  ;;  %v2573_v52 = vmul.f32 %v8633_v39, %v10815_v62  ;;  %v2661_v7 = vadd.f32 %v10925_v55, %v2625_v8  ;;  %v6171_v20 = vld [vmem:[%s11249_s18 + $0x18] sm:$0xff]  ;;  %v6192_v8 = vld [vmem:[%s11249_s18 + $0xc0] sm:$0xff] }
0x1f75   : > { %v8290_v48 = vpack.c.bf16 %v2659_v14, %v2658_v59  ;;  %v2606_v37 = vmul.f32 %v10921_v0, %v2570_v10  ;;  %v6170_v10 = vld [vmem:[%s11249_s18 + $0x10] sm:$0xff]  ;;  %v6188_v59 = vld [vmem:[%s11249_s18 + $0xa0] sm:$0xff] }
0x1f76   : > { %v8635_v60 = vpop.eup %8634  ;;  %v2510_v53 = vadd.f32 1e-05, %v2478_v23  ;;  %v2609_v9 = vmul.f32 %v10921_v0, %v2573_v52  ;;  %v8244_v46 = vpack.c.bf16 %v6171_v20, %v6170_v10  ;;  %v8246_v23 = vpack.c.bf16 %v6189_v6, %v6188_v59  ;;  %v6191_v52 = vld [vmem:[%s11249_s18 + $0xb8] sm:$0xff] }
0x1f77   : > { %8291 = vmatprep.subr.bf16.mxu1 %v8290_v48  ;;  %v2642_v18 = vadd.f32 %v10925_v55, %v2606_v37  ;;  %v2588_v25 = vmul.f32 %v8635_v60, %v10884_v43  ;;  %v8637_v12 = vpop.eup %8636  ;;  %v6172_v48 = vld [vmem:[%s11249_s18 + $0x20] sm:$0xff]  ;;  %v6173_v37 = vld [vmem:[%s11249_s18 + $0x28] sm:$0xff]  ;;  %v6190_v60 = vld [vmem:[%s11249_s18 + $0xb0] sm:$0xff] }
0x1f78   : > { %8644 = vrsqrt.f32 %v2510_v53  ;;  %v2591_v22 = vmul.f32 %v8637_v12, %v10829_v13  ;;  %v2645_v36 = vadd.f32 %v10925_v55, %v2609_v9  ;;  %v8248_v53 = vpack.c.bf16 %v6173_v37, %v6172_v48  ;;  %v6193_v12 = vld [vmem:[%s11249_s18 + $0xc8] sm:$0xff] }
0x1f79   : > { %v8292_v31 = vpack.c.bf16 %v2643_v45, %v2642_v18  ;;  %v2624_v29 = vmul.f32 %v10921_v0, %v2588_v25  ;;  %v8250_v18 = vpack.c.bf16 %v6191_v52, %v6190_v60  ;;  %v6174_v45 = vld [vmem:[%s11249_s18 + $0x30] sm:$0xff]  ;;  %v6175_v25 = vld [vmem:[%s11249_s18 + $0x38] sm:$0xff]  ;;  %v6177_v9 = vld [vmem:[%s11249_s18 + $0x48] sm:$0xff] }
0x1f7a   : > { %v8639_v34 = vpop.eup %8638  ;;  %v2627_v51 = vmul.f32 %v10921_v0, %v2591_v22 }
0x1f7b   : > { %v2572_v62 = vmul.f32 %v8639_v34, %v10890_v4  ;;  %8293 = vmatpush3.bf16.msra.mxu1 %v8292_v31  ;;  %v2660_v2 = vadd.f32 %v10925_v55, %v2624_v29  ;;  %v8641_v43 = vpop.eup %8640  ;;  %v8252_v31 = vpack.c.bf16 %v6175_v25, %v6174_v45  ;;  %v8254_v29 = vpack.c.bf16 %v6193_v12, %v6192_v8  ;;  %v6176_v34 = vld [vmem:[%s11249_s18 + $0x40] sm:$0xff] }
0x1f7c   : > { %v2575_v38 = vmul.f32 %v8641_v43, %v10839_v26  ;;  %v2663_v54 = vadd.f32 %v10925_v55, %v2627_v51  ;;  %v6178_v43 = vld [vmem:[%s11249_s18 + $0x50] sm:$0xff] }
0x1f7d   : > { %v8294_v42 = vpack.c.bf16 %v2661_v7, %v2660_v2  ;;  %v2608_v57 = vmul.f32 %v10921_v0, %v2572_v62  ;;  %v6194_v62 = vld [vmem:[%s11249_s18 + $0xd0] sm:$0xff]  ;;  %v6195_v2 = vld [vmem:[%s11249_s18 + $0xd8] sm:$0xff]  ;;  %v8256_v7 = vpack.c.bf16 %v6177_v9, %v6176_v34 }
0x1f7e   : > { %v8643_v32 = vpop.eup %8642  ;;  %v2611_v26 = vmul.f32 %v10921_v0, %v2575_v38  ;;  %v8258_v22 = vpack.c.bf16 %v6195_v2, %v6194_v62  ;;  %v6198_v51 = vld [vmem:[%s11249_s18 + $0xf0] sm:$0xff] }
0x1f7f   : > { %8295 = vmatprep.subr.bf16.mxu1 %v8294_v42  ;;  %v2644_v27 = vadd.f32 %v10925_v55, %v2608_v57  ;;  %v2590_v4 = vmul.f32 %v8643_v32, %v10898_v15  ;;  %v6179_v42 = vld [vmem:[%s11249_s18 + $0x58] sm:$0xff]  ;;  %v6196_v57 = vld [vmem:[%s11249_s18 + $0xe0] sm:$0xff]  ;;  %v6197_v32 = vld [vmem:[%s11249_s18 + $0xe8] sm:$0xff] }
0x1f80   : > { %v2647_v33 = vadd.f32 %v10925_v55, %v2611_v26  ;;  %v8262_v38 = vpack.c.bf16 %v6197_v32, %v6196_v57 }
0x1f81   : > { %v8296_v41 = vpack.c.bf16 %v2645_v36, %v2644_v27  ;;  %v2626_v1 = vmul.f32 %v10921_v0, %v2590_v4  ;;  %v8260_v36 = vpack.c.bf16 %v6179_v42, %v6178_v43  ;;  %v6180_v27 = vld [vmem:[%s11249_s18 + $0x60] sm:$0xff]  ;;  %v6181_v4 = vld [vmem:[%s11249_s18 + $0x68] sm:$0xff] }
0x1f82   : > { %v8645_v13 = vpop.eup %8644 }
0x1f83   : > { %v2574_v19 = vmul.f32 %v8645_v13, %v10910_v11  ;;  %8297 = vmatpush3.bf16.msra.mxu1 %v8296_v41  ;;  %v2662_v58 = vadd.f32 %v10925_v55, %v2626_v1  ;;  %v6199_v41 = vld [vmem:[%s11249_s18 + $0xf8] sm:$0xff]  ;;  %v8264_v1 = vpack.c.bf16 %v6181_v4, %v6180_v27 }
0x1f84   : > { %v8266_v13 = vpack.c.bf16 %v6199_v41, %v6198_v51 }
0x1f85   : > { %v8298_v40 = vpack.c.bf16 %v2663_v54, %v2662_v58  ;;  %v2610_v44 = vmul.f32 %v10921_v0, %v2574_v19  ;;  %v6169_v0 = vld [vmem:[%s11249_s18 + $0x8] sm:$0xff]  ;;  %v6182_v19 = vld [vmem:[%s11249_s18 + $0x70] sm:$0xff]  ;;  %v6183_v58 = vld [vmem:[%s11249_s18 + $0x78] sm:$0xff] }
0x1f86   : > { %v8240_v28 = vpack.c.bf16 %v6169_v0, %v6168_v24  ;;  %v8268_v54 = vpack.c.bf16 %v6183_v58, %v6182_v19 }
0x1f87   : > { %8299 = vmatprep.subr.bf16.mxu1 %v8298_v40  ;;  %v2646_v15 = vadd.f32 %v10925_v55, %v2610_v44 }
0x1f89   : > { %v8300_v56 = vpack.c.bf16 %v2647_v33, %v2646_v15 }
0x1f8b   : > { %v6083_v5 = vpop.xlane.xlu0 %6082  ;;  %v6075_v63 = vpop.xlane.xlu1 %6074  ;;  %8301 = vmatpush3.bf16.msra.mxu1 %v8300_v56 }
0x1f8c   : > { %8646 = vrcp.f32 %v6083_v5 }
0x1f8d   : > { %8648 = vrcp.f32 %v6075_v63 }
0x1f96   : > { %v8647_v11 = vpop.eup %8646 }
0x1f97   : > { %v8649_v61 = vpop.eup %8648  ;;  %v6086_v16 = vmul.f32 %v8647_v11, %v10942_v17  ;;  %v6085_v55 = vmul.f32 %v8647_v11, %v10939_v50 }
0x1f98   : > { %v6078_v35 = vmul.f32 %v8649_v61, %v10942_v17  ;;  %v11058_v30 = vmul.f32 %v8649_v61, %v10939_v50  ;;  %v8242_v50 = vpack.c.bf16 %v6187_v49, %v6186_v3 }
0x1f9a   : > { %v6088_v21 = vsel %vm2998_vm8, %v6086_v16, %v6078_v35  ;;  %v6092_v14 = vrot.slane %v6078_v35, 1  ;;  %v6087_v39 = vsel %vm2998_vm8, %v6085_v55, %v11058_v30  ;;  %v6091_v17 = vrot.slane %v11058_v30, 1 }
0x1f9b   : > { %6346 = vmatprep.mubr.f32.mxu1 %v6088_v21 }
0x1f9c   : > { %6159 = vmatprep.mubr.f32.mxu0 %v6092_v14  ;;  %6347 = vmatmul.mubr.f32.vlgmr.msra.gmra.mrb[68].mxu1 %v6087_v39 }
0x1f9d   : > { %6160 = vmatmul.mubr.f32.vlgmr.msra.gmra.mrb[64].mxu0 %v6091_v17 }
0x1f9e   : > { %8241 = vmatpush3.bf16.msra.mxu0 %v8240_v28  ;;  %6271 = vmatprep.mubr.f32.mxu0 %v6092_v14 }
0x1f9f   : > { %8243 = vmatprep.subr.bf16.mxu0 %v8242_v50 }
0x1fa2   : > { %8245 = vmatpush3.bf16.msra.mxu0 %v8244_v46 }
0x1fa3   : > { %8247 = vmatprep.subr.bf16.mxu0 %v8246_v23 }
0x1fa6   : > { %8249 = vmatpush3.bf16.msra.mxu0 %v8248_v53 }
0x1fa7   : > { %8251 = vmatprep.subr.bf16.mxu0 %v8250_v18 }
0x1faa   : > { %8253 = vmatpush3.bf16.msra.mxu0 %v8252_v31 }
0x1fab   : > { %8255 = vmatprep.subr.bf16.mxu0 %v8254_v29 }
0x1fae   : > { %8257 = vmatpush3.bf16.msra.mxu0 %v8256_v7 }
0x1faf   : > { %8259 = vmatprep.subr.bf16.mxu0 %v8258_v22 }
0x1fb2   : > { %8261 = vmatpush3.bf16.msra.mxu0 %v8260_v36 }
0x1fb3   : > { %8263 = vmatprep.subr.bf16.mxu0 %v8262_v38 }
0x1fb6   : > { %8265 = vmatpush3.bf16.msra.mxu0 %v8264_v1 }
0x1fb7   : > { %8267 = vmatprep.subr.bf16.mxu0 %v8266_v13 }
0x1fba   : > { %8269 = vmatpush3.bf16.msra.mxu0 %v8268_v54 }
0x1fbd   : > { %6272 = vmatmul.mubr.f32.vlgmr.msra.gmra.mrb[66].mxu0 %v6091_v17 }
0x1fbe   : > { %8668 = shalt.err (!%p8665_p3)
}
0x1fbf   : > { %s8669_s4 = scalar_lea.hbm %s11154_s23, 128  ;;  %s8673_s26 = scalar_lea.hbm %s11251_s20, 256 }
0x1fc0   : > { %p8670_p4 = scmp.ne.s32.totalorder %s11154_s23, %s8669_s4  ;;  %p8674_p9 = scmp.lt.u32.totalorder %s11154_s23, %s11251_s20 }
0x1fc1   : > { %p8675_p10 = scmp.lt.u32.totalorder %s8673_s26, %s8669_s4  ;;  %p8677_p12 = scmp.lt.u32.totalorder %s8669_s4, %s11154_s23 }
0x1fc2   : > { %p8671_p7 = pnand %p8670_p4, %p8910_p5 }
0x1fc3   : > { %p8676_p11 = por %p8675_p10, %p8674_p9 }
0x1fc4   : > { %p8672_p8 = pneg %p8671_p7 }
0x1fc5   : > { %p8678_p13 = por %p8677_p12, %p8676_p11 }
0x1fc7   : > { %p8679_p0 = pnand %p8678_p13, %p8672_p8 }
0x1fc9   : > { %8682 = shalt.err (!%p8679_p0)
}
0x1fca   : > { %8366 = dma.vmem_to_hbm [thread:$0]  (%p8910_p5), %s6393_s6, 128, %s11154_s23, %s6373_s7   ;;  %v6612_v63 = vld [vmem:[%s11250_s19] ss:$0 sm:$0xff]  ;;  %v6166_v16 = vmul.f32 0.5, %v10497_v47  ;;  %vm6370_vm0 = vcmask 10240   ;;  %vm6368_vm2 = vcmask 322816  }
0x1fcb   : > { %s11500_s22 = smov 32   ;;  %s6405_s23 = sshll.u32 %s10470_s27, 4  ;;  %s11189_s23 = int_to_ptr.vmem [resolvable:$true] %s6405_s23 }
0x1fcc   : > { %s11501_s6 = sshll.u32 %s8893_s3, 7  ;;  %s6378_s28 = scalar_lea.sflag [#allocation5], %s10465_s2 }
0x1fcd   : > { %s11187_s1 = scalar_lea.hbm %s11252_s21, %s11501_s6  ;;  %s8683_s26 = scalar_lea.vmem %s11189_s23, 128 }
0x1fce   : > { %p8684_p1 = scmp.ne.s32.totalorder %s11189_s23, %s8683_s26  ;;  %s8761_s0 = smov [#allocation4]  }
0x1fcf   : > { %s8687_s3 = sshll.u32 %s8761_s0, 4  ;;  %s8688_s3 = int_to_ptr.vmem [resolvable:$false] %s8687_s3 }
0x1fd0   : > { %p8685_p2 = pnand %p8684_p1, %p8910_p5  ;;  %p8690_p4 = scmp.lt.s32.totalorder %s11189_s23, %s8688_s3 }
0x1fd2   : > { %p8686_p3 = pneg %p8685_p2 }
0x206f   : > { %v7297_v26 = vpop.f32.mrb[68].mxu1 }
0x2070   : > { %v7227_v40 = vpop.f32.mrb[64].mxu0  ;;  %v7298_v44 = vpop.f32.mrb[69].mxu1 }
0x2071   : > { %v7299_v15 = vadd.f32 %v7298_v44, %v7297_v26  ;;  %v7228_v33 = vpop.f32.mrb[65].mxu0 }
0x2072   : > { %v7229_v56 = vadd.f32 %v7228_v33, %v7227_v40 }
0x2073   : > { %6365 = vrot.lane.b32.xlu1 %v7299_v15, %s11500_s22  ;;  %s8689_s22 = scalar_lea.vmem %s8688_s3, 256 }
0x2074   : > { %v6165_v61 = vmul.f32 0.5, %v7229_v56  ;;  %p8691_p7 = scmp.lt.s32.totalorder %s8689_s22, %s8683_s26 }
0x2076   : > { %v6167_v35 = vadd.f32 %v6166_v16, %v6165_v61  ;;  %p8692_p8 = por %p8691_p7, %p8690_p4 }
0x2078   : > { %p8693_p9 = pnand %p8692_p8, %p8686_p3 }
0x2090   : > { %v7262_v5 = vpop.f32.mrb[66].mxu0 }
0x2091   : > { %v7263_v11 = vpop.f32.mrb[67].mxu0 }
0x2092   : > { %v7264_v24 = vadd.f32 %v7263_v11, %v7262_v5 }
0x2094   : > { %v6274_v0 = vadd.f32 %v7264_v24, %v6612_v63 }
0x2096   : > { %8650 = vtanh.f32 %v6274_v0 }
0x20a0   : > { %v8651_v55 = vpop.eup %8650 }
0x20a1   : > { %v6278_v30 = vmul.f32 0.1, %v8651_v55 }
0x20a3   : > { %v6279_v3 = vadd.f32 %v6278_v30, %v6167_v35 }
0x20a5   : > { %v6613_v49 = vclamps-f32 %v6279_v3, 1.0 }
0x20a7   : > { %6371 = vst.msk [vmem:[%s10470_s27 + $0x4] sm:$0x7] %vm6370_vm0, %v6613_v49 }
0x20e5   : > { %v6366_v47 = vpop.permute.xlu1 %6365 }
0x20e6   : > { %6369 = vst.msk [vmem:[%s10470_s27] sm:$0xf] %vm6368_vm2, %v6366_v47 }
0x20e7   : > { %8696 = shalt.err (!%p8693_p9)
}
0x20e8   : > { %s8697_s2 = scalar_lea.hbm %s11187_s1, 128  ;;  %s8701_s29 = scalar_lea.hbm %s11252_s21, 256 }
0x20e9   : > { %p8698_p10 = scmp.ne.s32.totalorder %s11187_s1, %s8697_s2  ;;  %p8702_p13 = scmp.lt.u32.totalorder %s11187_s1, %s11252_s21 }
0x20ea   : > { %p8703_p0 = scmp.lt.u32.totalorder %s8701_s29, %s8697_s2  ;;  %p8705_p2 = scmp.lt.u32.totalorder %s8697_s2, %s11187_s1 }
0x20eb   : > { %p8699_p11 = pnand %p8698_p10, %p8910_p5 }
0x20ec   : > { %p8704_p1 = por %p8703_p0, %p8702_p13 }
0x20ed   : > { %p8700_p12 = pneg %p8699_p11 }
0x20ee   : > { %p8706_p3 = por %p8705_p2, %p8704_p1 }
0x20f0   : > { %p8707_p4 = pnand %p8706_p3, %p8700_p12 }
0x20f2   : > { %8710 = shalt.err (!%p8707_p4)
}
0x20f3   : > { %8367 = dma.vmem_to_hbm [thread:$0]  (%p8910_p5), %s11189_s23, 128, %s11187_s1, %s6378_s28  }
0x20f4 PF: > { %s11502_s4 = sld [smem:[#allocation10_spill]]  ;;  %s11503_s26 = sld [smem:[#allocation8_spill]] }
0x20fa   : > { %p8377_p7 = scmp.ge.s32.totalorder %s11502_s4, 2  ;;  %s6417_s3 = sand.u32 1, %s11503_s26  }
0x20fb   : > { %s6418_s22 = scalar_lea.sflag [#allocation3], %s6417_s3 }
0x20fc   : > { %p8371_p8 = pnand %p8377_p7, %p8914_p6 }
0x20fe   : > { %8728 = dma.done.wait (!%p8371_p8), %s6418_s22, 128  }
0x20ff   : > { %8730 = vsyncadd (!%p8371_p8), %s6418_s22, 4294967168  ;;  %s6427_s2 = scalar_lea.sflag [#allocation5], %s6417_s3 }
0x2100   : > { %8732 = dma.done.wait (!%p8371_p8), %s6427_s2, 128  }
0x2101   : > { %8734 = vsyncadd (!%p8371_p8), %s6427_s2, 4294967168  ;;  %s11505_s27 = sld [smem:[#allocation11_spill]]  ;;  %s11506_s5 = sld [smem:[#allocation9_spill]] }
0x2102   : > { %s11507_s26 = sld [smem:[#allocation12_spill]]  ;;  %s11508_s2 = smov %s8741_s25 }
0x2107   : > { %p35_p5 = scmp.ge.s32.totalorder %s11505_s27, 4   ;;  %s11509_s25 = smov %s11506_s5 }
0x2109   :  { %37 = sbr.rel (!%p35_p5) target bundleno = 14 (0xe), region = 155 }
0x2110   :  { %6432 = vsyncpa [#allocation3], 1 }
0x2111   :  { %6434 = vsyncpa [#allocation3 + $0x1], 1 }
0x2112   :  { %6435 = vsyncpa [#allocation5], 1 }
0x2113   :  { %6437 = vsyncpa [#allocation5 + $0x1], 1 }

</bundles_post_ra>
